<compile_context>
chip_gen: v6e
topology: v6e:2x2x1
jax: 0.10.0
libtpu: 0.0.40
codegen_flags: <defaults>
</compile_context>

<pallas_src>
import functools

import jax
import jax.numpy as jnp
from jax.experimental import pallas as pl
from jax.experimental.pallas import tpu as pltpu


def _leaky_relu(v, slope=0.02):
    # max-form: 2 VALU ops (mul + max) instead of cmp + mul + select.
    return jnp.maximum(v, slope * v)


def _generator_kernel(pts_ref, zw1_ref, w1p_ref,
                      w2_ref, b2_ref, w3_ref, b3_ref,
                      w4_ref, b4_ref, w5_ref, b5_ref,
                      w6_ref, b6_ref, o_ref):
    """One grid step: a row_tile-wide tile of points through the 6-layer MLP.

    Activations are [features, row_tile] (features on sublanes, rows on lanes):
    every hidden layer is W[out,in] @ h[in,rows] on the MXU and the width-1
    final layer is a sublane reduction yielding a lane-dense (1, row_tile) tile.
    """
    mx = w2_ref.dtype                        # bf16 or f32 matmul-operand dtype
    pts = pts_ref[0]                         # (point_dim, row_tile) f32

    # Layer 1: point part on the MXU (K = point_dim), z part + bias precomputed
    # per batch in the wrapper (zw1 = z @ W1_z.T + b1).
    h = jnp.dot(w1p_ref[...], pts, preferred_element_type=jnp.float32)
    h = _leaky_relu(h + zw1_ref[0])          # (gf8, row_tile) f32
    h = h.astype(mx)                         # cast once, in the layer epilogue

    # Layers 2-4: MXU matmul (mx operands, f32 accumulation), f32 epilogue,
    # cast-to-mx folded into the epilogue.
    for w_ref, b_ref in ((w2_ref, b2_ref), (w3_ref, b3_ref), (w4_ref, b4_ref)):
        v = jnp.dot(w_ref[...], h, preferred_element_type=jnp.float32)
        h = _leaky_relu(v + b_ref[...]).astype(mx)

    # Layer 5 output stays f32: it feeds the final reduction directly.
    v = jnp.dot(w5_ref[...], h, preferred_element_type=jnp.float32)
    h = _leaky_relu(v + b5_ref[...])         # (gf1, row_tile) f32

    # Layer 6 (width 1): sublane reduction instead of an N=1 MXU matmul.
    l6 = jnp.sum(h * w6_ref[...], axis=0, keepdims=True) + b6_ref[...]
    # torch.max(torch.min(l6, l6*0.01 + 0.99), l6*0.01)
    l6 = jnp.maximum(jnp.minimum(l6, l6 * 0.01 + 0.99), l6 * 0.01)
    o_ref[...] = l6.astype(o_ref.dtype)


def init_generator_params(key, z_dim, point_dim, gf_dim):
    """Synthetic params in PyTorch layout: W [out, in], b [out].

    Weight statistics mirror the module's __init__ (std=0.02, last-layer mean
    1e-5).  Biases get small random values (the module inits them to 0) purely
    so the numerical check also exercises the bias path.
    """
    dims_in = [z_dim + point_dim, gf_dim * 8, gf_dim * 8, gf_dim * 4,
               gf_dim * 2, gf_dim * 1]
    dims_out = [gf_dim * 8, gf_dim * 8, gf_dim * 4, gf_dim * 2, gf_dim * 1, 1]
    w_means = [0.0, 0.0, 0.0, 0.0, 0.0, 1e-05]

    params = []
    keys = jax.random.split(key, 2 * len(dims_in))
    for i, (din, dout, mean) in enumerate(zip(dims_in, dims_out, w_means)):
        kw, kb = keys[2 * i], keys[2 * i + 1]
        w = mean + 0.02 * jax.random.normal(kw, (dout, din), dtype=jnp.float32)
        b = 0.02 * jax.random.normal(kb, (dout,), dtype=jnp.float32)
        params.append((w, b))
    return params


@functools.partial(
    jax.jit, static_argnames=("row_tile", "use_bf16", "single_buffer_weights"))
def generator_forward(points, z, params, row_tile=None, use_bf16=True,
                      single_buffer_weights=True):
    """points: [B, N, point_dim] f32, z: [B, z_dim] f32 -> [B, N] f32."""
    B, N, point_dim = points.shape
    (w1, b1), (w2, b2), (w3, b3), (w4, b4), (w5, b5), (w6, b6) = params
    gf8 = w1.shape[0]

    # ---- row_tile selection: amortize per-grid-step overhead under a VMEM
    # budget of roughly 4 live gf8-wide f32 activation slabs (<= ~16 MiB of
    # activation temps; comfortably inside the 48 MiB limit below, which itself
    # leaves headroom under v7x's 64 MiB physical VMEM). ----
    if row_tile is None:
        budget = 16 * 1024 * 1024
        row_tile = budget // (4 * gf8 * 4)
        row_tile = max(256, min(8192, (row_tile // 256) * 256))
    assert row_tile % 128 == 0, "row_tile must be a multiple of 128"
    n_up = ((N + 127) // 128) * 128
    row_tile = min(row_tile, n_up)           # don't over-pad tiny N
    n_pad = (-N) % row_tile
    N_pad = N + n_pad
    num_n = N_pad // row_tile
    rows = B * N_pad

    # ---- Split layer 1: point part stays in the kernel, z part (+ bias) is a
    # tiny per-batch precompute -> no [B*N, z_dim+point_dim] slab in HBM. ----
    w1_p = w1[:, :point_dim].astype(jnp.float32)          # (gf8, point_dim)
    w1_z = w1[:, point_dim:]                               # (gf8, z_dim)
    zw1 = (z @ w1_z.T + b1)[:, :, None].astype(jnp.float32)  # (B, gf8, 1)

    # Points streamed unpadded as [B, point_dim, N]: rows land on the lane axis
    # and the per-point HBM read is point_dim*4 bytes.
    # TODO(synk): have the upstream producer emit points as [B, point_dim, N]
    # directly so this single transpose pass over HBM can be skipped too.
    pts_t = jnp.transpose(points, (0, 2, 1)).astype(jnp.float32)
    if n_pad:
        pts_t = jnp.pad(pts_t, ((0, 0), (0, 0), (0, n_pad)))

    mx_dtype = jnp.bfloat16 if use_bf16 else jnp.float32
    w2k, w3k, w4k, w5k = (w.astype(mx_dtype) for w in (w2, w3, w4, w5))
    b2k, b3k, b4k, b5k = (b[:, None].astype(jnp.float32) for b in (b2, b3, b4, b5))
    w6k = jnp.reshape(w6, (-1, 1)).astype(jnp.float32)     # (gf1, 1)
    b6k = jnp.reshape(b6, (1, 1)).astype(jnp.float32)

    # Grid-invariant weights/biases: constant index_map.  Single-buffer them so
    # they don't pay for pointless double-buffering VMEM (matters at gf_dim=64
    # under v7x's smaller VMEM).
    def const_spec(arr):
        idx = lambda b, n: (0,) * arr.ndim
        if single_buffer_weights:
            return pl.BlockSpec(arr.shape, idx, pipeline_mode=pl.Buffered(1))
        return pl.BlockSpec(arr.shape, idx)

    in_specs = [
        pl.BlockSpec((1, point_dim, row_tile), lambda b, n: (b, 0, n)),
        pl.BlockSpec((1, gf8, 1), lambda b, n: (b, 0, 0)),
        const_spec(w1_p),
        const_spec(w2k), const_spec(b2k),
        const_spec(w3k), const_spec(b3k),
        const_spec(w4k), const_spec(b4k),
        const_spec(w5k), const_spec(b5k),
        const_spec(w6k), const_spec(b6k),
    ]
    # Lane-dense output: last block dim = row_tile (multiple of 128).
    out_spec = pl.BlockSpec((1, row_tile), lambda b, n: (0, b * num_n + n))

    # Corrected scheduler hint: flops from the dense layers, bytes from the
    # unpadded point stream + zw1 + one resident copy of the weights + output.
    w_elems = sum(int(w.size) for w, _ in params)
    weight_bytes = sum(int(a.size) * a.dtype.itemsize
                       for a in (w1_p, w2k, b2k, w3k, b3k, w4k, b4k,
                                 w5k, b5k, w6k, b6k))
    cost = pl.CostEstimate(
        flops=2 * rows * w_elems,
        transcendentals=0,
        bytes_accessed=(rows * point_dim * 4        # streamed points
                        + int(zw1.size) * 4         # per-batch layer-1 z part
                        + rows * 4                  # output write
                        + weight_bytes))

    out = pl.pallas_call(
        _generator_kernel,
        out_shape=jax.ShapeDtypeStruct((1, rows), jnp.float32),
        grid_spec=pltpu.PrefetchScalarGridSpec(
            num_scalar_prefetch=0,
            grid=(B, num_n),                 # keep >=2 total steps (B>=2 or
            in_specs=in_specs,               # num_n>=2) so v7x's 2nd TC is used
            out_specs=out_spec),
        compiler_params=pltpu.CompilerParams(
            dimension_semantics=("parallel", "parallel"),
            # v7x: 64 MiB physical VMEM (32 MiB scoped default); v5e/v6e:
            # 128 MiB physical (16 / 32 MiB scoped defaults).  48 MiB leaves
            # double-buffer + weight headroom on v7x and is far above what
            # gf_dim<=64 / row_tile<=8192 actually needs.
            vmem_limit_bytes=48 * 1024 * 1024),
        cost_estimate=cost,
    )(pts_t, zw1, w1_p, w2k, b2k, w3k, b3k, w4k, b4k, w5k, b5k, w6k, b6k)

    return out.reshape(B, N_pad)[:, :N]      # matches l6.squeeze(-1)


def _reference_forward(points, z, params):
    """Pure-JAX f32 reference mirroring the PyTorch forward."""
    B, N, _ = points.shape
    zs = jnp.broadcast_to(z[:, None, :], (B, N, z.shape[-1]))
    h = jnp.concatenate([points, zs], axis=2)
    for i, (w, b) in enumerate(params):
        h = h @ w.T + b
        if i < 5:
            h = jnp.maximum(h, 0.02 * h)     # leaky_relu, negative_slope=0.02
    h = jnp.maximum(jnp.minimum(h, h * 0.01 + 0.99), h * 0.01)
    return h[..., 0]


if __name__ == "__main__":
    # Small shapes consistent with the module.
    z_dim, point_dim, gf_dim = 32, 3, 16
    B, N = 2, 4096

    key = jax.random.PRNGKey(0)
    kp, kz, kw = jax.random.split(key, 3)
    points = jax.random.uniform(kp, (B, N, point_dim), jnp.float32,
                                minval=-0.5, maxval=0.5)
    z = jax.random.normal(kz, (B, z_dim), dtype=jnp.float32)
    params = init_generator_params(kw, z_dim, point_dim, gf_dim)

    ref = _reference_forward(points, z, params)

    def run(**kwargs):
        try:
            return generator_forward(points, z, params, **kwargs)
        except Exception:
            # Single-buffering of the resident weights (pl.Buffered(1)) is an
            # optional VMEM optimization; fall back to default double-buffering
            # if this JAX/Mosaic build rejects it.
            return generator_forward(points, z, params,
                                     single_buffer_weights=False, **kwargs)

    # f32 path with an explicit smaller tile (exercises the n-axis tiling).
    out_f32 = jax.block_until_ready(run(row_tile=1024, use_bf16=False))
    assert out_f32.shape == (B, N)
    assert float(jnp.max(jnp.abs(out_f32 - ref))) < 1e-4, "f32 mismatch vs reference"

    # bf16-MXU path with the auto-selected (large) row_tile.
    out_bf16 = jax.block_until_ready(run(use_bf16=True))
    assert out_bf16.shape == (B, N)
    assert float(jnp.max(jnp.abs(out_bf16 - ref))) < 2e-3, "bf16 mismatch vs reference"

    print("KERNEL_OK")
</pallas_src>

<mosaic_0001>
module attributes {stable_mosaic.version = 11 : i64} {
  func.func @_generator_kernel(%arg0: i32, %arg1: i32, %arg2: memref<1x3x1024xf32, #tpu.memory_space<vmem>>, %arg3: memref<1x128x1xf32, #tpu.memory_space<vmem>>, %arg4: memref<128x3xf32, #tpu.memory_space<vmem>>, %arg5: memref<128x128xf32, #tpu.memory_space<vmem>>, %arg6: memref<128x1xf32, #tpu.memory_space<vmem>>, %arg7: memref<64x128xf32, #tpu.memory_space<vmem>>, %arg8: memref<64x1xf32, #tpu.memory_space<vmem>>, %arg9: memref<32x64xf32, #tpu.memory_space<vmem>>, %arg10: memref<32x1xf32, #tpu.memory_space<vmem>>, %arg11: memref<16x32xf32, #tpu.memory_space<vmem>>, %arg12: memref<16x1xf32, #tpu.memory_space<vmem>>, %arg13: memref<16x1xf32, #tpu.memory_space<vmem>>, %arg14: memref<1x1xf32, #tpu.memory_space<vmem>>, %arg15: memref<1x1024xf32, #tpu.memory_space<vmem>>) attributes {dimension_semantics = [#tpu.dimension_semantics<parallel>, #tpu.dimension_semantics<parallel>], iteration_bounds = array<i64: 2, 4>, scalar_prefetch = 0 : i64, scratch_operands = 0 : i64, tpu.core_type = #tpu.core_type<tc>, window_params = [{transform_indices = @transform_0, window_bounds = array<i64: 1, 3, 1024>}, {transform_indices = @transform_1, window_bounds = array<i64: 1, 128, 1>}, {pipeline_mode = #tpu.pipeline_mode<synchronous>, transform_indices = @transform_2, window_bounds = array<i64: 128, 3>}, {pipeline_mode = #tpu.pipeline_mode<synchronous>, transform_indices = @transform_3, window_bounds = array<i64: 128, 128>}, {pipeline_mode = #tpu.pipeline_mode<synchronous>, transform_indices = @transform_4, window_bounds = array<i64: 128, 1>}, {pipeline_mode = #tpu.pipeline_mode<synchronous>, transform_indices = @transform_5, window_bounds = array<i64: 64, 128>}, {pipeline_mode = #tpu.pipeline_mode<synchronous>, transform_indices = @transform_6, window_bounds = array<i64: 64, 1>}, {pipeline_mode = #tpu.pipeline_mode<synchronous>, transform_indices = @transform_7, window_bounds = array<i64: 32, 64>}, {pipeline_mode = #tpu.pipeline_mode<synchronous>, transform_indices = @transform_8, window_bounds = array<i64: 32, 1>}, {pipeline_mode = #tpu.pipeline_mode<synchronous>, transform_indices = @transform_9, window_bounds = array<i64: 16, 32>}, {pipeline_mode = #tpu.pipeline_mode<synchronous>, transform_indices = @transform_10, window_bounds = array<i64: 16, 1>}, {pipeline_mode = #tpu.pipeline_mode<synchronous>, transform_indices = @transform_11, window_bounds = array<i64: 16, 1>}, {pipeline_mode = #tpu.pipeline_mode<synchronous>, transform_indices = @transform_12, window_bounds = array<i64: 1, 1>}, {transform_indices = @transform_13, window_bounds = array<i64: 1, 1024>}]} {
    %c0 = arith.constant 0 : index
    %c0_0 = arith.constant 0 : index
    %c0_1 = arith.constant 0 : index
    %0 = vector.load %arg2[%c0, %c0_0, %c0_1] : memref<1x3x1024xf32, #tpu.memory_space<vmem>>, vector<1x3x1024xf32>
    %1 = vector.shape_cast %0 : vector<1x3x1024xf32> to vector<3x1024xf32>
    %c0_2 = arith.constant 0 : index
    %c0_3 = arith.constant 0 : index
    %2 = vector.load %arg4[%c0_2, %c0_3] : memref<128x3xf32, #tpu.memory_space<vmem>>, vector<128x3xf32>
    %cst = arith.constant dense<0.000000e+00> : vector<128x1024xf32>
    %3 = tpu.matmul %2, %1, %cst {dimension_numbers = #tpu.dot_dimension_numbers<[1], [0], [0], [1], [0, 0, 1, 1], [], []>} : vector<128x3xf32>, vector<3x1024xf32>, vector<128x1024xf32> -> vector<128x1024xf32>
    %c0_4 = arith.constant 0 : index
    %c0_5 = arith.constant 0 : index
    %c0_6 = arith.constant 0 : index
    %4 = vector.load %arg3[%c0_4, %c0_5, %c0_6] : memref<1x128x1xf32, #tpu.memory_space<vmem>>, vector<1x128x1xf32>
    %5 = vector.shape_cast %4 : vector<1x128x1xf32> to vector<128x1xf32>
    %6 = vector.broadcast %5 : vector<128x1xf32> to vector<128x1024xf32>
    %7 = arith.addf %3, %6 : vector<128x1024xf32>
    %cst_7 = arith.constant 2.000000e-02 : f32
    %8 = vector.broadcast %cst_7 : f32 to vector<128x1024xf32>
    %9 = arith.mulf %8, %7 : vector<128x1024xf32>
    %10 = arith.maximumf %7, %9 : vector<128x1024xf32>
    %c0_8 = arith.constant 0 : index
    %c0_9 = arith.constant 0 : index
    %11 = vector.load %arg5[%c0_8, %c0_9] : memref<128x128xf32, #tpu.memory_space<vmem>>, vector<128x128xf32>
    %cst_10 = arith.constant dense<0.000000e+00> : vector<128x1024xf32>
    %12 = tpu.matmul %11, %10, %cst_10 {dimension_numbers = #tpu.dot_dimension_numbers<[1], [0], [0], [1], [0, 0, 1, 1], [], []>} : vector<128x128xf32>, vector<128x1024xf32>, vector<128x1024xf32> -> vector<128x1024xf32>
    %c0_11 = arith.constant 0 : index
    %c0_12 = arith.constant 0 : index
    %13 = vector.load %arg6[%c0_11, %c0_12] : memref<128x1xf32, #tpu.memory_space<vmem>>, vector<128x1xf32>
    %14 = vector.broadcast %13 : vector<128x1xf32> to vector<128x1024xf32>
    %15 = arith.addf %12, %14 : vector<128x1024xf32>
    %cst_13 = arith.constant 2.000000e-02 : f32
    %16 = vector.broadcast %cst_13 : f32 to vector<128x1024xf32>
    %17 = arith.mulf %16, %15 : vector<128x1024xf32>
    %18 = arith.maximumf %15, %17 : vector<128x1024xf32>
    %c0_14 = arith.constant 0 : index
    %c0_15 = arith.constant 0 : index
    %19 = vector.load %arg7[%c0_14, %c0_15] : memref<64x128xf32, #tpu.memory_space<vmem>>, vector<64x128xf32>
    %cst_16 = arith.constant dense<0.000000e+00> : vector<64x1024xf32>
    %20 = tpu.matmul %19, %18, %cst_16 {dimension_numbers = #tpu.dot_dimension_numbers<[1], [0], [0], [1], [0, 0, 1, 1], [], []>} : vector<64x128xf32>, vector<128x1024xf32>, vector<64x1024xf32> -> vector<64x1024xf32>
    %c0_17 = arith.constant 0 : index
    %c0_18 = arith.constant 0 : index
    %21 = vector.load %arg8[%c0_17, %c0_18] : memref<64x1xf32, #tpu.memory_space<vmem>>, vector<64x1xf32>
    %22 = vector.broadcast %21 : vector<64x1xf32> to vector<64x1024xf32>
    %23 = arith.addf %20, %22 : vector<64x1024xf32>
    %cst_19 = arith.constant 2.000000e-02 : f32
    %24 = vector.broadcast %cst_19 : f32 to vector<64x1024xf32>
    %25 = arith.mulf %24, %23 : vector<64x1024xf32>
    %26 = arith.maximumf %23, %25 : vector<64x1024xf32>
    %c0_20 = arith.constant 0 : index
    %c0_21 = arith.constant 0 : index
    %27 = vector.load %arg9[%c0_20, %c0_21] : memref<32x64xf32, #tpu.memory_space<vmem>>, vector<32x64xf32>
    %cst_22 = arith.constant dense<0.000000e+00> : vector<32x1024xf32>
    %28 = tpu.matmul %27, %26, %cst_22 {dimension_numbers = #tpu.dot_dimension_numbers<[1], [0], [0], [1], [0, 0, 1, 1], [], []>} : vector<32x64xf32>, vector<64x1024xf32>, vector<32x1024xf32> -> vector<32x1024xf32>
    %c0_23 = arith.constant 0 : index
    %c0_24 = arith.constant 0 : index
    %29 = vector.load %arg10[%c0_23, %c0_24] : memref<32x1xf32, #tpu.memory_space<vmem>>, vector<32x1xf32>
    %30 = vector.broadcast %29 : vector<32x1xf32> to vector<32x1024xf32>
    %31 = arith.addf %28, %30 : vector<32x1024xf32>
    %cst_25 = arith.constant 2.000000e-02 : f32
    %32 = vector.broadcast %cst_25 : f32 to vector<32x1024xf32>
    %33 = arith.mulf %32, %31 : vector<32x1024xf32>
    %34 = arith.maximumf %31, %33 : vector<32x1024xf32>
    %c0_26 = arith.constant 0 : index
    %c0_27 = arith.constant 0 : index
    %35 = vector.load %arg11[%c0_26, %c0_27] : memref<16x32xf32, #tpu.memory_space<vmem>>, vector<16x32xf32>
    %cst_28 = arith.constant dense<0.000000e+00> : vector<16x1024xf32>
    %36 = tpu.matmul %35, %34, %cst_28 {dimension_numbers = #tpu.dot_dimension_numbers<[1], [0], [0], [1], [0, 0, 1, 1], [], []>} : vector<16x32xf32>, vector<32x1024xf32>, vector<16x1024xf32> -> vector<16x1024xf32>
    %c0_29 = arith.constant 0 : index
    %c0_30 = arith.constant 0 : index
    %37 = vector.load %arg12[%c0_29, %c0_30] : memref<16x1xf32, #tpu.memory_space<vmem>>, vector<16x1xf32>
    %38 = vector.broadcast %37 : vector<16x1xf32> to vector<16x1024xf32>
    %39 = arith.addf %36, %38 : vector<16x1024xf32>
    %cst_31 = arith.constant 2.000000e-02 : f32
    %40 = vector.broadcast %cst_31 : f32 to vector<16x1024xf32>
    %41 = arith.mulf %40, %39 : vector<16x1024xf32>
    %42 = arith.maximumf %39, %41 : vector<16x1024xf32>
    %c0_32 = arith.constant 0 : index
    %c0_33 = arith.constant 0 : index
    %43 = vector.load %arg13[%c0_32, %c0_33] : memref<16x1xf32, #tpu.memory_space<vmem>>, vector<16x1xf32>
    %44 = vector.broadcast %43 : vector<16x1xf32> to vector<16x1024xf32>
    %45 = arith.mulf %42, %44 : vector<16x1024xf32>
    %cst_34 = arith.constant dense<0.000000e+00> : vector<1024xf32>
    %46 = vector.multi_reduction <add>, %45, %cst_34 [0] : vector<16x1024xf32> to vector<1024xf32>
    %47 = vector.shape_cast %46 : vector<1024xf32> to vector<1x1024xf32>
    %c0_35 = arith.constant 0 : index
    %c0_36 = arith.constant 0 : index
    %48 = vector.load %arg14[%c0_35, %c0_36] : memref<1x1xf32, #tpu.memory_space<vmem>>, vector<1x1xf32>
    %49 = vector.broadcast %48 : vector<1x1xf32> to vector<1x1024xf32>
    %50 = arith.addf %47, %49 : vector<1x1024xf32>
    %cst_37 = arith.constant 0.00999999977 : f32
    %51 = vector.broadcast %cst_37 : f32 to vector<1x1024xf32>
    %52 = arith.mulf %50, %51 : vector<1x1024xf32>
    %cst_38 = arith.constant 9.900000e-01 : f32
    %53 = vector.broadcast %cst_38 : f32 to vector<1x1024xf32>
    %54 = arith.addf %52, %53 : vector<1x1024xf32>
    %55 = arith.minimumf %50, %54 : vector<1x1024xf32>
    %cst_39 = arith.constant 0.00999999977 : f32
    %56 = vector.broadcast %cst_39 : f32 to vector<1x1024xf32>
    %57 = arith.mulf %50, %56 : vector<1x1024xf32>
    %58 = arith.maximumf %55, %57 : vector<1x1024xf32>
    %c0_40 = arith.constant 0 : index
    %c0_41 = arith.constant 0 : index
    %59 = vector.load %arg15[%c0_40, %c0_41] : memref<1x1024xf32, #tpu.memory_space<vmem>>, vector<1x1024xf32>
    tpu.vector_store %arg15[%c0_40, %c0_41], %58 {strides = array<i32>} : memref<1x1024xf32, #tpu.memory_space<vmem>>, vector<1x1024xf32>,
    return
  }
  func.func @transform_0(%arg0: i32, %arg1: i32) -> (i32, i32, i32) {
    %c0_i32 = arith.constant 0 : i32
    %c0_i32_0 = arith.constant 0 : i32
    return %arg0, %c0_i32, %arg1 : i32, i32, i32
  }
  func.func @transform_1(%arg0: i32, %arg1: i32) -> (i32, i32, i32) {
    %c0_i32 = arith.constant 0 : i32
    %c0_i32_0 = arith.constant 0 : i32
    %c0_i32_1 = arith.constant 0 : i32
    return %arg0, %c0_i32, %c0_i32_0 : i32, i32, i32
  }
  func.func @transform_2(%arg0: i32, %arg1: i32) -> (i32, i32) {
    %c0_i32 = arith.constant 0 : i32
    %c0_i32_0 = arith.constant 0 : i32
    %c0_i32_1 = arith.constant 0 : i32
    return %c0_i32, %c0_i32_0 : i32, i32
  }
  func.func @transform_3(%arg0: i32, %arg1: i32) -> (i32, i32) {
    %c0_i32 = arith.constant 0 : i32
    %c0_i32_0 = arith.constant 0 : i32
    %c0_i32_1 = arith.constant 0 : i32
    return %c0_i32, %c0_i32_0 : i32, i32
  }
  func.func @transform_4(%arg0: i32, %arg1: i32) -> (i32, i32) {
    %c0_i32 = arith.constant 0 : i32
    %c0_i32_0 = arith.constant 0 : i32
    %c0_i32_1 = arith.constant 0 : i32
    return %c0_i32, %c0_i32_0 : i32, i32
  }
  func.func @transform_5(%arg0: i32, %arg1: i32) -> (i32, i32) {
    %c0_i32 = arith.constant 0 : i32
    %c0_i32_0 = arith.constant 0 : i32
    %c0_i32_1 = arith.constant 0 : i32
    return %c0_i32, %c0_i32_0 : i32, i32
  }
  func.func @transform_6(%arg0: i32, %arg1: i32) -> (i32, i32) {
    %c0_i32 = arith.constant 0 : i32
    %c0_i32_0 = arith.constant 0 : i32
    %c0_i32_1 = arith.constant 0 : i32
    return %c0_i32, %c0_i32_0 : i32, i32
  }
  func.func @transform_7(%arg0: i32, %arg1: i32) -> (i32, i32) {
    %c0_i32 = arith.constant 0 : i32
    %c0_i32_0 = arith.constant 0 : i32
    %c0_i32_1 = arith.constant 0 : i32
    return %c0_i32, %c0_i32_0 : i32, i32
  }
  func.func @transform_8(%arg0: i32, %arg1: i32) -> (i32, i32) {
    %c0_i32 = arith.constant 0 : i32
    %c0_i32_0 = arith.constant 0 : i32
    %c0_i32_1 = arith.constant 0 : i32
    return %c0_i32, %c0_i32_0 : i32, i32
  }
  func.func @transform_9(%arg0: i32, %arg1: i32) -> (i32, i32) {
    %c0_i32 = arith.constant 0 : i32
    %c0_i32_0 = arith.constant 0 : i32
    %c0_i32_1 = arith.constant 0 : i32
    return %c0_i32, %c0_i32_0 : i32, i32
  }
  func.func @transform_10(%arg0: i32, %arg1: i32) -> (i32, i32) {
    %c0_i32 = arith.constant 0 : i32
    %c0_i32_0 = arith.constant 0 : i32
    %c0_i32_1 = arith.constant 0 : i32
    return %c0_i32, %c0_i32_0 : i32, i32
  }
  func.func @transform_11(%arg0: i32, %arg1: i32) -> (i32, i32) {
    %c0_i32 = arith.constant 0 : i32
    %c0_i32_0 = arith.constant 0 : i32
    %c0_i32_1 = arith.constant 0 : i32
    return %c0_i32, %c0_i32_0 : i32, i32
  }
  func.func @transform_12(%arg0: i32, %arg1: i32) -> (i32, i32) {
    %c0_i32 = arith.constant 0 : i32
    %c0_i32_0 = arith.constant 0 : i32
    %c0_i32_1 = arith.constant 0 : i32
    return %c0_i32, %c0_i32_0 : i32, i32
  }
  func.func @transform_13(%arg0: i32, %arg1: i32) -> (i32, i32) {
    %c4_i32 = arith.constant 4 : i32
    %0 = arith.muli %arg0, %c4_i32 : i32
    %1 = arith.addi %0, %arg1 : i32
    %c0_i32 = arith.constant 0 : i32
    %c0_i32_0 = arith.constant 0 : i32
    return %c0_i32, %1 : i32, i32
  }
}

module attributes {stable_mosaic.version = 11 : i64} {
  func.func @_generator_kernel(%arg0: i32, %arg1: i32, %arg2: memref<1x3x1024xf32, #tpu.memory_space<vmem>>, %arg3: memref<1x128x1xf32, #tpu.memory_space<vmem>>, %arg4: memref<128x3xf32, #tpu.memory_space<vmem>>, %arg5: memref<128x128xf32, #tpu.memory_space<vmem>>, %arg6: memref<128x1xf32, #tpu.memory_space<vmem>>, %arg7: memref<64x128xf32, #tpu.memory_space<vmem>>, %arg8: memref<64x1xf32, #tpu.memory_space<vmem>>, %arg9: memref<32x64xf32, #tpu.memory_space<vmem>>, %arg10: memref<32x1xf32, #tpu.memory_space<vmem>>, %arg11: memref<16x32xf32, #tpu.memory_space<vmem>>, %arg12: memref<16x1xf32, #tpu.memory_space<vmem>>, %arg13: memref<16x1xf32, #tpu.memory_space<vmem>>, %arg14: memref<1x1xf32, #tpu.memory_space<vmem>>, %arg15: memref<1x1024xf32, #tpu.memory_space<vmem>>) attributes {dimension_semantics = [#tpu.dimension_semantics<parallel>, #tpu.dimension_semantics<parallel>], iteration_bounds = array<i64: 2, 4>, scalar_prefetch = 0 : i64, scratch_operands = 0 : i64, tpu.core_type = #tpu.core_type<tc>, window_params = [{transform_indices = @transform_0, window_bounds = array<i64: 1, 3, 1024>}, {transform_indices = @transform_1, window_bounds = array<i64: 1, 128, 1>}, {pipeline_mode = #tpu.pipeline_mode<synchronous>, transform_indices = @transform_2, window_bounds = array<i64: 128, 3>}, {pipeline_mode = #tpu.pipeline_mode<synchronous>, transform_indices = @transform_3, window_bounds = array<i64: 128, 128>}, {pipeline_mode = #tpu.pipeline_mode<synchronous>, transform_indices = @transform_4, window_bounds = array<i64: 128, 1>}, {pipeline_mode = #tpu.pipeline_mode<synchronous>, transform_indices = @transform_5, window_bounds = array<i64: 64, 128>}, {pipeline_mode = #tpu.pipeline_mode<synchronous>, transform_indices = @transform_6, window_bounds = array<i64: 64, 1>}, {pipeline_mode = #tpu.pipeline_mode<synchronous>, transform_indices = @transform_7, window_bounds = array<i64: 32, 64>}, {pipeline_mode = #tpu.pipeline_mode<synchronous>, transform_indices = @transform_8, window_bounds = array<i64: 32, 1>}, {pipeline_mode = #tpu.pipeline_mode<synchronous>, transform_indices = @transform_9, window_bounds = array<i64: 16, 32>}, {pipeline_mode = #tpu.pipeline_mode<synchronous>, transform_indices = @transform_10, window_bounds = array<i64: 16, 1>}, {pipeline_mode = #tpu.pipeline_mode<synchronous>, transform_indices = @transform_11, window_bounds = array<i64: 16, 1>}, {pipeline_mode = #tpu.pipeline_mode<synchronous>, transform_indices = @transform_12, window_bounds = array<i64: 1, 1>}, {transform_indices = @transform_13, window_bounds = array<i64: 1, 1024>}]} {
    %c0 = arith.constant 0 : index
    %c0_0 = arith.constant 0 : index
    %c0_1 = arith.constant 0 : index
    %0 = vector.load %arg2[%c0, %c0_0, %c0_1] : memref<1x3x1024xf32, #tpu.memory_space<vmem>>, vector<1x3x1024xf32>
    %1 = vector.shape_cast %0 : vector<1x3x1024xf32> to vector<3x1024xf32>
    %c0_2 = arith.constant 0 : index
    %c0_3 = arith.constant 0 : index
    %2 = vector.load %arg4[%c0_2, %c0_3] : memref<128x3xf32, #tpu.memory_space<vmem>>, vector<128x3xf32>
    %cst = arith.constant dense<0.000000e+00> : vector<128x1024xf32>
    %3 = tpu.matmul %2, %1, %cst {dimension_numbers = #tpu.dot_dimension_numbers<[1], [0], [0], [1], [0, 0, 1, 1], [], []>} : vector<128x3xf32>, vector<3x1024xf32>, vector<128x1024xf32> -> vector<128x1024xf32>
    %c0_4 = arith.constant 0 : index
    %c0_5 = arith.constant 0 : index
    %c0_6 = arith.constant 0 : index
    %4 = vector.load %arg3[%c0_4, %c0_5, %c0_6] : memref<1x128x1xf32, #tpu.memory_space<vmem>>, vector<1x128x1xf32>
    %5 = vector.shape_cast %4 : vector<1x128x1xf32> to vector<128x1xf32>
    %6 = vector.broadcast %5 : vector<128x1xf32> to vector<128x1024xf32>
    %7 = arith.addf %3, %6 : vector<128x1024xf32>
    %cst_7 = arith.constant 2.000000e-02 : f32
    %8 = vector.broadcast %cst_7 : f32 to vector<128x1024xf32>
    %9 = arith.mulf %8, %7 : vector<128x1024xf32>
    %10 = arith.maximumf %7, %9 : vector<128x1024xf32>
    %c0_8 = arith.constant 0 : index
    %c0_9 = arith.constant 0 : index
    %11 = vector.load %arg5[%c0_8, %c0_9] : memref<128x128xf32, #tpu.memory_space<vmem>>, vector<128x128xf32>
    %cst_10 = arith.constant dense<0.000000e+00> : vector<128x1024xf32>
    %12 = tpu.matmul %11, %10, %cst_10 {dimension_numbers = #tpu.dot_dimension_numbers<[1], [0], [0], [1], [0, 0, 1, 1], [], []>} : vector<128x128xf32>, vector<128x1024xf32>, vector<128x1024xf32> -> vector<128x1024xf32>
    %c0_11 = arith.constant 0 : index
    %c0_12 = arith.constant 0 : index
    %13 = vector.load %arg6[%c0_11, %c0_12] : memref<128x1xf32, #tpu.memory_space<vmem>>, vector<128x1xf32>
    %14 = vector.broadcast %13 : vector<128x1xf32> to vector<128x1024xf32>
    %15 = arith.addf %12, %14 : vector<128x1024xf32>
    %cst_13 = arith.constant 2.000000e-02 : f32
    %16 = vector.broadcast %cst_13 : f32 to vector<128x1024xf32>
    %17 = arith.mulf %16, %15 : vector<128x1024xf32>
    %18 = arith.maximumf %15, %17 : vector<128x1024xf32>
    %c0_14 = arith.constant 0 : index
    %c0_15 = arith.constant 0 : index
    %19 = vector.load %arg7[%c0_14, %c0_15] : memref<64x128xf32, #tpu.memory_space<vmem>>, vector<64x128xf32>
    %cst_16 = arith.constant dense<0.000000e+00> : vector<64x1024xf32>
    %20 = tpu.matmul %19, %18, %cst_16 {dimension_numbers = #tpu.dot_dimension_numbers<[1], [0], [0], [1], [0, 0, 1, 1], [], []>} : vector<64x128xf32>, vector<128x1024xf32>, vector<64x1024xf32> -> vector<64x1024xf32>
    %c0_17 = arith.constant 0 : index
    %c0_18 = arith.constant 0 : index
    %21 = vector.load %arg8[%c0_17, %c0_18] : memref<64x1xf32, #tpu.memory_space<vmem>>, vector<64x1xf32>
    %22 = vector.broadcast %21 : vector<64x1xf32> to vector<64x1024xf32>
    %23 = arith.addf %20, %22 : vector<64x1024xf32>
    %cst_19 = arith.constant 2.000000e-02 : f32
    %24 = vector.broadcast %cst_19 : f32 to vector<64x1024xf32>
    %25 = arith.mulf %24, %23 : vector<64x1024xf32>
    %26 = arith.maximumf %23, %25 : vector<64x1024xf32>
    %c0_20 = arith.constant 0 : index
    %c0_21 = arith.constant 0 : index
    %27 = vector.load %arg9[%c0_20, %c0_21] : memref<32x64xf32, #tpu.memory_space<vmem>>, vector<32x64xf32>
    %cst_22 = arith.constant dense<0.000000e+00> : vector<32x1024xf32>
    %28 = tpu.matmul %27, %26, %cst_22 {dimension_numbers = #tpu.dot_dimension_numbers<[1], [0], [0], [1], [0, 0, 1, 1], [], []>} : vector<32x64xf32>, vector<64x1024xf32>, vector<32x1024xf32> -> vector<32x1024xf32>
    %c0_23 = arith.constant 0 : index
    %c0_24 = arith.constant 0 : index
    %29 = vector.load %arg10[%c0_23, %c0_24] : memref<32x1xf32, #tpu.memory_space<vmem>>, vector<32x1xf32>
    %30 = vector.broadcast %29 : vector<32x1xf32> to vector<32x1024xf32>
    %31 = arith.addf %28, %30 : vector<32x1024xf32>
    %cst_25 = arith.constant 2.000000e-02 : f32
    %32 = vector.broadcast %cst_25 : f32 to vector<32x1024xf32>
    %33 = arith.mulf %32, %31 : vector<32x1024xf32>
    %34 = arith.maximumf %31, %33 : vector<32x1024xf32>
    %c0_26 = arith.constant 0 : index
    %c0_27 = arith.constant 0 : index
    %35 = vector.load %arg11[%c0_26, %c0_27] : memref<16x32xf32, #tpu.memory_space<vmem>>, vector<16x32xf32>
    %cst_28 = arith.constant dense<0.000000e+00> : vector<16x1024xf32>
    %36 = tpu.matmul %35, %34, %cst_28 {dimension_numbers = #tpu.dot_dimension_numbers<[1], [0], [0], [1], [0, 0, 1, 1], [], []>} : vector<16x32xf32>, vector<32x1024xf32>, vector<16x1024xf32> -> vector<16x1024xf32>
    %c0_29 = arith.constant 0 : index
    %c0_30 = arith.constant 0 : index
    %37 = vector.load %arg12[%c0_29, %c0_30] : memref<16x1xf32, #tpu.memory_space<vmem>>, vector<16x1xf32>
    %38 = vector.broadcast %37 : vector<16x1xf32> to vector<16x1024xf32>
    %39 = arith.addf %36, %38 : vector<16x1024xf32>
    %cst_31 = arith.constant 2.000000e-02 : f32
    %40 = vector.broadcast %cst_31 : f32 to vector<16x1024xf32>
    %41 = arith.mulf %40, %39 : vector<16x1024xf32>
    %42 = arith.maximumf %39, %41 : vector<16x1024xf32>
    %c0_32 = arith.constant 0 : index
    %c0_33 = arith.constant 0 : index
    %43 = vector.load %arg13[%c0_32, %c0_33] : memref<16x1xf32, #tpu.memory_space<vmem>>, vector<16x1xf32>
    %44 = vector.broadcast %43 : vector<16x1xf32> to vector<16x1024xf32>
    %45 = arith.mulf %42, %44 : vector<16x1024xf32>
    %cst_34 = arith.constant dense<0.000000e+00> : vector<1024xf32>
    %46 = vector.multi_reduction <add>, %45, %cst_34 [0] : vector<16x1024xf32> to vector<1024xf32>
    %47 = vector.shape_cast %46 : vector<1024xf32> to vector<1x1024xf32>
    %c0_35 = arith.constant 0 : index
    %c0_36 = arith.constant 0 : index
    %48 = vector.load %arg14[%c0_35, %c0_36] : memref<1x1xf32, #tpu.memory_space<vmem>>, vector<1x1xf32>
    %49 = vector.broadcast %48 : vector<1x1xf32> to vector<1x1024xf32>
    %50 = arith.addf %47, %49 : vector<1x1024xf32>
    %cst_37 = arith.constant 0.00999999977 : f32
    %51 = vector.broadcast %cst_37 : f32 to vector<1x1024xf32>
    %52 = arith.mulf %50, %51 : vector<1x1024xf32>
    %cst_38 = arith.constant 9.900000e-01 : f32
    %53 = vector.broadcast %cst_38 : f32 to vector<1x1024xf32>
    %54 = arith.addf %52, %53 : vector<1x1024xf32>
    %55 = arith.minimumf %50, %54 : vector<1x1024xf32>
    %cst_39 = arith.constant 0.00999999977 : f32
    %56 = vector.broadcast %cst_39 : f32 to vector<1x1024xf32>
    %57 = arith.mulf %50, %56 : vector<1x1024xf32>
    %58 = arith.maximumf %55, %57 : vector<1x1024xf32>
    %c0_40 = arith.constant 0 : index
    %c0_41 = arith.constant 0 : index
    %59 = vector.load %arg15[%c0_40, %c0_41] : memref<1x1024xf32, #tpu.memory_space<vmem>>, vector<1x1024xf32>
    tpu.vector_store %arg15[%c0_40, %c0_41], %58 {strides = array<i32>} : memref<1x1024xf32, #tpu.memory_space<vmem>>, vector<1x1024xf32>,
    return
  }
  func.func @transform_0(%arg0: i32, %arg1: i32) -> (i32, i32, i32) {
    %c0_i32 = arith.constant 0 : i32
    %c0_i32_0 = arith.constant 0 : i32
    return %arg0, %c0_i32, %arg1 : i32, i32, i32
  }
  func.func @transform_1(%arg0: i32, %arg1: i32) -> (i32, i32, i32) {
    %c0_i32 = arith.constant 0 : i32
    %c0_i32_0 = arith.constant 0 : i32
    %c0_i32_1 = arith.constant 0 : i32
    return %arg0, %c0_i32, %c0_i32_0 : i32, i32, i32
  }
  func.func @transform_2(%arg0: i32, %arg1: i32) -> (i32, i32) {
    %c0_i32 = arith.constant 0 : i32
    %c0_i32_0 = arith.constant 0 : i32
    %c0_i32_1 = arith.constant 0 : i32
    return %c0_i32, %c0_i32_0 : i32, i32
  }
  func.func @transform_3(%arg0: i32, %arg1: i32) -> (i32, i32) {
    %c0_i32 = arith.constant 0 : i32
    %c0_i32_0 = arith.constant 0 : i32
    %c0_i32_1 = arith.constant 0 : i32
    return %c0_i32, %c0_i32_0 : i32, i32
  }
  func.func @transform_4(%arg0: i32, %arg1: i32) -> (i32, i32) {
    %c0_i32 = arith.constant 0 : i32
    %c0_i32_0 = arith.constant 0 : i32
    %c0_i32_1 = arith.constant 0 : i32
    return %c0_i32, %c0_i32_0 : i32, i32
  }
  func.func @transform_5(%arg0: i32, %arg1: i32) -> (i32, i32) {
    %c0_i32 = arith.constant 0 : i32
    %c0_i32_0 = arith.constant 0 : i32
    %c0_i32_1 = arith.constant 0 : i32
    return %c0_i32, %c0_i32_0 : i32, i32
  }
  func.func @transform_6(%arg0: i32, %arg1: i32) -> (i32, i32) {
    %c0_i32 = arith.constant 0 : i32
    %c0_i32_0 = arith.constant 0 : i32
    %c0_i32_1 = arith.constant 0 : i32
    return %c0_i32, %c0_i32_0 : i32, i32
  }
  func.func @transform_7(%arg0: i32, %arg1: i32) -> (i32, i32) {
    %c0_i32 = arith.constant 0 : i32
    %c0_i32_0 = arith.constant 0 : i32
    %c0_i32_1 = arith.constant 0 : i32
    return %c0_i32, %c0_i32_0 : i32, i32
  }
  func.func @transform_8(%arg0: i32, %arg1: i32) -> (i32, i32) {
    %c0_i32 = arith.constant 0 : i32
    %c0_i32_0 = arith.constant 0 : i32
    %c0_i32_1 = arith.constant 0 : i32
    return %c0_i32, %c0_i32_0 : i32, i32
  }
  func.func @transform_9(%arg0: i32, %arg1: i32) -> (i32, i32) {
    %c0_i32 = arith.constant 0 : i32
    %c0_i32_0 = arith.constant 0 : i32
    %c0_i32_1 = arith.constant 0 : i32
    return %c0_i32, %c0_i32_0 : i32, i32
  }
  func.func @transform_10(%arg0: i32, %arg1: i32) -> (i32, i32) {
    %c0_i32 = arith.constant 0 : i32
    %c0_i32_0 = arith.constant 0 : i32
    %c0_i32_1 = arith.constant 0 : i32
    return %c0_i32, %c0_i32_0 : i32, i32
  }
  func.func @transform_11(%arg0: i32, %arg1: i32) -> (i32, i32) {
    %c0_i32 = arith.constant 0 : i32
    %c0_i32_0 = arith.constant 0 : i32
    %c0_i32_1 = arith.constant 0 : i32
    return %c0_i32, %c0_i32_0 : i32, i32
  }
  func.func @transform_12(%arg0: i32, %arg1: i32) -> (i32, i32) {
    %c0_i32 = arith.constant 0 : i32
    %c0_i32_0 = arith.constant 0 : i32
    %c0_i32_1 = arith.constant 0 : i32
    return %c0_i32, %c0_i32_0 : i32, i32
  }
  func.func @transform_13(%arg0: i32, %arg1: i32) -> (i32, i32) {
    %c4_i32 = arith.constant 4 : i32
    %0 = arith.muli %arg0, %c4_i32 : i32
    %1 = arith.addi %0, %arg1 : i32
    %c0_i32 = arith.constant 0 : i32
    %c0_i32_0 = arith.constant 0 : i32
    return %c0_i32, %1 : i32, i32
  }
}

</mosaic_0001>

<bundles_post_ra>
// kernel: generator_forward.1
= control target key start
LH: loop header
LB: loop body
LE: loop exit
PB: predicated region body
PF: predicated region fallthrough
CT: control target
= control target key end

     0   :  { %s4617_s27 = smov 0   ;;  %s4619_s28 = smov 0   ;;  %s7517_s0 = inlined_call_operand.vmem [shape: f32[2,3,4096], index: 0, kind: input, shape index: {}]   ;;  %s7518_s1 = inlined_call_operand.vmem [shape: f32[2,128,1], index: 1, kind: input, shape index: {}]   ;;  %s7519_s2 = inlined_call_operand.vmem [shape: f32[128,3], index: 2, kind: input, shape index: {}]   ;;  %s7520_s3 = inlined_call_operand.vmem [shape: f32[128,128], index: 3, kind: input, shape index: {}]   ;;  %s7521_s4 = inlined_call_operand.vmem [shape: f32[128,1], index: 4, kind: input, shape index: {}]   ;;  %s7522_s5 = inlined_call_operand.vmem [shape: f32[64,128], index: 5, kind: input, shape index: {}]   ;;  %s7523_s6 = inlined_call_operand.vmem [shape: f32[64,1], index: 6, kind: input, shape index: {}]   ;;  %s7524_s7 = inlined_call_operand.vmem [shape: f32[32,64], index: 7, kind: input, shape index: {}]   ;;  %s7525_s8 = inlined_call_operand.vmem [shape: f32[32,1], index: 8, kind: input, shape index: {}]   ;;  %s7526_s9 = inlined_call_operand.vmem [shape: f32[16,32], index: 9, kind: input, shape index: {}]   ;;  %s7527_s10 = inlined_call_operand.vmem [shape: f32[16,1], index: 10, kind: input, shape index: {}]   ;;  %s7528_s11 = inlined_call_operand.vmem [shape: f32[16,1], index: 11, kind: input, shape index: {}]   ;;  %s7529_s12 = inlined_call_operand.<no memory space> [shape: f32[1,1], index: 12, kind: input, shape index: {}]   ;;  %s7530_s13 = inlined_call_operand.vmem [shape: f32[1,8192], index: 13, kind: output, shape index: {}]  }
   0x1   :  { %v18_v0 = vstv %s7529_s12  ;;  %s4621_s29 = smov 0   ;;  %s4623_s30 = smov 0  }
   0x2   :  { %19 = vst [vmem:[#allocation2] sm:$0x1] %v18_v0  ;;  %s4625_s14 = smov 0  }
   0x3 LB: > { %s34_s12 = sadd.s32 1, %s4531_s29  ;;  %s37_s15 = sadd.s32 1, %s4535_s30  ;;  %s4539_s14 = sphi %s4625_s14, %s25_s14   ;;  %s4535_s30 = sphi %s4623_s30, %s8007_s30   ;;  %s4531_s29 = sphi %s4621_s29, %s8006_s29   ;;  %s4527_s28 = sphi %s4619_s28, %s8005_s28   ;;  %s4523_s27 = sphi %s4617_s27, %s8004_s27  }
   0x4   : > { %p35_p0 = scmp.ge.s32.totalorder %s34_s12, 4  ;;  %p4345_p1 = scmp.ge.s32.totalorder %s4539_s14, 1 }
   0x5   : > { %p422_p2 = scmp.lt.s32.totalorder %s4539_s14, 9 }
   0x6   : > { %s8009_s12 = smov (%p35_p0, %s34_s12), 0  ;;  %s8011_s15 = smov (!%p35_p0, %s37_s15), %s4535_s30 }
   0x7   : > { %p423_p3 = pnand %p4345_p1, %p422_p2  ;;  %p39_p4 = scmp.ge.s32.totalorder %s8011_s15, 2 }
   0x9   : > { %s8013_s15 = smov (%p39_p4, %s8011_s15), 0  ;;  %426 = sbr.rel (%p423_p3) target bundleno = 1402 (0x57a), region = 72 }
   0xa   : > { %7691 = sst [smem:[#allocation3_spill]] %s8013_s15 }
   0xe   : > { %s4346_s16 = sshll.u32 %s4523_s27, 3  ;;  %p477_p5 = scmp.lt.s32.totalorder %s4527_s28, 1  ;;  %v7531_v1 = vmov 0.0   ;;  %v4542_v2 = vmov 0   ;;  %vm673_vm0 = vcmask 1042432   ;;  %v4669_v11 = vld [vmem:[%s7519_s2] sm:$0xff] }
   0xf   : > { %p479_p6 = scmp.lt.s32.totalorder %s4346_s16, 31  ;;  %754 = vmatprep.mubr.f32.mxu0 %v7531_v1  ;;  %915 = vmatprep.mubr.f32.mxu1 %v7531_v1  ;;  %vm624_vm1 = vcmask 23552   ;;  %v4684_v14 = vld [vmem:[%s7519_s2 + $0x8] sm:$0xff]  ;;  %v4701_v17 = vld [vmem:[%s7519_s2 + $0x10] sm:$0xff]  ;;  %v4714_v20 = vld [vmem:[%s7519_s2 + $0x18] sm:$0xff]  ;;  %vm3266_vm2 = vcmask 523264  }
  0x10   : > { %s478_s17 = scalar_select %p477_p5, %s4527_s28, 1  ;;  %4495 = vset.pattern.permute.xlu0 %v4542_v2  ;;  %4496 = vset.pattern.permute.xlu1 %v4542_v2  ;;  %v4727_v23 = vld [vmem:[%s7519_s2 + $0x20] sm:$0xff]  ;;  %v4740_v26 = vld [vmem:[%s7519_s2 + $0x28] sm:$0xff]  ;;  %v4753_v29 = vld [vmem:[%s7519_s2 + $0x30] sm:$0xff]  ;;  %vm3713_vm3 = vcmask 261120  }
  0x11   : > { %s8015_s16 = smov (!%p479_p6, %s4346_s16), 31  ;;  %v4766_v32 = vld [vmem:[%s7519_s2 + $0x38] sm:$0xff]  ;;  %v4779_v35 = vld [vmem:[%s7519_s2 + $0x40] sm:$0xff]  ;;  %v1620_v37 = vld [vmem:[%s7521_s4 + $0x70] sm:$0xff] }
  0x12   : > { %s4347_s18 = sshll.u32 %s478_s17, 5  ;;  %s4451_s19 = sshll.u32 %s478_s17, 7  ;;  %v1621_v36 = vld [vmem:[%s7521_s4 + $0x78] sm:$0xff]  ;;  %v4796_v38 = vld [vmem:[%s7519_s2 + $0x48] sm:$0xff]  ;;  %v1618_v40 = vld [vmem:[%s7521_s4 + $0x60] sm:$0xff] }
  0x13   : > { %s482_s20 = sadd.s32 %s4347_s18, %s8015_s16  ;;  %s4659_s23 = scalar_lea.vmem %s7518_s1, %s4451_s19  ;;  %v1619_v39 = vld [vmem:[%s7521_s4 + $0x68] sm:$0xff]  ;;  %v4813_v41 = vld [vmem:[%s7519_s2 + $0x50] sm:$0xff]  ;;  %v1617_v42 = vld [vmem:[%s7521_s4 + $0x58] sm:$0xff] }
  0x14   : > { %s4348_s24 = sshll.u32 %s482_s20, 2  ;;  %v535_v3 = vld [vmem:[%s4659_s23 + $0x78] sm:$0xff]  ;;  %v533_v4 = vld [vmem:[%s4659_s23 + $0x68] sm:$0xff]  ;;  %v534_v15 = vld [vmem:[%s4659_s23 + $0x70] sm:$0xff]  ;;  %s4351_s17 = sshll.u32 %s4527_s28, 2 }
  0x15   : > { %s484_s15 = scalar_lea.vmem %s7517_s0, %s4348_s24  ;;  %613 = vperm.xlu0 %4495, %v535_v3   ;;  %603 = vperm.xlu1 %4496, %v533_v4   ;;  %v532_v16 = vld [vmem:[%s4659_s23 + $0x60] sm:$0xff]  ;;  %v531_v18 = vld [vmem:[%s4659_s23 + $0x58] sm:$0xff]  ;;  %v530_v19 = vld [vmem:[%s4659_s23 + $0x50] sm:$0xff] }
  0x16   : > { %v500_v5 = vld [vmem:[%s484_s15] sm:$0x77]  ;;  %v501_v6 = vld [vmem:[%s484_s15 + $0x8] sm:$0x77]  ;;  %v502_v7 = vld [vmem:[%s484_s15 + $0x10] sm:$0x77] }
  0x17   : > { %v620_v8 = vcombine.high %v500_v5, %v500_v5  ;;  %v621_v9 = vcombine.high %v501_v6, %v501_v6  ;;  %v503_v10 = vld [vmem:[%s484_s15 + $0x18] sm:$0x77]  ;;  %v622_v12 = vcombine.high %v502_v7, %v502_v7  ;;  %v529_v21 = vld [vmem:[%s4659_s23 + $0x48] sm:$0xff]  ;;  %v528_v22 = vld [vmem:[%s4659_s23 + $0x40] sm:$0xff]  ;;  %s492_s15 = sadd.s32 %s4523_s27, %s4351_s17 }
  0x18   : > { %v623_v13 = vcombine.high %v503_v10, %v503_v10  ;;  %v527_v24 = vld [vmem:[%s4659_s23 + $0x38] sm:$0xff]  ;;  %v526_v25 = vld [vmem:[%s4659_s23 + $0x30] sm:$0xff]  ;;  %v525_v27 = vld [vmem:[%s4659_s23 + $0x28] sm:$0xff]  ;;  %s4352_s18 = sshll.u32 %s492_s15, 3 }
  0x19   : > { %4353 = vmatprep.subr.msk.mxu0 %vm673_vm0, %v620_v8  ;;  %4371 = vmatprep.subr.msk.mxu1 %vm673_vm0, %v621_v9  ;;  %v524_v28 = vld [vmem:[%s4659_s23 + $0x20] sm:$0xff]  ;;  %v523_v30 = vld [vmem:[%s4659_s23 + $0x18] sm:$0xff]  ;;  %v522_v31 = vld [vmem:[%s4659_s23 + $0x10] sm:$0xff]  ;;  %p494_p7 = scmp.lt.s32.totalorder %s4352_s18, 63 }
  0x1a   : > { %4354 = vmatpush1.msk.msra.mxu0 %vm673_vm0, %v500_v5  ;;  %4372 = vmatpush1.msk.msra.mxu1 %vm673_vm0, %v501_v6  ;;  %v521_v33 = vld [vmem:[%s4659_s23 + $0x8] sm:$0xff]  ;;  %v520_v34 = vld [vmem:[%s4659_s23] sm:$0xff]  ;;  %v1616_v43 = vld [vmem:[%s7521_s4 + $0x50] sm:$0xff] }
  0x1b   : > { %4355 = vmatmul.mubr.msk.f32.vlgmr.msra.gmra.mxu0 %vm624_vm1, %v4669_v11  ;;  %4373 = vmatmul.mubr.msk.f32.vlgmr.msra.gmra.mxu1 %vm624_vm1, %v4669_v11  ;;  %v4830_v44 = vld [vmem:[%s7519_s2 + $0x58] sm:$0xff]  ;;  %v1615_v45 = vld [vmem:[%s7521_s4 + $0x48] sm:$0xff]  ;;  %v1614_v46 = vld [vmem:[%s7521_s4 + $0x40] sm:$0xff]  ;;  %s8017_s18 = smov (!%p494_p7, %s4352_s18), 63 }
  0x1c   : > { %760 = vmatprep.mubr.f32.mxu0 %v7531_v1  ;;  %921 = vmatprep.mubr.f32.mxu1 %v7531_v1  ;;  %v4847_v47 = vld [vmem:[%s7519_s2 + $0x60] sm:$0xff]  ;;  %v1613_v48 = vld [vmem:[%s7521_s4 + $0x38] sm:$0xff]  ;;  %v1612_v49 = vld [vmem:[%s7521_s4 + $0x30] sm:$0xff]  ;;  %s496_s19 = scalar_lea.vmem %s7530_s13, %s8017_s18 }
  0x1d   : > { %4389 = vmatprep.subr.msk.mxu0 %vm673_vm0, %v622_v12  ;;  %4407 = vmatprep.subr.msk.mxu1 %vm673_vm0, %v623_v13  ;;  %v4864_v50 = vld [vmem:[%s7519_s2 + $0x68] sm:$0xff]  ;;  %v1610_v52 = vld [vmem:[%s7521_s4 + $0x20] sm:$0xff]  ;;  %v4881_v53 = vld [vmem:[%s7519_s2 + $0x70] sm:$0xff] }
  0x1e   : > { %4390 = vmatpush1.msk.msra.mxu0 %vm673_vm0, %v502_v7  ;;  %4408 = vmatpush1.msk.msra.mxu1 %vm673_vm0, %v503_v10  ;;  %v1611_v51 = vld [vmem:[%s7521_s4 + $0x28] sm:$0xff]  ;;  %v1609_v54 = vld [vmem:[%s7521_s4 + $0x18] sm:$0xff]  ;;  %v1608_v55 = vld [vmem:[%s7521_s4 + $0x10] sm:$0xff] }
  0x1f   : > { %4356 = vmatmul.mubr.msk.f32.gmra.mxu0 %vm624_vm1, %v4684_v14  ;;  %4374 = vmatmul.mubr.msk.f32.gmra.mxu1 %vm624_vm1, %v4684_v14  ;;  %v4898_v56 = vld [vmem:[%s7519_s2 + $0x78] sm:$0xff]  ;;  %v1607_v57 = vld [vmem:[%s7521_s4 + $0x8] sm:$0xff]  ;;  %v1606_v58 = vld [vmem:[%s7521_s4] sm:$0xff] }
  0x20   : > { %766 = vmatprep.mubr.f32.mxu0 %v7531_v1  ;;  %927 = vmatprep.mubr.f32.mxu1 %v7531_v1  ;;  %v2617_v59 = vld [vmem:[%s7523_s6 + $0x38] sm:$0xff]  ;;  %v2616_v60 = vld [vmem:[%s7523_s6 + $0x30] sm:$0xff]  ;;  %v2615_v61 = vld [vmem:[%s7523_s6 + $0x28] sm:$0xff] }
  0x21   : > { %608 = vperm.xlu0 %4495, %v534_v15   ;;  %598 = vperm.xlu1 %4496, %v532_v16   ;;  %v2614_v62 = vld [vmem:[%s7523_s6 + $0x20] sm:$0xff]  ;;  %v2613_v63 = vld [vmem:[%s7523_s6 + $0x18] sm:$0xff]  ;;  %v2612_v0 = vld [vmem:[%s7523_s6 + $0x10] sm:$0xff] }
  0x22   : > { %v2611_v2 = vld [vmem:[%s7523_s6 + $0x8] sm:$0xff]  ;;  %v2610_v3 = vld [vmem:[%s7523_s6] sm:$0xff]  ;;  %v3245_v4 = vld [vmem:[%s7525_s8 + $0x18] sm:$0xff] }
  0x23   : > { %4357 = vmatmul.mubr.msk.f32.gmra.mxu0 %vm624_vm1, %v4701_v17  ;;  %4375 = vmatmul.mubr.msk.f32.gmra.mxu1 %vm624_vm1, %v4701_v17  ;;  %v3244_v5 = vld [vmem:[%s7525_s8 + $0x10] sm:$0xff]  ;;  %v3243_v6 = vld [vmem:[%s7525_s8 + $0x8] sm:$0xff]  ;;  %v3242_v7 = vld [vmem:[%s7525_s8] sm:$0xff] }
  0x24   : > { %772 = vmatprep.mubr.f32.mxu0 %v7531_v1  ;;  %933 = vmatprep.mubr.f32.mxu1 %v7531_v1  ;;  %v3701_v8 = vld [vmem:[%s7527_s10] sm:$0xff]  ;;  %v3702_v9 = vld [vmem:[%s7527_s10 + $0x8] sm:$0xff] }
  0x25   : > { %593 = vperm.xlu0 %4495, %v531_v18   ;;  %588 = vperm.xlu1 %4496, %v530_v19   ;;  %v4060_v10 = vld [vmem:[%s7528_s11] sm:$0xff] }
  0x26   : > { %v4144_v12 = vld [vmem:[#allocation2] sm:$0x1] }
  0x27   : > { %4358 = vmatmul.mubr.msk.f32.gmra.mxu0 %vm624_vm1, %v4714_v20  ;;  %4376 = vmatmul.mubr.msk.f32.gmra.mxu1 %vm624_vm1, %v4714_v20 }
  0x28   : > { %778 = vmatprep.mubr.f32.mxu0 %v7531_v1  ;;  %939 = vmatprep.mubr.f32.mxu1 %v7531_v1 }
  0x29   : > { %583 = vperm.xlu0 %4495, %v529_v21   ;;  %578 = vperm.xlu1 %4496, %v528_v22  }
  0x2b   : > { %4359 = vmatmul.mubr.msk.f32.gmra.mxu0 %vm624_vm1, %v4727_v23  ;;  %4377 = vmatmul.mubr.msk.f32.gmra.mxu1 %vm624_vm1, %v4727_v23 }
  0x2c   : > { %784 = vmatprep.mubr.f32.mxu0 %v7531_v1  ;;  %945 = vmatprep.mubr.f32.mxu1 %v7531_v1 }
  0x2d   : > { %573 = vperm.xlu0 %4495, %v527_v24   ;;  %568 = vperm.xlu1 %4496, %v526_v25  }
  0x2f   : > { %4360 = vmatmul.mubr.msk.f32.gmra.mxu0 %vm624_vm1, %v4740_v26  ;;  %4378 = vmatmul.mubr.msk.f32.gmra.mxu1 %vm624_vm1, %v4740_v26 }
  0x30   : > { %790 = vmatprep.mubr.f32.mxu0 %v7531_v1  ;;  %951 = vmatprep.mubr.f32.mxu1 %v7531_v1 }
  0x31   : > { %563 = vperm.xlu0 %4495, %v525_v27   ;;  %558 = vperm.xlu1 %4496, %v524_v28  }
  0x33   : > { %4361 = vmatmul.mubr.msk.f32.gmra.mxu0 %vm624_vm1, %v4753_v29  ;;  %4379 = vmatmul.mubr.msk.f32.gmra.mxu1 %vm624_vm1, %v4753_v29 }
  0x34   : > { %796 = vmatprep.mubr.f32.mxu0 %v7531_v1  ;;  %957 = vmatprep.mubr.f32.mxu1 %v7531_v1 }
  0x35   : > { %553 = vperm.xlu0 %4495, %v523_v30   ;;  %548 = vperm.xlu1 %4496, %v522_v31  }
  0x37   : > { %4362 = vmatmul.mubr.msk.f32.gmra.mxu0 %vm624_vm1, %v4766_v32  ;;  %4380 = vmatmul.mubr.msk.f32.gmra.mxu1 %vm624_vm1, %v4766_v32 }
  0x38   : > { %802 = vmatprep.mubr.f32.mxu0 %v7531_v1  ;;  %963 = vmatprep.mubr.f32.mxu1 %v7531_v1 }
  0x39   : > { %543 = vperm.xlu0 %4495, %v521_v33   ;;  %538 = vperm.xlu1 %4496, %v520_v34  }
  0x3b   : > { %4363 = vmatmul.mubr.msk.f32.gmra.mxu0 %vm624_vm1, %v4779_v35  ;;  %4381 = vmatmul.mubr.msk.f32.gmra.mxu1 %vm624_vm1, %v4779_v35 }
  0x3c   : > { %808 = vmatprep.mubr.f32.mxu0 %v7531_v1  ;;  %969 = vmatprep.mubr.f32.mxu1 %v7531_v1 }
  0x3d   : > { %1699 = vperm.xlu0 %4495, %v1621_v36   ;;  %1694 = vperm.xlu1 %4496, %v1620_v37  }
  0x3f   : > { %4364 = vmatmul.mubr.msk.f32.gmra.mxu0 %vm624_vm1, %v4796_v38  ;;  %4382 = vmatmul.mubr.msk.f32.gmra.mxu1 %vm624_vm1, %v4796_v38 }
  0x40   : > { %814 = vmatprep.mubr.f32.mxu0 %v7531_v1  ;;  %975 = vmatprep.mubr.f32.mxu1 %v7531_v1 }
  0x41   : > { %1689 = vperm.xlu0 %4495, %v1619_v39   ;;  %1684 = vperm.xlu1 %4496, %v1618_v40  }
  0x43   : > { %4365 = vmatmul.mubr.msk.f32.gmra.mxu0 %vm624_vm1, %v4813_v41  ;;  %4383 = vmatmul.mubr.msk.f32.gmra.mxu1 %vm624_vm1, %v4813_v41 }
  0x44   : > { %820 = vmatprep.mubr.f32.mxu0 %v7531_v1  ;;  %981 = vmatprep.mubr.f32.mxu1 %v7531_v1 }
  0x45   : > { %1679 = vperm.xlu0 %4495, %v1617_v42   ;;  %1674 = vperm.xlu1 %4496, %v1616_v43  }
  0x47   : > { %4366 = vmatmul.mubr.msk.f32.gmra.mxu0 %vm624_vm1, %v4830_v44  ;;  %4384 = vmatmul.mubr.msk.f32.gmra.mxu1 %vm624_vm1, %v4830_v44 }
  0x48   : > { %826 = vmatprep.mubr.f32.mxu0 %v7531_v1  ;;  %987 = vmatprep.mubr.f32.mxu1 %v7531_v1 }
  0x49   : > { %1669 = vperm.xlu0 %4495, %v1615_v45   ;;  %1664 = vperm.xlu1 %4496, %v1614_v46  }
  0x4b   : > { %4367 = vmatmul.mubr.msk.f32.gmra.mxu0 %vm624_vm1, %v4847_v47  ;;  %4385 = vmatmul.mubr.msk.f32.gmra.mxu1 %vm624_vm1, %v4847_v47 }
  0x4c   : > { %832 = vmatprep.mubr.f32.mxu0 %v7531_v1  ;;  %993 = vmatprep.mubr.f32.mxu1 %v7531_v1 }
  0x4d   : > { %1659 = vperm.xlu0 %4495, %v1613_v48   ;;  %1654 = vperm.xlu1 %4496, %v1612_v49  }
  0x4f   : > { %4368 = vmatmul.mubr.msk.f32.gmra.mxu0 %vm624_vm1, %v4864_v50  ;;  %4386 = vmatmul.mubr.msk.f32.gmra.mxu1 %vm624_vm1, %v4864_v50 }
  0x50   : > { %838 = vmatprep.mubr.f32.mxu0 %v7531_v1  ;;  %999 = vmatprep.mubr.f32.mxu1 %v7531_v1 }
  0x51   : > { %1649 = vperm.xlu0 %4495, %v1611_v51   ;;  %1644 = vperm.xlu1 %4496, %v1610_v52  }
  0x53   : > { %4369 = vmatmul.mubr.msk.f32.gmra.mxu0 %vm624_vm1, %v4881_v53  ;;  %4387 = vmatmul.mubr.msk.f32.gmra.mxu1 %vm624_vm1, %v4881_v53 }
  0x54   : > { %844 = vmatprep.mubr.f32.mxu0 %v7531_v1  ;;  %1005 = vmatprep.mubr.f32.mxu1 %v7531_v1 }
  0x55   : > { %1639 = vperm.xlu0 %4495, %v1609_v54   ;;  %1634 = vperm.xlu1 %4496, %v1608_v55  }
  0x57   : > { %4370 = vmatmul.mubr.msk.f32.gmra.mxu0 %vm624_vm1, %v4898_v56  ;;  %4388 = vmatmul.mubr.msk.f32.gmra.mxu1 %vm624_vm1, %v4898_v56 }
  0x58   : > { %1076 = vmatprep.mubr.f32.mxu0 %v7531_v1  ;;  %1237 = vmatprep.mubr.f32.mxu1 %v7531_v1 }
  0x59   : > { %1629 = vperm.xlu0 %4495, %v1607_v57   ;;  %1624 = vperm.xlu1 %4496, %v1606_v58  }
  0x5b   : > { %4391 = vmatmul.mubr.msk.f32.vlgmr.msra.gmra.mxu0 %vm624_vm1, %v4669_v11  ;;  %4409 = vmatmul.mubr.msk.f32.vlgmr.msra.gmra.mxu1 %vm624_vm1, %v4669_v11  ;;  %v4061_v11 = vld [vmem:[%s7528_s11 + $0x8] sm:$0xff] }
  0x5c   : > { %1082 = vmatprep.mubr.f32.mxu0 %v7531_v1  ;;  %1243 = vmatprep.mubr.f32.mxu1 %v7531_v1 }
  0x5d   : > { %2655 = vperm.xlu0 %4495, %v2617_v59   ;;  %2650 = vperm.xlu1 %4496, %v2616_v60  }
  0x5f   : > { %4392 = vmatmul.mubr.msk.f32.gmra.mxu0 %vm624_vm1, %v4684_v14  ;;  %4410 = vmatmul.mubr.msk.f32.gmra.mxu1 %vm624_vm1, %v4684_v14 }
  0x60   : > { %1088 = vmatprep.mubr.f32.mxu0 %v7531_v1  ;;  %1249 = vmatprep.mubr.f32.mxu1 %v7531_v1 }
  0x61   : > { %2645 = vperm.xlu0 %4495, %v2615_v61   ;;  %2640 = vperm.xlu1 %4496, %v2614_v62  }
  0x63   : > { %4393 = vmatmul.mubr.msk.f32.gmra.mxu0 %vm624_vm1, %v4701_v17  ;;  %4411 = vmatmul.mubr.msk.f32.gmra.mxu1 %vm624_vm1, %v4701_v17 }
  0x64   : > { %1094 = vmatprep.mubr.f32.mxu0 %v7531_v1  ;;  %1255 = vmatprep.mubr.f32.mxu1 %v7531_v1 }
  0x65   : > { %2635 = vperm.xlu0 %4495, %v2613_v63   ;;  %2630 = vperm.xlu1 %4496, %v2612_v0  }
  0x67   : > { %4394 = vmatmul.mubr.msk.f32.gmra.mxu0 %vm624_vm1, %v4714_v20  ;;  %4412 = vmatmul.mubr.msk.f32.gmra.mxu1 %vm624_vm1, %v4714_v20 }
  0x68   : > { %1100 = vmatprep.mubr.f32.mxu0 %v7531_v1  ;;  %1261 = vmatprep.mubr.f32.mxu1 %v7531_v1 }
  0x69   : > { %2625 = vperm.xlu0 %4495, %v2611_v2   ;;  %2620 = vperm.xlu1 %4496, %v2610_v3  }
  0x6b   : > { %4395 = vmatmul.mubr.msk.f32.gmra.mxu0 %vm624_vm1, %v4727_v23  ;;  %4413 = vmatmul.mubr.msk.f32.gmra.mxu1 %vm624_vm1, %v4727_v23 }
  0x6c   : > { %1106 = vmatprep.mubr.f32.mxu0 %v7531_v1  ;;  %1267 = vmatprep.mubr.f32.mxu1 %v7531_v1 }
  0x6d   : > { %3263 = vperm.xlu0 %4495, %v3245_v4   ;;  %3258 = vperm.xlu1 %4496, %v3244_v5  }
  0x6f   : > { %4396 = vmatmul.mubr.msk.f32.gmra.mxu0 %vm624_vm1, %v4740_v26  ;;  %4414 = vmatmul.mubr.msk.f32.gmra.mxu1 %vm624_vm1, %v4740_v26 }
  0x70   : > { %1112 = vmatprep.mubr.f32.mxu0 %v7531_v1  ;;  %1273 = vmatprep.mubr.f32.mxu1 %v7531_v1 }
  0x71   : > { %3253 = vperm.xlu0 %4495, %v3243_v6   ;;  %3248 = vperm.xlu1 %4496, %v3242_v7  }
  0x73   : > { %4397 = vmatmul.mubr.msk.f32.gmra.mxu0 %vm624_vm1, %v4753_v29  ;;  %4415 = vmatmul.mubr.msk.f32.gmra.mxu1 %vm624_vm1, %v4753_v29 }
  0x74   : > { %1118 = vmatprep.mubr.f32.mxu0 %v7531_v1  ;;  %1279 = vmatprep.mubr.f32.mxu1 %v7531_v1 }
  0x75   : > { %3705 = vperm.xlu0 %4495, %v3701_v8   ;;  %3710 = vperm.xlu1 %4496, %v3702_v9  }
  0x77   : > { %4398 = vmatmul.mubr.msk.f32.gmra.mxu0 %vm624_vm1, %v4766_v32  ;;  %4416 = vmatmul.mubr.msk.f32.gmra.mxu1 %vm624_vm1, %v4766_v32 }
  0x78   : > { %1124 = vmatprep.mubr.f32.mxu0 %v7531_v1  ;;  %1285 = vmatprep.mubr.f32.mxu1 %v7531_v1 }
  0x79   : > { %4064 = vperm.xlu0 %4495, %v4060_v10   ;;  %4069 = vperm.xlu1 %4496, %v4061_v11  }
  0x7b   : > { %4399 = vmatmul.mubr.msk.f32.gmra.mxu0 %vm624_vm1, %v4779_v35  ;;  %4417 = vmatmul.mubr.msk.f32.gmra.mxu1 %vm624_vm1, %v4779_v35 }
  0x7c   : > { %1130 = vmatprep.mubr.f32.mxu0 %v7531_v1  ;;  %1291 = vmatprep.mubr.f32.mxu1 %v7531_v1 }
  0x7d   : > { %4147 = vperm.xlu0 %4495, %v4144_v12  }
  0x7f   : > { %4400 = vmatmul.mubr.msk.f32.gmra.mxu0 %vm624_vm1, %v4796_v38  ;;  %4418 = vmatmul.mubr.msk.f32.gmra.mxu1 %vm624_vm1, %v4796_v38 }
  0x80   : > { %1136 = vmatprep.mubr.f32.mxu0 %v7531_v1  ;;  %1297 = vmatprep.mubr.f32.mxu1 %v7531_v1 }
  0x83   : > { %4401 = vmatmul.mubr.msk.f32.gmra.mxu0 %vm624_vm1, %v4813_v41  ;;  %4419 = vmatmul.mubr.msk.f32.gmra.mxu1 %vm624_vm1, %v4813_v41 }
  0x84   : > { %1142 = vmatprep.mubr.f32.mxu0 %v7531_v1  ;;  %1303 = vmatprep.mubr.f32.mxu1 %v7531_v1 }
  0x87   : > { %4402 = vmatmul.mubr.msk.f32.gmra.mxu0 %vm624_vm1, %v4830_v44  ;;  %4420 = vmatmul.mubr.msk.f32.gmra.mxu1 %vm624_vm1, %v4830_v44 }
  0x88   : > { %1148 = vmatprep.mubr.f32.mxu0 %v7531_v1  ;;  %1309 = vmatprep.mubr.f32.mxu1 %v7531_v1 }
  0x8b   : > { %4403 = vmatmul.mubr.msk.f32.gmra.mxu0 %vm624_vm1, %v4847_v47  ;;  %4421 = vmatmul.mubr.msk.f32.gmra.mxu1 %vm624_vm1, %v4847_v47 }
  0x8c   : > { %1154 = vmatprep.mubr.f32.mxu0 %v7531_v1  ;;  %1315 = vmatprep.mubr.f32.mxu1 %v7531_v1 }
  0x8f   : > { %4404 = vmatmul.mubr.msk.f32.gmra.mxu0 %vm624_vm1, %v4864_v50  ;;  %4422 = vmatmul.mubr.msk.f32.gmra.mxu1 %vm624_vm1, %v4864_v50 }
  0x90   : > { %1160 = vmatprep.mubr.f32.mxu0 %v7531_v1  ;;  %1321 = vmatprep.mubr.f32.mxu1 %v7531_v1  ;;  %v5068_v19 = vpop.permute.xlu1 %603  ;;  %v5078_v24 = vpop.permute.xlu0 %613 }
  0x91   : > { %7692 = vst [vmem:[#allocation4_spill] sm:$0xff] %v5068_v19  ;;  %7694 = vst [vmem:[#allocation6_spill] sm:$0xff] %v5078_v24 }
  0x93   : > { %4405 = vmatmul.mubr.msk.f32.gmra.mxu0 %vm624_vm1, %v4881_v53  ;;  %4423 = vmatmul.mubr.msk.f32.gmra.mxu1 %vm624_vm1, %v4881_v53 }
  0x94   : > { %1166 = vmatprep.mubr.f32.mxu0 %v7531_v1  ;;  %1327 = vmatprep.mubr.f32.mxu1 %v7531_v1 }
  0x97   : > { %4406 = vmatmul.mubr.msk.f32.gmra.mxu0 %vm624_vm1, %v4898_v56  ;;  %4424 = vmatmul.mubr.msk.f32.gmra.mxu1 %vm624_vm1, %v4898_v56 }
  0x98   : > { %1766 = vmatprep.mubr.f32.mxu0 %v7531_v1  ;;  %1927 = vmatprep.mubr.f32.mxu1 %v7531_v1 }
  0x9c   : > { %v5084_v27 = vpop.permute.xlu1 %598  ;;  %v5094_v32 = vpop.permute.xlu0 %608 }
  0x9d   : > { %7696 = vst [vmem:[#allocation8_spill] sm:$0xff] %v5094_v32 }
  0xa0   : > { %v5100_v35 = vpop.permute.xlu1 %588  ;;  %v5110_v40 = vpop.permute.xlu0 %593 }
  0xa1   : > { %7698 = vst [vmem:[#allocation10_spill] sm:$0xff] %v5110_v40 }
  0xa4   : > { %v5116_v43 = vpop.permute.xlu1 %578  ;;  %v5120_v48 = vpop.permute.xlu0 %583 }
  0xa5   : > { %7699 = vst [vmem:[#allocation11_spill] sm:$0xff] %v5116_v43 }
  0xa8   : > { %v5122_v51 = vpop.permute.xlu1 %568  ;;  %v5126_v56 = vpop.permute.xlu0 %573 }
  0xac   : > { %v5128_v59 = vpop.permute.xlu1 %558  ;;  %v5132_v0 = vpop.permute.xlu0 %563 }
  0xad   : > { %7702 = vst [vmem:[#allocation14_spill] sm:$0xff] %v5128_v59  ;;  %7704 = vst [vmem:[#allocation16_spill] sm:$0xff] %v5132_v0 }
  0xb0   : > { %v5136_v4 = vpop.permute.xlu1 %548  ;;  %v5138_v9 = vpop.permute.xlu0 %553 }
  0xb1   : > { %7706 = vst [vmem:[#allocation18_spill] sm:$0xff] %v5136_v4  ;;  %7707 = vst [vmem:[#allocation19_spill] sm:$0xff] %v5138_v9 }
  0xb4   : > { %v5140_v12 = vpop.permute.xlu1 %538 }
  0xb5   : > { %7708 = vst [vmem:[#allocation20_spill] sm:$0xff] %v5140_v12 }
  0xdb   : > { %v5056_v13 = vpop.f32.mrf.mxu0  ;;  %v5058_v14 = vpop.f32.mrf.mxu1 }
  0xdd   : > { %v5060_v15 = vpop.f32.mrf.mxu0  ;;  %v5062_v16 = vpop.f32.mrf.mxu1 }
  0xdf   : > { %v5064_v17 = vpop.f32.mrf.mxu0  ;;  %v5066_v18 = vpop.f32.mrf.mxu1 }
  0xe1   : > { %v5070_v20 = vpop.f32.mrf.mxu0  ;;  %v5072_v21 = vpop.f32.mrf.mxu1 }
  0xe2   : > { %7693 = vst [vmem:[#allocation5_spill] sm:$0xff] %v5072_v21 }
  0xe3   : > { %v5074_v22 = vpop.f32.mrf.mxu0  ;;  %v5076_v23 = vpop.f32.mrf.mxu1 }
  0xe5   : > { %v5080_v25 = vpop.f32.mrf.mxu0  ;;  %v5082_v26 = vpop.f32.mrf.mxu1 }
  0xe7   : > { %v5086_v28 = vpop.f32.mrf.mxu0  ;;  %v5088_v29 = vpop.f32.mrf.mxu1 }
  0xe9   : > { %v5090_v30 = vpop.f32.mrf.mxu0  ;;  %v5092_v31 = vpop.f32.mrf.mxu1 }
  0xea   : > { %7695 = vst [vmem:[#allocation7_spill] sm:$0xff] %v5092_v31 }
  0xeb   : > { %v5096_v33 = vpop.f32.mrf.mxu0  ;;  %v5098_v34 = vpop.f32.mrf.mxu1 }
  0xed   : > { %v5102_v36 = vpop.f32.mrf.mxu0  ;;  %v5104_v37 = vpop.f32.mrf.mxu1 }
  0xee   : > { %7697 = vst [vmem:[#allocation9_spill] sm:$0xff] %v5104_v37 }
  0xef   : > { %v5106_v38 = vpop.f32.mrf.mxu0  ;;  %v5108_v39 = vpop.f32.mrf.mxu1 }
  0xf1   : > { %v5112_v41 = vpop.f32.mrf.mxu0  ;;  %v5114_v42 = vpop.f32.mrf.mxu1 }
  0xf3   : > { %v792_v44 = vpop.f32.mrf.mxu0  ;;  %v953_v45 = vpop.f32.mrf.mxu1 }
  0xf5   : > { %v794_v46 = vpop.f32.mrf.mxu0  ;;  %v5118_v47 = vpop.f32.mrf.mxu1 }
  0xf6   : > { %7700 = vst [vmem:[#allocation12_spill] sm:$0xff] %v5118_v47  ;;  %v5148_v47 = vpop.permute.xlu0 %543 }
  0xf7   : > { %v798_v49 = vpop.f32.mrf.mxu0  ;;  %v959_v50 = vpop.f32.mrf.mxu1  ;;  %7711 = vst [vmem:[#allocation23_spill] sm:$0xff] %v5148_v47 }
  0xf9   : > { %v800_v52 = vpop.f32.mrf.mxu0  ;;  %v5124_v53 = vpop.f32.mrf.mxu1 }
  0xfa   : > { %7701 = vst [vmem:[#allocation13_spill] sm:$0xff] %v5124_v53  ;;  %v5152_v53 = vadd.f32 %v5056_v13, %v5140_v12  ;;  %v5172_v13 = vadd.f32 %v5066_v18, %v5148_v47  ;;  %v5192_v18 = vadd.f32 %v5082_v26, %v5136_v4  ;;  %v5212_v26 = vadd.f32 %v5098_v34, %v5128_v59 }
  0xfb   : > { %v804_v54 = vpop.f32.mrf.mxu0  ;;  %v965_v55 = vpop.f32.mrf.mxu1  ;;  %v5232_v34 = vadd.f32 %v5114_v42, %v5132_v0  ;;  %v5250_v42 = vadd.f32 %v800_v52, %v5126_v56 }
  0xfc   : > { %7712 = vst [vmem:[#allocation24_spill] sm:$0xff] %v5152_v53  ;;  %7717 = vst [vmem:[#allocation29_spill] sm:$0xff] %v5172_v13  ;;  %v5244_v13 = vadd.f32 %v798_v49, %v5126_v56 }
  0xfd   : > { %v806_v57 = vpop.f32.mrf.mxu0  ;;  %v967_v58 = vpop.f32.mrf.mxu1  ;;  %7722 = vst [vmem:[#allocation34_spill] sm:$0xff] %v5192_v18  ;;  %7727 = vst [vmem:[#allocation39_spill] sm:$0xff] %v5212_v26 }
  0xfe   : > { %7731 = vst [vmem:[#allocation43_spill] sm:$0xff] %v5232_v34 }
  0xff   : > { %v810_v60 = vpop.f32.mrf.mxu0  ;;  %v5130_v61 = vpop.f32.mrf.mxu1 }
 0x100   : > { %7703 = vst [vmem:[#allocation15_spill] sm:$0xff] %v5130_v61  ;;  %v5156_v61 = vadd.f32 %v5058_v14, %v5140_v12  ;;  %v5176_v14 = vadd.f32 %v5070_v20, %v5148_v47  ;;  %v5196_v20 = vadd.f32 %v5086_v28, %v5138_v9  ;;  %v5216_v28 = vadd.f32 %v5102_v36, %v5128_v59 }
 0x101   : > { %v812_v62 = vpop.f32.mrf.mxu0  ;;  %v973_v63 = vpop.f32.mrf.mxu1  ;;  %v5238_v36 = vadd.f32 %v953_v45, %v5122_v51  ;;  %v5256_v45 = vadd.f32 %v965_v55, %v5116_v43  ;;  %v5265_v49 = vadd.f32 %v810_v60, %v5120_v48 }
 0x102   : > { %7713 = vst [vmem:[#allocation25_spill] sm:$0xff] %v5156_v61  ;;  %7718 = vst [vmem:[#allocation30_spill] sm:$0xff] %v5176_v14  ;;  %v5268_v52 = vadd.f32 %v812_v62, %v5120_v48 }
 0x103   : > { %v816_v2 = vpop.f32.mrf.mxu0  ;;  %v5134_v3 = vpop.f32.mrf.mxu1  ;;  %7723 = vst [vmem:[#allocation35_spill] sm:$0xff] %v5196_v20  ;;  %7728 = vst [vmem:[#allocation40_spill] sm:$0xff] %v5216_v28 }
 0x104   : > { %7705 = vst [vmem:[#allocation17_spill] sm:$0xff] %v5134_v3  ;;  %v5160_v3 = vadd.f32 %v5060_v15, %v5140_v12  ;;  %v5180_v15 = vadd.f32 %v5074_v22, %v5136_v4  ;;  %v5200_v22 = vadd.f32 %v5088_v29, %v5138_v9  ;;  %v5220_v29 = vadd.f32 %v5106_v38, %v5132_v0 }
 0x105   : > { %v818_v5 = vpop.f32.mrf.mxu0  ;;  %v979_v6 = vpop.f32.mrf.mxu1  ;;  %v5241_v38 = vadd.f32 %v794_v46, %v5122_v51  ;;  %v5259_v46 = vadd.f32 %v806_v57, %v5116_v43  ;;  %v5274_v55 = vadd.f32 %v816_v2, %v5100_v35 }
 0x106   : > { %7714 = vst [vmem:[#allocation26_spill] sm:$0xff] %v5160_v3  ;;  %7719 = vst [vmem:[#allocation31_spill] sm:$0xff] %v5180_v15  ;;  %v5277_v57 = vadd.f32 %v818_v5, %v5100_v35 }
 0x107   : > { %v822_v7 = vpop.f32.mrf.mxu0  ;;  %v983_v8 = vpop.f32.mrf.mxu1  ;;  %7724 = vst [vmem:[#allocation36_spill] sm:$0xff] %v5200_v22  ;;  %7729 = vst [vmem:[#allocation41_spill] sm:$0xff] %v5220_v29 }
 0x108   : > { %v5283_v60 = vadd.f32 %v822_v7, %v5110_v40 }
 0x109   : > { %v824_v10 = vpop.f32.mrf.mxu0  ;;  %v985_v11 = vpop.f32.mrf.mxu1 }
 0x10a   : > { %v5296_v15 = vadd.f32 %v985_v11, %v5110_v40 }
 0x10b   : > { %v5142_v1 = vpop.f32.mrf.mxu0  ;;  %v5144_v21 = vpop.f32.mrf.mxu1 }
 0x10c   : > { %7709 = vst [vmem:[#allocation21_spill] sm:$0xff] %v5144_v21  ;;  %v5164_v21 = vadd.f32 %v5062_v16, %v5140_v12  ;;  %v5184_v16 = vadd.f32 %v5076_v23, %v5136_v4  ;;  %v5204_v23 = vadd.f32 %v5090_v30, %v5138_v9  ;;  %v5224_v30 = vadd.f32 %v5108_v39, %v5132_v0 }
 0x10d   : > { %v830_v31 = vpop.f32.mrf.mxu0  ;;  %v5146_v37 = vpop.f32.mrf.mxu1 }
 0x10e   : > { %7710 = vst [vmem:[#allocation22_spill] sm:$0xff] %v5146_v37  ;;  %7715 = vst [vmem:[#allocation27_spill] sm:$0xff] %v5164_v21  ;;  %v5168_v37 = vadd.f32 %v5064_v17, %v5148_v47  ;;  %v5188_v17 = vadd.f32 %v5080_v25, %v5136_v4  ;;  %v5208_v25 = vadd.f32 %v5096_v33, %v5128_v59 }
 0x10f   : > { %v834_v61 = vpop.f32.mrf.mxu0  ;;  %v995_v53 = vpop.f32.mrf.mxu1  ;;  %7720 = vst [vmem:[#allocation32_spill] sm:$0xff] %v5184_v16  ;;  %7725 = vst [vmem:[#allocation37_spill] sm:$0xff] %v5204_v23  ;;  %v5228_v33 = vadd.f32 %v5112_v41, %v5132_v0  ;;  %v5235_v21 = vadd.f32 %v792_v44, %v5122_v51  ;;  %v5247_v41 = vadd.f32 %v959_v50, %v5126_v56 }
 0x110   : > { %7716 = vst [vmem:[#allocation28_spill] sm:$0xff] %v5168_v37  ;;  %7721 = vst [vmem:[#allocation33_spill] sm:$0xff] %v5188_v17  ;;  %v5253_v44 = vadd.f32 %v804_v54, %v5116_v43  ;;  %v5262_v0 = vadd.f32 %v967_v58, %v5116_v43  ;;  %v5271_v54 = vadd.f32 %v973_v63, %v5120_v48 }
 0x111   : > { %7726 = vst [vmem:[#allocation38_spill] sm:$0xff] %v5208_v25  ;;  %v836_v4 = vpop.f32.mrf.mxu0  ;;  %v997_v12 = vpop.f32.mrf.mxu1  ;;  %7730 = vst [vmem:[#allocation42_spill] sm:$0xff] %v5224_v30  ;;  %v5280_v58 = vadd.f32 %v979_v6, %v5100_v35  ;;  %v5286_v43 = vadd.f32 %v983_v8, %v5110_v40  ;;  %v5290_v16 = vadd.f32 %v824_v10, %v5110_v40 }
 0x112   : > { %v5299_v7 = vadd.f32 %v830_v31, %v5084_v27  ;;  %v5304_v10 = vadd.f32 %v834_v61, %v5068_v19  ;;  %v5310_v11 = vadd.f32 %v997_v12, %v5068_v19 }
 0x113   : > { %v840_v3 = vpop.f32.mrf.mxu0  ;;  %v1001_v39 = vpop.f32.mrf.mxu1 }
 0x114   : > { %v841_v8 = vadd.f32 %v840_v3, %v5094_v32  ;;  %v1441_v28 = vmul.f32 0.02, %v5310_v11 }
 0x115   : > { %v842_v50 = vpop.f32.mrf.mxu0  ;;  %v1003_v37 = vpop.f32.mrf.mxu1  ;;  %v7734_v12 = vld [vmem:[#allocation22_spill] sm:$0xff] }
 0x116   : > { %v843_v62 = vadd.f32 %v842_v50, %v5094_v32  ;;  %v1004_v2 = vadd.f32 %v1003_v37, %v5094_v32  ;;  %v1002_v50 = vadd.f32 %v1001_v39, %v5094_v32  ;;  %v837_v37 = vadd.f32 %v836_v4, %v5068_v19 }
 0x117   : > { %v846_v14 = vpop.f32.mrf.mxu0  ;;  %v1007_v63 = vpop.f32.mrf.mxu1  ;;  %v5317_v32 = vadd.f32 %v995_v53, %v5068_v19  ;;  %v7737_v53 = vld [vmem:[#allocation21_spill] sm:$0xff] }
 0x118   : > { %v847_v5 = vadd.f32 %v846_v14, %v5078_v24  ;;  %v1008_v6 = vadd.f32 %v1007_v63, %v5078_v24  ;;  %v1447_v31 = vmul.f32 0.02, %v843_v62  ;;  %v1449_v61 = vmul.f32 0.02, %v1004_v2 }
 0x119   : > { %v848_v18 = vpop.f32.mrf.mxu0  ;;  %v1009_v17 = vpop.f32.mrf.mxu1  ;;  %v1448_v23 = vmul.f32 0.02, %v1002_v50  ;;  %v1439_v19 = vmul.f32 0.02, %v837_v37 }
 0x11a   : > { %v849_v14 = vadd.f32 %v848_v18, %v5078_v24  ;;  %v1010_v63 = vadd.f32 %v1009_v17, %v5078_v24  ;;  %v1454_v40 = vmul.f32 0.02, %v847_v5  ;;  %v1456_v22 = vmul.f32 0.02, %v1008_v6 }
 0x11b   : > { %v5312_v3 = vpop.f32.mrf.mxu0  ;;  %v5314_v39 = vpop.f32.mrf.mxu1  ;;  %v5321_v18 = vadd.f32 %v5142_v1, %v5084_v27  ;;  %v5325_v17 = vadd.f32 %v7734_v12, %v5084_v27  ;;  %v1446_v24 = vmul.f32 0.02, %v841_v8  ;;  %v1438_v1 = vmul.f32 0.02, %v5304_v10 }
 0x11c   : > { %7732 = vst [vmem:[#allocation44_spill] sm:$0xff] %v5312_v3  ;;  %7733 = vst [vmem:[#allocation45_spill] sm:$0xff] %v5314_v39  ;;  %v1455_v20 = vmul.f32 0.02, %v849_v14  ;;  %v1457_v4 = vmul.f32 0.02, %v1010_v63  ;;  %v5333_v39 = vadd.f32 %v7737_v53, %v5084_v27  ;;  %v1582_v30 = vmax.f32 %v847_v5, %v1454_v40 }
 0x11d   : > { %v5327_v47 = vpop.f32.mrf.mxu0  ;;  %v5329_v3 = vpop.f32.mrf.mxu1  ;;  %v1584_v12 = vmax.f32 %v1008_v6, %v1456_v22  ;;  %v1575_v9 = vmax.f32 %v843_v62, %v1447_v31  ;;  %v1577_v53 = vmax.f32 %v1004_v2, %v1449_v61  ;;  %v7742_v5 = vld [vmem:[#allocation17_spill] sm:$0xff]  ;;  %v1423_v62 = vmul.f32 0.02, %v5290_v16  ;;  %v7745_v31 = vld [vmem:[#allocation15_spill] sm:$0xff] }
 0x11e   : > { %7735 = vst [vmem:[#allocation22_spill] sm:$0xff] %v5327_v47  ;;  %7736 = vst [vmem:[#allocation46_spill] sm:$0xff] %v5329_v3  ;;  %v1583_v26 = vmax.f32 %v849_v14, %v1455_v20  ;;  %v1585_v25 = vmax.f32 %v1010_v63, %v1457_v4  ;;  %v1431_v47 = vmul.f32 0.02, %v5299_v7  ;;  %v1440_v3 = vmul.f32 0.02, %v5317_v32 }
 0x11f   : > { %v5337_v29 = vpop.f32.mrf.mxu0  ;;  %v5339_v34 = vpop.f32.mrf.mxu1  ;;  %v1430_v20 = vmul.f32 0.02, %v5321_v18  ;;  %v1433_v14 = vmul.f32 0.02, %v5325_v17  ;;  %v1574_v63 = vmax.f32 %v841_v8, %v1446_v24  ;;  %v1576_v4 = vmax.f32 %v1002_v50, %v1448_v23 }
 0x120   : > { %7738 = vst [vmem:[#allocation21_spill] sm:$0xff] %v5337_v29  ;;  %7739 = vst [vmem:[#allocation47_spill] sm:$0xff] %v5339_v34  ;;  %1702 = vmatprep.subr.mxu0 %v1583_v26  ;;  %1863 = vmatprep.subr.mxu1 %v1585_v25  ;;  %v5351_v6 = vadd.f32 %v7742_v5, %v5100_v35  ;;  %v1432_v25 = vmul.f32 0.02, %v5333_v39  ;;  %v1567_v26 = vmax.f32 %v837_v37, %v1439_v19  ;;  %v7774_v34 = vld [vmem:[#allocation34_spill] sm:$0xff] }
 0x121   : > { %v5345_v40 = vpop.f32.mrf.mxu0  ;;  %v5347_v22 = vpop.f32.mrf.mxu1  ;;  %1703 = vmatpush1.msra.mxu0 %v1582_v30  ;;  %1864 = vmatpush1.msra.mxu1 %v1584_v12  ;;  %v1422_v24 = vmul.f32 0.02, %v5283_v60  ;;  %v1425_v23 = vmul.f32 0.02, %v5296_v15  ;;  %v1566_v2 = vmax.f32 %v5304_v10, %v1438_v1  ;;  %v1569_v30 = vmax.f32 %v5310_v11, %v1441_v28  ;;  %v7777_v29 = vld [vmem:[#allocation30_spill] sm:$0xff] }
 0x122   : > { %7740 = vst [vmem:[#allocation48_spill] sm:$0xff] %v5345_v40  ;;  %7741 = vst [vmem:[#allocation49_spill] sm:$0xff] %v5347_v22  ;;  %1704 = vmatprep.subr.mxu0 %v1575_v9  ;;  %1865 = vmatprep.subr.mxu1 %v1577_v53  ;;  %v5365_v61 = vadd.f32 %v7745_v31, %v5120_v48  ;;  %v1424_v19 = vmul.f32 0.02, %v5286_v43  ;;  %v1559_v9 = vmax.f32 %v5299_v7, %v1431_v47 }
 0x123   : > { %v5359_v8 = vpop.f32.mrf.mxu0  ;;  %v5361_v50 = vpop.f32.mrf.mxu1  ;;  %1705 = vmatpush1.msra.mxu0 %v1574_v63  ;;  %1866 = vmatpush1.msra.mxu1 %v1576_v4  ;;  %v1568_v37 = vmax.f32 %v5317_v32, %v1440_v3  ;;  %v1415_v10 = vmul.f32 0.02, %v5277_v57  ;;  %v1417_v28 = vmul.f32 0.02, %v5280_v58  ;;  %v1558_v11 = vmax.f32 %v5321_v18, %v1430_v20 }
 0x124   : > { %7743 = vst [vmem:[#allocation17_spill] sm:$0xff] %v5359_v8  ;;  %7744 = vst [vmem:[#allocation50_spill] sm:$0xff] %v5361_v50  ;;  %1706 = vmatprep.subr.mxu0 %v1567_v26  ;;  %v1561_v1 = vmax.f32 %v5325_v17, %v1433_v14  ;;  %1867 = vmatprep.subr.mxu1 %v1569_v30  ;;  %v1414_v63 = vmul.f32 0.02, %v5274_v55  ;;  %v1416_v47 = vmul.f32 0.02, %v5351_v6 }
 0x125   : > { %v5374_v12 = vpop.f32.mrf.mxu0  ;;  %v5376_v53 = vpop.f32.mrf.mxu1  ;;  %1707 = vmatpush1.msra.mxu0 %v1566_v2  ;;  %v1551_v32 = vmax.f32 %v5290_v16, %v1423_v62  ;;  %v1560_v7 = vmax.f32 %v5333_v39, %v1432_v25  ;;  %1868 = vmatpush1.msra.mxu1 %v1568_v37  ;;  %v1407_v3 = vmul.f32 0.02, %v5268_v52  ;;  %v1409_v18 = vmul.f32 0.02, %v5271_v54  ;;  %v7750_v16 = vld [vmem:[#allocation13_spill] sm:$0xff]  ;;  %v7753_v30 = vld [vmem:[#allocation12_spill] sm:$0xff] }
 0x126   : > { %7746 = vst [vmem:[#allocation15_spill] sm:$0xff] %v5374_v12  ;;  %7747 = vst [vmem:[#allocation51_spill] sm:$0xff] %v5376_v53  ;;  %1708 = vmatprep.subr.mxu0 %v1559_v9  ;;  %v1550_v17 = vmax.f32 %v5283_v60, %v1422_v24  ;;  %v1553_v20 = vmax.f32 %v5296_v15, %v1425_v23  ;;  %1869 = vmatprep.subr.mxu1 %v1561_v1  ;;  %v1406_v39 = vmul.f32 0.02, %v5265_v49  ;;  %v7793_v53 = vld [vmem:[#allocation8_spill] sm:$0xff] }
 0x127   : > { %v5386_v14 = vpop.f32.mrf.mxu0  ;;  %v5388_v4 = vpop.f32.mrf.mxu1  ;;  %1709 = vmatpush1.msra.mxu0 %v1558_v11  ;;  %v5392_v5 = vadd.f32 %v7750_v16, %v5126_v56  ;;  %v1408_v62 = vmul.f32 0.02, %v5365_v61  ;;  %v1552_v25 = vmax.f32 %v5286_v43, %v1424_v19  ;;  %1870 = vmatpush1.msra.mxu1 %v1560_v7  ;;  %v1399_v15 = vmul.f32 0.02, %v5259_v46 }
 0x128   : > { %7748 = vst [vmem:[#allocation52_spill] sm:$0xff] %v5386_v14  ;;  %7749 = vst [vmem:[#allocation53_spill] sm:$0xff] %v5388_v4  ;;  %1710 = vmatprep.subr.mxu0 %v1551_v32  ;;  %v1401_v60 = vmul.f32 0.02, %v5262_v0  ;;  %v1543_v26 = vmax.f32 %v5277_v57, %v1415_v10  ;;  %v1545_v24 = vmax.f32 %v5280_v58, %v1417_v28  ;;  %1871 = vmatprep.subr.mxu1 %v1553_v20 }
 0x129   : > { %v5401_v23 = vpop.f32.mrf.mxu0  ;;  %v5403_v2 = vpop.f32.mrf.mxu1  ;;  %1711 = vmatpush1.msra.mxu0 %v1550_v17  ;;  %v5407_v31 = vadd.f32 %v7753_v30, %v5122_v51  ;;  %v1398_v43 = vmul.f32 0.02, %v5253_v44  ;;  %v1542_v19 = vmax.f32 %v5274_v55, %v1414_v63  ;;  %v1544_v9 = vmax.f32 %v5351_v6, %v1416_v47  ;;  %1872 = vmatpush1.msra.mxu1 %v1552_v25 }
 0x12a   : > { %7751 = vst [vmem:[#allocation13_spill] sm:$0xff] %v5401_v23  ;;  %7752 = vst [vmem:[#allocation54_spill] sm:$0xff] %v5403_v2  ;;  %v1391_v57 = vmul.f32 0.02, %v5250_v42  ;;  %v1400_v58 = vmul.f32 0.02, %v5256_v45  ;;  %v1535_v37 = vmax.f32 %v5268_v52, %v1407_v3  ;;  %v1537_v10 = vmax.f32 %v5271_v54, %v1409_v18  ;;  %1712 = vmatprep.subr.mxu0 %v1543_v26 }
 0x12b   : > { %1873 = vmatprep.subr.mxu1 %v1545_v24  ;;  %v5416_v28 = vpop.f32.mrf.mxu0  ;;  %v5418_v11 = vpop.f32.mrf.mxu1  ;;  %v1390_v1 = vmul.f32 0.02, %v5244_v13  ;;  %v1393_v55 = vmul.f32 0.02, %v5392_v5  ;;  %v1534_v6 = vmax.f32 %v5265_v49, %v1406_v39  ;;  %v1536_v63 = vmax.f32 %v5365_v61, %v1408_v62  ;;  %1713 = vmatpush1.msra.mxu0 %v1542_v19  ;;  %v7758_v49 = vld [vmem:[#allocation9_spill] sm:$0xff] }
 0x12c   : > { %7754 = vst [vmem:[#allocation12_spill] sm:$0xff] %v5416_v28  ;;  %7755 = vst [vmem:[#allocation55_spill] sm:$0xff] %v5418_v11  ;;  %1874 = vmatpush1.msra.mxu1 %v1544_v9  ;;  %v1383_v52 = vmul.f32 0.02, %v5241_v38  ;;  %v1392_v54 = vmul.f32 0.02, %v5247_v41  ;;  %v1527_v47 = vmax.f32 %v5259_v46, %v1399_v15  ;;  %v1529_v32 = vmax.f32 %v5262_v0, %v1401_v60 }
 0x12d   : > { %1714 = vmatprep.subr.mxu0 %v1535_v37  ;;  %1875 = vmatprep.subr.mxu1 %v1537_v10  ;;  %v5428_v7 = vpop.f32.mrf.mxu0  ;;  %v5430_v3 = vpop.f32.mrf.mxu1  ;;  %v5434_v18 = vadd.f32 %v7758_v49, %v5128_v59  ;;  %v1382_v61 = vmul.f32 0.02, %v5235_v21  ;;  %v1385_v17 = vmul.f32 0.02, %v5407_v31  ;;  %v1526_v20 = vmax.f32 %v5253_v44, %v1398_v43  ;;  %v7760_v15 = vld [vmem:[#allocation19_spill] sm:$0xff] }
 0x12e   : > { %7756 = vst [vmem:[#allocation56_spill] sm:$0xff] %v5428_v7  ;;  %7757 = vst [vmem:[#allocation57_spill] sm:$0xff] %v5430_v3  ;;  %1715 = vmatpush1.msra.mxu0 %v1534_v6  ;;  %1876 = vmatpush1.msra.mxu1 %v1536_v63  ;;  %v1375_v0 = vmul.f32 0.02, %v5228_v33  ;;  %v1384_v46 = vmul.f32 0.02, %v5238_v36  ;;  %v1519_v16 = vmax.f32 %v5250_v42, %v1391_v57 }
 0x12f   : > { %v1528_v39 = vmax.f32 %v5256_v45, %v1400_v58  ;;  %1716 = vmatprep.subr.mxu0 %v1527_v47  ;;  %1877 = vmatprep.subr.mxu1 %v1529_v32  ;;  %v5443_v62 = vpop.f32.mrf.mxu0  ;;  %v5445_v25 = vpop.f32.mrf.mxu1  ;;  %v7761_v60 = vld [vmem:[#allocation7_spill] sm:$0xff]  ;;  %v1518_v30 = vmax.f32 %v5244_v13, %v1390_v1  ;;  %v1521_v43 = vmax.f32 %v5392_v5, %v1393_v55  ;;  %v7763_v42 = vld [vmem:[#allocation41_spill] sm:$0xff]  ;;  %v7764_v45 = vld [vmem:[#allocation42_spill] sm:$0xff]  ;;  %v1369_v13 = vmul.f32 0.02, %v5434_v18 }
 0x130   : > { %7759 = vst [vmem:[#allocation9_spill] sm:$0xff] %v5445_v25  ;;  %v5449_v26 = vadd.f32 %v7761_v60, %v7760_v15  ;;  %v7762_v44 = vld [vmem:[#allocation43_spill] sm:$0xff]  ;;  %1717 = vmatpush1.msra.mxu0 %v1526_v20  ;;  %v1374_v19 = vmul.f32 0.02, %v7763_v42  ;;  %v1376_v9 = vmul.f32 0.02, %v7764_v45  ;;  %v1511_v57 = vmax.f32 %v5241_v38, %v1383_v52 }
 0x131   : > { %v1377_v24 = vmul.f32 0.02, %v7762_v44  ;;  %v1520_v58 = vmax.f32 %v5247_v41, %v1392_v54  ;;  %1878 = vmatpush1.msra.mxu1 %v1528_v39  ;;  %1718 = vmatprep.subr.mxu0 %v1519_v16  ;;  %v5458_v37 = vpop.f32.mrf.mxu0  ;;  %v5460_v10 = vpop.f32.mrf.mxu1  ;;  %v7765_v6 = vld [vmem:[#allocation40_spill] sm:$0xff]  ;;  %v1510_v5 = vmax.f32 %v5235_v21, %v1382_v61  ;;  %v1513_v1 = vmax.f32 %v5407_v31, %v1385_v17  ;;  %v7766_v55 = vld [vmem:[#allocation38_spill] sm:$0xff]  ;;  %v7767_v52 = vld [vmem:[#allocation39_spill] sm:$0xff] }
 0x132   : > { %v1367_v63 = vmul.f32 0.02, %v7765_v6  ;;  %1879 = vmatprep.subr.mxu1 %v1521_v43  ;;  %1719 = vmatpush1.msra.mxu0 %v1518_v30  ;;  %v1366_v38 = vmul.f32 0.02, %v7766_v55  ;;  %v1368_v41 = vmul.f32 0.02, %v7767_v52  ;;  %v1503_v54 = vmax.f32 %v5228_v33, %v1375_v0 }
 0x133   : > { %v1512_v47 = vmax.f32 %v5238_v36, %v1384_v46  ;;  %1880 = vmatpush1.msra.mxu1 %v1520_v58  ;;  %1720 = vmatprep.subr.mxu0 %v1511_v57  ;;  %v5470_v32 = vpop.f32.mrf.mxu0  ;;  %v5472_v49 = vpop.f32.mrf.mxu1  ;;  %v7768_v20 = vld [vmem:[#allocation23_spill] sm:$0xff]  ;;  %v7769_v21 = vld [vmem:[#allocation5_spill] sm:$0xff]  ;;  %v1361_v16 = vmul.f32 0.02, %v5449_v26  ;;  %v1505_v39 = vmax.f32 %v7762_v44, %v1377_v24  ;;  %v7772_v0 = vld [vmem:[#allocation36_spill] sm:$0xff]  ;;  %v1502_v60 = vmax.f32 %v7763_v42, %v1374_v19 }
 0x134   : > { %v5476_v61 = vadd.f32 %v7769_v21, %v7768_v20  ;;  %v7770_v31 = vld [vmem:[#allocation37_spill] sm:$0xff]  ;;  %1881 = vmatprep.subr.mxu1 %v1513_v1  ;;  %1721 = vmatpush1.msra.mxu0 %v1510_v5  ;;  %v7771_v33 = vld [vmem:[#allocation35_spill] sm:$0xff]  ;;  %v1360_v46 = vmul.f32 0.02, %v7772_v0  ;;  %v1504_v30 = vmax.f32 %v7764_v45, %v1376_v9  ;;  %v1353_v44 = vmul.f32 0.02, %v7774_v34 }
 0x135   : > { %v1359_v17 = vmul.f32 0.02, %v7770_v31  ;;  %v1358_v36 = vmul.f32 0.02, %v7771_v33  ;;  %1882 = vmatpush1.msra.mxu1 %v1512_v47  ;;  %1722 = vmatprep.subr.mxu0 %v1503_v54  ;;  %v5485_v43 = vpop.f32.mrf.mxu0  ;;  %v5487_v57 = vpop.f32.mrf.mxu1  ;;  %v7773_v58 = vld [vmem:[#allocation33_spill] sm:$0xff]  ;;  %v1495_v24 = vmax.f32 %v7765_v6, %v1367_v63  ;;  %v1497_v5 = vmax.f32 %v5434_v18, %v1369_v13  ;;  %v7775_v1 = vld [vmem:[#allocation31_spill] sm:$0xff] }
 0x136   : > { %v1351_v21 = vmul.f32 0.02, %v7773_v58  ;;  %1883 = vmatprep.subr.mxu1 %v1505_v39  ;;  %v1350_v22 = vmul.f32 0.02, %v7775_v1  ;;  %v7776_v42 = vld [vmem:[#allocation32_spill] sm:$0xff]  ;;  %v1494_v45 = vmax.f32 %v7766_v55, %v1366_v38  ;;  %v1496_v9 = vmax.f32 %v7767_v52, %v1368_v41  ;;  %1723 = vmatpush1.msra.mxu0 %v1502_v60  ;;  %v7779_v38 = vld [vmem:[#allocation29_spill] sm:$0xff] }
 0x137   : > { %v1352_v19 = vmul.f32 0.02, %v7776_v42  ;;  %1884 = vmatpush1.msra.mxu1 %v1504_v30  ;;  %v5497_v54 = vpop.f32.mrf.mxu0  ;;  %v5499_v47 = vpop.f32.mrf.mxu1  ;;  %v1343_v40 = vmul.f32 0.02, %v7777_v29  ;;  %v1345_v6 = vmul.f32 0.02, %v5476_v61  ;;  %v1487_v18 = vmax.f32 %v7770_v31, %v1359_v17  ;;  %1724 = vmatprep.subr.mxu0 %v1495_v24 }
 0x138   : > { %v1489_v63 = vmax.f32 %v5449_v26, %v1361_v16  ;;  %1885 = vmatprep.subr.mxu1 %v1497_v5  ;;  %v7778_v13 = vld [vmem:[#allocation28_spill] sm:$0xff]  ;;  %v1344_v52 = vmul.f32 0.02, %v7779_v38  ;;  %v1486_v41 = vmax.f32 %v7771_v33, %v1358_v36  ;;  %v1488_v39 = vmax.f32 %v7772_v0, %v1360_v46  ;;  %1725 = vmatpush1.msra.mxu0 %v1494_v45  ;;  %v7780_v20 = vld [vmem:[#allocation26_spill] sm:$0xff]  ;;  %v7781_v17 = vld [vmem:[#allocation27_spill] sm:$0xff] }
 0x139   : > { %v1342_v55 = vmul.f32 0.02, %v7778_v13  ;;  %1886 = vmatpush1.msra.mxu1 %v1496_v9  ;;  %v5509_v60 = vpop.f32.mrf.mxu0  ;;  %v5511_v30 = vpop.f32.mrf.mxu1  ;;  %v1335_v31 = vmul.f32 0.02, %v7780_v20  ;;  %v1337_v26 = vmul.f32 0.02, %v7781_v17  ;;  %v1479_v16 = vmax.f32 %v7773_v58, %v1351_v21  ;;  %1726 = vmatprep.subr.mxu0 %v1487_v18 }
 0x13a   : > { %v1481_v24 = vmax.f32 %v7774_v34, %v1353_v44  ;;  %1887 = vmatprep.subr.mxu1 %v1489_v63  ;;  %v7782_v5 = vld [vmem:[#allocation24_spill] sm:$0xff]  ;;  %v7783_v36 = vld [vmem:[#allocation25_spill] sm:$0xff]  ;;  %v1478_v46 = vmax.f32 %v7775_v1, %v1350_v22  ;;  %v1480_v45 = vmax.f32 %v7776_v42, %v1352_v19  ;;  %1727 = vmatpush1.msra.mxu0 %v1486_v41 }
 0x13b   : > { %v1334_v33 = vmul.f32 0.02, %v7782_v5  ;;  %v1336_v0 = vmul.f32 0.02, %v7783_v36  ;;  %1888 = vmatpush1.msra.mxu1 %v1488_v39  ;;  %v5521_v9 = vpop.f32.mrf.mxu0  ;;  %v5523_v50 = vpop.f32.mrf.mxu1  ;;  %v1471_v58 = vmax.f32 %v7777_v29, %v1343_v40  ;;  %v1473_v34 = vmax.f32 %v5476_v61, %v1345_v6  ;;  %1728 = vmatprep.subr.mxu0 %v1479_v16  ;;  %v5544_v18 = vld [vmem:[%s7520_s3] sm:$0xff] }
 0x13c   : > { %1889 = vmatprep.subr.mxu1 %v1481_v24  ;;  %v1470_v21 = vmax.f32 %v7778_v13, %v1342_v55  ;;  %v1472_v44 = vmax.f32 %v7779_v38, %v1344_v52  ;;  %1729 = vmatpush1.msra.mxu0 %v1478_v46  ;;  %v1463_v42 = vmax.f32 %v7780_v20, %v1335_v31  ;;  %v7785_v38 = vmov 0.0   ;;  %v5561_v52 = vld [vmem:[%s7520_s3 + $0x8] sm:$0xff] }
 0x13d   : > { %1890 = vmatpush1.msra.mxu1 %v1480_v45  ;;  %v5529_v22 = vpop.f32.mrf.mxu0  ;;  %v5531_v1 = vpop.f32.mrf.mxu1  ;;  %v1465_v19 = vmax.f32 %v7781_v17, %v1337_v26  ;;  %1730 = vmatprep.subr.mxu0 %v1471_v58  ;;  %v1462_v29 = vmax.f32 %v7782_v5, %v1334_v33  ;;  %v1464_v40 = vmax.f32 %v7783_v36, %v1336_v0  ;;  %v5578_v26 = vld [vmem:[%s7520_s3 + $0x10] sm:$0xff]  ;;  %v5595_v36 = vld [vmem:[%s7520_s3 + $0x18] sm:$0xff] }
 0x13e   : > { %1891 = vmatprep.subr.mxu1 %v1473_v34  ;;  %1731 = vmatpush1.msra.mxu0 %v1470_v21  ;;  %7784 = vst [vmem:[#allocation7_spill] sm:$0xff] %v5544_v18  ;;  %7786 = vst [vmem:[#allocation43_spill] sm:$0xff] %v5561_v52  ;;  %v5604_v34 = vld [vmem:[%s7520_s3 + $0x20] sm:$0xff] }
 0x13f   : > { %1892 = vmatpush1.msra.mxu1 %v1472_v44  ;;  %v5537_v61 = vpop.f32.mrf.mxu0  ;;  %v5539_v6 = vpop.f32.mrf.mxu1  ;;  %1732 = vmatprep.subr.mxu0 %v1463_v42  ;;  %7787 = vst [vmem:[#allocation41_spill] sm:$0xff] %v5578_v26  ;;  %7788 = vst [vmem:[#allocation42_spill] sm:$0xff] %v5595_v36 }
 0x140   : > { %1893 = vmatprep.subr.mxu1 %v1465_v19  ;;  %1733 = vmatpush1.msra.mxu0 %v1462_v29  ;;  %7789 = vst [vmem:[#allocation40_spill] sm:$0xff] %v5604_v34  ;;  %v5613_v29 = vld [vmem:[%s7520_s3 + $0x28] sm:$0xff] }
 0x141   : > { %1894 = vmatpush1.msra.mxu1 %v1464_v40  ;;  %v5546_v20 = vpop.f32.mrf.mxu0  ;;  %v5548_v63 = vpop.f32.mrf.mxu1  ;;  %1767 = vmatmul.mubr.f32.vlgmr.msra.gmra.mxu0 %v5544_v18  ;;  %7790 = vst [vmem:[#allocation38_spill] sm:$0xff] %v5613_v29 }
 0x142   : > { %1928 = vmatmul.mubr.f32.vlgmr.msra.gmra.mxu1 %v5544_v18  ;;  %1772 = vmatprep.mubr.f32.mxu0 %v7785_v38  ;;  %v7792_v18 = vld [vmem:[#allocation6_spill] sm:$0xff] }
 0x143   : > { %v5552_v13 = vpop.f32.mrf.mxu0  ;;  %v5554_v55 = vpop.f32.mrf.mxu1  ;;  %1933 = vmatprep.mubr.f32.mxu1 %v7785_v38 }
 0x145   : > { %v5563_v41 = vpop.f32.mrf.mxu0  ;;  %v5565_v39 = vpop.f32.mrf.mxu1  ;;  %1773 = vmatmul.mubr.f32.gmra.mxu0 %v5561_v52 }
 0x146   : > { %1934 = vmatmul.mubr.f32.gmra.mxu1 %v5561_v52  ;;  %1778 = vmatprep.mubr.f32.mxu0 %v7785_v38 }
 0x147   : > { %v5569_v31 = vpop.f32.mrf.mxu0  ;;  %v5571_v17 = vpop.f32.mrf.mxu1  ;;  %1939 = vmatprep.mubr.f32.mxu1 %v7785_v38 }
 0x149   : > { %v5580_v16 = vpop.f32.mrf.mxu0  ;;  %v5582_v24 = vpop.f32.mrf.mxu1  ;;  %1779 = vmatmul.mubr.f32.gmra.mxu0 %v5578_v26 }
 0x14a   : > { %1940 = vmatmul.mubr.f32.gmra.mxu1 %v5578_v26  ;;  %1784 = vmatprep.mubr.f32.mxu0 %v7785_v38 }
 0x14b   : > { %v5586_v5 = vpop.f32.mrf.mxu0  ;;  %v5588_v33 = vpop.f32.mrf.mxu1  ;;  %1945 = vmatprep.mubr.f32.mxu1 %v7785_v38 }
 0x14d   : > { %v1152_v0 = vpop.f32.mrf.mxu0  ;;  %v1313_v46 = vpop.f32.mrf.mxu1  ;;  %1785 = vmatmul.mubr.f32.gmra.mxu0 %v5595_v36 }
 0x14e   : > { %1946 = vmatmul.mubr.f32.gmra.mxu1 %v5595_v36  ;;  %1790 = vmatprep.mubr.f32.mxu0 %v7785_v38 }
 0x14f   : > { %v1156_v45 = vpop.f32.mrf.mxu0  ;;  %v1317_v58 = vpop.f32.mrf.mxu1  ;;  %1951 = vmatprep.mubr.f32.mxu1 %v7785_v38 }
 0x151   : > { %v1158_v21 = vpop.f32.mrf.mxu0  ;;  %v1319_v44 = vpop.f32.mrf.mxu1  ;;  %1791 = vmatmul.mubr.f32.gmra.mxu0 %v5604_v34 }
 0x152   : > { %1952 = vmatmul.mubr.f32.gmra.mxu1 %v5604_v34  ;;  %1796 = vmatprep.mubr.f32.mxu0 %v7785_v38  ;;  %v5622_v34 = vld [vmem:[%s7520_s3 + $0x30] sm:$0xff] }
 0x153   : > { %v1162_v42 = vpop.f32.mrf.mxu0  ;;  %v1323_v19 = vpop.f32.mrf.mxu1  ;;  %1957 = vmatprep.mubr.f32.mxu1 %v7785_v38  ;;  %7791 = vst [vmem:[#allocation39_spill] sm:$0xff] %v5622_v34 }
 0x154   : > { %v1163_v15 = vadd.f32 %v1162_v42, %v7793_v53 }
 0x155   : > { %v1164_v40 = vpop.f32.mrf.mxu0  ;;  %v1325_v36 = vpop.f32.mrf.mxu1  ;;  %1797 = vmatmul.mubr.f32.gmra.mxu0 %v5613_v29 }
 0x156   : > { %1958 = vmatmul.mubr.f32.gmra.mxu1 %v5613_v29  ;;  %1802 = vmatprep.mubr.f32.mxu0 %v7785_v38  ;;  %v1165_v4 = vadd.f32 %v1164_v40, %v7793_v53  ;;  %v1326_v29 = vadd.f32 %v1325_v36, %v7793_v53  ;;  %v1324_v36 = vadd.f32 %v1323_v19, %v7793_v53  ;;  %v7795_v40 = vld [vmem:[#allocation4_spill] sm:$0xff] }
 0x157   : > { %v1168_v26 = vpop.f32.mrf.mxu0  ;;  %v1329_v52 = vpop.f32.mrf.mxu1  ;;  %1963 = vmatprep.mubr.f32.mxu1 %v7785_v38  ;;  %v5645_v42 = vadd.f32 %v1158_v21, %v7795_v40  ;;  %v5648_v3 = vadd.f32 %v1156_v45, %v7795_v40  ;;  %v5651_v25 = vadd.f32 %v1319_v44, %v7795_v40  ;;  %v5656_v53 = vadd.f32 %v1317_v58, %v7795_v40  ;;  %v5663_v45 = vld [vmem:[%s7520_s3 + $0x40] sm:$0xff] }
 0x158   : > { %v1169_v8 = vadd.f32 %v1168_v26, %v7792_v18  ;;  %v1330_v12 = vadd.f32 %v1329_v52, %v7792_v18  ;;  %v5638_v52 = vld [vmem:[%s7520_s3 + $0x38] sm:$0xff]  ;;  %v5641_v26 = vadd.f32 %v1152_v0, %v5084_v27  ;;  %v1453_v7 = vmul.f32 0.02, %v1326_v29  ;;  %v7797_v44 = vld [vmem:[#allocation44_spill] sm:$0xff] }
 0x159   : > { %v1170_v2 = vpop.f32.mrf.mxu0  ;;  %v1331_v14 = vpop.f32.mrf.mxu1  ;;  %1803 = vmatmul.mubr.f32.gmra.mxu0 %v5622_v34  ;;  %7794 = vst [vmem:[#allocation5_spill] sm:$0xff] %v5638_v52  ;;  %v1450_v0 = vmul.f32 0.02, %v1163_v15  ;;  %v1452_v58 = vmul.f32 0.02, %v1324_v36 }
 0x15a   : > { %1964 = vmatmul.mubr.f32.gmra.mxu1 %v5622_v34  ;;  %v1171_v23 = vadd.f32 %v1170_v2, %v7792_v18  ;;  %v1458_v11 = vmul.f32 0.02, %v1169_v8  ;;  %v1332_v28 = vadd.f32 %v1331_v14, %v7792_v18  ;;  %1808 = vmatprep.mubr.f32.mxu0 %v7785_v38  ;;  %v1451_v34 = vmul.f32 0.02, %v1165_v4 }
 0x15b   : > { %1969 = vmatprep.mubr.f32.mxu1 %v7785_v38  ;;  %v1460_v14 = vmul.f32 0.02, %v1330_v12 }
 0x15c   : > { %v1459_v2 = vmul.f32 0.02, %v1171_v23  ;;  %v1461_v18 = vmul.f32 0.02, %v1332_v28  ;;  %v1586_v21 = vmax.f32 %v1169_v8, %v1458_v11  ;;  %v5674_v8 = vadd.f32 %v5586_v5, %v5084_v27 }
 0x15d   : > { %1809 = vmatmul.mubr.f32.gmra.mxu0 %v5638_v52  ;;  %v1579_v11 = vmax.f32 %v1165_v4, %v1451_v34  ;;  %v1588_v40 = vmax.f32 %v1330_v12, %v1460_v14  ;;  %v1435_v12 = vmul.f32 0.02, %v5641_v26  ;;  %v1444_v4 = vmul.f32 0.02, %v5656_v53 }
 0x15e   : > { %v1587_v59 = vmax.f32 %v1171_v23, %v1459_v2  ;;  %1970 = vmatmul.mubr.f32.gmra.mxu1 %v5638_v52  ;;  %v1589_v19 = vmax.f32 %v1332_v28, %v1461_v18  ;;  %1814 = vmatprep.mubr.f32.mxu0 %v7785_v38  ;;  %v7796_v23 = vld [vmem:[#allocation20_spill] sm:$0xff]  ;;  %v5670_v52 = vadd.f32 %v1313_v46, %v5084_v27  ;;  %v1443_v28 = vmul.f32 0.02, %v5645_v42 }
 0x15f   : > { %1975 = vmatprep.mubr.f32.mxu1 %v7785_v38  ;;  %v5667_v2 = vadd.f32 %v7797_v44, %v7796_v23  ;;  %v5679_v18 = vadd.f32 %v5588_v33, %v5084_v27  ;;  %v1442_v44 = vmul.f32 0.02, %v5648_v3  ;;  %v1445_v46 = vmul.f32 0.02, %v5651_v25  ;;  %v5694_v27 = vld [vmem:[%s7520_s3 + $0x48] sm:$0xff] }
 0x160   : > { %2024 = vmatprep.subr.mxu0 %v1587_v59  ;;  %2185 = vmatprep.subr.mxu1 %v1589_v19  ;;  %v7799_v59 = vld [vmem:[#allocation10_spill] sm:$0xff]  ;;  %v1578_v34 = vmax.f32 %v1163_v15, %v1450_v0  ;;  %v1437_v33 = vmul.f32 0.02, %v5670_v52  ;;  %v5708_v15 = vadd.f32 %v5563_v41, %v5100_v35  ;;  %v1571_v0 = vmax.f32 %v5645_v42, %v1443_v28 }
 0x161   : > { %7798 = vst [vmem:[#allocation37_spill] sm:$0xff] %v5667_v2  ;;  %2025 = vmatpush1.msra.mxu0 %v1586_v21  ;;  %v1581_v2 = vmax.f32 %v1326_v29, %v1453_v7  ;;  %v5687_v5 = vadd.f32 %v5580_v16, %v7799_v59  ;;  %2186 = vmatpush1.msra.mxu1 %v1588_v40 }
 0x162   : > { %1815 = vmatmul.mubr.f32.gmra.mxu0 %v5663_v45  ;;  %1976 = vmatmul.mubr.f32.gmra.mxu1 %v5663_v45  ;;  %v5698_v7 = vadd.f32 %v5569_v31, %v7799_v59  ;;  %v5702_v16 = vadd.f32 %v5582_v24, %v7799_v59  ;;  %v1580_v29 = vmax.f32 %v1324_v36, %v1452_v58  ;;  %v1434_v31 = vmul.f32 0.02, %v5674_v8 }
 0x163   : > { %2026 = vmatprep.subr.mxu0 %v1579_v11  ;;  %2187 = vmatprep.subr.mxu1 %v1581_v2  ;;  %v5712_v14 = vadd.f32 %v5571_v17, %v7799_v59  ;;  %v5719_v24 = vadd.f32 %v5565_v39, %v5100_v35  ;;  %v1436_v36 = vmul.f32 0.02, %v5679_v18  ;;  %v1570_v41 = vmax.f32 %v5648_v3, %v1442_v44 }
 0x164   : > { %1820 = vmatprep.mubr.f32.mxu0 %v7785_v38  ;;  %1981 = vmatprep.mubr.f32.mxu1 %v7785_v38  ;;  %v1573_v21 = vmax.f32 %v5651_v25, %v1445_v46  ;;  %v5727_v17 = vadd.f32 %v5552_v13, %v5100_v35  ;;  %v1427_v42 = vmul.f32 0.02, %v5687_v5  ;;  %v1563_v19 = vmax.f32 %v5641_v26, %v1435_v12 }
 0x165   : > { %2027 = vmatpush1.msra.mxu0 %v1578_v34  ;;  %2188 = vmatpush1.msra.mxu1 %v1580_v29  ;;  %v1572_v39 = vmax.f32 %v5656_v53, %v1444_v4  ;;  %v5735_v3 = vadd.f32 %v5554_v55, %v5100_v35  ;;  %v1426_v25 = vmul.f32 0.02, %v5698_v7  ;;  %v1429_v2 = vmul.f32 0.02, %v5702_v16  ;;  %v5750_v35 = vld [vmem:[%s7520_s3 + $0x50] sm:$0xff] }
 0x166   : > { %1821 = vmatmul.mubr.f32.gmra.mxu0 %v5694_v27  ;;  %1982 = vmatmul.mubr.f32.gmra.mxu1 %v5694_v27  ;;  %v1565_v13 = vmax.f32 %v5670_v52, %v1437_v33  ;;  %v5742_v26 = vadd.f32 %v5546_v20, %v5120_v48  ;;  %v1419_v53 = vmul.f32 0.02, %v5708_v15  ;;  %v1428_v58 = vmul.f32 0.02, %v5712_v14 }
 0x167   : > { %2028 = vmatprep.subr.mxu0 %v1571_v0  ;;  %2189 = vmatprep.subr.mxu1 %v1573_v21  ;;  %v1562_v28 = vmax.f32 %v5674_v8, %v1434_v31  ;;  %v5754_v55 = vadd.f32 %v5537_v61, %v5120_v48  ;;  %v5758_v20 = vadd.f32 %v5548_v63, %v5120_v48  ;;  %v1421_v52 = vmul.f32 0.02, %v5719_v24  ;;  %v7800_v8 = vld [vmem:[#allocation11_spill] sm:$0xff] }
 0x168   : > { %2029 = vmatpush1.msra.mxu0 %v1570_v41  ;;  %2190 = vmatpush1.msra.mxu1 %v1572_v39  ;;  %v1564_v11 = vmax.f32 %v5679_v18, %v1436_v36  ;;  %v5765_v40 = vadd.f32 %v5529_v22, %v7800_v8  ;;  %v5769_v44 = vadd.f32 %v5539_v6, %v5120_v48  ;;  %v1418_v61 = vmul.f32 0.02, %v5727_v17 }
 0x169   : > { %2030 = vmatprep.subr.mxu0 %v1563_v19  ;;  %2191 = vmatprep.subr.mxu1 %v1565_v13  ;;  %v1555_v63 = vmax.f32 %v5687_v5, %v1427_v42  ;;  %v5776_v18 = vadd.f32 %v5531_v1, %v7800_v8  ;;  %v1420_v46 = vmul.f32 0.02, %v5735_v3  ;;  %v1554_v22 = vmax.f32 %v5698_v7, %v1426_v25 }
 0x16a   : > { %1826 = vmatprep.mubr.f32.mxu0 %v7785_v38  ;;  %1987 = vmatprep.mubr.f32.mxu1 %v7785_v38  ;;  %v1557_v59 = vmax.f32 %v5702_v16, %v1429_v2  ;;  %v5784_v48 = vadd.f32 %v5521_v9, %v7800_v8  ;;  %v1411_v6 = vmul.f32 0.02, %v5742_v26  ;;  %v1547_v5 = vmax.f32 %v5708_v15, %v1419_v53 }
 0x16b   : > { %2031 = vmatpush1.msra.mxu0 %v1562_v28  ;;  %2192 = vmatpush1.msra.mxu1 %v1564_v11  ;;  %v1556_v1 = vmax.f32 %v5712_v14, %v1428_v58  ;;  %v5792_v12 = vadd.f32 %v5523_v50, %v7800_v8  ;;  %v1410_v4 = vmul.f32 0.02, %v5754_v55  ;;  %v1413_v34 = vmul.f32 0.02, %v5758_v20  ;;  %v5807_v50 = vld [vmem:[%s7520_s3 + $0x58] sm:$0xff]  ;;  %v7805_v8 = vld [vmem:[#allocation57_spill] sm:$0xff] }
 0x16c   : > { %1827 = vmatmul.mubr.f32.gmra.mxu0 %v5750_v35  ;;  %1988 = vmatmul.mubr.f32.gmra.mxu1 %v5750_v35  ;;  %v1549_v9 = vmax.f32 %v5719_v24, %v1421_v52  ;;  %v5799_v7 = vadd.f32 %v5509_v60, %v5126_v56  ;;  %v1403_v16 = vmul.f32 0.02, %v5765_v40  ;;  %v1412_v33 = vmul.f32 0.02, %v5769_v44  ;;  %v7802_v28 = vld [vmem:[#allocation14_spill] sm:$0xff]  ;;  %v7804_v52 = vld [vmem:[#allocation9_spill] sm:$0xff] }
 0x16d   : > { %2032 = vmatprep.subr.mxu0 %v1555_v63  ;;  %2193 = vmatprep.subr.mxu1 %v1557_v59  ;;  %v1546_v29 = vmax.f32 %v5727_v17, %v1418_v61  ;;  %v5811_v15 = vadd.f32 %v5497_v54, %v5126_v56  ;;  %v5815_v60 = vadd.f32 %v5511_v30, %v5126_v56  ;;  %v1405_v14 = vmul.f32 0.02, %v5776_v18 }
 0x16e   : > { %2033 = vmatpush1.msra.mxu0 %v1554_v22  ;;  %2194 = vmatpush1.msra.mxu1 %v1556_v1  ;;  %v1548_v31 = vmax.f32 %v5735_v3, %v1420_v46  ;;  %v5822_v0 = vadd.f32 %v5485_v43, %v5122_v51  ;;  %v5826_v24 = vadd.f32 %v5499_v47, %v5126_v56  ;;  %v1402_v54 = vmul.f32 0.02, %v5784_v48  ;;  %v7801_v3 = vld [vmem:[#allocation16_spill] sm:$0xff] }
 0x16f   : > { %2034 = vmatprep.subr.mxu0 %v1547_v5  ;;  %2195 = vmatprep.subr.mxu1 %v1549_v9  ;;  %v1539_v30 = vmax.f32 %v5742_v26, %v1411_v6  ;;  %v5833_v36 = vadd.f32 %v5487_v57, %v5122_v51  ;;  %v1404_v41 = vmul.f32 0.02, %v5792_v12  ;;  %v1538_v43 = vmax.f32 %v5754_v55, %v1410_v4  ;;  %v7803_v55 = vld [vmem:[#allocation56_spill] sm:$0xff]  ;;  %v7807_v6 = vld [vmem:[#allocation55_spill] sm:$0xff]  ;;  %v7809_v9 = vld [vmem:[#allocation13_spill] sm:$0xff] }
 0x170   : > { %1832 = vmatprep.mubr.f32.mxu0 %v7785_v38  ;;  %1993 = vmatprep.mubr.f32.mxu1 %v7785_v38  ;;  %v1541_v21 = vmax.f32 %v5758_v20, %v1413_v34  ;;  %v5841_v56 = vadd.f32 %v5470_v32, %v5122_v51  ;;  %v1395_v47 = vmul.f32 0.02, %v5799_v7  ;;  %v1531_v17 = vmax.f32 %v5765_v40, %v1403_v16  ;;  %v7808_v34 = vld [vmem:[#allocation19_spill] sm:$0xff] }
 0x171   : > { %2035 = vmatpush1.msra.mxu0 %v1546_v29  ;;  %2196 = vmatpush1.msra.mxu1 %v1548_v31  ;;  %v1540_v57 = vmax.f32 %v5769_v44, %v1412_v33  ;;  %v5849_v42 = vadd.f32 %v5472_v49, %v5122_v51  ;;  %v1394_v19 = vmul.f32 0.02, %v5811_v15  ;;  %v1397_v39 = vmul.f32 0.02, %v5815_v60  ;;  %v5864_v51 = vld [vmem:[%s7520_s3 + $0x60] sm:$0xff]  ;;  %v7811_v31 = vld [vmem:[#allocation54_spill] sm:$0xff] }
 0x172   : > { %1833 = vmatmul.mubr.f32.gmra.mxu0 %v5807_v50  ;;  %1994 = vmatmul.mubr.f32.gmra.mxu1 %v5807_v50  ;;  %v1533_v32 = vmax.f32 %v5776_v18, %v1405_v14  ;;  %v5856_v25 = vadd.f32 %v5458_v37, %v7801_v3  ;;  %v1387_v2 = vmul.f32 0.02, %v5822_v0  ;;  %v1396_v13 = vmul.f32 0.02, %v5826_v24  ;;  %v7806_v18 = vld [vmem:[#allocation12_spill] sm:$0xff] }
 0x173   : > { %2036 = vmatprep.subr.mxu0 %v1539_v30  ;;  %2197 = vmatprep.subr.mxu1 %v1541_v21  ;;  %v1530_v26 = vmax.f32 %v5784_v48, %v1402_v54  ;;  %v5868_v49 = vadd.f32 %v5443_v62, %v7801_v3  ;;  %v5872_v37 = vadd.f32 %v5460_v10, %v7801_v3  ;;  %v1389_v53 = vmul.f32 0.02, %v5833_v36  ;;  %v7812_v30 = vld [vmem:[#allocation18_spill] sm:$0xff] }
 0x174   : > { %2037 = vmatpush1.msra.mxu0 %v1538_v43  ;;  %2198 = vmatpush1.msra.mxu1 %v1540_v57  ;;  %v1532_v58 = vmax.f32 %v5792_v12, %v1404_v41  ;;  %v5879_v20 = vadd.f32 %v7803_v55, %v7802_v28  ;;  %v5883_v11 = vadd.f32 %v7804_v52, %v7801_v3  ;;  %v1386_v62 = vmul.f32 0.02, %v5841_v56  ;;  %v7814_v43 = vld [vmem:[#allocation53_spill] sm:$0xff]  ;;  %v7819_v55 = vld [vmem:[#allocation48_spill] sm:$0xff] }
 0x175   : > { %2038 = vmatprep.subr.mxu0 %v1531_v17  ;;  %2199 = vmatprep.subr.mxu1 %v1533_v32  ;;  %v1523_v10 = vmax.f32 %v5799_v7, %v1395_v47  ;;  %v5890_v40 = vadd.f32 %v7805_v8, %v7802_v28  ;;  %v1388_v44 = vmul.f32 0.02, %v5849_v42  ;;  %v1522_v61 = vmax.f32 %v5811_v15, %v1394_v19  ;;  %v5921_v15 = vld [vmem:[%s7520_s3 + $0x68] sm:$0xff]  ;;  %v7815_v17 = vld [vmem:[#allocation51_spill] sm:$0xff] }
 0x176   : > { %1838 = vmatprep.mubr.f32.mxu0 %v7785_v38  ;;  %1999 = vmatprep.mubr.f32.mxu1 %v7785_v38  ;;  %v1525_v63 = vmax.f32 %v5815_v60, %v1397_v39  ;;  %v5898_v46 = vadd.f32 %v7806_v18, %v7802_v28  ;;  %v1379_v22 = vmul.f32 0.02, %v5856_v25  ;;  %v1515_v59 = vmax.f32 %v5822_v0, %v1387_v2  ;;  %v7810_v60 = vld [vmem:[#allocation52_spill] sm:$0xff]  ;;  %v7816_v32 = vld [vmem:[#allocation17_spill] sm:$0xff] }
 0x177   : > { %2039 = vmatpush1.msra.mxu0 %v1530_v26  ;;  %2200 = vmatpush1.msra.mxu1 %v1532_v58  ;;  %v1524_v48 = vmax.f32 %v5826_v24, %v1396_v13  ;;  %v5906_v5 = vadd.f32 %v7807_v6, %v7802_v28  ;;  %v1378_v1 = vmul.f32 0.02, %v5868_v49  ;;  %v1381_v12 = vmul.f32 0.02, %v5872_v37  ;;  %v7817_v26 = vld [vmem:[#allocation50_spill] sm:$0xff]  ;;  %v7818_v28 = vld [vmem:[#allocation23_spill] sm:$0xff] }
 0x178   : > { %1839 = vmatmul.mubr.f32.gmra.mxu0 %v5864_v51  ;;  %2000 = vmatmul.mubr.f32.gmra.mxu1 %v5864_v51  ;;  %v1517_v4 = vmax.f32 %v5833_v36, %v1389_v53  ;;  %v5913_v7 = vadd.f32 %v7809_v9, %v7808_v34  ;;  %v1371_v16 = vmul.f32 0.02, %v5879_v20  ;;  %v1380_v33 = vmul.f32 0.02, %v5883_v11  ;;  %v7813_v36 = vld [vmem:[#allocation15_spill] sm:$0xff]  ;;  %v7820_v8 = vld [vmem:[#allocation21_spill] sm:$0xff] }
 0x179   : > { %2040 = vmatprep.subr.mxu0 %v1523_v10  ;;  %2201 = vmatprep.subr.mxu1 %v1525_v63  ;;  %v1514_v29 = vmax.f32 %v5841_v56, %v1386_v62  ;;  %v5925_v14 = vadd.f32 %v7810_v60, %v7808_v34  ;;  %v5929_v0 = vadd.f32 %v7811_v31, %v7808_v34  ;;  %v1373_v24 = vmul.f32 0.02, %v5890_v40  ;;  %v5969_v10 = vld [vmem:[%s7520_s3 + $0x70] sm:$0xff] }
 0x17a   : > { %2041 = vmatpush1.msra.mxu0 %v1522_v61  ;;  %2202 = vmatpush1.msra.mxu1 %v1524_v48  ;;  %v1516_v54 = vmax.f32 %v5849_v42, %v1388_v44  ;;  %v5936_v41 = vadd.f32 %v7813_v36, %v7812_v30  ;;  %v1258_v21 = vadd.f32 %v7814_v43, %v7808_v34  ;;  %v1370_v56 = vmul.f32 0.02, %v5898_v46  ;;  %v7821_v44 = vld [vmem:[#allocation49_spill] sm:$0xff] }
 0x17b   : > { %2042 = vmatprep.subr.mxu0 %v1515_v59  ;;  %2203 = vmatprep.subr.mxu1 %v1517_v4  ;;  %v1507_v47 = vmax.f32 %v5856_v25, %v1379_v22  ;;  %v5945_v57 = vadd.f32 %v7815_v17, %v7812_v30  ;;  %v1372_v42 = vmul.f32 0.02, %v5906_v5  ;;  %v1506_v19 = vmax.f32 %v5868_v49, %v1378_v1  ;;  %v7823_v59 = vld [vmem:[#allocation47_spill] sm:$0xff]  ;;  %v7826_v36 = vld [vmem:[#allocation37_spill] sm:$0xff] }
 0x17c   : > { %1844 = vmatprep.mubr.f32.mxu0 %v7785_v38  ;;  %2005 = vmatprep.mubr.f32.mxu1 %v7785_v38  ;;  %v1509_v39 = vmax.f32 %v5872_v37, %v1381_v12  ;;  %v1091_v3 = vadd.f32 %v7816_v32, %v7812_v30  ;;  %v1363_v25 = vmul.f32 0.02, %v5913_v7  ;;  %v1499_v2 = vmax.f32 %v5879_v20, %v1371_v16  ;;  %v7824_v12 = vld [vmem:[#allocation46_spill] sm:$0xff]  ;;  %v7825_v16 = vld [vmem:[#allocation45_spill] sm:$0xff] }
 0x17d   : > { %2043 = vmatpush1.msra.mxu0 %v1514_v29  ;;  %2204 = vmatpush1.msra.mxu1 %v1516_v54  ;;  %v1508_v13 = vmax.f32 %v5883_v11, %v1380_v33  ;;  %v1252_v49 = vadd.f32 %v7817_v26, %v7812_v30  ;;  %v1362_v37 = vmul.f32 0.02, %v5925_v14  ;;  %v1365_v53 = vmul.f32 0.02, %v5929_v0  ;;  %v7830_v26 = vld [vmem:[#allocation42_spill] sm:$0xff] }
 0x17e   : > { %1845 = vmatmul.mubr.f32.gmra.mxu0 %v5921_v15  ;;  %2006 = vmatmul.mubr.f32.gmra.mxu1 %v5921_v15  ;;  %v1501_v58 = vmax.f32 %v5890_v40, %v1373_v24  ;;  %v1087_v52 = vadd.f32 %v7819_v55, %v7818_v28  ;;  %v1355_v20 = vmul.f32 0.02, %v5936_v41  ;;  %v1364_v11 = vmul.f32 0.02, %v1258_v21 }
 0x17f   : > { %2044 = vmatprep.subr.mxu0 %v1507_v47  ;;  %2205 = vmatprep.subr.mxu1 %v1509_v39  ;;  %v1498_v62 = vmax.f32 %v5898_v46, %v1370_v56  ;;  %v1085_v40 = vadd.f32 %v7820_v8, %v7818_v28  ;;  %v1248_v61 = vadd.f32 %v7821_v44, %v7818_v28  ;;  %v1357_v63 = vmul.f32 0.02, %v5945_v57  ;;  %v7822_v46 = vld [vmem:[#allocation22_spill] sm:$0xff] }
 0x180   : > { %2045 = vmatpush1.msra.mxu0 %v1506_v19  ;;  %2206 = vmatpush1.msra.mxu1 %v1508_v13  ;;  %v1500_v18 = vmax.f32 %v5906_v5, %v1372_v42  ;;  %v1081_v22 = vadd.f32 %v7822_v46, %v7796_v23  ;;  %v1246_v48 = vadd.f32 %v7823_v59, %v7818_v28  ;;  %v1354_v6 = vmul.f32 0.02, %v1091_v3  ;;  %v7829_v13 = vld [vmem:[#allocation41_spill] sm:$0xff]  ;;  %v6113_v59 = vpop.permute.xlu0 %1699 }
 0x181   : > { %2046 = vmatprep.subr.mxu0 %v1499_v2  ;;  %2207 = vmatprep.subr.mxu1 %v1501_v58  ;;  %v1491_v1 = vmax.f32 %v5913_v7, %v1363_v25  ;;  %v1242_v4 = vadd.f32 %v7824_v12, %v7796_v23  ;;  %v1356_v34 = vmul.f32 0.02, %v1252_v49  ;;  %v1490_v5 = vmax.f32 %v5925_v14, %v1362_v37  ;;  %v7827_v25 = vld [vmem:[#allocation7_spill] sm:$0xff]  ;;  %v7832_v37 = vld [vmem:[#allocation38_spill] sm:$0xff]  ;;  %v7834_v58 = vld [vmem:[#allocation5_spill] sm:$0xff] }
 0x182   : > { %1850 = vmatprep.mubr.f32.mxu0 %v7785_v38  ;;  %2011 = vmatprep.mubr.f32.mxu1 %v7785_v38  ;;  %v1493_v9 = vmax.f32 %v5929_v0, %v1365_v53  ;;  %v1240_v33 = vadd.f32 %v7825_v16, %v7796_v23  ;;  %v1347_v29 = vmul.f32 0.02, %v1087_v52  ;;  %v1483_v7 = vmax.f32 %v5936_v41, %v1355_v20  ;;  %v5997_v23 = vld [vmem:[%s7520_s3 + $0x78] sm:$0xff] }
 0x183   : > { %2047 = vmatpush1.msra.mxu0 %v1498_v62  ;;  %2208 = vmatpush1.msra.mxu1 %v1500_v18  ;;  %v1492_v60 = vmax.f32 %v1258_v21, %v1364_v11  ;;  %v1346_v31 = vmul.f32 0.02, %v1085_v40  ;;  %v1349_v24 = vmul.f32 0.02, %v1248_v61  ;;  %v1485_v54 = vmax.f32 %v5945_v57, %v1357_v63  ;;  %v7828_v2 = vld [vmem:[#allocation43_spill] sm:$0xff]  ;;  %v6107_v18 = vpop.permute.xlu1 %1694  ;;  %7836 = vst [vmem:[#allocation36_spill] sm:$0xff] %v6113_v59 }
 0x184   : > { %1851 = vmatmul.mubr.f32.gmra.mxu0 %v5969_v10  ;;  %2012 = vmatmul.mubr.f32.gmra.mxu1 %v5969_v10  ;;  %v1339_v14 = vmul.f32 0.02, %v1081_v22  ;;  %v1348_v0 = vmul.f32 0.02, %v1246_v48  ;;  %v1482_v30 = vmax.f32 %v1091_v3, %v1354_v6  ;;  %v1338_v41 = vmul.f32 0.02, %v7826_v36 }
 0x185   : > { %2048 = vmatprep.subr.mxu0 %v1491_v1  ;;  %2209 = vmatprep.subr.mxu1 %v1493_v9  ;;  %v1341_v43 = vmul.f32 0.02, %v1242_v4  ;;  %v1484_v21 = vmax.f32 %v1252_v49, %v1356_v34  ;;  %v1340_v56 = vmul.f32 0.02, %v1240_v33  ;;  %v1475_v47 = vmax.f32 %v1087_v52, %v1347_v29  ;;  %v7831_v49 = vld [vmem:[#allocation40_spill] sm:$0xff]  ;;  %v7833_v53 = vld [vmem:[#allocation39_spill] sm:$0xff]  ;;  %v6129_v9 = vpop.permute.xlu0 %1689 }
 0x186   : > { %2049 = vmatpush1.msra.mxu0 %v1490_v5  ;;  %2210 = vmatpush1.msra.mxu1 %v1492_v60  ;;  %v1474_v17 = vmax.f32 %v1085_v40, %v1346_v31  ;;  %v1477_v57 = vmax.f32 %v1248_v61, %v1349_v24  ;;  %v1467_v42 = vmax.f32 %v1081_v22, %v1339_v14 }
 0x187   : > { %2050 = vmatprep.subr.mxu0 %v1483_v7  ;;  %2211 = vmatprep.subr.mxu1 %v1485_v54  ;;  %v1476_v19 = vmax.f32 %v1246_v48, %v1348_v0  ;;  %v1466_v39 = vmax.f32 %v7826_v36, %v1338_v41  ;;  %v1469_v32 = vmax.f32 %v1242_v4, %v1341_v43  ;;  %v6123_v4 = vpop.permute.xlu1 %1684 }
 0x188   : > { %1856 = vmatprep.mubr.f32.mxu0 %v7785_v38  ;;  %2017 = vmatprep.mubr.f32.mxu1 %v7785_v38  ;;  %v1468_v3 = vmax.f32 %v1240_v33, %v1340_v56  ;;  %7835 = vst [vmem:[#allocation35_spill] sm:$0xff] %v6107_v18  ;;  %7837 = vst [vmem:[#allocation33_spill] sm:$0xff] %v6123_v4 }
 0x189   : > { %2051 = vmatpush1.msra.mxu0 %v1482_v30  ;;  %2212 = vmatpush1.msra.mxu1 %v1484_v21  ;;  %7838 = vst [vmem:[#allocation34_spill] sm:$0xff] %v6129_v9  ;;  %v6145_v54 = vpop.permute.xlu0 %1679 }
 0x18a   : > { %1857 = vmatmul.mubr.f32.gmra.mxu0 %v5997_v23  ;;  %2018 = vmatmul.mubr.f32.gmra.mxu1 %v5997_v23  ;;  %7840 = vst [vmem:[#allocation32_spill] sm:$0xff] %v6145_v54 }
 0x18b   : > { %2052 = vmatprep.subr.mxu0 %v1475_v47  ;;  %2213 = vmatprep.subr.mxu1 %v1477_v57  ;;  %v6139_v60 = vpop.permute.xlu1 %1674 }
 0x18c   : > { %2053 = vmatpush1.msra.mxu0 %v1474_v17  ;;  %2214 = vmatpush1.msra.mxu1 %v1476_v19  ;;  %7839 = vst [vmem:[#allocation31_spill] sm:$0xff] %v6139_v60 }
 0x18d   : > { %2054 = vmatprep.subr.mxu0 %v1467_v42  ;;  %2215 = vmatprep.subr.mxu1 %v1469_v32  ;;  %v6159_v43 = vpop.permute.xlu0 %1669 }
 0x18e   : > { %2055 = vmatpush1.msra.mxu0 %v1466_v39  ;;  %2088 = vmatprep.mubr.f32.mxu0 %v7785_v38  ;;  %7842 = vst [vmem:[#allocation28_spill] sm:$0xff] %v6159_v43 }
 0x18f   : > { %2216 = vmatpush1.msra.mxu1 %v1468_v3  ;;  %2249 = vmatprep.mubr.f32.mxu1 %v7785_v38  ;;  %v6155_v36 = vpop.permute.xlu1 %1664 }
 0x190   : > { %2089 = vmatmul.mubr.f32.vlgmr.msra.gmra.mxu0 %v7827_v25  ;;  %2250 = vmatmul.mubr.f32.vlgmr.msra.gmra.mxu1 %v7827_v25  ;;  %7841 = vst [vmem:[#allocation30_spill] sm:$0xff] %v6155_v36 }
 0x191   : > { %2094 = vmatprep.mubr.f32.mxu0 %v7785_v38  ;;  %2255 = vmatprep.mubr.f32.mxu1 %v7785_v38  ;;  %v6171_v42 = vpop.permute.xlu0 %1659 }
 0x192   : > { %7844 = vst [vmem:[#allocation26_spill] sm:$0xff] %v6171_v42 }
 0x193   : > { %v6167_v17 = vpop.permute.xlu1 %1654 }
 0x194   : > { %2095 = vmatmul.mubr.f32.gmra.mxu0 %v7828_v2  ;;  %2256 = vmatmul.mubr.f32.gmra.mxu1 %v7828_v2  ;;  %7843 = vst [vmem:[#allocation29_spill] sm:$0xff] %v6167_v17 }
 0x195   : > { %2100 = vmatprep.mubr.f32.mxu0 %v7785_v38  ;;  %2261 = vmatprep.mubr.f32.mxu1 %v7785_v38  ;;  %v6183_v2 = vpop.permute.xlu0 %1649 }
 0x196   : > { %7846 = vst [vmem:[#allocation24_spill] sm:$0xff] %v6183_v2 }
 0x197   : > { %v6179_v3 = vpop.permute.xlu1 %1644 }
 0x198   : > { %2101 = vmatmul.mubr.f32.gmra.mxu0 %v7829_v13  ;;  %2262 = vmatmul.mubr.f32.gmra.mxu1 %v7829_v13  ;;  %7845 = vst [vmem:[#allocation27_spill] sm:$0xff] %v6179_v3 }
 0x199   : > { %2106 = vmatprep.mubr.f32.mxu0 %v7785_v38  ;;  %2267 = vmatprep.mubr.f32.mxu1 %v7785_v38 }
 0x19c   : > { %2107 = vmatmul.mubr.f32.gmra.mxu0 %v7830_v26  ;;  %2268 = vmatmul.mubr.f32.gmra.mxu1 %v7830_v26 }
 0x19d   : > { %2112 = vmatprep.mubr.f32.mxu0 %v7785_v38  ;;  %2273 = vmatprep.mubr.f32.mxu1 %v7785_v38 }
 0x1a0   : > { %2113 = vmatmul.mubr.f32.gmra.mxu0 %v7831_v49  ;;  %2274 = vmatmul.mubr.f32.gmra.mxu1 %v7831_v49 }
 0x1a1   : > { %2118 = vmatprep.mubr.f32.mxu0 %v7785_v38  ;;  %2279 = vmatprep.mubr.f32.mxu1 %v7785_v38 }
 0x1a4   : > { %2119 = vmatmul.mubr.f32.gmra.mxu0 %v7832_v37  ;;  %2280 = vmatmul.mubr.f32.gmra.mxu1 %v7832_v37  ;;  %v6191_v37 = vpop.permute.xlu1 %1634 }
 0x1a5   : > { %2124 = vmatprep.mubr.f32.mxu0 %v7785_v38  ;;  %2285 = vmatprep.mubr.f32.mxu1 %v7785_v38  ;;  %7850 = vst [vmem:[#allocation4_spill] sm:$0xff] %v6191_v37 }
 0x1a8   : > { %2125 = vmatmul.mubr.f32.gmra.mxu0 %v7833_v53  ;;  %2286 = vmatmul.mubr.f32.gmra.mxu1 %v7833_v53  ;;  %v6203_v59 = vpop.permute.xlu1 %1624 }
 0x1a9   : > { %2130 = vmatprep.mubr.f32.mxu0 %v7785_v38  ;;  %2291 = vmatprep.mubr.f32.mxu1 %v7785_v38  ;;  %7855 = vst [vmem:[#allocation16_spill] sm:$0xff] %v6203_v59 }
 0x1ac   : > { %2131 = vmatmul.mubr.f32.gmra.mxu0 %v7834_v58  ;;  %2292 = vmatmul.mubr.f32.gmra.mxu1 %v7834_v58  ;;  %v6195_v58 = vpop.permute.xlu0 %1639 }
 0x1ad   : > { %2136 = vmatprep.mubr.f32.mxu0 %v7785_v38  ;;  %2297 = vmatprep.mubr.f32.mxu1 %v7785_v38  ;;  %7852 = vst [vmem:[#allocation44_spill] sm:$0xff] %v6195_v58 }
 0x1b0   : > { %2137 = vmatmul.mubr.f32.gmra.mxu0 %v5663_v45  ;;  %2298 = vmatmul.mubr.f32.gmra.mxu1 %v5663_v45 }
 0x1b1   : > { %2142 = vmatprep.mubr.f32.mxu0 %v7785_v38  ;;  %2303 = vmatprep.mubr.f32.mxu1 %v7785_v38 }
 0x1b4   : > { %2143 = vmatmul.mubr.f32.gmra.mxu0 %v5694_v27  ;;  %2304 = vmatmul.mubr.f32.gmra.mxu1 %v5694_v27 }
 0x1b5   : > { %2148 = vmatprep.mubr.f32.mxu0 %v7785_v38  ;;  %2309 = vmatprep.mubr.f32.mxu1 %v7785_v38 }
 0x1b8   : > { %2149 = vmatmul.mubr.f32.gmra.mxu0 %v5750_v35  ;;  %2310 = vmatmul.mubr.f32.gmra.mxu1 %v5750_v35 }
 0x1b9   : > { %2154 = vmatprep.mubr.f32.mxu0 %v7785_v38  ;;  %2315 = vmatprep.mubr.f32.mxu1 %v7785_v38 }
 0x1bc   : > { %2155 = vmatmul.mubr.f32.gmra.mxu0 %v5807_v50  ;;  %2316 = vmatmul.mubr.f32.gmra.mxu1 %v5807_v50 }
 0x1bd   : > { %2160 = vmatprep.mubr.f32.mxu0 %v7785_v38  ;;  %2321 = vmatprep.mubr.f32.mxu1 %v7785_v38 }
 0x1c0   : > { %2161 = vmatmul.mubr.f32.gmra.mxu0 %v5864_v51  ;;  %2322 = vmatmul.mubr.f32.gmra.mxu1 %v5864_v51 }
 0x1c1   : > { %2166 = vmatprep.mubr.f32.mxu0 %v7785_v38  ;;  %2327 = vmatprep.mubr.f32.mxu1 %v7785_v38 }
 0x1c4   : > { %2167 = vmatmul.mubr.f32.gmra.mxu0 %v5921_v15  ;;  %2328 = vmatmul.mubr.f32.gmra.mxu1 %v5921_v15 }
 0x1c5   : > { %2172 = vmatprep.mubr.f32.mxu0 %v7785_v38  ;;  %2333 = vmatprep.mubr.f32.mxu1 %v7785_v38 }
 0x1c8   : > { %2173 = vmatmul.mubr.f32.gmra.mxu0 %v5969_v10  ;;  %2334 = vmatmul.mubr.f32.gmra.mxu1 %v5969_v10 }
 0x1c9   : > { %2178 = vmatprep.mubr.f32.mxu0 %v7785_v38  ;;  %2339 = vmatprep.mubr.f32.mxu1 %v7785_v38 }
 0x1cc   : > { %2179 = vmatmul.mubr.f32.gmra.mxu0 %v5997_v23  ;;  %2340 = vmatmul.mubr.f32.gmra.mxu1 %v5997_v23 }
 0x1cd   : > { %2722 = vmatprep.mubr.f32.mxu0 %v7785_v38  ;;  %2835 = vmatprep.mubr.f32.mxu1 %v7785_v38 }
 0x201   : > { %v6071_v45 = vpop.f32.mrf.mxu0 }
 0x202   : > { %v6073_v27 = vpop.f32.mrf.mxu1 }
 0x203   : > { %v6075_v35 = vpop.f32.mrf.mxu0 }
 0x204   : > { %v6077_v50 = vpop.f32.mrf.mxu1 }
 0x205   : > { %v6079_v51 = vpop.f32.mrf.mxu0 }
 0x206   : > { %v6081_v15 = vpop.f32.mrf.mxu1 }
 0x207   : > { %v6083_v28 = vpop.f32.mrf.mxu0 }
 0x208   : > { %v6085_v55 = vpop.f32.mrf.mxu1 }
 0x209   : > { %v6087_v52 = vpop.f32.mrf.mxu0 }
 0x20a   : > { %v6089_v20 = vpop.f32.mrf.mxu1 }
 0x20b   : > { %v6091_v11 = vpop.f32.mrf.mxu0 }
 0x20c   : > { %v6093_v62 = vpop.f32.mrf.mxu1 }
 0x20d   : > { %v6095_v10 = vpop.f32.mrf.mxu0 }
 0x20e   : > { %v6097_v8 = vpop.f32.mrf.mxu1 }
 0x20f   : > { %v6099_v40 = vpop.f32.mrf.mxu0 }
 0x210   : > { %v6101_v44 = vpop.f32.mrf.mxu1 }
 0x211   : > { %v6103_v61 = vpop.f32.mrf.mxu0 }
 0x212   : > { %v6105_v63 = vpop.f32.mrf.mxu1 }
 0x213   : > { %v6109_v46 = vpop.f32.mrf.mxu0 }
 0x214   : > { %v6111_v22 = vpop.f32.mrf.mxu1 }
 0x215   : > { %v6115_v48 = vpop.f32.mrf.mxu0 }
 0x216   : > { %v6117_v6 = vpop.f32.mrf.mxu1 }
 0x217   : > { %v6119_v1 = vpop.f32.mrf.mxu0 }
 0x218   : > { %v6121_v12 = vpop.f32.mrf.mxu1 }
 0x219   : > { %v6125_v34 = vpop.f32.mrf.mxu0 }
 0x21a   : > { %v6127_v5 = vpop.f32.mrf.mxu1 }
 0x21b   : > { %v6131_v16 = vpop.f32.mrf.mxu0 }
 0x21c   : > { %v6133_v33 = vpop.f32.mrf.mxu1 }
 0x21d   : > { %v6135_v29 = vpop.f32.mrf.mxu0 }
 0x21e   : > { %v6137_v7 = vpop.f32.mrf.mxu1 }
 0x21f   : > { %v6141_v31 = vpop.f32.mrf.mxu0 }
 0x220   : > { %v6143_v24 = vpop.f32.mrf.mxu1 }
 0x222   : > { %v6147_v14 = vpop.f32.mrf.mxu0  ;;  %v6149_v0 = vpop.f32.mrf.mxu1 }
 0x224   : > { %v6151_v30 = vpop.f32.mrf.mxu0  ;;  %v6153_v23 = vpop.f32.mrf.mxu1 }
 0x226   : > { %v6157_v41 = vpop.f32.mrf.mxu0  ;;  %v6161_v21 = vpop.f32.mrf.mxu1 }
 0x228   : > { %v6163_v56 = vpop.f32.mrf.mxu0  ;;  %v6165_v47 = vpop.f32.mrf.mxu1 }
 0x22c   : > { %v6169_v57 = vpop.f32.mrf.mxu0  ;;  %v6173_v19 = vpop.f32.mrf.mxu1 }
 0x22e   : > { %v6175_v39 = vpop.f32.mrf.mxu0  ;;  %v6177_v32 = vpop.f32.mrf.mxu1 }
 0x232   : > { %v6181_v25 = vpop.f32.mrf.mxu0  ;;  %v6185_v13 = vpop.f32.mrf.mxu1 }
 0x233   : > { %7847 = vst [vmem:[#allocation25_spill] sm:$0xff] %v6185_v13  ;;  %v6207_v13 = vpop.permute.xlu0 %1629 }
 0x234   : > { %v6187_v26 = vpop.f32.mrf.mxu0  ;;  %v6189_v49 = vpop.f32.mrf.mxu1  ;;  %7857 = vst [vmem:[#allocation56_spill] sm:$0xff] %v6207_v13 }
 0x235   : > { %7848 = vst [vmem:[#allocation6_spill] sm:$0xff] %v6187_v26  ;;  %7849 = vst [vmem:[#allocation8_spill] sm:$0xff] %v6189_v49  ;;  %v6211_v49 = vadd.f32 %v6071_v45, %v6203_v59  ;;  %v6233_v45 = vadd.f32 %v6081_v15, %v6207_v13  ;;  %v6253_v15 = vadd.f32 %v6091_v11, %v6191_v37 }
 0x236   : > { %v6273_v11 = vadd.f32 %v6101_v44, %v6195_v58  ;;  %v6293_v44 = vadd.f32 %v6115_v48, %v6183_v2  ;;  %v6313_v48 = vadd.f32 %v6127_v5, %v6167_v17  ;;  %v6333_v5 = vadd.f32 %v6141_v31, %v6171_v42 }
 0x237   : > { %7858 = vst [vmem:[#allocation9_spill] sm:$0xff] %v6211_v49  ;;  %7863 = vst [vmem:[#allocation13_spill] sm:$0xff] %v6233_v45  ;;  %v6353_v31 = vadd.f32 %v6153_v23, %v6155_v36  ;;  %v6373_v23 = vadd.f32 %v6169_v57, %v6139_v60 }
 0x238   : > { %v6193_v53 = vpop.f32.mrf.mxu0  ;;  %v6197_v38 = vpop.f32.mrf.mxu1  ;;  %7868 = vst [vmem:[#allocation53_spill] sm:$0xff] %v6253_v15  ;;  %7873 = vst [vmem:[#allocation48_spill] sm:$0xff] %v6273_v11 }
 0x239   : > { %7851 = vst [vmem:[#allocation20_spill] sm:$0xff] %v6193_v53  ;;  %7853 = vst [vmem:[#allocation10_spill] sm:$0xff] %v6197_v38  ;;  %v6215_v53 = vadd.f32 %v6073_v27, %v6203_v59  ;;  %v6221_v38 = vadd.f32 %v6075_v35, %v6203_v59  ;;  %v6241_v35 = vadd.f32 %v6085_v55, %v6207_v13 }
 0x23a   : > { %v6199_v9 = vpop.f32.mrf.mxu0  ;;  %v6201_v4 = vpop.f32.mrf.mxu1  ;;  %v6261_v55 = vadd.f32 %v6095_v10, %v6195_v58  ;;  %v6281_v10 = vadd.f32 %v6105_v63, %v6179_v3  ;;  %7878 = vst [vmem:[#allocation46_spill] sm:$0xff] %v6293_v44  ;;  %v6301_v63 = vadd.f32 %v6119_v1, %v6183_v2  ;;  %v6321_v1 = vadd.f32 %v6133_v33, %v6167_v17 }
 0x23b   : > { %7854 = vst [vmem:[#allocation11_spill] sm:$0xff] %v6201_v4  ;;  %7859 = vst [vmem:[#allocation57_spill] sm:$0xff] %v6215_v53  ;;  %v6225_v4 = vadd.f32 %v6077_v50, %v6203_v59  ;;  %v6237_v53 = vadd.f32 %v6083_v28, %v6207_v13  ;;  %v6245_v50 = vadd.f32 %v6087_v52, %v6191_v37 }
 0x23c   : > { %7860 = vst [vmem:[#allocation12_spill] sm:$0xff] %v6221_v38  ;;  %7865 = vst [vmem:[#allocation54_spill] sm:$0xff] %v6241_v35  ;;  %v6257_v28 = vadd.f32 %v6093_v62, %v6191_v37  ;;  %v6265_v52 = vadd.f32 %v6097_v8, %v6195_v58  ;;  %v6277_v62 = vadd.f32 %v6103_v61, %v6179_v3 }
 0x23d   : > { %7861 = vst [vmem:[#allocation55_spill] sm:$0xff] %v6225_v4  ;;  %7864 = vst [vmem:[#allocation52_spill] sm:$0xff] %v6237_v53  ;;  %v6285_v8 = vadd.f32 %v6109_v46, %v6179_v3  ;;  %v6297_v61 = vadd.f32 %v6117_v6, %v6183_v2  ;;  %v6305_v46 = vadd.f32 %v6121_v12, %v6183_v2 }
 0x23e   : > { %v6205_v18 = vpop.f32.mrf.mxu0  ;;  %v6217_v26 = vpop.f32.mrf.mxu1  ;;  %7866 = vst [vmem:[#allocation18_spill] sm:$0xff] %v6245_v50  ;;  %7869 = vst [vmem:[#allocation51_spill] sm:$0xff] %v6257_v28  ;;  %v6317_v6 = vadd.f32 %v6131_v16, %v6167_v17  ;;  %v6325_v12 = vadd.f32 %v6135_v29, %v6171_v42  ;;  %v6337_v16 = vadd.f32 %v6143_v24, %v6171_v42 }
 0x23f   : > { %7856 = vst [vmem:[#allocation14_spill] sm:$0xff] %v6205_v18  ;;  %v6229_v18 = vadd.f32 %v6079_v51, %v6207_v13  ;;  %v6249_v51 = vadd.f32 %v6089_v20, %v6191_v37  ;;  %7870 = vst [vmem:[#allocation17_spill] sm:$0xff] %v6261_v55  ;;  %v6269_v20 = vadd.f32 %v6099_v40, %v6195_v58  ;;  %v7884_v13 = vld [vmem:[#allocation35_spill] sm:$0xff] }
 0x240   : > { %v1848_v27 = vpop.f32.mrf.mxu0  ;;  %v2009_v59 = vpop.f32.mrf.mxu1  ;;  %7871 = vst [vmem:[#allocation50_spill] sm:$0xff] %v6265_v52  ;;  %7874 = vst [vmem:[#allocation21_spill] sm:$0xff] %v6277_v62  ;;  %v6289_v40 = vadd.f32 %v6111_v22, %v6179_v3  ;;  %v6309_v22 = vadd.f32 %v6125_v34, %v6167_v17  ;;  %v6329_v34 = vadd.f32 %v6137_v7, %v6171_v42  ;;  %v7887_v45 = vld [vmem:[#allocation20_spill] sm:$0xff] }
 0x241   : > { %7862 = vst [vmem:[#allocation19_spill] sm:$0xff] %v6229_v18  ;;  %7867 = vst [vmem:[#allocation15_spill] sm:$0xff] %v6249_v51  ;;  %v6341_v33 = vadd.f32 %v6147_v14, %v6155_v36  ;;  %v6345_v29 = vadd.f32 %v6149_v0, %v6155_v36  ;;  %v6349_v7 = vadd.f32 %v6151_v30, %v6155_v36 }
 0x242   : > { %7872 = vst [vmem:[#allocation23_spill] sm:$0xff] %v6269_v20  ;;  %7875 = vst [vmem:[#allocation49_spill] sm:$0xff] %v6281_v10  ;;  %v6357_v24 = vadd.f32 %v6157_v41, %v6159_v43  ;;  %v6361_v14 = vadd.f32 %v6161_v21, %v6159_v43  ;;  %v6365_v0 = vadd.f32 %v6163_v56, %v6159_v43 }
 0x243   : > { %7876 = vst [vmem:[#allocation22_spill] sm:$0xff] %v6285_v8  ;;  %7877 = vst [vmem:[#allocation47_spill] sm:$0xff] %v6289_v40  ;;  %v6369_v30 = vadd.f32 %v6165_v47, %v6159_v43  ;;  %v6377_v41 = vadd.f32 %v6173_v19, %v6139_v60  ;;  %v6381_v21 = vadd.f32 %v6175_v39, %v6139_v60  ;;  %v7881_v43 = vld [vmem:[#allocation25_spill] sm:$0xff]  ;;  %v7882_v19 = vld [vmem:[#allocation6_spill] sm:$0xff] }
 0x244   : > { %7879 = vst [vmem:[#allocation45_spill] sm:$0xff] %v6297_v61  ;;  %v1852_v58 = vpop.f32.mrf.mxu0  ;;  %7880 = vst [vmem:[#allocation37_spill] sm:$0xff] %v6305_v46  ;;  %v2013_v3 = vpop.f32.mrf.mxu1  ;;  %v6385_v56 = vadd.f32 %v6177_v32, %v6139_v60  ;;  %v6389_v47 = vadd.f32 %v6181_v25, %v6145_v54  ;;  %v6393_v57 = vadd.f32 %v7881_v43, %v6145_v54  ;;  %v7883_v39 = vld [vmem:[#allocation8_spill] sm:$0xff]  ;;  %v7886_v25 = vld [vmem:[#allocation33_spill] sm:$0xff] }
 0x245   : > { %v6397_v42 = vadd.f32 %v7882_v19, %v6145_v54  ;;  %v6401_v37 = vadd.f32 %v7883_v39, %v6145_v54  ;;  %v7885_v60 = vld [vmem:[#allocation36_spill] sm:$0xff]  ;;  %v6407_v38 = vadd.f32 %v7887_v45, %v7886_v25  ;;  %v1853_v43 = vadd.f32 %v1852_v58, %v7884_v13  ;;  %v7888_v54 = vld [vmem:[#allocation34_spill] sm:$0xff] }
 0x246   : > { %v1854_v2 = vpop.f32.mrf.mxu0  ;;  %v2015_v17 = vpop.f32.mrf.mxu1  ;;  %v6414_v39 = vadd.f32 %v6199_v9, %v7886_v25  ;;  %v7889_v45 = vld [vmem:[#allocation14_spill] sm:$0xff]  ;;  %v6427_v9 = vadd.f32 %v6217_v26, %v7888_v54 }
 0x247   : > { %v1855_v32 = vadd.f32 %v1854_v2, %v7884_v13  ;;  %v2016_v35 = vadd.f32 %v2015_v17, %v7884_v13  ;;  %v1849_v2 = vadd.f32 %v1848_v27, %v7888_v54  ;;  %v6421_v28 = vadd.f32 %v7889_v45, %v7888_v54 }
 0x248   : > { %v2010_v17 = vadd.f32 %v2009_v59, %v7888_v54  ;;  %v7892_v59 = vld [vmem:[#allocation10_spill] sm:$0xff]  ;;  %v2443_v61 = vmul.f32 0.02, %v6414_v39 }
 0x249   : > { %v2459_v50 = vmul.f32 0.02, %v1855_v32  ;;  %v2461_v15 = vmul.f32 0.02, %v2016_v35  ;;  %v6437_v55 = vadd.f32 %v7892_v59, %v7886_v25  ;;  %v2450_v10 = vmul.f32 0.02, %v6421_v28 }
 0x24a   : > { %v1858_v36 = vpop.f32.mrf.mxu0  ;;  %v2019_v49 = vpop.f32.mrf.mxu1  ;;  %v2453_v20 = vmul.f32 0.02, %v2010_v17 }
 0x24b   : > { %v1859_v4 = vadd.f32 %v1858_v36, %v7885_v60  ;;  %v2020_v19 = vadd.f32 %v2019_v49, %v7885_v60  ;;  %v2014_v36 = vadd.f32 %v2013_v3, %v7884_v13  ;;  %v7890_v3 = vld [vmem:[#allocation11_spill] sm:$0xff]  ;;  %v2458_v13 = vmul.f32 0.02, %v1853_v43 }
 0x24c   : > { %v1860_v18 = vpop.f32.mrf.mxu0  ;;  %v2021_v53 = vpop.f32.mrf.mxu1  ;;  %v2587_v8 = vmax.f32 %v1855_v32, %v2459_v50 }
 0x24d   : > { %v1861_v51 = vadd.f32 %v1860_v18, %v7885_v60  ;;  %v2466_v58 = vmul.f32 0.02, %v1859_v4  ;;  %v2022_v49 = vadd.f32 %v2021_v53, %v7885_v60  ;;  %v2468_v27 = vmul.f32 0.02, %v2020_v19 }
 0x24e   : > { %v6431_v18 = vadd.f32 %v7890_v3, %v7886_v25  ;;  %v2451_v53 = vmul.f32 0.02, %v1849_v2  ;;  %v2460_v60 = vmul.f32 0.02, %v2014_v36  ;;  %v2586_v25 = vmax.f32 %v1853_v43, %v2458_v13 }
 0x24f   : > { %v2467_v52 = vmul.f32 0.02, %v1861_v51  ;;  %v2469_v45 = vmul.f32 0.02, %v2022_v49  ;;  %v2594_v40 = vmax.f32 %v1859_v4, %v2466_v58  ;;  %v2596_v46 = vmax.f32 %v2020_v19, %v2468_v27 }
 0x250   : > { %v6433_v11 = vpop.f32.mrf.mxu0  ;;  %v6439_v54 = vpop.f32.mrf.mxu1  ;;  %v2435_v4 = vmul.f32 0.02, %v6397_v42  ;;  %v2444_v58 = vmul.f32 0.02, %v6437_v55  ;;  %v2588_v50 = vmax.f32 %v2014_v36, %v2460_v60  ;;  %v2434_v19 = vmul.f32 0.02, %v6389_v47 }
 0x251   : > { %7891 = vst [vmem:[#allocation7_spill] sm:$0xff] %v6433_v11  ;;  %v2595_v26 = vmax.f32 %v1861_v51, %v2467_v52  ;;  %7893 = vst [vmem:[#allocation43_spill] sm:$0xff] %v6439_v54  ;;  %v2597_v3 = vmax.f32 %v2022_v49, %v2469_v45  ;;  %v2452_v11 = vmul.f32 0.02, %v6427_v9  ;;  %v2442_v51 = vmul.f32 0.02, %v6407_v38 }
 0x252   : > { %v6442_v62 = vpop.f32.mrf.mxu0  ;;  %v6446_v59 = vpop.f32.mrf.mxu1  ;;  %v2445_v52 = vmul.f32 0.02, %v6431_v18  ;;  %v2589_v54 = vmax.f32 %v2016_v35, %v2461_v15  ;;  %v2579_v49 = vmax.f32 %v1849_v2, %v2451_v53  ;;  %v2437_v27 = vmul.f32 0.02, %v6401_v37 }
 0x253   : > { %2658 = vmatprep.subr.mxu0 %v2595_v26  ;;  %2771 = vmatprep.subr.mxu1 %v2597_v3  ;;  %v2578_v13 = vmax.f32 %v6421_v28, %v2450_v10  ;;  %v2581_v35 = vmax.f32 %v2010_v17, %v2453_v20  ;;  %v2436_v43 = vmul.f32 0.02, %v6393_v57  ;;  %v2571_v60 = vmax.f32 %v6414_v39, %v2443_v61 }
 0x254   : > { %v6450_v44 = vpop.f32.mrf.mxu0  ;;  %2659 = vmatpush1.msra.mxu0 %v2594_v40  ;;  %v6454_v32 = vpop.f32.mrf.mxu1  ;;  %2772 = vmatpush1.msra.mxu1 %v2596_v46  ;;  %v2427_v40 = vmul.f32 0.02, %v6381_v21  ;;  %v2580_v46 = vmax.f32 %v6427_v9, %v2452_v11  ;;  %v2426_v2 = vmul.f32 0.02, %v6373_v23  ;;  %v2429_v28 = vmul.f32 0.02, %v6385_v56 }
 0x255   : > { %2660 = vmatprep.subr.mxu0 %v2587_v8  ;;  %2773 = vmatprep.subr.mxu1 %v2589_v54  ;;  %v2570_v20 = vmax.f32 %v6407_v38, %v2442_v51  ;;  %v2573_v54 = vmax.f32 %v6431_v18, %v2445_v52  ;;  %v2419_v61 = vmul.f32 0.02, %v6365_v0  ;;  %v2428_v11 = vmul.f32 0.02, %v6377_v41 }
 0x256   : > { %v6459_v15 = vpop.f32.mrf.mxu0  ;;  %2661 = vmatpush1.msra.mxu0 %v2586_v25  ;;  %v6465_v8 = vpop.f32.mrf.mxu1  ;;  %2774 = vmatpush1.msra.mxu1 %v2588_v50  ;;  %v2563_v25 = vmax.f32 %v6397_v42, %v2435_v4  ;;  %v2572_v39 = vmax.f32 %v6437_v55, %v2444_v58  ;;  %v2418_v38 = vmul.f32 0.02, %v6357_v24  ;;  %v2421_v17 = vmul.f32 0.02, %v6369_v30 }
 0x257   : > { %2662 = vmatprep.subr.mxu0 %v2579_v49  ;;  %2775 = vmatprep.subr.mxu1 %v2581_v35  ;;  %v2562_v9 = vmax.f32 %v6389_v47, %v2434_v19  ;;  %v2565_v18 = vmax.f32 %v6401_v37, %v2437_v27  ;;  %v2411_v42 = vmul.f32 0.02, %v6349_v7  ;;  %v2420_v55 = vmul.f32 0.02, %v6361_v14 }
 0x258   : > { %v6471_v10 = vpop.f32.mrf.mxu0  ;;  %2663 = vmatpush1.msra.mxu0 %v2578_v13  ;;  %v6477_v36 = vpop.f32.mrf.mxu1  ;;  %2776 = vmatpush1.msra.mxu1 %v2580_v46  ;;  %v2555_v53 = vmax.f32 %v6381_v21, %v2427_v40  ;;  %v2564_v26 = vmax.f32 %v6393_v57, %v2436_v43  ;;  %v2410_v47 = vmul.f32 0.02, %v6341_v33  ;;  %v2413_v37 = vmul.f32 0.02, %v6353_v31 }
 0x259   : > { %2664 = vmatprep.subr.mxu0 %v2571_v60  ;;  %2777 = vmatprep.subr.mxu1 %v2573_v54  ;;  %v2554_v51 = vmax.f32 %v6373_v23, %v2426_v2  ;;  %v2557_v52 = vmax.f32 %v6385_v56, %v2429_v28  ;;  %v2403_v21 = vmul.f32 0.02, %v6333_v5  ;;  %v2412_v57 = vmul.f32 0.02, %v6345_v29 }
 0x25a   : > { %v6483_v45 = vpop.f32.mrf.mxu0  ;;  %2665 = vmatpush1.msra.mxu0 %v2570_v20  ;;  %v6489_v3 = vpop.f32.mrf.mxu1  ;;  %2778 = vmatpush1.msra.mxu1 %v2572_v39  ;;  %v2547_v58 = vmax.f32 %v6365_v0, %v2419_v61  ;;  %v2556_v49 = vmax.f32 %v6377_v41, %v2428_v11  ;;  %v2402_v23 = vmul.f32 0.02, %v6325_v12  ;;  %v2405_v56 = vmul.f32 0.02, %v6337_v16  ;;  %v7894_v61 = vld [vmem:[#allocation46_spill] sm:$0xff]  ;;  %v7895_v11 = vld [vmem:[#allocation37_spill] sm:$0xff] }
 0x25b   : > { %2666 = vmatprep.subr.mxu0 %v2563_v25  ;;  %2779 = vmatprep.subr.mxu1 %v2565_v18  ;;  %v2546_v19 = vmax.f32 %v6357_v24, %v2418_v38  ;;  %v2549_v27 = vmax.f32 %v6369_v30, %v2421_v17  ;;  %v2395_v0 = vmul.f32 0.02, %v6317_v6  ;;  %v2404_v41 = vmul.f32 0.02, %v6329_v34  ;;  %v7896_v17 = vld [vmem:[#allocation22_spill] sm:$0xff] }
 0x25c   : > { %v6495_v4 = vpop.f32.mrf.mxu0  ;;  %2667 = vmatpush1.msra.mxu0 %v2562_v9  ;;  %v6501_v50 = vpop.f32.mrf.mxu1  ;;  %2780 = vmatpush1.msra.mxu1 %v2564_v26  ;;  %v2539_v35 = vmax.f32 %v6349_v7, %v2411_v42  ;;  %v2548_v40 = vmax.f32 %v6361_v14, %v2420_v55  ;;  %v2394_v24 = vmul.f32 0.02, %v6309_v22  ;;  %v2397_v30 = vmul.f32 0.02, %v6321_v1  ;;  %v7897_v9 = vld [vmem:[#allocation45_spill] sm:$0xff]  ;;  %v7899_v26 = vld [vmem:[#allocation47_spill] sm:$0xff] }
 0x25d   : > { %2668 = vmatprep.subr.mxu0 %v2555_v53  ;;  %2781 = vmatprep.subr.mxu1 %v2557_v52  ;;  %v2538_v60 = vmax.f32 %v6341_v33, %v2410_v47  ;;  %v2541_v46 = vmax.f32 %v6353_v31, %v2413_v37  ;;  %v2387_v7 = vmul.f32 0.02, %v6301_v63  ;;  %v2396_v14 = vmul.f32 0.02, %v6313_v48  ;;  %v7898_v53 = vld [vmem:[#allocation21_spill] sm:$0xff]  ;;  %v7900_v52 = vld [vmem:[#allocation23_spill] sm:$0xff] }
 0x25e   : > { %v6507_v13 = vpop.f32.mrf.mxu0  ;;  %2669 = vmatpush1.msra.mxu0 %v2554_v51  ;;  %v6513_v43 = vpop.f32.mrf.mxu1  ;;  %2782 = vmatpush1.msra.mxu1 %v2556_v49  ;;  %v2531_v28 = vmax.f32 %v6333_v5, %v2403_v21  ;;  %v2540_v20 = vmax.f32 %v6345_v29, %v2412_v57  ;;  %v2386_v33 = vmul.f32 0.02, %v7894_v61  ;;  %v2389_v31 = vmul.f32 0.02, %v7895_v11  ;;  %v7901_v21 = vld [vmem:[#allocation49_spill] sm:$0xff] }
 0x25f   : > { %2670 = vmatprep.subr.mxu0 %v2547_v58  ;;  %2783 = vmatprep.subr.mxu1 %v2549_v27  ;;  %v2530_v25 = vmax.f32 %v6325_v12, %v2402_v23  ;;  %v2533_v39 = vmax.f32 %v6337_v16, %v2405_v56  ;;  %v2379_v5 = vmul.f32 0.02, %v7896_v17  ;;  %v2388_v29 = vmul.f32 0.02, %v7897_v9  ;;  %v7902_v23 = vld [vmem:[#allocation17_spill] sm:$0xff]  ;;  %v7903_v56 = vld [vmem:[#allocation48_spill] sm:$0xff] }
 0x260   : > { %v6519_v2 = vpop.f32.mrf.mxu0  ;;  %2671 = vmatpush1.msra.mxu0 %v2546_v19  ;;  %v6525_v54 = vpop.f32.mrf.mxu1  ;;  %2784 = vmatpush1.msra.mxu1 %v2548_v40  ;;  %v2523_v18 = vmax.f32 %v6317_v6, %v2395_v0  ;;  %v2532_v42 = vmax.f32 %v6329_v34, %v2404_v41  ;;  %v2378_v12 = vmul.f32 0.02, %v7898_v53  ;;  %v2381_v16 = vmul.f32 0.02, %v7899_v26  ;;  %v7904_v41 = vld [vmem:[#allocation53_spill] sm:$0xff] }
 0x261   : > { %2672 = vmatprep.subr.mxu0 %v2539_v35  ;;  %2785 = vmatprep.subr.mxu1 %v2541_v46  ;;  %v2522_v47 = vmax.f32 %v6309_v22, %v2394_v24  ;;  %v2525_v37 = vmax.f32 %v6321_v1, %v2397_v30  ;;  %v2371_v6 = vmul.f32 0.02, %v7900_v52  ;;  %v2380_v34 = vmul.f32 0.02, %v7901_v21  ;;  %v7905_v35 = vld [vmem:[#allocation50_spill] sm:$0xff] }
 0x262   : > { %v6531_v38 = vpop.f32.mrf.mxu0  ;;  %2673 = vmatpush1.msra.mxu0 %v2538_v60  ;;  %v6537_v55 = vpop.f32.mrf.mxu1  ;;  %2786 = vmatpush1.msra.mxu1 %v2540_v20  ;;  %v2515_v57 = vmax.f32 %v6301_v63, %v2387_v7  ;;  %v2524_v58 = vmax.f32 %v6313_v48, %v2396_v14  ;;  %v2370_v22 = vmul.f32 0.02, %v7902_v23  ;;  %v2373_v1 = vmul.f32 0.02, %v7903_v56  ;;  %v7906_v60 = vld [vmem:[#allocation18_spill] sm:$0xff]  ;;  %v7907_v7 = vld [vmem:[#allocation51_spill] sm:$0xff] }
 0x263   : > { %2674 = vmatprep.subr.mxu0 %v2531_v28  ;;  %2787 = vmatprep.subr.mxu1 %v2533_v39  ;;  %v2514_v19 = vmax.f32 %v7894_v61, %v2386_v33  ;;  %v2517_v27 = vmax.f32 %v7895_v11, %v2389_v31  ;;  %v2363_v63 = vmul.f32 0.02, %v7904_v41  ;;  %v2372_v48 = vmul.f32 0.02, %v7905_v35  ;;  %v7908_v33 = vld [vmem:[#allocation52_spill] sm:$0xff]  ;;  %v7909_v31 = vld [vmem:[#allocation15_spill] sm:$0xff] }
 0x264   : > { %v6543_v51 = vpop.f32.mrf.mxu0  ;;  %2675 = vmatpush1.msra.mxu0 %v2530_v25  ;;  %v6549_v49 = vpop.f32.mrf.mxu1  ;;  %2788 = vmatpush1.msra.mxu1 %v2532_v42  ;;  %v2507_v40 = vmax.f32 %v7896_v17, %v2379_v5  ;;  %v2516_v24 = vmax.f32 %v7897_v9, %v2388_v29  ;;  %v2362_v46 = vmul.f32 0.02, %v7906_v60  ;;  %v2365_v14 = vmul.f32 0.02, %v7907_v7  ;;  %v7910_v9 = vld [vmem:[#allocation19_spill] sm:$0xff] }
 0x265   : > { %2676 = vmatprep.subr.mxu0 %v2523_v18  ;;  %2789 = vmatprep.subr.mxu1 %v2525_v37  ;;  %v2506_v28 = vmax.f32 %v7898_v53, %v2378_v12  ;;  %v2509_v20 = vmax.f32 %v7899_v26, %v2381_v16  ;;  %v2355_v11 = vmul.f32 0.02, %v7908_v33  ;;  %v2364_v25 = vmul.f32 0.02, %v7909_v31  ;;  %v7911_v18 = vld [vmem:[#allocation54_spill] sm:$0xff]  ;;  %v7912_v16 = vld [vmem:[#allocation12_spill] sm:$0xff] }
 0x266   : > { %v6555_v0 = vpop.f32.mrf.mxu0  ;;  %2677 = vmatpush1.msra.mxu0 %v2522_v47  ;;  %v6561_v30 = vpop.f32.mrf.mxu1  ;;  %2790 = vmatpush1.msra.mxu1 %v2524_v58  ;;  %v2499_v39 = vmax.f32 %v7900_v52, %v2371_v6  ;;  %v2508_v17 = vmax.f32 %v7901_v21, %v2380_v34  ;;  %v2354_v29 = vmul.f32 0.02, %v7910_v9  ;;  %v2357_v42 = vmul.f32 0.02, %v7911_v18  ;;  %v7913_v37 = vld [vmem:[#allocation13_spill] sm:$0xff] }
 0x267   : > { %2678 = vmatprep.subr.mxu0 %v2515_v57  ;;  %2791 = vmatprep.subr.mxu1 %v2517_v27  ;;  %v2498_v53 = vmax.f32 %v7902_v23, %v2370_v22  ;;  %v2501_v12 = vmax.f32 %v7903_v56, %v2373_v1  ;;  %v2347_v47 = vmul.f32 0.02, %v7912_v16  ;;  %v2356_v52 = vmul.f32 0.02, %v7913_v37  ;;  %v7914_v57 = vld [vmem:[#allocation9_spill] sm:$0xff]  ;;  %v7915_v23 = vld [vmem:[#allocation55_spill] sm:$0xff] }
 0x268   : > { %v6567_v61 = vpop.f32.mrf.mxu0  ;;  %2679 = vmatpush1.msra.mxu0 %v2514_v19  ;;  %v6573_v5 = vpop.f32.mrf.mxu1  ;;  %2792 = vmatpush1.msra.mxu1 %v2516_v24  ;;  %v2491_v6 = vmax.f32 %v7904_v41, %v2363_v63  ;;  %v2500_v21 = vmax.f32 %v7905_v35, %v2372_v48  ;;  %v2346_v58 = vmul.f32 0.02, %v7914_v57  ;;  %v2349_v22 = vmul.f32 0.02, %v7915_v23  ;;  %v7916_v27 = vld [vmem:[#allocation57_spill] sm:$0xff] }
 0x269   : > { %2680 = vmatprep.subr.mxu0 %v2507_v40  ;;  %2793 = vmatprep.subr.mxu1 %v2509_v20  ;;  %v2490_v56 = vmax.f32 %v7906_v60, %v2362_v46  ;;  %v2493_v1 = vmax.f32 %v7907_v7, %v2365_v14  ;;  %v2348_v41 = vmul.f32 0.02, %v7916_v27  ;;  %v2483_v63 = vmax.f32 %v7908_v33, %v2355_v11  ;;  %v6613_v11 = vld [vmem:[%s7522_s5] sm:$0xff] }
 0x26a   : > { %v6579_v26 = vpop.f32.mrf.mxu0  ;;  %2681 = vmatpush1.msra.mxu0 %v2506_v28  ;;  %v6585_v34 = vpop.f32.mrf.mxu1  ;;  %2794 = vmatpush1.msra.mxu1 %v2508_v17  ;;  %v2492_v35 = vmax.f32 %v7909_v31, %v2364_v25  ;;  %v2482_v40 = vmax.f32 %v7910_v9, %v2354_v29  ;;  %v2485_v24 = vmax.f32 %v7911_v18, %v2357_v42  ;;  %v7918_v29 = vmov 0.0   ;;  %v6630_v18 = vld [vmem:[%s7522_s5 + $0x8] sm:$0xff] }
 0x26b   : > { %2682 = vmatprep.subr.mxu0 %v2499_v39  ;;  %2795 = vmatprep.subr.mxu1 %v2501_v12  ;;  %v2475_v46 = vmax.f32 %v7912_v16, %v2347_v47  ;;  %v2484_v7 = vmax.f32 %v7913_v37, %v2356_v52  ;;  %v2474_v28 = vmax.f32 %v7914_v57, %v2346_v58  ;;  %v6647_v47 = vld [vmem:[%s7522_s5 + $0x10] sm:$0xff]  ;;  %v6664_v57 = vld [vmem:[%s7522_s5 + $0x18] sm:$0xff] }
 0x26c   : > { %v6591_v19 = vpop.f32.mrf.mxu0  ;;  %2683 = vmatpush1.msra.mxu0 %v2498_v53  ;;  %v6596_v48 = vpop.f32.mrf.mxu1  ;;  %2796 = vmatpush1.msra.mxu1 %v2500_v21  ;;  %v2477_v20 = vmax.f32 %v7915_v23, %v2349_v22  ;;  %7917 = vst [vmem:[#allocation41_spill] sm:$0xff] %v6613_v11  ;;  %v2476_v31 = vmax.f32 %v7916_v27, %v2348_v41  ;;  %7919 = vst [vmem:[#allocation42_spill] sm:$0xff] %v6630_v18 }
 0x26d   : > { %2684 = vmatprep.subr.mxu0 %v2491_v6  ;;  %2797 = vmatprep.subr.mxu1 %v2493_v1  ;;  %7920 = vst [vmem:[#allocation40_spill] sm:$0xff] %v6647_v47  ;;  %7921 = vst [vmem:[#allocation38_spill] sm:$0xff] %v6664_v57  ;;  %v7923_v1 = vld [vmem:[#allocation7_spill] sm:$0xff] }
 0x26e   : > { %v6600_v60 = vpop.f32.mrf.mxu0  ;;  %2685 = vmatpush1.msra.mxu0 %v2490_v56  ;;  %v6604_v14 = vpop.f32.mrf.mxu1  ;;  %2798 = vmatpush1.msra.mxu1 %v2492_v35  ;;  %v7922_v56 = vld [vmem:[#allocation16_spill] sm:$0xff]  ;;  %v7926_v35 = vld [vmem:[#allocation43_spill] sm:$0xff] }
 0x26f   : > { %2686 = vmatprep.subr.mxu0 %v2483_v63  ;;  %2799 = vmatprep.subr.mxu1 %v2485_v24  ;;  %v6676_v27 = vadd.f32 %v7923_v1, %v7922_v56  ;;  %v6685_v63 = vld [vmem:[%s7522_s5 + $0x20] sm:$0xff]  ;;  %v6693_v24 = vadd.f32 %v6442_v62, %v7922_v56 }
 0x270   : > { %v6608_v33 = vpop.f32.mrf.mxu0  ;;  %2687 = vmatpush1.msra.mxu0 %v2482_v40  ;;  %v6616_v25 = vpop.f32.mrf.mxu1  ;;  %2800 = vmatpush1.msra.mxu1 %v2484_v7  ;;  %7925 = vst [vmem:[#allocation5_spill] sm:$0xff] %v6685_v63  ;;  %v6689_v40 = vadd.f32 %v7926_v35, %v7922_v56  ;;  %v7930_v7 = vld [vmem:[#allocation56_spill] sm:$0xff] }
 0x271   : > { %2688 = vmatprep.subr.mxu0 %v2475_v46  ;;  %2801 = vmatprep.subr.mxu1 %v2477_v20  ;;  %7924 = vst [vmem:[#allocation39_spill] sm:$0xff] %v6676_v27  ;;  %7928 = vst [vmem:[#allocation6_spill] sm:$0xff] %v6693_v24  ;;  %v6697_v46 = vadd.f32 %v6446_v59, %v7922_v56  ;;  %v6712_v62 = vadd.f32 %v6459_v15, %v7930_v7  ;;  %v7935_v56 = vld [vmem:[#allocation4_spill] sm:$0xff]  ;;  %v7961_v24 = vld [vmem:[#allocation31_spill] sm:$0xff] }
 0x272   : > { %v6618_v39 = vpop.f32.mrf.mxu0  ;;  %2689 = vmatpush1.msra.mxu0 %v2474_v28  ;;  %v6620_v17 = vpop.f32.mrf.mxu1  ;;  %2802 = vmatpush1.msra.mxu1 %v2476_v31  ;;  %7927 = vst [vmem:[#allocation25_spill] sm:$0xff] %v6689_v40  ;;  %v6701_v28 = vadd.f32 %v6450_v44, %v7930_v7  ;;  %v6708_v31 = vadd.f32 %v6454_v32, %v7930_v7 }
 0x273   : > { %2723 = vmatmul.mubr.f32.vlgmr.msra.gmra.mxu0 %v6613_v11  ;;  %2836 = vmatmul.mubr.f32.vlgmr.msra.gmra.mxu1 %v6613_v11  ;;  %7929 = vst [vmem:[#allocation8_spill] sm:$0xff] %v6697_v46  ;;  %7933 = vst [vmem:[#allocation11_spill] sm:$0xff] %v6712_v62  ;;  %v6716_v59 = vadd.f32 %v6465_v8, %v7930_v7  ;;  %v6720_v44 = vadd.f32 %v6471_v10, %v7935_v56  ;;  %v7940_v8 = vld [vmem:[#allocation44_spill] sm:$0xff] }
 0x274   : > { %v6623_v9 = vpop.f32.mrf.mxu0  ;;  %2728 = vmatprep.mubr.f32.mxu0 %v7918_v29  ;;  %v6632_v42 = vpop.f32.mrf.mxu1  ;;  %2841 = vmatprep.mubr.f32.mxu1 %v7918_v29  ;;  %7931 = vst [vmem:[#allocation20_spill] sm:$0xff] %v6701_v28  ;;  %7932 = vst [vmem:[#allocation14_spill] sm:$0xff] %v6708_v31  ;;  %v6726_v35 = vadd.f32 %v6477_v36, %v7935_v56  ;;  %v6730_v32 = vadd.f32 %v6483_v45, %v7935_v56 }
 0x275   : > { %7934 = vst [vmem:[#allocation10_spill] sm:$0xff] %v6716_v59  ;;  %7936 = vst [vmem:[#allocation46_spill] sm:$0xff] %v6720_v44  ;;  %v6734_v15 = vadd.f32 %v6489_v3, %v7935_v56  ;;  %v6738_v7 = vadd.f32 %v6495_v4, %v7940_v8  ;;  %v6745_v36 = vadd.f32 %v6501_v50, %v7940_v8  ;;  %v6762_v4 = vld [vmem:[%s7522_s5 + $0x28] sm:$0xff]  ;;  %v7946_v50 = vld [vmem:[#allocation27_spill] sm:$0xff] }
 0x276   : > { %v6635_v53 = vpop.f32.mrf.mxu0  ;;  %v6637_v12 = vpop.f32.mrf.mxu1  ;;  %7937 = vst [vmem:[#allocation37_spill] sm:$0xff] %v6726_v35  ;;  %7938 = vst [vmem:[#allocation22_spill] sm:$0xff] %v6730_v32  ;;  %v6749_v45 = vadd.f32 %v6507_v13, %v7940_v8  ;;  %v6753_v3 = vadd.f32 %v6513_v43, %v7940_v8  ;;  %v6770_v13 = vadd.f32 %v6525_v54, %v7946_v50  ;;  %v7965_v59 = vld [vmem:[#allocation36_spill] sm:$0xff]  ;;  %v7966_v35 = vld [vmem:[#allocation33_spill] sm:$0xff] }
 0x277   : > { %2729 = vmatmul.mubr.f32.gmra.mxu0 %v6630_v18  ;;  %2842 = vmatmul.mubr.f32.gmra.mxu1 %v6630_v18  ;;  %7939 = vst [vmem:[#allocation45_spill] sm:$0xff] %v6734_v15  ;;  %7941 = vst [vmem:[#allocation21_spill] sm:$0xff] %v6738_v7  ;;  %v6774_v43 = vadd.f32 %v6531_v38, %v7946_v50  ;;  %v6778_v8 = vadd.f32 %v6537_v55, %v7946_v50  ;;  %v7955_v18 = vld [vmem:[#allocation29_spill] sm:$0xff] }
 0x278   : > { %v6640_v16 = vpop.f32.mrf.mxu0  ;;  %2734 = vmatprep.mubr.f32.mxu0 %v7918_v29  ;;  %v6649_v37 = vpop.f32.mrf.mxu1  ;;  %2847 = vmatprep.mubr.f32.mxu1 %v7918_v29  ;;  %7942 = vst [vmem:[#allocation47_spill] sm:$0xff] %v6745_v36  ;;  %7943 = vst [vmem:[#allocation23_spill] sm:$0xff] %v6749_v45  ;;  %v6801_v11 = vadd.f32 %v6567_v61, %v7955_v18 }
 0x279   : > { %7944 = vst [vmem:[#allocation49_spill] sm:$0xff] %v6753_v3  ;;  %7945 = vst [vmem:[#allocation17_spill] sm:$0xff] %v6762_v4 }
 0x27a   : > { %v6652_v52 = vpop.f32.mrf.mxu0  ;;  %v6654_v6 = vpop.f32.mrf.mxu1  ;;  %7948 = vst [vmem:[#allocation53_spill] sm:$0xff] %v6770_v13  ;;  %7949 = vst [vmem:[#allocation50_spill] sm:$0xff] %v6774_v43 }
 0x27b   : > { %2735 = vmatmul.mubr.f32.gmra.mxu0 %v6647_v47  ;;  %2848 = vmatmul.mubr.f32.gmra.mxu1 %v6647_v47  ;;  %7950 = vst [vmem:[#allocation18_spill] sm:$0xff] %v6778_v8  ;;  %v7951_v47 = vld [vmem:[#allocation24_spill] sm:$0xff] }
 0x27c   : > { %v6657_v21 = vpop.f32.mrf.mxu0  ;;  %2740 = vmatprep.mubr.f32.mxu0 %v7918_v29  ;;  %v6666_v58 = vpop.f32.mrf.mxu1  ;;  %2853 = vmatprep.mubr.f32.mxu1 %v7918_v29  ;;  %v6789_v54 = vadd.f32 %v6549_v49, %v7951_v47  ;;  %v6793_v38 = vadd.f32 %v6555_v0, %v7951_v47  ;;  %v6797_v55 = vadd.f32 %v6561_v30, %v7951_v47  ;;  %v7957_v30 = vld [vmem:[#allocation26_spill] sm:$0xff] }
 0x27d   : > { %v6809_v49 = vadd.f32 %v6579_v26, %v7955_v18  ;;  %v6813_v0 = vadd.f32 %v6585_v34, %v7955_v18  ;;  %v6822_v61 = vadd.f32 %v6596_v48, %v7957_v30  ;;  %v6833_v34 = vld [vmem:[%s7522_s5 + $0x30] sm:$0xff] }
 0x27e   : > { %v6669_v23 = vpop.f32.mrf.mxu0  ;;  %v6671_v22 = vpop.f32.mrf.mxu1  ;;  %7953 = vst [vmem:[#allocation52_spill] sm:$0xff] %v6789_v54  ;;  %7954 = vst [vmem:[#allocation15_spill] sm:$0xff] %v6797_v55  ;;  %v7959_v48 = vld [vmem:[#allocation30_spill] sm:$0xff] }
 0x27f   : > { %2741 = vmatmul.mubr.f32.gmra.mxu0 %v6664_v57  ;;  %2854 = vmatmul.mubr.f32.gmra.mxu1 %v6664_v57  ;;  %v6766_v57 = vadd.f32 %v6519_v2, %v7946_v50  ;;  %v6785_v2 = vadd.f32 %v6543_v51, %v7951_v47  ;;  %v6805_v51 = vadd.f32 %v6573_v5, %v7955_v18 }
 0x280   : > { %v6678_v41 = vpop.f32.mrf.mxu0  ;;  %2746 = vmatprep.mubr.f32.mxu0 %v7918_v29  ;;  %v6703_v20 = vpop.f32.mrf.mxu1  ;;  %2859 = vmatprep.mubr.f32.mxu1 %v7918_v29  ;;  %v6818_v47 = vadd.f32 %v6591_v19, %v7957_v30  ;;  %v6826_v5 = vadd.f32 %v6600_v60, %v7957_v30  ;;  %7958 = vst [vmem:[#allocation54_spill] sm:$0xff] %v6833_v34 }
 0x281   : > { %7947 = vst [vmem:[#allocation48_spill] sm:$0xff] %v6766_v57  ;;  %7952 = vst [vmem:[#allocation51_spill] sm:$0xff] %v6785_v2  ;;  %v6837_v19 = vadd.f32 %v6604_v14, %v7957_v30  ;;  %v6841_v18 = vadd.f32 %v6608_v33, %v7959_v48  ;;  %v6845_v60 = vadd.f32 %v6616_v25, %v7959_v48  ;;  %v7960_v14 = vld [vmem:[#allocation28_spill] sm:$0xff] }
 0x282   : > { %v6722_v1 = vpop.f32.mrf.mxu0  ;;  %v6740_v10 = vpop.f32.mrf.mxu1  ;;  %7956 = vst [vmem:[#allocation19_spill] sm:$0xff] %v6805_v51  ;;  %v6854_v27 = vadd.f32 %v6620_v17, %v7959_v48  ;;  %v6858_v30 = vadd.f32 %v6623_v9, %v7960_v14  ;;  %v6862_v33 = vadd.f32 %v6632_v42, %v7960_v14  ;;  %v6866_v25 = vadd.f32 %v6635_v53, %v7960_v14 }
 0x283   : > { %2747 = vmatmul.mubr.f32.gmra.mxu0 %v6685_v63  ;;  %2860 = vmatmul.mubr.f32.gmra.mxu1 %v6685_v63  ;;  %v6870_v31 = vadd.f32 %v6637_v12, %v7960_v14  ;;  %v6874_v17 = vadd.f32 %v6640_v16, %v7961_v24  ;;  %v6878_v9 = vadd.f32 %v6649_v37, %v7961_v24  ;;  %v7962_v12 = vld [vmem:[#allocation32_spill] sm:$0xff] }
 0x284   : > { %v6755_v56 = vpop.f32.mrf.mxu0  ;;  %2752 = vmatprep.mubr.f32.mxu0 %v7918_v29  ;;  %v6780_v63 = vpop.f32.mrf.mxu1  ;;  %2865 = vmatprep.mubr.f32.mxu1 %v7918_v29  ;;  %v6882_v42 = vadd.f32 %v6652_v52, %v7961_v24  ;;  %v6887_v53 = vadd.f32 %v6654_v6, %v7961_v24  ;;  %v6891_v14 = vadd.f32 %v6657_v21, %v7962_v12  ;;  %v6902_v52 = vld [vmem:[%s7522_s5 + $0x38] sm:$0xff] }
 0x285   : > { %v6895_v16 = vadd.f32 %v6666_v58, %v7962_v12  ;;  %7963 = vst [vmem:[#allocation12_spill] sm:$0xff] %v6902_v52  ;;  %v6906_v6 = vadd.f32 %v6669_v23, %v7962_v12  ;;  %v6910_v21 = vadd.f32 %v6671_v22, %v7962_v12  ;;  %v7964_v58 = vld [vmem:[#allocation35_spill] sm:$0xff]  ;;  %v6917_v62 = vadd.f32 %v6678_v41, %v7966_v35 }
 0x286   : > { %v2170_v50 = vpop.f32.mrf.mxu0  ;;  %v2331_v40 = vpop.f32.mrf.mxu1  ;;  %v6924_v22 = vadd.f32 %v6722_v1, %v7966_v35 }
 0x287   : > { %2753 = vmatmul.mubr.f32.gmra.mxu0 %v6762_v4  ;;  %2866 = vmatmul.mubr.f32.gmra.mxu1 %v6762_v4  ;;  %v6849_v4 = vadd.f32 %v6618_v39, %v7959_v48 }
 0x288   : > { %v2174_v26 = vpop.f32.mrf.mxu0  ;;  %2758 = vmatprep.mubr.f32.mxu0 %v7918_v29  ;;  %v2335_v46 = vpop.f32.mrf.mxu1  ;;  %2871 = vmatprep.mubr.f32.mxu1 %v7918_v29  ;;  %v2447_v57 = vmul.f32 0.02, %v6924_v22 }
 0x289   : > { %v2175_v15 = vadd.f32 %v2174_v26, %v7964_v58 }
 0x28a   : > { %v2176_v39 = vpop.f32.mrf.mxu0  ;;  %v2337_v48 = vpop.f32.mrf.mxu1 }
 0x28b   : > { %2759 = vmatmul.mubr.f32.gmra.mxu0 %v6833_v34  ;;  %2872 = vmatmul.mubr.f32.gmra.mxu1 %v6833_v34  ;;  %v2177_v24 = vadd.f32 %v2176_v39, %v7964_v58  ;;  %v2338_v23 = vadd.f32 %v2337_v48, %v7964_v58  ;;  %v7967_v39 = vld [vmem:[#allocation34_spill] sm:$0xff] }
 0x28c   : > { %v2180_v37 = vpop.f32.mrf.mxu0  ;;  %2764 = vmatprep.mubr.f32.mxu0 %v7918_v29  ;;  %v2341_v34 = vpop.f32.mrf.mxu1  ;;  %2877 = vmatprep.mubr.f32.mxu1 %v7918_v29  ;;  %v2171_v12 = vadd.f32 %v2170_v50, %v7967_v39  ;;  %v2169_v41 = vadd.f32 %v6755_v56, %v7967_v39  ;;  %v2332_v26 = vadd.f32 %v2331_v40, %v7967_v39 }
 0x28d   : > { %v2181_v28 = vadd.f32 %v2180_v37, %v7965_v59  ;;  %v2342_v44 = vadd.f32 %v2341_v34, %v7965_v59  ;;  %v2336_v37 = vadd.f32 %v2335_v46, %v7964_v58  ;;  %v2330_v46 = vadd.f32 %v6780_v63, %v7967_v39 }
 0x28e   : > { %v2182_v36 = vpop.f32.mrf.mxu0  ;;  %v2343_v3 = vpop.f32.mrf.mxu1  ;;  %v2463_v1 = vmul.f32 0.02, %v2177_v24  ;;  %v2326_v56 = vadd.f32 %v6740_v10, %v7966_v35  ;;  %v2462_v58 = vmul.f32 0.02, %v2175_v15  ;;  %v2465_v40 = vmul.f32 0.02, %v2338_v23 }
 0x28f   : > { %v2183_v32 = vadd.f32 %v2182_v36, %v7965_v59  ;;  %2765 = vmatmul.mubr.f32.gmra.mxu0 %v6902_v52  ;;  %v2470_v34 = vmul.f32 0.02, %v2181_v28  ;;  %v2344_v48 = vadd.f32 %v2343_v3, %v7965_v59  ;;  %2878 = vmatmul.mubr.f32.gmra.mxu1 %v6902_v52  ;;  %v2472_v36 = vmul.f32 0.02, %v2342_v44 }
 0x290   : > { %2948 = vmatprep.mubr.f32.mxu0 %v7918_v29  ;;  %3061 = vmatprep.mubr.f32.mxu1 %v7918_v29  ;;  %v2324_v59 = vadd.f32 %v6703_v20, %v7966_v35  ;;  %v2455_v3 = vmul.f32 0.02, %v2171_v12  ;;  %v2464_v52 = vmul.f32 0.02, %v2336_v37  ;;  %v2454_v45 = vmul.f32 0.02, %v2169_v41 }
 0x291   : > { %v2471_v50 = vmul.f32 0.02, %v2183_v32  ;;  %v2473_v7 = vmul.f32 0.02, %v2344_v48  ;;  %v2457_v8 = vmul.f32 0.02, %v2332_v26  ;;  %v2598_v63 = vmax.f32 %v2181_v28, %v2470_v34 }
 0x292   : > { %v2456_v54 = vmul.f32 0.02, %v2330_v46  ;;  %v2591_v29 = vmax.f32 %v2177_v24, %v2463_v1  ;;  %v2600_v43 = vmax.f32 %v2342_v44, %v2472_v36  ;;  %v2446_v10 = vmul.f32 0.02, %v6917_v62 }
 0x293   : > { %v2599_v13 = vmax.f32 %v2183_v32, %v2471_v50  ;;  %v2601_v39 = vmax.f32 %v2344_v48, %v2473_v7  ;;  %v2449_v55 = vmul.f32 0.02, %v2326_v56  ;;  %v2590_v2 = vmax.f32 %v2175_v15, %v2462_v58 }
 0x294   : > { %v2593_v51 = vmax.f32 %v2338_v23, %v2465_v40  ;;  %v2439_v20 = vmul.f32 0.02, %v6906_v6  ;;  %v2448_v35 = vmul.f32 0.02, %v2324_v59  ;;  %v2583_v32 = vmax.f32 %v2171_v12, %v2455_v3 }
 0x295   : > { %2884 = vmatprep.subr.mxu0 %v2599_v13  ;;  %2997 = vmatprep.subr.mxu1 %v2601_v39  ;;  %v2592_v50 = vmax.f32 %v2336_v37, %v2464_v52  ;;  %v2438_v28 = vmul.f32 0.02, %v6891_v14  ;;  %v2441_v7 = vmul.f32 0.02, %v6910_v21  ;;  %v2582_v44 = vmax.f32 %v2169_v41, %v2454_v45  ;;  %v7968_v39 = vld [vmem:[#allocation19_spill] sm:$0xff] }
 0x296   : > { %2885 = vmatpush1.msra.mxu0 %v2598_v63  ;;  %2998 = vmatpush1.msra.mxu1 %v2600_v43  ;;  %v2585_v13 = vmax.f32 %v2332_v26, %v2457_v8  ;;  %v2431_v15 = vmul.f32 0.02, %v6882_v42  ;;  %v2440_v24 = vmul.f32 0.02, %v6895_v16  ;;  %v2575_v23 = vmax.f32 %v6924_v22, %v2447_v57 }
 0x297   : > { %2886 = vmatprep.subr.mxu0 %v2591_v29  ;;  %2999 = vmatprep.subr.mxu1 %v2593_v51  ;;  %v2584_v34 = vmax.f32 %v2330_v46, %v2456_v54  ;;  %v2430_v43 = vmul.f32 0.02, %v6874_v17  ;;  %v2433_v29 = vmul.f32 0.02, %v6887_v53  ;;  %v2574_v52 = vmax.f32 %v6917_v62, %v2446_v10 }
 0x298   : > { %2887 = vmatpush1.msra.mxu0 %v2590_v2  ;;  %3000 = vmatpush1.msra.mxu1 %v2592_v50  ;;  %v2577_v12 = vmax.f32 %v2326_v56, %v2449_v55  ;;  %v2423_v45 = vmul.f32 0.02, %v6866_v25  ;;  %v2432_v8 = vmul.f32 0.02, %v6878_v9  ;;  %v2567_v2 = vmax.f32 %v6906_v6, %v2439_v20  ;;  %v7969_v20 = vld [vmem:[#allocation51_spill] sm:$0xff] }
 0x299   : > { %2888 = vmatprep.subr.mxu0 %v2583_v32  ;;  %3001 = vmatprep.subr.mxu1 %v2585_v13  ;;  %v2576_v51 = vmax.f32 %v2324_v59, %v2448_v35  ;;  %v2422_v57 = vmul.f32 0.02, %v6858_v30  ;;  %v2425_v54 = vmul.f32 0.02, %v6870_v31  ;;  %v2566_v22 = vmax.f32 %v6891_v14, %v2438_v28  ;;  %v7970_v32 = vld [vmem:[#allocation15_spill] sm:$0xff]  ;;  %v7971_v28 = vld [vmem:[#allocation50_spill] sm:$0xff] }
 0x29a   : > { %2889 = vmatpush1.msra.mxu0 %v2582_v44  ;;  %3002 = vmatpush1.msra.mxu1 %v2584_v34  ;;  %v2569_v62 = vmax.f32 %v6910_v21, %v2441_v7  ;;  %v2415_v55 = vmul.f32 0.02, %v6849_v4  ;;  %v2424_v37 = vmul.f32 0.02, %v6862_v33  ;;  %v2559_v41 = vmax.f32 %v6882_v42, %v2431_v15  ;;  %v7972_v44 = vld [vmem:[#allocation52_spill] sm:$0xff] }
 0x29b   : > { %2890 = vmatprep.subr.mxu0 %v2575_v23  ;;  %3003 = vmatprep.subr.mxu1 %v2577_v12  ;;  %v2568_v6 = vmax.f32 %v6895_v16, %v2440_v24  ;;  %v2414_v26 = vmul.f32 0.02, %v6841_v18  ;;  %v2417_v48 = vmul.f32 0.02, %v6854_v27  ;;  %v2558_v14 = vmax.f32 %v6874_v17, %v2430_v43  ;;  %v7973_v15 = vld [vmem:[#allocation48_spill] sm:$0xff]  ;;  %v7974_v23 = vld [vmem:[#allocation18_spill] sm:$0xff] }
 0x29c   : > { %2891 = vmatpush1.msra.mxu0 %v2574_v52  ;;  %3004 = vmatpush1.msra.mxu1 %v2576_v51  ;;  %v2561_v21 = vmax.f32 %v6887_v53, %v2433_v29  ;;  %v2407_v46 = vmul.f32 0.02, %v6826_v5  ;;  %v2416_v1 = vmul.f32 0.02, %v6845_v60  ;;  %v2551_v42 = vmax.f32 %v6866_v25, %v2423_v45  ;;  %v7975_v43 = vld [vmem:[#allocation23_spill] sm:$0xff]  ;;  %v7976_v52 = vld [vmem:[#allocation53_spill] sm:$0xff] }
 0x29d   : > { %2892 = vmatprep.subr.mxu0 %v2567_v2  ;;  %3005 = vmatprep.subr.mxu1 %v2569_v62  ;;  %v2560_v16 = vmax.f32 %v6878_v9, %v2432_v8  ;;  %v2406_v36 = vmul.f32 0.02, %v6818_v47  ;;  %v2409_v56 = vmul.f32 0.02, %v6837_v19  ;;  %v2550_v17 = vmax.f32 %v6858_v30, %v2422_v57  ;;  %v7977_v45 = vld [vmem:[#allocation21_spill] sm:$0xff]  ;;  %v7979_v57 = vld [vmem:[#allocation22_spill] sm:$0xff] }
 0x29e   : > { %2893 = vmatpush1.msra.mxu0 %v2566_v22  ;;  %3006 = vmatpush1.msra.mxu1 %v2568_v6  ;;  %v2553_v53 = vmax.f32 %v6870_v31, %v2425_v54  ;;  %v2399_v58 = vmul.f32 0.02, %v6809_v49  ;;  %v2408_v40 = vmul.f32 0.02, %v6822_v61  ;;  %v2543_v25 = vmax.f32 %v6849_v4, %v2415_v55  ;;  %v7978_v2 = vld [vmem:[#allocation49_spill] sm:$0xff]  ;;  %v7980_v22 = vld [vmem:[#allocation47_spill] sm:$0xff] }
 0x29f   : > { %2894 = vmatprep.subr.mxu0 %v2559_v41  ;;  %3007 = vmatprep.subr.mxu1 %v2561_v21  ;;  %v2552_v9 = vmax.f32 %v6862_v33, %v2424_v37  ;;  %v2398_v59 = vmul.f32 0.02, %v6801_v11  ;;  %v2401_v3 = vmul.f32 0.02, %v6813_v0  ;;  %v2542_v30 = vmax.f32 %v6841_v18, %v2414_v26  ;;  %v7981_v37 = vld [vmem:[#allocation46_spill] sm:$0xff]  ;;  %v7982_v6 = vld [vmem:[#allocation45_spill] sm:$0xff] }
 0x2a0   : > { %2895 = vmatpush1.msra.mxu0 %v2558_v14  ;;  %3008 = vmatpush1.msra.mxu1 %v2560_v16  ;;  %v2545_v31 = vmax.f32 %v6854_v27, %v2417_v48  ;;  %v2391_v63 = vmul.f32 0.02, %v6793_v38  ;;  %v2400_v10 = vmul.f32 0.02, %v7968_v39  ;;  %v2535_v4 = vmax.f32 %v6826_v5, %v2407_v46  ;;  %v7983_v21 = vld [vmem:[#allocation11_spill] sm:$0xff] }
 0x2a1   : > { %2896 = vmatprep.subr.mxu0 %v2551_v42  ;;  %3009 = vmatprep.subr.mxu1 %v2553_v53  ;;  %v2544_v33 = vmax.f32 %v6845_v60, %v2416_v1  ;;  %v2390_v35 = vmul.f32 0.02, %v7969_v20  ;;  %v2393_v50 = vmul.f32 0.02, %v7970_v32  ;;  %v2534_v18 = vmax.f32 %v6818_v47, %v2406_v36  ;;  %v7984_v1 = vld [vmem:[#allocation37_spill] sm:$0xff]  ;;  %v7986_v53 = vld [vmem:[#allocation10_spill] sm:$0xff] }
 0x2a2   : > { %2897 = vmatpush1.msra.mxu0 %v2550_v17  ;;  %3010 = vmatpush1.msra.mxu1 %v2552_v9  ;;  %v2537_v27 = vmax.f32 %v6837_v19, %v2409_v56  ;;  %v2383_v7 = vmul.f32 0.02, %v7971_v28  ;;  %v2392_v13 = vmul.f32 0.02, %v7972_v44  ;;  %v2527_v5 = vmax.f32 %v6809_v49, %v2399_v58  ;;  %v7985_v56 = vld [vmem:[#allocation20_spill] sm:$0xff]  ;;  %v7987_v9 = vld [vmem:[#allocation6_spill] sm:$0xff] }
 0x2a3   : > { %2898 = vmatprep.subr.mxu0 %v2543_v25  ;;  %3011 = vmatprep.subr.mxu1 %v2545_v31  ;;  %v2536_v60 = vmax.f32 %v6822_v61, %v2408_v40  ;;  %v2382_v24 = vmul.f32 0.02, %v7973_v15  ;;  %v2385_v34 = vmul.f32 0.02, %v7974_v23  ;;  %v2526_v47 = vmax.f32 %v6801_v11, %v2398_v59 }
 0x2a4   : > { %2899 = vmatpush1.msra.mxu0 %v2542_v30  ;;  %3012 = vmatpush1.msra.mxu1 %v2544_v33  ;;  %v2529_v19 = vmax.f32 %v6813_v0, %v2401_v3  ;;  %v2375_v29 = vmul.f32 0.02, %v7975_v43  ;;  %v2384_v12 = vmul.f32 0.02, %v7976_v52  ;;  %v2519_v49 = vmax.f32 %v6793_v38, %v2391_v63  ;;  %v7988_v3 = vld [vmem:[#allocation14_spill] sm:$0xff] }
 0x2a5   : > { %2900 = vmatprep.subr.mxu0 %v2535_v4  ;;  %3013 = vmatprep.subr.mxu1 %v2537_v27  ;;  %v2528_v61 = vmax.f32 %v7968_v39, %v2400_v10  ;;  %v2374_v8 = vmul.f32 0.02, %v7977_v45  ;;  %v2377_v51 = vmul.f32 0.02, %v7978_v2  ;;  %v2518_v11 = vmax.f32 %v7969_v20, %v2390_v35  ;;  %v7989_v39 = vld [vmem:[#allocation39_spill] sm:$0xff]  ;;  %v7990_v4 = vld [vmem:[#allocation8_spill] sm:$0xff] }
 0x2a6   : > { %2901 = vmatpush1.msra.mxu0 %v2534_v18  ;;  %3014 = vmatpush1.msra.mxu1 %v2536_v60  ;;  %v2521_v0 = vmax.f32 %v7970_v32, %v2393_v50  ;;  %v2367_v54 = vmul.f32 0.02, %v7979_v57  ;;  %v2376_v62 = vmul.f32 0.02, %v7980_v22  ;;  %v2511_v38 = vmax.f32 %v7971_v28, %v2383_v7  ;;  %v7991_v32 = vld [vmem:[#allocation25_spill] sm:$0xff] }
 0x2a7   : > { %2902 = vmatprep.subr.mxu0 %v2527_v5  ;;  %3015 = vmatprep.subr.mxu1 %v2529_v19  ;;  %v2520_v55 = vmax.f32 %v7972_v44, %v2392_v13  ;;  %v2366_v41 = vmul.f32 0.02, %v7981_v37  ;;  %v2369_v26 = vmul.f32 0.02, %v7982_v6  ;;  %v2510_v48 = vmax.f32 %v7973_v15, %v2382_v24  ;;  %v7992_v24 = vld [vmem:[#allocation41_spill] sm:$0xff]  ;;  %v7996_v19 = vld [vmem:[#allocation38_spill] sm:$0xff] }
 0x2a8   : > { %2903 = vmatpush1.msra.mxu0 %v2526_v47  ;;  %3016 = vmatpush1.msra.mxu1 %v2528_v61  ;;  %v2513_v14 = vmax.f32 %v7974_v23, %v2385_v34  ;;  %v2359_v46 = vmul.f32 0.02, %v7983_v21  ;;  %v2368_v42 = vmul.f32 0.02, %v7984_v1  ;;  %v2503_v16 = vmax.f32 %v7975_v43, %v2375_v29  ;;  %v7994_v34 = vld [vmem:[#allocation42_spill] sm:$0xff]  ;;  %v7995_v47 = vld [vmem:[#allocation40_spill] sm:$0xff] }
 0x2a9   : > { %2904 = vmatprep.subr.mxu0 %v2519_v49  ;;  %3017 = vmatprep.subr.mxu1 %v2521_v0  ;;  %v2512_v36 = vmax.f32 %v7976_v52, %v2384_v12  ;;  %v2358_v17 = vmul.f32 0.02, %v7985_v56  ;;  %v2361_v58 = vmul.f32 0.02, %v7986_v53  ;;  %v2502_v40 = vmax.f32 %v7977_v45, %v2374_v8  ;;  %v7997_v43 = vld [vmem:[#allocation5_spill] sm:$0xff]  ;;  %v7999_v52 = vld [vmem:[#allocation54_spill] sm:$0xff] }
 0x2aa   : > { %2905 = vmatpush1.msra.mxu0 %v2518_v11  ;;  %3018 = vmatpush1.msra.mxu1 %v2520_v55  ;;  %v2505_v25 = vmax.f32 %v7978_v2, %v2377_v51  ;;  %v2351_v59 = vmul.f32 0.02, %v7987_v9  ;;  %v2360_v30 = vmul.f32 0.02, %v7988_v3  ;;  %v2495_v31 = vmax.f32 %v7979_v57, %v2367_v54  ;;  %v7998_v29 = vld [vmem:[#allocation17_spill] sm:$0xff]  ;;  %v8000_v12 = vld [vmem:[#allocation12_spill] sm:$0xff]  ;;  %v7075_v11 = vpop.permute.xlu1 %2650  ;;  %v7077_v57 = vpop.permute.xlu0 %2655 }
 0x2ab   : > { %2906 = vmatprep.subr.mxu0 %v2511_v38  ;;  %3019 = vmatprep.subr.mxu1 %v2513_v14  ;;  %v2504_v63 = vmax.f32 %v7980_v22, %v2376_v62  ;;  %v2350_v10 = vmul.f32 0.02, %v7989_v39  ;;  %v2353_v33 = vmul.f32 0.02, %v7990_v4  ;;  %v2494_v20 = vmax.f32 %v7981_v37, %v2366_v41 }
 0x2ac   : > { %2907 = vmatpush1.msra.mxu0 %v2510_v48  ;;  %3020 = vmatpush1.msra.mxu1 %v2512_v36  ;;  %v2497_v35 = vmax.f32 %v7982_v6, %v2369_v26  ;;  %v2352_v50 = vmul.f32 0.02, %v7991_v32  ;;  %v2487_v18 = vmax.f32 %v7983_v21, %v2359_v46  ;;  %v2496_v27 = vmax.f32 %v7984_v1, %v2368_v42 }
 0x2ad   : > { %2908 = vmatprep.subr.mxu0 %v2503_v16  ;;  %3021 = vmatprep.subr.mxu1 %v2505_v25  ;;  %v2486_v28 = vmax.f32 %v7985_v56, %v2358_v17  ;;  %v2489_v7 = vmax.f32 %v7986_v53, %v2361_v58  ;;  %v2479_v44 = vmax.f32 %v7987_v9, %v2351_v59  ;;  %v7993_v23 = vmov 0.0  }
 0x2ae   : > { %2909 = vmatpush1.msra.mxu0 %v2502_v40  ;;  %3022 = vmatpush1.msra.mxu1 %v2504_v63  ;;  %v2488_v13 = vmax.f32 %v7988_v3, %v2360_v30  ;;  %v2478_v5 = vmax.f32 %v7989_v39, %v2350_v10  ;;  %v2481_v60 = vmax.f32 %v7990_v4, %v2353_v33  ;;  %v7079_v37 = vpop.permute.xlu1 %2640  ;;  %v7081_v6 = vpop.permute.xlu0 %2645 }
 0x2af   : > { %2910 = vmatprep.subr.mxu0 %v2495_v31  ;;  %3023 = vmatprep.subr.mxu1 %v2497_v35  ;;  %v2480_v15 = vmax.f32 %v7991_v32, %v2352_v50  ;;  %8001 = vst [vmem:[#allocation13_spill] sm:$0xff] %v7081_v6 }
 0x2b0   : > { %2911 = vmatpush1.msra.mxu0 %v2494_v20  ;;  %3024 = vmatpush1.msra.mxu1 %v2496_v27 }
 0x2b1   : > { %2912 = vmatprep.subr.mxu0 %v2487_v18  ;;  %3025 = vmatprep.subr.mxu1 %v2489_v7 }
 0x2b2   : > { %2913 = vmatpush1.msra.mxu0 %v2486_v28  ;;  %3026 = vmatpush1.msra.mxu1 %v2488_v13  ;;  %v7083_v1 = vpop.permute.xlu1 %2630  ;;  %v7085_v16 = vpop.permute.xlu0 %2635 }
 0x2b3   : > { %2914 = vmatprep.subr.mxu0 %v2479_v44  ;;  %3027 = vmatprep.subr.mxu1 %v2481_v60 }
 0x2b4   : > { %2915 = vmatpush1.msra.mxu0 %v2478_v5  ;;  %3028 = vmatpush1.msra.mxu1 %v2480_v15 }
 0x2b5   : > { %2949 = vmatmul.mubr.f32.vlgmr.msra.gmra.mxu0 %v7992_v24  ;;  %3062 = vmatmul.mubr.f32.vlgmr.msra.gmra.mxu1 %v7992_v24 }
 0x2b6   : > { %2954 = vmatprep.mubr.f32.mxu0 %v7993_v23  ;;  %3067 = vmatprep.mubr.f32.mxu1 %v7993_v23  ;;  %v7087_v40 = vpop.permute.xlu1 %2620  ;;  %v7089_v9 = vpop.permute.xlu0 %2625 }
 0x2b9   : > { %2955 = vmatmul.mubr.f32.gmra.mxu0 %v7994_v34  ;;  %3068 = vmatmul.mubr.f32.gmra.mxu1 %v7994_v34 }
 0x2ba   : > { %2960 = vmatprep.mubr.f32.mxu0 %v7993_v23  ;;  %3073 = vmatprep.mubr.f32.mxu1 %v7993_v23 }
 0x2bd   : > { %2961 = vmatmul.mubr.f32.gmra.mxu0 %v7995_v47  ;;  %3074 = vmatmul.mubr.f32.gmra.mxu1 %v7995_v47 }
 0x2be   : > { %2966 = vmatprep.mubr.f32.mxu0 %v7993_v23  ;;  %3079 = vmatprep.mubr.f32.mxu1 %v7993_v23 }
 0x2c1   : > { %2967 = vmatmul.mubr.f32.gmra.mxu0 %v7996_v19  ;;  %3080 = vmatmul.mubr.f32.gmra.mxu1 %v7996_v19 }
 0x2c2   : > { %2972 = vmatprep.mubr.f32.mxu0 %v7993_v23  ;;  %3085 = vmatprep.mubr.f32.mxu1 %v7993_v23 }
 0x2c5   : > { %2973 = vmatmul.mubr.f32.gmra.mxu0 %v7997_v43  ;;  %3086 = vmatmul.mubr.f32.gmra.mxu1 %v7997_v43 }
 0x2c6   : > { %2978 = vmatprep.mubr.f32.mxu0 %v7993_v23  ;;  %3091 = vmatprep.mubr.f32.mxu1 %v7993_v23 }
 0x2c9   : > { %2979 = vmatmul.mubr.f32.gmra.mxu0 %v7998_v29  ;;  %3092 = vmatmul.mubr.f32.gmra.mxu1 %v7998_v29 }
 0x2ca   : > { %2984 = vmatprep.mubr.f32.mxu0 %v7993_v23  ;;  %3097 = vmatprep.mubr.f32.mxu1 %v7993_v23 }
 0x2cd   : > { %2985 = vmatmul.mubr.f32.gmra.mxu0 %v7999_v52  ;;  %3098 = vmatmul.mubr.f32.gmra.mxu1 %v7999_v52 }
 0x2ce   : > { %2990 = vmatprep.mubr.f32.mxu0 %v7993_v23  ;;  %3103 = vmatprep.mubr.f32.mxu1 %v7993_v23 }
 0x2d1   : > { %2991 = vmatmul.mubr.f32.gmra.mxu0 %v8000_v12  ;;  %3104 = vmatmul.mubr.f32.gmra.mxu1 %v8000_v12 }
 0x2d2   : > { %3343 = vmatprep.mubr.f32.mxu0 %v7993_v23  ;;  %3432 = vmatprep.mubr.f32.mxu1 %v7993_v23 }
 0x333   : > { %v2724_v49 = vpop.f32.mrf.mxu0  ;;  %v2837_v61 = vpop.f32.mrf.mxu1 }
 0x334   : > { %v7092_v59 = vadd.f32 %v2724_v49, %v7087_v40  ;;  %v7095_v3 = vadd.f32 %v2837_v61, %v7087_v40 }
 0x335   : > { %v2726_v45 = vpop.f32.mrf.mxu0  ;;  %v2839_v8 = vpop.f32.mrf.mxu1 }
 0x336   : > { %v7098_v31 = vadd.f32 %v2726_v45, %v7087_v40  ;;  %v7101_v63 = vadd.f32 %v2839_v8, %v7087_v40 }
 0x337   : > { %v2730_v2 = vpop.f32.mrf.mxu0  ;;  %v2843_v51 = vpop.f32.mrf.mxu1 }
 0x338   : > { %v7104_v39 = vadd.f32 %v2730_v2, %v7089_v9  ;;  %v7107_v10 = vadd.f32 %v2843_v51, %v7089_v9 }
 0x339   : > { %v2732_v0 = vpop.f32.mrf.mxu0  ;;  %v2845_v54 = vpop.f32.mrf.mxu1 }
 0x33a   : > { %v7110_v33 = vadd.f32 %v2732_v0, %v7089_v9  ;;  %v7113_v20 = vadd.f32 %v2845_v54, %v7089_v9 }
 0x33b   : > { %v2736_v22 = vpop.f32.mrf.mxu0  ;;  %v2849_v62 = vpop.f32.mrf.mxu1 }
 0x33c   : > { %v7116_v35 = vadd.f32 %v2736_v22, %v7083_v1  ;;  %v7119_v32 = vadd.f32 %v2849_v62, %v7083_v1 }
 0x33d   : > { %v2738_v38 = vpop.f32.mrf.mxu0  ;;  %v2851_v55 = vpop.f32.mrf.mxu1 }
 0x33e   : > { %v7122_v18 = vadd.f32 %v2738_v38, %v7083_v1  ;;  %v7125_v27 = vadd.f32 %v2851_v55, %v7083_v1 }
 0x33f   : > { %v2742_v41 = vpop.f32.mrf.mxu0  ;;  %v2855_v26 = vpop.f32.mrf.mxu1 }
 0x340   : > { %v7128_v28 = vadd.f32 %v2742_v41, %v7085_v16  ;;  %v7131_v7 = vadd.f32 %v2855_v26, %v7085_v16 }
 0x341   : > { %v2744_v48 = vpop.f32.mrf.mxu0  ;;  %v2857_v14 = vpop.f32.mrf.mxu1 }
 0x342   : > { %v7134_v13 = vadd.f32 %v2744_v48, %v7085_v16  ;;  %v7137_v5 = vadd.f32 %v2857_v14, %v7085_v16 }
 0x343   : > { %v2748_v21 = vpop.f32.mrf.mxu0  ;;  %v2861_v46 = vpop.f32.mrf.mxu1 }
 0x344   : > { %v7142_v34 = vadd.f32 %v2748_v21, %v7079_v37  ;;  %v2862_v14 = vadd.f32 %v2861_v46, %v7079_v37  ;;  %v3135_v46 = vmul.f32 0.02, %v7134_v13 }
 0x345   : > { %v2750_v42 = vpop.f32.mrf.mxu0  ;;  %v2863_v36 = vpop.f32.mrf.mxu1 }
 0x346   : > { %v7148_v52 = vadd.f32 %v2750_v42, %v7079_v37  ;;  %v2864_v55 = vadd.f32 %v2863_v36, %v7079_v37  ;;  %v3142_v36 = vmul.f32 0.02, %v7142_v34 }
 0x347   : > { %v2754_v56 = vpop.f32.mrf.mxu0  ;;  %v2867_v17 = vpop.f32.mrf.mxu1 }
 0x348   : > { %v2755_v8 = vadd.f32 %v2754_v56, %v7081_v6  ;;  %v2868_v54 = vadd.f32 %v2867_v17, %v7081_v6 }
 0x349   : > { %v2756_v53 = vpop.f32.mrf.mxu0  ;;  %v2869_v58 = vpop.f32.mrf.mxu1 }
 0x34a   : > { %v2757_v12 = vadd.f32 %v2756_v53, %v7081_v6  ;;  %v2870_v2 = vadd.f32 %v2869_v58, %v7081_v6  ;;  %v3150_v53 = vmul.f32 0.02, %v2755_v8  ;;  %v3152_v17 = vmul.f32 0.02, %v2868_v54 }
 0x34b   : > { %v2760_v25 = vpop.f32.mrf.mxu0  ;;  %v2873_v30 = vpop.f32.mrf.mxu1 }
 0x34c   : > { %v2761_v47 = vadd.f32 %v2760_v25, %v7075_v11  ;;  %v2874_v49 = vadd.f32 %v2873_v30, %v7075_v11  ;;  %v3151_v21 = vmul.f32 0.02, %v2757_v12  ;;  %v3153_v58 = vmul.f32 0.02, %v2870_v2 }
 0x34d   : > { %v2762_v4 = vpop.f32.mrf.mxu0  ;;  %v2875_v50 = vpop.f32.mrf.mxu1 }
 0x34e   : > { %v2763_v60 = vadd.f32 %v2762_v4, %v7075_v11  ;;  %v2876_v19 = vadd.f32 %v2875_v50, %v7075_v11  ;;  %v3158_v41 = vmul.f32 0.02, %v2761_v47  ;;  %v3160_v42 = vmul.f32 0.02, %v2874_v49 }
 0x34f   : > { %v2766_v44 = vpop.f32.mrf.mxu0  ;;  %v2879_v24 = vpop.f32.mrf.mxu1  ;;  %v3143_v4 = vmul.f32 0.02, %v7148_v52 }
 0x350   : > { %v2767_v15 = vadd.f32 %v2766_v44, %v7077_v57  ;;  %v2880_v43 = vadd.f32 %v2879_v24, %v7077_v57  ;;  %v3159_v22 = vmul.f32 0.02, %v2763_v60  ;;  %v3161_v26 = vmul.f32 0.02, %v2876_v19 }
 0x351   : > { %v2768_v29 = vpop.f32.mrf.mxu0  ;;  %v2881_v45 = vpop.f32.mrf.mxu1  ;;  %v3145_v24 = vmul.f32 0.02, %v2864_v55  ;;  %v3224_v6 = vmax.f32 %v2874_v49, %v3160_v42  ;;  %v3129_v49 = vmul.f32 0.02, %v7125_v27 }
 0x352   : > { %v2769_v61 = vadd.f32 %v2768_v29, %v7077_v57  ;;  %v3166_v51 = vmul.f32 0.02, %v2767_v15  ;;  %v2882_v0 = vadd.f32 %v2881_v45, %v7077_v57  ;;  %v3168_v62 = vmul.f32 0.02, %v2880_v43 }
 0x353   : > { %v3223_v50 = vmax.f32 %v2763_v60, %v3159_v22  ;;  %v3222_v29 = vmax.f32 %v2761_v47, %v3158_v41  ;;  %v3225_v45 = vmax.f32 %v2876_v19, %v3161_v26  ;;  %v3137_v60 = vmul.f32 0.02, %v7137_v5 }
 0x354   : > { %v3167_v38 = vmul.f32 0.02, %v2769_v61  ;;  %v3169_v48 = vmul.f32 0.02, %v2882_v0  ;;  %v3230_v25 = vmax.f32 %v2767_v15, %v3166_v51  ;;  %v3232_v44 = vmax.f32 %v2880_v43, %v3168_v62 }
 0x355   : > { %v3134_v15 = vmul.f32 0.02, %v7128_v28  ;;  %v3214_v43 = vmax.f32 %v2755_v8, %v3150_v53  ;;  %v3217_v51 = vmax.f32 %v2870_v2, %v3153_v58  ;;  %v3127_v47 = vmul.f32 0.02, %v7122_v18 }
 0x356   : > { %v3231_v56 = vmax.f32 %v2769_v61, %v3167_v38  ;;  %v3233_v30 = vmax.f32 %v2882_v0, %v3169_v48  ;;  %v3144_v61 = vmul.f32 0.02, %v2862_v14  ;;  %v3215_v38 = vmax.f32 %v2757_v12, %v3151_v21 }
 0x357   : > { %v3136_v19 = vmul.f32 0.02, %v7131_v7  ;;  %v3207_v0 = vmax.f32 %v7148_v52, %v3143_v4  ;;  %v3216_v22 = vmax.f32 %v2868_v54, %v3152_v17  ;;  %v3126_v12 = vmul.f32 0.02, %v7116_v35 }
 0x358   : > { %3295 = vmatprep.subr.mxu0 %v3231_v56  ;;  %3384 = vmatprep.subr.mxu1 %v3233_v30  ;;  %v3206_v62 = vmax.f32 %v7142_v34, %v3142_v36  ;;  %v3209_v41 = vmax.f32 %v2864_v55, %v3145_v24  ;;  %v3119_v8 = vmul.f32 0.02, %v7110_v33  ;;  %v3128_v2 = vmul.f32 0.02, %v7119_v32 }
 0x359   : > { %3296 = vmatpush1.msra.mxu0 %v3230_v25  ;;  %3385 = vmatpush1.msra.mxu1 %v3232_v44  ;;  %v3199_v26 = vmax.f32 %v7134_v13, %v3135_v46  ;;  %v3208_v48 = vmax.f32 %v2862_v14, %v3144_v61  ;;  %v3121_v52 = vmul.f32 0.02, %v7113_v20  ;;  %v3198_v54 = vmax.f32 %v7128_v28, %v3134_v15 }
 0x35a   : > { %3297 = vmatprep.subr.mxu0 %v3223_v50  ;;  %3386 = vmatprep.subr.mxu1 %v3225_v45  ;;  %v3201_v34 = vmax.f32 %v7137_v5, %v3137_v60  ;;  %v3111_v55 = vmul.f32 0.02, %v7098_v31  ;;  %v3120_v21 = vmul.f32 0.02, %v7107_v10  ;;  %v3191_v42 = vmax.f32 %v7122_v18, %v3127_v47 }
 0x35b   : > { %3298 = vmatpush1.msra.mxu0 %v3222_v29  ;;  %3387 = vmatpush1.msra.mxu1 %v3224_v6  ;;  %v3118_v6 = vmul.f32 0.02, %v7104_v39  ;;  %v3200_v13 = vmax.f32 %v7131_v7, %v3136_v19  ;;  %v3110_v14 = vmul.f32 0.02, %v7092_v59  ;;  %v3113_v56 = vmul.f32 0.02, %v7101_v63 }
 0x35c   : > { %3299 = vmatprep.subr.mxu0 %v3215_v38  ;;  %3388 = vmatprep.subr.mxu1 %v3217_v51  ;;  %v3190_v28 = vmax.f32 %v7116_v35, %v3126_v12  ;;  %v3193_v5 = vmax.f32 %v7125_v27, %v3129_v49  ;;  %v3112_v53 = vmul.f32 0.02, %v7095_v3  ;;  %v3183_v58 = vmax.f32 %v7110_v33, %v3119_v8 }
 0x35d   : > { %3300 = vmatpush1.msra.mxu0 %v3214_v43  ;;  %3389 = vmatpush1.msra.mxu1 %v3216_v22  ;;  %v3192_v18 = vmax.f32 %v7119_v32, %v3128_v2  ;;  %v3182_v7 = vmax.f32 %v7104_v39, %v3118_v6  ;;  %v3185_v25 = vmax.f32 %v7113_v20, %v3121_v52  ;;  %v7197_v39 = vld [vmem:[%s7524_s7] sm:$0xff] }
 0x35e   : > { %3301 = vmatprep.subr.mxu0 %v3207_v0  ;;  %3390 = vmatprep.subr.mxu1 %v3209_v41  ;;  %v3175_v35 = vmax.f32 %v7098_v31, %v3111_v55  ;;  %v3184_v27 = vmax.f32 %v7107_v10, %v3120_v21  ;;  %v3174_v30 = vmax.f32 %v7092_v59, %v3110_v14  ;;  %v7208_v59 = vld [vmem:[%s7524_s7 + $0x8] sm:$0xff]  ;;  %v7230_v31 = vld [vmem:[%s7524_s7 + $0x18] sm:$0xff] }
 0x35f   : > { %3302 = vmatpush1.msra.mxu0 %v3206_v62  ;;  %3391 = vmatpush1.msra.mxu1 %v3208_v48  ;;  %v3177_v33 = vmax.f32 %v7101_v63, %v3113_v56  ;;  %v3176_v20 = vmax.f32 %v7095_v3, %v3112_v53  ;;  %v7219_v3 = vld [vmem:[%s7524_s7 + $0x10] sm:$0xff] }
 0x360   : > { %3303 = vmatprep.subr.mxu0 %v3199_v26  ;;  %3392 = vmatprep.subr.mxu1 %v3201_v34 }
 0x361   : > { %3304 = vmatpush1.msra.mxu0 %v3198_v54  ;;  %3393 = vmatpush1.msra.mxu1 %v3200_v13 }
 0x362   : > { %3305 = vmatprep.subr.mxu0 %v3191_v42  ;;  %3394 = vmatprep.subr.mxu1 %v3193_v5 }
 0x363   : > { %3306 = vmatpush1.msra.mxu0 %v3190_v28  ;;  %3395 = vmatpush1.msra.mxu1 %v3192_v18 }
 0x364   : > { %3307 = vmatprep.subr.mxu0 %v3183_v58  ;;  %3396 = vmatprep.subr.mxu1 %v3185_v25 }
 0x365   : > { %3308 = vmatpush1.msra.mxu0 %v3182_v7  ;;  %3397 = vmatpush1.msra.mxu1 %v3184_v27 }
 0x366   : > { %3309 = vmatprep.subr.mxu0 %v3175_v35  ;;  %3398 = vmatprep.subr.mxu1 %v3177_v33 }
 0x367   : > { %3310 = vmatpush1.msra.mxu0 %v3174_v30  ;;  %3399 = vmatpush1.msra.mxu1 %v3176_v20 }
 0x368   : > { %4425 = vmatmul.mubr.msk.f32.vlgmr.msra.gmra.mxu0 %vm3266_vm2, %v7197_v39  ;;  %4429 = vmatmul.mubr.msk.f32.vlgmr.msra.gmra.mxu1 %vm3266_vm2, %v7197_v39 }
 0x369   : > { %3349 = vmatprep.mubr.f32.mxu0 %v7993_v23  ;;  %3438 = vmatprep.mubr.f32.mxu1 %v7993_v23 }
 0x36c   : > { %4426 = vmatmul.mubr.msk.f32.gmra.mxu0 %vm3266_vm2, %v7208_v59  ;;  %4430 = vmatmul.mubr.msk.f32.gmra.mxu1 %vm3266_vm2, %v7208_v59 }
 0x36d   : > { %3355 = vmatprep.mubr.f32.mxu0 %v7993_v23  ;;  %3444 = vmatprep.mubr.f32.mxu1 %v7993_v23 }
 0x370   : > { %4427 = vmatmul.mubr.msk.f32.gmra.mxu0 %vm3266_vm2, %v7219_v3  ;;  %4431 = vmatmul.mubr.msk.f32.gmra.mxu1 %vm3266_vm2, %v7219_v3 }
 0x371   : > { %3361 = vmatprep.mubr.f32.mxu0 %v7993_v23  ;;  %3450 = vmatprep.mubr.f32.mxu1 %v7993_v23 }
 0x374   : > { %4428 = vmatmul.mubr.msk.f32.gmra.mxu0 %vm3266_vm2, %v7230_v31  ;;  %4432 = vmatmul.mubr.msk.f32.gmra.mxu1 %vm3266_vm2, %v7230_v31 }
 0x375   : > { %v2950_v63 = vpop.f32.mrf.mxu0  ;;  %3521 = vmatprep.mubr.f32.mxu0 %v7993_v23  ;;  %v3063_v10 = vpop.f32.mrf.mxu1  ;;  %3610 = vmatprep.mubr.f32.mxu1 %v7993_v23 }
 0x376   : > { %v7240_v41 = vadd.f32 %v2950_v63, %v7087_v40  ;;  %v7243_v8 = vadd.f32 %v3063_v10, %v7087_v40 }
 0x377   : > { %v2952_v32 = vpop.f32.mrf.mxu0  ;;  %v3065_v4 = vpop.f32.mrf.mxu1 }
 0x378   : > { %v7246_v26 = vadd.f32 %v2952_v32, %v7087_v40  ;;  %v7249_v48 = vadd.f32 %v3065_v4, %v7087_v40 }
 0x379   : > { %v2956_v17 = vpop.f32.mrf.mxu0  ;;  %v3069_v50 = vpop.f32.mrf.mxu1 }
 0x37a   : > { %v7252_v6 = vadd.f32 %v2956_v17, %v7089_v9  ;;  %v7255_v52 = vadd.f32 %v3069_v50, %v7089_v9 }
 0x37b   : > { %v2958_v44 = vpop.f32.mrf.mxu0  ;;  %v3071_v36 = vpop.f32.mrf.mxu1 }
 0x37c   : > { %v7258_v34 = vadd.f32 %v2958_v44, %v7089_v9  ;;  %v7261_v55 = vadd.f32 %v3071_v36, %v7089_v9 }
 0x37d   : > { %v2962_v24 = vpop.f32.mrf.mxu0  ;;  %v3075_v29 = vpop.f32.mrf.mxu1 }
 0x37e   : > { %v7264_v21 = vadd.f32 %v2962_v24, %v7083_v1  ;;  %v7267_v42 = vadd.f32 %v3075_v29, %v7083_v1 }
 0x37f   : > { %v2964_v45 = vpop.f32.mrf.mxu0  ;;  %v3077_v46 = vpop.f32.mrf.mxu1 }
 0x380   : > { %v7270_v13 = vadd.f32 %v2964_v45, %v7083_v1  ;;  %v7273_v14 = vadd.f32 %v3077_v46, %v7083_v1 }
 0x381   : > { %v2968_v61 = vpop.f32.mrf.mxu0  ;;  %v3081_v38 = vpop.f32.mrf.mxu1 }
 0x382   : > { %v7276_v56 = vadd.f32 %v2968_v61, %v7085_v16  ;;  %v7279_v28 = vadd.f32 %v3081_v38, %v7085_v16 }
 0x383   : > { %v2970_v15 = vpop.f32.mrf.mxu0  ;;  %v3083_v60 = vpop.f32.mrf.mxu1 }
 0x384   : > { %v7282_v5 = vadd.f32 %v2970_v15, %v7085_v16  ;;  %v7285_v53 = vadd.f32 %v3083_v60, %v7085_v16  ;;  %v8002_v16 = vld [vmem:[#allocation13_spill] sm:$0xff] }
 0x385   : > { %v2974_v43 = vpop.f32.mrf.mxu0  ;;  %v3087_v51 = vpop.f32.mrf.mxu1 }
 0x386   : > { %v7290_v1 = vadd.f32 %v2974_v43, %v7079_v37  ;;  %v3088_v15 = vadd.f32 %v3087_v51, %v7079_v37 }
 0x387   : > { %v2976_v47 = vpop.f32.mrf.mxu0  ;;  %v3089_v19 = vpop.f32.mrf.mxu1 }
 0x388   : > { %v7296_v33 = vadd.f32 %v2976_v47, %v7079_v37  ;;  %v3090_v46 = vadd.f32 %v3089_v19, %v7079_v37  ;;  %v3146_v19 = vmul.f32 0.02, %v7290_v1  ;;  %v3139_v37 = vmul.f32 0.02, %v7282_v5 }
 0x389   : > { %v2980_v0 = vpop.f32.mrf.mxu0  ;;  %v3093_v22 = vpop.f32.mrf.mxu1  ;;  %v3148_v51 = vmul.f32 0.02, %v3088_v15 }
 0x38a   : > { %v2981_v4 = vadd.f32 %v2980_v0, %v8002_v16  ;;  %v3094_v36 = vadd.f32 %v3093_v22, %v8002_v16 }
 0x38b   : > { %v2982_v12 = vpop.f32.mrf.mxu0  ;;  %v3095_v49 = vpop.f32.mrf.mxu1 }
 0x38c   : > { %v2983_v20 = vadd.f32 %v2982_v12, %v8002_v16  ;;  %v3096_v17 = vadd.f32 %v3095_v49, %v8002_v16  ;;  %v3154_v0 = vmul.f32 0.02, %v2981_v4  ;;  %v3156_v22 = vmul.f32 0.02, %v3094_v36 }
 0x38d   : > { %v2986_v62 = vpop.f32.mrf.mxu0  ;;  %v3099_v2 = vpop.f32.mrf.mxu1 }
 0x38e   : > { %v2987_v25 = vadd.f32 %v2986_v62, %v7075_v11  ;;  %v3100_v63 = vadd.f32 %v3099_v2, %v7075_v11  ;;  %v3155_v60 = vmul.f32 0.02, %v2983_v20  ;;  %v3157_v12 = vmul.f32 0.02, %v3096_v17 }
 0x38f   : > { %v2988_v54 = vpop.f32.mrf.mxu0  ;;  %v3101_v40 = vpop.f32.mrf.mxu1 }
 0x390   : > { %v2989_v58 = vadd.f32 %v2988_v54, %v7075_v11  ;;  %v3102_v35 = vadd.f32 %v3101_v40, %v7075_v11  ;;  %v3162_v61 = vmul.f32 0.02, %v2987_v25  ;;  %v3164_v43 = vmul.f32 0.02, %v3100_v63 }
 0x391   : > { %v2992_v9 = vpop.f32.mrf.mxu0  ;;  %v3105_v7 = vpop.f32.mrf.mxu1  ;;  %v3149_v40 = vmul.f32 0.02, %v3090_v46 }
 0x392   : > { %v2993_v18 = vadd.f32 %v2992_v9, %v7077_v57  ;;  %v3106_v27 = vadd.f32 %v3105_v7, %v7077_v57  ;;  %v3163_v24 = vmul.f32 0.02, %v2989_v58  ;;  %v3165_v38 = vmul.f32 0.02, %v3102_v35 }
 0x393   : > { %v2994_v30 = vpop.f32.mrf.mxu0  ;;  %v3107_v32 = vpop.f32.mrf.mxu1  ;;  %v3226_v9 = vmax.f32 %v2987_v25, %v3162_v61  ;;  %v3228_v16 = vmax.f32 %v3100_v63, %v3164_v43  ;;  %v3131_v25 = vmul.f32 0.02, %v7270_v13  ;;  %v3133_v63 = vmul.f32 0.02, %v7273_v14 }
 0x394   : > { %v2995_v10 = vadd.f32 %v2994_v30, %v7077_v57  ;;  %v3170_v50 = vmul.f32 0.02, %v2993_v18  ;;  %v3108_v44 = vadd.f32 %v3107_v32, %v7077_v57  ;;  %v3172_v29 = vmul.f32 0.02, %v3106_v27 }
 0x395   : > { %v3147_v57 = vmul.f32 0.02, %v7296_v33  ;;  %v3227_v2 = vmax.f32 %v2989_v58, %v3163_v24  ;;  %v3229_v7 = vmax.f32 %v3102_v35, %v3165_v38  ;;  %v3219_v30 = vmax.f32 %v2983_v20, %v3155_v60 }
 0x396   : > { %v3171_v45 = vmul.f32 0.02, %v2995_v10  ;;  %v3173_v11 = vmul.f32 0.02, %v3108_v44  ;;  %v3234_v49 = vmax.f32 %v2993_v18, %v3170_v50  ;;  %v3236_v54 = vmax.f32 %v3106_v27, %v3172_v29 }
 0x397   : > { %v3138_v18 = vmul.f32 0.02, %v7276_v56  ;;  %v3141_v58 = vmul.f32 0.02, %v7285_v53  ;;  %v3218_v27 = vmax.f32 %v2981_v4, %v3154_v0  ;;  %v3140_v35 = vmul.f32 0.02, %v7279_v28 }
 0x398   : > { %v3235_v47 = vmax.f32 %v2995_v10, %v3171_v45  ;;  %v3237_v62 = vmax.f32 %v3108_v44, %v3173_v11  ;;  %v3221_v10 = vmax.f32 %v3096_v17, %v3157_v12  ;;  %v3211_v32 = vmax.f32 %v7296_v33, %v3147_v57 }
 0x399   : > { %v3220_v50 = vmax.f32 %v3094_v36, %v3156_v22  ;;  %v3130_v20 = vmul.f32 0.02, %v7264_v21  ;;  %v3210_v44 = vmax.f32 %v7290_v1, %v3146_v19  ;;  %v3213_v24 = vmax.f32 %v3090_v46, %v3149_v40 }
 0x39a   : > { %3473 = vmatprep.subr.mxu0 %v3235_v47  ;;  %3562 = vmatprep.subr.mxu1 %v3237_v62  ;;  %v3123_v4 = vmul.f32 0.02, %v7258_v34  ;;  %v3132_v17 = vmul.f32 0.02, %v7267_v42  ;;  %v3203_v29 = vmax.f32 %v7282_v5, %v3139_v37  ;;  %v3212_v45 = vmax.f32 %v3088_v15, %v3148_v51 }
 0x39b   : > { %3474 = vmatpush1.msra.mxu0 %v3234_v49  ;;  %3563 = vmatpush1.msra.mxu1 %v3236_v54  ;;  %v3122_v33 = vmul.f32 0.02, %v7252_v6  ;;  %v3125_v36 = vmul.f32 0.02, %v7261_v55  ;;  %v3202_v61 = vmax.f32 %v7276_v56, %v3138_v18  ;;  %v3205_v1 = vmax.f32 %v7285_v53, %v3141_v58 }
 0x39c   : > { %3475 = vmatprep.subr.mxu0 %v3227_v2  ;;  %3564 = vmatprep.subr.mxu1 %v3229_v7  ;;  %v3115_v46 = vmul.f32 0.02, %v7246_v26  ;;  %v3124_v38 = vmul.f32 0.02, %v7255_v52  ;;  %v3195_v11 = vmax.f32 %v7270_v13, %v3131_v25  ;;  %v3204_v5 = vmax.f32 %v7279_v28, %v3140_v35 }
 0x39d   : > { %3476 = vmatpush1.msra.mxu0 %v3226_v9  ;;  %3565 = vmatpush1.msra.mxu1 %v3228_v16  ;;  %v3114_v15 = vmul.f32 0.02, %v7240_v41  ;;  %v3117_v60 = vmul.f32 0.02, %v7249_v48  ;;  %v3194_v56 = vmax.f32 %v7264_v21, %v3130_v20  ;;  %v3197_v53 = vmax.f32 %v7273_v14, %v3133_v63 }
 0x39e   : > { %3477 = vmatprep.subr.mxu0 %v3219_v30  ;;  %3566 = vmatprep.subr.mxu1 %v3221_v10  ;;  %v3116_v43 = vmul.f32 0.02, %v7243_v8  ;;  %v3187_v47 = vmax.f32 %v7258_v34, %v3123_v4  ;;  %v3196_v13 = vmax.f32 %v7267_v42, %v3132_v17  ;;  %v3186_v28 = vmax.f32 %v7252_v6, %v3122_v33  ;;  %v7367_v6 = vpop.permute.xlu1 %3258 }
 0x39f   : > { %3478 = vmatpush1.msra.mxu0 %v3218_v27  ;;  %3567 = vmatpush1.msra.mxu1 %v3220_v50  ;;  %v3189_v0 = vmax.f32 %v7261_v55, %v3125_v36  ;;  %v3179_v21 = vmax.f32 %v7246_v26, %v3115_v46  ;;  %v3188_v14 = vmax.f32 %v7255_v52, %v3124_v38  ;;  %v7369_v55 = vpop.permute.xlu0 %3263 }
 0x3a0   : > { %3479 = vmatprep.subr.mxu0 %v3211_v32  ;;  %3568 = vmatprep.subr.mxu1 %v3213_v24  ;;  %v3178_v12 = vmax.f32 %v7240_v41, %v3114_v15  ;;  %v3181_v34 = vmax.f32 %v7249_v48, %v3117_v60  ;;  %v3180_v42 = vmax.f32 %v7243_v8, %v3116_v43 }
 0x3a1   : > { %3480 = vmatpush1.msra.mxu0 %v3210_v44  ;;  %3569 = vmatpush1.msra.mxu1 %v3212_v45 }
 0x3a2   : > { %3481 = vmatprep.subr.mxu0 %v3203_v29  ;;  %3570 = vmatprep.subr.mxu1 %v3205_v1  ;;  %v7371_v2 = vpop.permute.xlu1 %3248 }
 0x3a3   : > { %3482 = vmatpush1.msra.mxu0 %v3202_v61  ;;  %3571 = vmatpush1.msra.mxu1 %v3204_v5  ;;  %v7375_v9 = vpop.permute.xlu0 %3253 }
 0x3a4   : > { %3483 = vmatprep.subr.mxu0 %v3195_v11  ;;  %3572 = vmatprep.subr.mxu1 %v3197_v53 }
 0x3a5   : > { %3484 = vmatpush1.msra.mxu0 %v3194_v56  ;;  %3573 = vmatpush1.msra.mxu1 %v3196_v13 }
 0x3a6   : > { %3485 = vmatprep.subr.mxu0 %v3187_v47  ;;  %3574 = vmatprep.subr.mxu1 %v3189_v0 }
 0x3a7   : > { %3486 = vmatpush1.msra.mxu0 %v3186_v28  ;;  %3575 = vmatpush1.msra.mxu1 %v3188_v14 }
 0x3a8   : > { %3487 = vmatprep.subr.mxu0 %v3179_v21  ;;  %3576 = vmatprep.subr.mxu1 %v3181_v34 }
 0x3a9   : > { %3488 = vmatpush1.msra.mxu0 %v3178_v12  ;;  %3577 = vmatpush1.msra.mxu1 %v3180_v42 }
 0x3aa   : > { %4433 = vmatmul.mubr.msk.f32.vlgmr.msra.gmra.mxu0 %vm3266_vm2, %v7197_v39  ;;  %4437 = vmatmul.mubr.msk.f32.vlgmr.msra.gmra.mxu1 %vm3266_vm2, %v7197_v39 }
 0x3ab   : > { %3527 = vmatprep.mubr.f32.mxu0 %v7993_v23  ;;  %3616 = vmatprep.mubr.f32.mxu1 %v7993_v23 }
 0x3ae   : > { %4434 = vmatmul.mubr.msk.f32.gmra.mxu0 %vm3266_vm2, %v7208_v59  ;;  %4438 = vmatmul.mubr.msk.f32.gmra.mxu1 %vm3266_vm2, %v7208_v59 }
 0x3af   : > { %3533 = vmatprep.mubr.f32.mxu0 %v7993_v23  ;;  %3622 = vmatprep.mubr.f32.mxu1 %v7993_v23 }
 0x3b2   : > { %4435 = vmatmul.mubr.msk.f32.gmra.mxu0 %vm3266_vm2, %v7219_v3  ;;  %4439 = vmatmul.mubr.msk.f32.gmra.mxu1 %vm3266_vm2, %v7219_v3 }
 0x3b3   : > { %3539 = vmatprep.mubr.f32.mxu0 %v7993_v23  ;;  %3628 = vmatprep.mubr.f32.mxu1 %v7993_v23 }
 0x3b6   : > { %4436 = vmatmul.mubr.msk.f32.gmra.mxu0 %vm3266_vm2, %v7230_v31  ;;  %4440 = vmatmul.mubr.msk.f32.gmra.mxu1 %vm3266_vm2, %v7230_v31 }
 0x3b7   : > { %3784 = vmatprep.mubr.f32.mxu0 %v7993_v23  ;;  %3861 = vmatprep.mubr.f32.mxu1 %v7993_v23 }
 0x428   : > { %v3345_v39 = vpop.f32.mrf.mxu0  ;;  %v3434_v59 = vpop.f32.mrf.mxu1 }
 0x429   : > { %v7378_v7 = vadd.f32 %v3345_v39, %v7371_v2  ;;  %v3435_v36 = vadd.f32 %v3434_v59, %v7371_v2 }
 0x42a   : > { %v3347_v41 = vpop.f32.mrf.mxu0  ;;  %v3436_v8 = vpop.f32.mrf.mxu1 }
 0x42b   : > { %v3348_v18 = vadd.f32 %v3347_v41, %v7371_v2  ;;  %v3437_v17 = vadd.f32 %v3436_v8, %v7371_v2  ;;  %v3635_v47 = vmul.f32 0.02, %v7378_v7  ;;  %v3637_v21 = vmul.f32 0.02, %v3435_v36 }
 0x42c   : > { %v3351_v26 = vpop.f32.mrf.mxu0  ;;  %v3440_v3 = vpop.f32.mrf.mxu1 }
 0x42d   : > { %v3352_v35 = vadd.f32 %v3351_v26, %v7375_v9  ;;  %v3441_v63 = vadd.f32 %v3440_v3, %v7375_v9  ;;  %v3636_v60 = vmul.f32 0.02, %v3348_v18  ;;  %v3638_v13 = vmul.f32 0.02, %v3437_v17  ;;  %v7398_v26 = vld [vmem:[%s7526_s9] sm:$0xff] }
 0x42e   : > { %v3353_v48 = vpop.f32.mrf.mxu0  ;;  %v3442_v52 = vpop.f32.mrf.mxu1  ;;  %v3667_v41 = vmax.f32 %v7378_v7, %v3635_v47  ;;  %v3669_v3 = vmax.f32 %v3435_v36, %v3637_v21 }
 0x42f   : > { %v3354_v58 = vadd.f32 %v3353_v48, %v7375_v9  ;;  %v3443_v32 = vadd.f32 %v3442_v52, %v7375_v9  ;;  %v3643_v38 = vmul.f32 0.02, %v3352_v35  ;;  %v3645_v56 = vmul.f32 0.02, %v3441_v63  ;;  %v7408_v48 = vld [vmem:[%s7526_s9 + $0x8] sm:$0xff] }
 0x430   : > { %v3357_v49 = vpop.f32.mrf.mxu0  ;;  %v3446_v62 = vpop.f32.mrf.mxu1  ;;  %v3668_v39 = vmax.f32 %v3348_v18, %v3636_v60  ;;  %v3670_v8 = vmax.f32 %v3437_v17, %v3638_v13 }
 0x431   : > { %v3358_v37 = vadd.f32 %v3357_v49, %v7367_v6  ;;  %v3447_v27 = vadd.f32 %v3446_v62, %v7367_v6  ;;  %v3644_v61 = vmul.f32 0.02, %v3354_v58  ;;  %v3646_v11 = vmul.f32 0.02, %v3443_v32 }
 0x432   : > { %v3359_v57 = vpop.f32.mrf.mxu0  ;;  %v3448_v31 = vpop.f32.mrf.mxu1  ;;  %v3675_v34 = vmax.f32 %v3352_v35, %v3643_v38  ;;  %v3677_v59 = vmax.f32 %v3441_v63, %v3645_v56 }
 0x433   : > { %v3360_v54 = vadd.f32 %v3359_v57, %v7367_v6  ;;  %v3449_v51 = vadd.f32 %v3448_v31, %v7367_v6  ;;  %v3651_v29 = vmul.f32 0.02, %v3358_v37  ;;  %v3653_v1 = vmul.f32 0.02, %v3447_v27 }
 0x434   : > { %v3363_v22 = vpop.f32.mrf.mxu0  ;;  %v3452_v40 = vpop.f32.mrf.mxu1  ;;  %v3676_v14 = vmax.f32 %v3354_v58, %v3644_v61  ;;  %v3678_v42 = vmax.f32 %v3443_v32, %v3646_v11 }
 0x435   : > { %v3364_v19 = vadd.f32 %v3363_v22, %v7369_v55  ;;  %v3453_v30 = vadd.f32 %v3452_v40, %v7369_v55  ;;  %v3652_v44 = vmul.f32 0.02, %v3360_v54  ;;  %v3654_v45 = vmul.f32 0.02, %v3449_v51 }
 0x436   : > { %v3365_v16 = vpop.f32.mrf.mxu0  ;;  %v3454_v25 = vpop.f32.mrf.mxu1  ;;  %v3683_v28 = vmax.f32 %v3358_v37, %v3651_v29  ;;  %v3685_v12 = vmax.f32 %v3447_v27, %v3653_v1 }
 0x437   : > { %v3366_v10 = vadd.f32 %v3365_v16, %v7369_v55  ;;  %v3659_v50 = vmul.f32 0.02, %v3364_v19  ;;  %v3455_v20 = vadd.f32 %v3454_v25, %v7369_v55  ;;  %v3661_v24 = vmul.f32 0.02, %v3453_v30 }
 0x438   : > { %v3684_v53 = vmax.f32 %v3360_v54, %v3652_v44  ;;  %v3686_v0 = vmax.f32 %v3449_v51, %v3654_v45 }
 0x439   : > { %v3660_v4 = vmul.f32 0.02, %v3366_v10  ;;  %v3662_v33 = vmul.f32 0.02, %v3455_v20  ;;  %v3691_v5 = vmax.f32 %v3364_v19, %v3659_v50  ;;  %v3693_v43 = vmax.f32 %v3453_v30, %v3661_v24 }
 0x43b   : > { %v3692_v46 = vmax.f32 %v3366_v10, %v3660_v4  ;;  %v3694_v15 = vmax.f32 %v3455_v20, %v3662_v33 }
 0x43d   : > { %3744 = vmatprep.subr.mxu0 %v3692_v46  ;;  %3821 = vmatprep.subr.mxu1 %v3694_v15 }
 0x43e   : > { %3745 = vmatpush1.msra.mxu0 %v3691_v5  ;;  %3822 = vmatpush1.msra.mxu1 %v3693_v43 }
 0x43f   : > { %3746 = vmatprep.subr.mxu0 %v3684_v53  ;;  %3823 = vmatprep.subr.mxu1 %v3686_v0 }
 0x440   : > { %3747 = vmatpush1.msra.mxu0 %v3683_v28  ;;  %3824 = vmatpush1.msra.mxu1 %v3685_v12 }
 0x441   : > { %3748 = vmatprep.subr.mxu0 %v3676_v14  ;;  %3825 = vmatprep.subr.mxu1 %v3678_v42 }
 0x442   : > { %3749 = vmatpush1.msra.mxu0 %v3675_v34  ;;  %3826 = vmatpush1.msra.mxu1 %v3677_v59 }
 0x443   : > { %3750 = vmatprep.subr.mxu0 %v3668_v39  ;;  %3827 = vmatprep.subr.mxu1 %v3670_v8 }
 0x444   : > { %3751 = vmatpush1.msra.mxu0 %v3667_v41  ;;  %3828 = vmatpush1.msra.mxu1 %v3669_v3 }
 0x445   : > { %4441 = vmatmul.mubr.msk.f32.vlgmr.msra.gmra.mxu0 %vm3713_vm3, %v7398_v26  ;;  %4443 = vmatmul.mubr.msk.f32.vlgmr.msra.gmra.mxu1 %vm3713_vm3, %v7398_v26 }
 0x446   : > { %3790 = vmatprep.mubr.f32.mxu0 %v7993_v23  ;;  %3867 = vmatprep.mubr.f32.mxu1 %v7993_v23 }
 0x449   : > { %4442 = vmatmul.mubr.msk.f32.gmra.mxu0 %vm3713_vm3, %v7408_v48  ;;  %4444 = vmatmul.mubr.msk.f32.gmra.mxu1 %vm3713_vm3, %v7408_v48 }
 0x44a   : > { %3938 = vmatprep.mubr.f32.mxu0 %v7993_v23  ;;  %4015 = vmatprep.mubr.f32.mxu1 %v7993_v23 }
 0x46a   : > { %v3523_v52 = vpop.f32.mrf.mxu0  ;;  %v3612_v49 = vpop.f32.mrf.mxu1 }
 0x46b   : > { %v3524_v27 = vadd.f32 %v3523_v52, %v7371_v2  ;;  %v3613_v5 = vadd.f32 %v3612_v49, %v7371_v2 }
 0x46c   : > { %v3525_v62 = vpop.f32.mrf.mxu0  ;;  %v3614_v57 = vpop.f32.mrf.mxu1 }
 0x46d   : > { %v3526_v50 = vadd.f32 %v3525_v62, %v7371_v2  ;;  %v3615_v46 = vadd.f32 %v3614_v57, %v7371_v2  ;;  %v3639_v21 = vmul.f32 0.02, %v3524_v27  ;;  %v3641_v42 = vmul.f32 0.02, %v3613_v5 }
 0x46e   : > { %v3529_v31 = vpop.f32.mrf.mxu0  ;;  %v3618_v22 = vpop.f32.mrf.mxu1 }
 0x46f   : > { %v3530_v4 = vadd.f32 %v3529_v31, %v7375_v9  ;;  %v3619_v33 = vadd.f32 %v3618_v22, %v7375_v9  ;;  %v3642_v14 = vmul.f32 0.02, %v3615_v46  ;;  %v3671_v52 = vmax.f32 %v3524_v27, %v3639_v21 }
 0x470   : > { %v3531_v54 = vpop.f32.mrf.mxu0  ;;  %v3620_v19 = vpop.f32.mrf.mxu1  ;;  %v3673_v62 = vmax.f32 %v3613_v5, %v3641_v42 }
 0x471   : > { %v3532_v20 = vadd.f32 %v3531_v54, %v7375_v9  ;;  %v3621_v17 = vadd.f32 %v3620_v19, %v7375_v9  ;;  %v3647_v53 = vmul.f32 0.02, %v3530_v4  ;;  %v3649_v28 = vmul.f32 0.02, %v3619_v33 }
 0x472   : > { %v3535_v40 = vpop.f32.mrf.mxu0  ;;  %v3624_v7 = vpop.f32.mrf.mxu1  ;;  %v3674_v49 = vmax.f32 %v3615_v46, %v3642_v14 }
 0x473   : > { %v3536_v10 = vadd.f32 %v3535_v40, %v7367_v6  ;;  %v3625_v63 = vadd.f32 %v3624_v7, %v7367_v6  ;;  %v3648_v15 = vmul.f32 0.02, %v3532_v20  ;;  %v3650_v43 = vmul.f32 0.02, %v3621_v17 }
 0x474   : > { %v3537_v37 = vpop.f32.mrf.mxu0  ;;  %v3626_v51 = vpop.f32.mrf.mxu1  ;;  %v3679_v59 = vmax.f32 %v3530_v4, %v3647_v53  ;;  %v3681_v3 = vmax.f32 %v3619_v33, %v3649_v28 }
 0x475   : > { %v3538_v16 = vadd.f32 %v3537_v37, %v7367_v6  ;;  %v3627_v25 = vadd.f32 %v3626_v51, %v7367_v6  ;;  %v3655_v38 = vmul.f32 0.02, %v3536_v10  ;;  %v3657_v60 = vmul.f32 0.02, %v3625_v63  ;;  %v7443_v51 = vpop.permute.xlu1 %3710 }
 0x476   : > { %v3541_v30 = vpop.f32.mrf.mxu0  ;;  %v3630_v58 = vpop.f32.mrf.mxu1  ;;  %v3680_v2 = vmax.f32 %v3532_v20, %v3648_v15  ;;  %v3682_v41 = vmax.f32 %v3621_v17, %v3650_v43 }
 0x477   : > { %v3542_v18 = vadd.f32 %v3541_v30, %v7369_v55  ;;  %v3631_v35 = vadd.f32 %v3630_v58, %v7369_v55  ;;  %v3656_v36 = vmul.f32 0.02, %v3538_v16  ;;  %v3658_v11 = vmul.f32 0.02, %v3627_v25  ;;  %v7446_v30 = vpop.permute.xlu0 %3705 }
 0x478   : > { %v3543_v32 = vpop.f32.mrf.mxu0  ;;  %v3632_v24 = vpop.f32.mrf.mxu1  ;;  %v3687_v12 = vmax.f32 %v3536_v10, %v3655_v38  ;;  %v3689_v39 = vmax.f32 %v3625_v63, %v3657_v60 }
 0x479   : > { %v3544_v44 = vadd.f32 %v3543_v32, %v7369_v55  ;;  %v3663_v29 = vmul.f32 0.02, %v3542_v18  ;;  %v3633_v45 = vadd.f32 %v3632_v24, %v7369_v55  ;;  %v3665_v61 = vmul.f32 0.02, %v3631_v35  ;;  %v7455_v33 = vpop.permute.xlu1 %4069 }
 0x47a   : > { %v3640_v55 = vmul.f32 0.02, %v3526_v50  ;;  %v3688_v9 = vmax.f32 %v3538_v16, %v3656_v36  ;;  %v3690_v34 = vmax.f32 %v3627_v25, %v3658_v11 }
 0x47b   : > { %v3664_v1 = vmul.f32 0.02, %v3544_v44  ;;  %v3666_v6 = vmul.f32 0.02, %v3633_v45  ;;  %v3695_v47 = vmax.f32 %v3542_v18, %v3663_v29  ;;  %v3697_v0 = vmax.f32 %v3631_v35, %v3665_v61  ;;  %v7458_v38 = vpop.permute.xlu0 %4064 }
 0x47c   : > { %v3672_v8 = vmax.f32 %v3526_v50, %v3640_v55 }
 0x47d   : > { %v3696_v56 = vmax.f32 %v3544_v44, %v3664_v1  ;;  %v3698_v13 = vmax.f32 %v3633_v45, %v3666_v6 }
 0x47f   : > { %3898 = vmatprep.subr.mxu0 %v3696_v56  ;;  %3975 = vmatprep.subr.mxu1 %v3698_v13 }
 0x480   : > { %3899 = vmatpush1.msra.mxu0 %v3695_v47  ;;  %3976 = vmatpush1.msra.mxu1 %v3697_v0 }
 0x481   : > { %3900 = vmatprep.subr.mxu0 %v3688_v9  ;;  %3977 = vmatprep.subr.mxu1 %v3690_v34  ;;  %v4150_v34 = vlaneseq }
 0x482   : > { %3901 = vmatpush1.msra.mxu0 %v3687_v12  ;;  %3978 = vmatpush1.msra.mxu1 %v3689_v39 }
 0x483   : > { %3902 = vmatprep.subr.mxu0 %v3680_v2  ;;  %3979 = vmatprep.subr.mxu1 %v3682_v41  ;;  %v7467_v41 = vshrl.u32 %v4150_v34, 7 }
 0x484   : > { %3903 = vmatpush1.msra.mxu0 %v3679_v59  ;;  %3980 = vmatpush1.msra.mxu1 %v3681_v3 }
 0x485   : > { %3904 = vmatprep.subr.mxu0 %v3672_v8  ;;  %3981 = vmatprep.subr.mxu1 %v3674_v49 }
 0x486   : > { %3905 = vmatpush1.msra.mxu0 %v3671_v52  ;;  %3982 = vmatpush1.msra.mxu1 %v3673_v62 }
 0x487   : > { %4445 = vmatmul.mubr.msk.f32.vlgmr.msra.gmra.mxu0 %vm3713_vm3, %v7398_v26  ;;  %4447 = vmatmul.mubr.msk.f32.vlgmr.msra.gmra.mxu1 %vm3713_vm3, %v7398_v26 }
 0x488   : > { %3944 = vmatprep.mubr.f32.mxu0 %v7993_v23  ;;  %4021 = vmatprep.mubr.f32.mxu1 %v7993_v23 }
 0x48b   : > { %4446 = vmatmul.mubr.msk.f32.gmra.mxu0 %vm3713_vm3, %v7408_v48  ;;  %4448 = vmatmul.mubr.msk.f32.gmra.mxu1 %vm3713_vm3, %v7408_v48 }
 0x505   : > { %v3786_v57 = vpop.f32.mrf.mxu0  ;;  %v3863_v31 = vpop.f32.mrf.mxu1 }
 0x506   : > { %v3787_v27 = vadd.f32 %v3786_v57, %v7446_v30  ;;  %v3864_v25 = vadd.f32 %v3863_v31, %v7446_v30 }
 0x507   : > { %v3788_v22 = vpop.f32.mrf.mxu0  ;;  %v3865_v54 = vpop.f32.mrf.mxu1 }
 0x508   : > { %v3789_v16 = vadd.f32 %v3788_v22, %v7446_v30  ;;  %v3866_v18 = vadd.f32 %v3865_v54, %v7446_v30  ;;  %v4028_v44 = vmul.f32 0.02, %v3787_v27  ;;  %v4030_v4 = vmul.f32 0.02, %v3864_v25 }
 0x509   : > { %v3792_v19 = vpop.f32.mrf.mxu0  ;;  %v3869_v40 = vpop.f32.mrf.mxu1  ;;  %v4152_v22 = vsub.s32 0, %v7467_v41 }
 0x50a   : > { %v3793_v48 = vadd.f32 %v3792_v19, %v7443_v51  ;;  %v3870_v58 = vadd.f32 %v3869_v40, %v7443_v51  ;;  %v4029_v32 = vmul.f32 0.02, %v3789_v16  ;;  %v4031_v20 = vmul.f32 0.02, %v3866_v18 }
 0x50b   : > { %v3794_v7 = vpop.f32.mrf.mxu0  ;;  %v3871_v37 = vpop.f32.mrf.mxu1  ;;  %v4044_v1 = vmax.f32 %v3787_v27, %v4028_v44  ;;  %v4046_v11 = vmax.f32 %v3864_v25, %v4030_v4 }
 0x50c   : > { %v3795_v26 = vadd.f32 %v3794_v7, %v7443_v51  ;;  %v3872_v23 = vadd.f32 %v3871_v37, %v7443_v51  ;;  %v4036_v50 = vmul.f32 0.02, %v3793_v48  ;;  %v4038_v63 = vmul.f32 0.02, %v3870_v58  ;;  %v4148_v7 = vpop.permute.xlu0 %4147 }
 0x50d   : > { %v4045_v29 = vmax.f32 %v3789_v16, %v4029_v32  ;;  %v4047_v36 = vmax.f32 %v3866_v18, %v4031_v20  ;;  %v4072_v53 = vmul.f32 %v7458_v38, %v4044_v1  ;;  %v4074_v47 = vmul.f32 %v7458_v38, %v4046_v11 }
 0x50e   : > { %v4037_v10 = vmul.f32 0.02, %v3795_v26  ;;  %v4039_v35 = vmul.f32 0.02, %v3872_v23  ;;  %v4052_v45 = vmax.f32 %v3793_v48, %v4036_v50  ;;  %v4054_v61 = vmax.f32 %v3870_v58, %v4038_v63 }
 0x50f   : > { %v4073_v5 = vmul.f32 %v7458_v38, %v4045_v29  ;;  %v4075_v60 = vmul.f32 %v7458_v38, %v4047_v36  ;;  %v7475_v50 = vrot.slane %v4148_v7, %v4152_v22 }
 0x510   : > { %v4053_v24 = vmax.f32 %v3795_v26, %v4037_v10  ;;  %v4055_v17 = vmax.f32 %v3872_v23, %v4039_v35  ;;  %v4080_v15 = vmul.f32 %v7455_v33, %v4052_v45  ;;  %v4082_v56 = vmul.f32 %v7455_v33, %v4054_v61 }
 0x512   : > { %v4081_v46 = vmul.f32 %v7455_v33, %v4053_v24  ;;  %v4083_v6 = vmul.f32 %v7455_v33, %v4055_v17  ;;  %v4088_v55 = vadd.f32 %v4080_v15, %v4072_v53  ;;  %v4102_v28 = vadd.f32 %v4082_v56, %v4074_v47 }
 0x514   : > { %v4095_v43 = vadd.f32 %v4081_v46, %v4073_v5  ;;  %v4109_v13 = vadd.f32 %v4083_v6, %v4075_v60  ;;  %v4089_v21 = vrot.slane %v4088_v55, 4  ;;  %v4103_v14 = vrot.slane %v4102_v28, 4 }
 0x516   : > { %v4096_v9 = vrot.slane %v4095_v43, 4  ;;  %v4110_v0 = vrot.slane %v4109_v13, 4  ;;  %v4090_v2 = vadd.f32 %v4089_v21, %v4088_v55  ;;  %v4104_v39 = vadd.f32 %v4103_v14, %v4102_v28 }
 0x518   : > { %v4097_v12 = vadd.f32 %v4096_v9, %v4095_v43  ;;  %v4111_v42 = vadd.f32 %v4110_v0, %v4109_v13  ;;  %v4091_v3 = vrot.slane %v4090_v2, 2  ;;  %v4105_v52 = vrot.slane %v4104_v39, 2 }
 0x51a   : > { %v4098_v59 = vrot.slane %v4097_v12, 2  ;;  %v4112_v8 = vrot.slane %v4111_v42, 2  ;;  %v4092_v37 = vadd.f32 %v4091_v3, %v4090_v2  ;;  %v4106_v48 = vadd.f32 %v4105_v52, %v4104_v39 }
 0x51c   : > { %v4099_v62 = vadd.f32 %v4098_v59, %v4097_v12  ;;  %v4113_v54 = vadd.f32 %v4112_v8, %v4111_v42  ;;  %v4093_v4 = vrot.slane %v4092_v37, 1 }
 0x51e   : > { %v4100_v10 = vrot.slane %v4099_v62, 1  ;;  %v4114_v20 = vrot.slane %v4113_v54, 1  ;;  %v4094_v47 = vadd.f32 %v4093_v4, %v4092_v37 }
 0x520   : > { %v4101_v11 = vadd.f32 %v4100_v10, %v4099_v62  ;;  %v4115_v60 = vadd.f32 %v4114_v20, %v4113_v54 }
 0x522   : > { %v4155_v14 = vadd.f32 %v7475_v50, %v4101_v11  ;;  %v4157_v2 = vadd.f32 %v7475_v50, %v4115_v60 }
 0x547   : > { %v3940_v49 = vpop.f32.mrf.mxu0  ;;  %v4017_v31 = vpop.f32.mrf.mxu1 }
 0x548   : > { %v3941_v57 = vadd.f32 %v3940_v49, %v7446_v30  ;;  %v4018_v19 = vadd.f32 %v4017_v31, %v7446_v30  ;;  %v4154_v49 = vadd.f32 %v7475_v50, %v4094_v47 }
 0x549   : > { %v3942_v40 = vpop.f32.mrf.mxu0  ;;  %v4019_v16 = vpop.f32.mrf.mxu1 }
 0x54a   : > { %v4032_v26 = vmul.f32 0.02, %v3941_v57  ;;  %v3943_v23 = vadd.f32 %v3942_v40, %v7446_v30  ;;  %v4034_v18 = vmul.f32 0.02, %v4018_v19  ;;  %v4020_v58 = vadd.f32 %v4019_v16, %v7446_v30 }
 0x54b   : > { %v3946_v27 = vpop.f32.mrf.mxu0  ;;  %v4023_v32 = vpop.f32.mrf.mxu1  ;;  %v4107_v30 = vrot.slane %v4106_v48, 1  ;;  %v4165_v40 = vmul.f32 0.01, %v4157_v2 }
 0x54c   : > { %v4033_v25 = vmul.f32 0.02, %v3943_v23  ;;  %v3947_v35 = vadd.f32 %v3946_v27, %v7443_v51  ;;  %v4035_v63 = vmul.f32 0.02, %v4020_v58  ;;  %v4024_v44 = vadd.f32 %v4023_v32, %v7443_v51 }
 0x54d   : > { %v3948_v24 = vpop.f32.mrf.mxu0  ;;  %v4048_v17 = vmax.f32 %v3941_v57, %v4032_v26  ;;  %v4025_v36 = vpop.f32.mrf.mxu1  ;;  %v4050_v61 = vmax.f32 %v4018_v19, %v4034_v18  ;;  %v4108_v9 = vadd.f32 %v4107_v30, %v4106_v48  ;;  %v4163_v19 = vmul.f32 0.01, %v4155_v14 }
 0x54e   : > { %v4040_v29 = vmul.f32 0.02, %v3947_v35  ;;  %v3949_v45 = vadd.f32 %v3948_v24, %v7443_v51  ;;  %v4042_v1 = vmul.f32 0.02, %v4024_v44  ;;  %v4026_v46 = vadd.f32 %v4025_v36, %v7443_v51 }
 0x54f   : > { %v4049_v6 = vmax.f32 %v3943_v23, %v4033_v25  ;;  %v4051_v56 = vmax.f32 %v4020_v58, %v4035_v63  ;;  %v4076_v13 = vmul.f32 %v7458_v38, %v4048_v17  ;;  %v4078_v0 = vmul.f32 %v7458_v38, %v4050_v61 }
 0x550   : > { %v4056_v5 = vmax.f32 %v3947_v35, %v4040_v29  ;;  %v4041_v15 = vmul.f32 0.02, %v3949_v45  ;;  %v4058_v53 = vmax.f32 %v4024_v44, %v4042_v1  ;;  %v4043_v43 = vmul.f32 0.02, %v4026_v46 }
 0x551   : > { %v4077_v12 = vmul.f32 %v7458_v38, %v4049_v6  ;;  %v4079_v39 = vmul.f32 %v7458_v38, %v4051_v56  ;;  %v4156_v62 = vadd.f32 %v7475_v50, %v4108_v9  ;;  %v4162_v38 = vmul.f32 0.01, %v4154_v49 }
 0x552   : > { %v4084_v55 = vmul.f32 %v7455_v33, %v4056_v5  ;;  %v4057_v28 = vmax.f32 %v3949_v45, %v4041_v15  ;;  %v4086_v21 = vmul.f32 %v7455_v33, %v4058_v53  ;;  %v4059_v51 = vmax.f32 %v4026_v46, %v4043_v43 }
 0x553   : > { %v4164_v16 = vmul.f32 0.01, %v4156_v62  ;;  %v4171_v27 = vadd.f32 0.99, %v4163_v19  ;;  %v4173_v10 = vadd.f32 0.99, %v4165_v40 }
 0x554   : > { %v4116_v34 = vadd.f32 %v4084_v55, %v4076_v13  ;;  %v4085_v42 = vmul.f32 %v7455_v33, %v4057_v28  ;;  %v4130_v59 = vadd.f32 %v4086_v21, %v4078_v0  ;;  %v4087_v8 = vmul.f32 %v7455_v33, %v4059_v51 }
 0x555   : > { %v4170_v63 = vadd.f32 0.99, %v4162_v38  ;;  %v4172_v44 = vadd.f32 0.99, %v4164_v16  ;;  %v4543_v17 = vmov 1966171168   ;;  %v4179_v30 = vmin.f32 %v4155_v14, %v4171_v27 }
 0x556   : > { %v4117_v3 = vrot.slane %v4116_v34, 4  ;;  %v4123_v52 = vadd.f32 %v4085_v42, %v4077_v12  ;;  %v4131_v57 = vrot.slane %v4130_v59, 4  ;;  %v4137_v31 = vadd.f32 %v4087_v8, %v4079_v39 }
 0x557   : > { %v4207_v29 = vunpack.c.l.s4 %v4543_v17  ;;  %v4181_v61 = vmin.f32 %v4157_v2, %v4173_v10  ;;  %v4178_v5 = vmin.f32 %v4154_v49, %v4170_v63  ;;  %v4180_v15 = vmin.f32 %v4156_v62, %v4172_v44 }
 0x558   : > { %v4118_v22 = vadd.f32 %v4117_v3, %v4116_v34  ;;  %v4124_v54 = vrot.slane %v4123_v52, 4  ;;  %v4132_v7 = vadd.f32 %v4131_v57, %v4130_v59  ;;  %v4138_v37 = vrot.slane %v4137_v31, 4 }
 0x559   : > { %v4208_v53 = vunpack.c.0.s8 %v4207_v29  ;;  %v4187_v13 = vmax.f32 %v4179_v30, %v4163_v19  ;;  %v4189_v55 = vmax.f32 %v4181_v61, %v4165_v40  ;;  %v4186_v51 = vmax.f32 %v4178_v5, %v4162_v38 }
 0x55a   : > { %v4119_v26 = vrot.slane %v4118_v22, 2  ;;  %v4125_v23 = vadd.f32 %v4124_v54, %v4123_v52  ;;  %v4133_v48 = vrot.slane %v4132_v7, 2  ;;  %v4139_v33 = vadd.f32 %v4138_v37, %v4137_v31 }
 0x55b   : > { %v4188_v14 = vmax.f32 %v4180_v15, %v4164_v16  ;;  %v4211_v42 = vsub.s32 %v4208_v53, %v7467_v41  ;;  %v4202_v59 = vcombine.low %v4186_v51, %v4187_v13 }
 0x55c   : > { %v4120_v18 = vadd.f32 %v4119_v26, %v4118_v22  ;;  %v4126_v58 = vrot.slane %v4125_v23, 2  ;;  %v4134_v25 = vadd.f32 %v4133_v48, %v4132_v7  ;;  %v4140_v35 = vrot.slane %v4139_v33, 2 }
 0x55d   : > { %v4203_v8 = vcombine.low %v4188_v14, %v4189_v55  ;;  %v4212_v31 = vrot.slane %v4202_v59, %v4211_v42 }
 0x55e   : > { %v4121_v32 = vrot.slane %v4120_v18, 1  ;;  %v4127_v20 = vadd.f32 %v4126_v58, %v4125_v23  ;;  %v4135_v24 = vrot.slane %v4134_v25, 1  ;;  %v4141_v4 = vadd.f32 %v4140_v35, %v4139_v33 }
 0x55f   : > { %v4219_v22 = vrot.slane %v4203_v8, %v4211_v42 }
 0x560   : > { %v4122_v45 = vadd.f32 %v4121_v32, %v4120_v18  ;;  %v4128_v36 = vrot.slane %v4127_v20, 1  ;;  %v4136_v1 = vadd.f32 %v4135_v24, %v4134_v25  ;;  %v4142_v46 = vrot.slane %v4141_v4, 1 }
 0x561   : > { %v4234_v37 = vcombine.low %v4212_v31, %v4219_v22 }
 0x562   : > { %v4158_v11 = vadd.f32 %v7475_v50, %v4122_v45  ;;  %v4129_v6 = vadd.f32 %v4128_v36, %v4127_v20  ;;  %v4160_v60 = vadd.f32 %v7475_v50, %v4136_v1  ;;  %v4143_v56 = vadd.f32 %v4142_v46, %v4141_v4 }
 0x563   : > { %v4242_v38 = vrot.slane %v4234_v37, %v4211_v42 }
 0x564   : > { %v4166_v43 = vmul.f32 0.01, %v4158_v11  ;;  %v4159_v47 = vadd.f32 %v7475_v50, %v4129_v6  ;;  %v4168_v28 = vmul.f32 0.01, %v4160_v60  ;;  %v4161_v9 = vadd.f32 %v7475_v50, %v4143_v56 }
 0x566   : > { %v4174_v0 = vadd.f32 0.99, %v4166_v43  ;;  %v4167_v21 = vmul.f32 0.01, %v4159_v47  ;;  %v4176_v12 = vadd.f32 0.99, %v4168_v28 }
 0x567   : > { %v4169_v34 = vmul.f32 0.01, %v4161_v9 }
 0x568   : > { %v4182_v2 = vmin.f32 %v4158_v11, %v4174_v0  ;;  %v4175_v39 = vadd.f32 0.99, %v4167_v21  ;;  %v4184_v3 = vmin.f32 %v4160_v60, %v4176_v12 }
 0x569   : > { %v4177_v52 = vadd.f32 0.99, %v4169_v34 }
 0x56a   : > { %v4183_v49 = vmin.f32 %v4159_v47, %v4175_v39  ;;  %v4190_v57 = vmax.f32 %v4182_v2, %v4166_v43  ;;  %v4192_v54 = vmax.f32 %v4184_v3, %v4168_v28 }
 0x56b   : > { %v4185_v62 = vmin.f32 %v4161_v9, %v4177_v52 }
 0x56c   : > { %v4191_v50 = vmax.f32 %v4183_v49, %v4167_v21 }
 0x56d   : > { %v4193_v19 = vmax.f32 %v4185_v62, %v4169_v34 }
 0x56e   : > { %v4204_v40 = vcombine.low %v4190_v57, %v4191_v50 }
 0x56f   : > { %v4205_v7 = vcombine.low %v4192_v54, %v4193_v19 }
 0x570   : > { %v4226_v41 = vrot.slane %v4204_v40, %v4211_v42 }
 0x571   : > { %v4233_v26 = vrot.slane %v4205_v7, %v4211_v42 }
 0x573   : > { %v4235_v23 = vcombine.low %v4226_v41, %v4233_v26 }
 0x575   : > { %v4249_v16 = vrot.slane %v4235_v23, %v4211_v42 }
 0x577   : > { %v4250_v48 = vcombine.low %v4242_v38, %v4249_v16 }
 0x579   : > { %4252 = vst [vmem:[%s496_s19] sm:$0xff] %v4250_v48 }
 0x57a PF: > { %s25_s14 = sadd.s32 1, %s4539_s14   ;;  %s8003_s20 = sld [smem:[#allocation3_spill]] }
 0x57b   : > { %p22_p8 = scmp.ge.s32.totalorder %s25_s14, 10   ;;  %s8004_s27 = smov %s4531_s29 }
 0x57c   : > { %s8005_s28 = smov %s4535_s30  ;;  %s8006_s29 = smov %s8009_s12 }
 0x57d   :  { %24 = sbr.rel (!%p22_p8) target bundleno = 3 (0x3), region = 105 }
 0x580   : > { %s8007_s30 = smov %s8003_s20 }

// kernel: generator_forward.1
= control target key start
LH: loop header
LB: loop body
LE: loop exit
PB: predicated region body
PF: predicated region fallthrough
CT: control target
= control target key end

     0   :  { %s4617_s27 = smov 0   ;;  %s4619_s28 = smov 0   ;;  %s7517_s0 = inlined_call_operand.vmem [shape: f32[2,3,4096], index: 0, kind: input, shape index: {}]   ;;  %s7518_s1 = inlined_call_operand.vmem [shape: f32[2,128,1], index: 1, kind: input, shape index: {}]   ;;  %s7519_s2 = inlined_call_operand.vmem [shape: f32[128,3], index: 2, kind: input, shape index: {}]   ;;  %s7520_s3 = inlined_call_operand.vmem [shape: f32[128,128], index: 3, kind: input, shape index: {}]   ;;  %s7521_s4 = inlined_call_operand.vmem [shape: f32[128,1], index: 4, kind: input, shape index: {}]   ;;  %s7522_s5 = inlined_call_operand.vmem [shape: f32[64,128], index: 5, kind: input, shape index: {}]   ;;  %s7523_s6 = inlined_call_operand.vmem [shape: f32[64,1], index: 6, kind: input, shape index: {}]   ;;  %s7524_s7 = inlined_call_operand.vmem [shape: f32[32,64], index: 7, kind: input, shape index: {}]   ;;  %s7525_s8 = inlined_call_operand.vmem [shape: f32[32,1], index: 8, kind: input, shape index: {}]   ;;  %s7526_s9 = inlined_call_operand.vmem [shape: f32[16,32], index: 9, kind: input, shape index: {}]   ;;  %s7527_s10 = inlined_call_operand.vmem [shape: f32[16,1], index: 10, kind: input, shape index: {}]   ;;  %s7528_s11 = inlined_call_operand.vmem [shape: f32[16,1], index: 11, kind: input, shape index: {}]   ;;  %s7529_s12 = inlined_call_operand.<no memory space> [shape: f32[1,1], index: 12, kind: input, shape index: {}]   ;;  %s7530_s13 = inlined_call_operand.vmem [shape: f32[1,8192], index: 13, kind: output, shape index: {}]  }
   0x1   :  { %v18_v0 = vstv %s7529_s12  ;;  %s4621_s29 = smov 0   ;;  %s4623_s30 = smov 0  }
   0x2   :  { %19 = vst [vmem:[#allocation2] sm:$0x1] %v18_v0  ;;  %s4625_s14 = smov 0  }
   0x3 LB: > { %s34_s12 = sadd.s32 1, %s4531_s29  ;;  %s37_s15 = sadd.s32 1, %s4535_s30  ;;  %s4539_s14 = sphi %s4625_s14, %s25_s14   ;;  %s4535_s30 = sphi %s4623_s30, %s8007_s30   ;;  %s4531_s29 = sphi %s4621_s29, %s8006_s29   ;;  %s4527_s28 = sphi %s4619_s28, %s8005_s28   ;;  %s4523_s27 = sphi %s4617_s27, %s8004_s27  }
   0x4   : > { %p35_p0 = scmp.ge.s32.totalorder %s34_s12, 4  ;;  %p4345_p1 = scmp.ge.s32.totalorder %s4539_s14, 1 }
   0x5   : > { %p422_p2 = scmp.lt.s32.totalorder %s4539_s14, 9 }
   0x6   : > { %s8009_s12 = smov (%p35_p0, %s34_s12), 0  ;;  %s8011_s15 = smov (!%p35_p0, %s37_s15), %s4535_s30 }
   0x7   : > { %p423_p3 = pnand %p4345_p1, %p422_p2  ;;  %p39_p4 = scmp.ge.s32.totalorder %s8011_s15, 2 }
   0x9   : > { %s8013_s15 = smov (%p39_p4, %s8011_s15), 0  ;;  %426 = sbr.rel (%p423_p3) target bundleno = 1402 (0x57a), region = 72 }
   0xa   : > { %7691 = sst [smem:[#allocation3_spill]] %s8013_s15 }
   0xe   : > { %s4346_s16 = sshll.u32 %s4523_s27, 3  ;;  %p477_p5 = scmp.lt.s32.totalorder %s4527_s28, 1  ;;  %v7531_v1 = vmov 0.0   ;;  %v4542_v2 = vmov 0   ;;  %vm673_vm0 = vcmask 1042432   ;;  %v4669_v11 = vld [vmem:[%s7519_s2] sm:$0xff] }
   0xf   : > { %p479_p6 = scmp.lt.s32.totalorder %s4346_s16, 31  ;;  %754 = vmatprep.mubr.f32.mxu0 %v7531_v1  ;;  %915 = vmatprep.mubr.f32.mxu1 %v7531_v1  ;;  %vm624_vm1 = vcmask 23552   ;;  %v4684_v14 = vld [vmem:[%s7519_s2 + $0x8] sm:$0xff]  ;;  %v4701_v17 = vld [vmem:[%s7519_s2 + $0x10] sm:$0xff]  ;;  %v4714_v20 = vld [vmem:[%s7519_s2 + $0x18] sm:$0xff]  ;;  %vm3266_vm2 = vcmask 523264  }
  0x10   : > { %s478_s17 = scalar_select %p477_p5, %s4527_s28, 1  ;;  %4495 = vset.pattern.permute.xlu0 %v4542_v2  ;;  %4496 = vset.pattern.permute.xlu1 %v4542_v2  ;;  %v4727_v23 = vld [vmem:[%s7519_s2 + $0x20] sm:$0xff]  ;;  %v4740_v26 = vld [vmem:[%s7519_s2 + $0x28] sm:$0xff]  ;;  %v4753_v29 = vld [vmem:[%s7519_s2 + $0x30] sm:$0xff]  ;;  %vm3713_vm3 = vcmask 261120  }
  0x11   : > { %s8015_s16 = smov (!%p479_p6, %s4346_s16), 31  ;;  %v4766_v32 = vld [vmem:[%s7519_s2 + $0x38] sm:$0xff]  ;;  %v4779_v35 = vld [vmem:[%s7519_s2 + $0x40] sm:$0xff]  ;;  %v1620_v37 = vld [vmem:[%s7521_s4 + $0x70] sm:$0xff] }
  0x12   : > { %s4347_s18 = sshll.u32 %s478_s17, 5  ;;  %s4451_s19 = sshll.u32 %s478_s17, 7  ;;  %v1621_v36 = vld [vmem:[%s7521_s4 + $0x78] sm:$0xff]  ;;  %v4796_v38 = vld [vmem:[%s7519_s2 + $0x48] sm:$0xff]  ;;  %v1618_v40 = vld [vmem:[%s7521_s4 + $0x60] sm:$0xff] }
  0x13   : > { %s482_s20 = sadd.s32 %s4347_s18, %s8015_s16  ;;  %s4659_s23 = scalar_lea.vmem %s7518_s1, %s4451_s19  ;;  %v1619_v39 = vld [vmem:[%s7521_s4 + $0x68] sm:$0xff]  ;;  %v4813_v41 = vld [vmem:[%s7519_s2 + $0x50] sm:$0xff]  ;;  %v1617_v42 = vld [vmem:[%s7521_s4 + $0x58] sm:$0xff] }
  0x14   : > { %s4348_s24 = sshll.u32 %s482_s20, 2  ;;  %v535_v3 = vld [vmem:[%s4659_s23 + $0x78] sm:$0xff]  ;;  %v533_v4 = vld [vmem:[%s4659_s23 + $0x68] sm:$0xff]  ;;  %v534_v15 = vld [vmem:[%s4659_s23 + $0x70] sm:$0xff]  ;;  %s4351_s17 = sshll.u32 %s4527_s28, 2 }
  0x15   : > { %s484_s15 = scalar_lea.vmem %s7517_s0, %s4348_s24  ;;  %613 = vperm.xlu0 %4495, %v535_v3   ;;  %603 = vperm.xlu1 %4496, %v533_v4   ;;  %v532_v16 = vld [vmem:[%s4659_s23 + $0x60] sm:$0xff]  ;;  %v531_v18 = vld [vmem:[%s4659_s23 + $0x58] sm:$0xff]  ;;  %v530_v19 = vld [vmem:[%s4659_s23 + $0x50] sm:$0xff] }
  0x16   : > { %v500_v5 = vld [vmem:[%s484_s15] sm:$0x77]  ;;  %v501_v6 = vld [vmem:[%s484_s15 + $0x8] sm:$0x77]  ;;  %v502_v7 = vld [vmem:[%s484_s15 + $0x10] sm:$0x77] }
  0x17   : > { %v620_v8 = vcombine.high %v500_v5, %v500_v5  ;;  %v621_v9 = vcombine.high %v501_v6, %v501_v6  ;;  %v503_v10 = vld [vmem:[%s484_s15 + $0x18] sm:$0x77]  ;;  %v622_v12 = vcombine.high %v502_v7, %v502_v7  ;;  %v529_v21 = vld [vmem:[%s4659_s23 + $0x48] sm:$0xff]  ;;  %v528_v22 = vld [vmem:[%s4659_s23 + $0x40] sm:$0xff]  ;;  %s492_s15 = sadd.s32 %s4523_s27, %s4351_s17 }
  0x18   : > { %v623_v13 = vcombine.high %v503_v10, %v503_v10  ;;  %v527_v24 = vld [vmem:[%s4659_s23 + $0x38] sm:$0xff]  ;;  %v526_v25 = vld [vmem:[%s4659_s23 + $0x30] sm:$0xff]  ;;  %v525_v27 = vld [vmem:[%s4659_s23 + $0x28] sm:$0xff]  ;;  %s4352_s18 = sshll.u32 %s492_s15, 3 }
  0x19   : > { %4353 = vmatprep.subr.msk.mxu0 %vm673_vm0, %v620_v8  ;;  %4371 = vmatprep.subr.msk.mxu1 %vm673_vm0, %v621_v9  ;;  %v524_v28 = vld [vmem:[%s4659_s23 + $0x20] sm:$0xff]  ;;  %v523_v30 = vld [vmem:[%s4659_s23 + $0x18] sm:$0xff]  ;;  %v522_v31 = vld [vmem:[%s4659_s23 + $0x10] sm:$0xff]  ;;  %p494_p7 = scmp.lt.s32.totalorder %s4352_s18, 63 }
  0x1a   : > { %4354 = vmatpush1.msk.msra.mxu0 %vm673_vm0, %v500_v5  ;;  %4372 = vmatpush1.msk.msra.mxu1 %vm673_vm0, %v501_v6  ;;  %v521_v33 = vld [vmem:[%s4659_s23 + $0x8] sm:$0xff]  ;;  %v520_v34 = vld [vmem:[%s4659_s23] sm:$0xff]  ;;  %v1616_v43 = vld [vmem:[%s7521_s4 + $0x50] sm:$0xff] }
  0x1b   : > { %4355 = vmatmul.mubr.msk.f32.vlgmr.msra.gmra.mxu0 %vm624_vm1, %v4669_v11  ;;  %4373 = vmatmul.mubr.msk.f32.vlgmr.msra.gmra.mxu1 %vm624_vm1, %v4669_v11  ;;  %v4830_v44 = vld [vmem:[%s7519_s2 + $0x58] sm:$0xff]  ;;  %v1615_v45 = vld [vmem:[%s7521_s4 + $0x48] sm:$0xff]  ;;  %v1614_v46 = vld [vmem:[%s7521_s4 + $0x40] sm:$0xff]  ;;  %s8017_s18 = smov (!%p494_p7, %s4352_s18), 63 }
  0x1c   : > { %760 = vmatprep.mubr.f32.mxu0 %v7531_v1  ;;  %921 = vmatprep.mubr.f32.mxu1 %v7531_v1  ;;  %v4847_v47 = vld [vmem:[%s7519_s2 + $0x60] sm:$0xff]  ;;  %v1613_v48 = vld [vmem:[%s7521_s4 + $0x38] sm:$0xff]  ;;  %v1612_v49 = vld [vmem:[%s7521_s4 + $0x30] sm:$0xff]  ;;  %s496_s19 = scalar_lea.vmem %s7530_s13, %s8017_s18 }
  0x1d   : > { %4389 = vmatprep.subr.msk.mxu0 %vm673_vm0, %v622_v12  ;;  %4407 = vmatprep.subr.msk.mxu1 %vm673_vm0, %v623_v13  ;;  %v4864_v50 = vld [vmem:[%s7519_s2 + $0x68] sm:$0xff]  ;;  %v1610_v52 = vld [vmem:[%s7521_s4 + $0x20] sm:$0xff]  ;;  %v4881_v53 = vld [vmem:[%s7519_s2 + $0x70] sm:$0xff] }
  0x1e   : > { %4390 = vmatpush1.msk.msra.mxu0 %vm673_vm0, %v502_v7  ;;  %4408 = vmatpush1.msk.msra.mxu1 %vm673_vm0, %v503_v10  ;;  %v1611_v51 = vld [vmem:[%s7521_s4 + $0x28] sm:$0xff]  ;;  %v1609_v54 = vld [vmem:[%s7521_s4 + $0x18] sm:$0xff]  ;;  %v1608_v55 = vld [vmem:[%s7521_s4 + $0x10] sm:$0xff] }
  0x1f   : > { %4356 = vmatmul.mubr.msk.f32.gmra.mxu0 %vm624_vm1, %v4684_v14  ;;  %4374 = vmatmul.mubr.msk.f32.gmra.mxu1 %vm624_vm1, %v4684_v14  ;;  %v4898_v56 = vld [vmem:[%s7519_s2 + $0x78] sm:$0xff]  ;;  %v1607_v57 = vld [vmem:[%s7521_s4 + $0x8] sm:$0xff]  ;;  %v1606_v58 = vld [vmem:[%s7521_s4] sm:$0xff] }
  0x20   : > { %766 = vmatprep.mubr.f32.mxu0 %v7531_v1  ;;  %927 = vmatprep.mubr.f32.mxu1 %v7531_v1  ;;  %v2617_v59 = vld [vmem:[%s7523_s6 + $0x38] sm:$0xff]  ;;  %v2616_v60 = vld [vmem:[%s7523_s6 + $0x30] sm:$0xff]  ;;  %v2615_v61 = vld [vmem:[%s7523_s6 + $0x28] sm:$0xff] }
  0x21   : > { %608 = vperm.xlu0 %4495, %v534_v15   ;;  %598 = vperm.xlu1 %4496, %v532_v16   ;;  %v2614_v62 = vld [vmem:[%s7523_s6 + $0x20] sm:$0xff]  ;;  %v2613_v63 = vld [vmem:[%s7523_s6 + $0x18] sm:$0xff]  ;;  %v2612_v0 = vld [vmem:[%s7523_s6 + $0x10] sm:$0xff] }
  0x22   : > { %v2611_v2 = vld [vmem:[%s7523_s6 + $0x8] sm:$0xff]  ;;  %v2610_v3 = vld [vmem:[%s7523_s6] sm:$0xff]  ;;  %v3245_v4 = vld [vmem:[%s7525_s8 + $0x18] sm:$0xff] }
  0x23   : > { %4357 = vmatmul.mubr.msk.f32.gmra.mxu0 %vm624_vm1, %v4701_v17  ;;  %4375 = vmatmul.mubr.msk.f32.gmra.mxu1 %vm624_vm1, %v4701_v17  ;;  %v3244_v5 = vld [vmem:[%s7525_s8 + $0x10] sm:$0xff]  ;;  %v3243_v6 = vld [vmem:[%s7525_s8 + $0x8] sm:$0xff]  ;;  %v3242_v7 = vld [vmem:[%s7525_s8] sm:$0xff] }
  0x24   : > { %772 = vmatprep.mubr.f32.mxu0 %v7531_v1  ;;  %933 = vmatprep.mubr.f32.mxu1 %v7531_v1  ;;  %v3701_v8 = vld [vmem:[%s7527_s10] sm:$0xff]  ;;  %v3702_v9 = vld [vmem:[%s7527_s10 + $0x8] sm:$0xff] }
  0x25   : > { %593 = vperm.xlu0 %4495, %v531_v18   ;;  %588 = vperm.xlu1 %4496, %v530_v19   ;;  %v4060_v10 = vld [vmem:[%s7528_s11] sm:$0xff] }
  0x26   : > { %v4144_v12 = vld [vmem:[#allocation2] sm:$0x1] }
  0x27   : > { %4358 = vmatmul.mubr.msk.f32.gmra.mxu0 %vm624_vm1, %v4714_v20  ;;  %4376 = vmatmul.mubr.msk.f32.gmra.mxu1 %vm624_vm1, %v4714_v20 }
  0x28   : > { %778 = vmatprep.mubr.f32.mxu0 %v7531_v1  ;;  %939 = vmatprep.mubr.f32.mxu1 %v7531_v1 }
  0x29   : > { %583 = vperm.xlu0 %4495, %v529_v21   ;;  %578 = vperm.xlu1 %4496, %v528_v22  }
  0x2b   : > { %4359 = vmatmul.mubr.msk.f32.gmra.mxu0 %vm624_vm1, %v4727_v23  ;;  %4377 = vmatmul.mubr.msk.f32.gmra.mxu1 %vm624_vm1, %v4727_v23 }
  0x2c   : > { %784 = vmatprep.mubr.f32.mxu0 %v7531_v1  ;;  %945 = vmatprep.mubr.f32.mxu1 %v7531_v1 }
  0x2d   : > { %573 = vperm.xlu0 %4495, %v527_v24   ;;  %568 = vperm.xlu1 %4496, %v526_v25  }
  0x2f   : > { %4360 = vmatmul.mubr.msk.f32.gmra.mxu0 %vm624_vm1, %v4740_v26  ;;  %4378 = vmatmul.mubr.msk.f32.gmra.mxu1 %vm624_vm1, %v4740_v26 }
  0x30   : > { %790 = vmatprep.mubr.f32.mxu0 %v7531_v1  ;;  %951 = vmatprep.mubr.f32.mxu1 %v7531_v1 }
  0x31   : > { %563 = vperm.xlu0 %4495, %v525_v27   ;;  %558 = vperm.xlu1 %4496, %v524_v28  }
  0x33   : > { %4361 = vmatmul.mubr.msk.f32.gmra.mxu0 %vm624_vm1, %v4753_v29  ;;  %4379 = vmatmul.mubr.msk.f32.gmra.mxu1 %vm624_vm1, %v4753_v29 }
  0x34   : > { %796 = vmatprep.mubr.f32.mxu0 %v7531_v1  ;;  %957 = vmatprep.mubr.f32.mxu1 %v7531_v1 }
  0x35   : > { %553 = vperm.xlu0 %4495, %v523_v30   ;;  %548 = vperm.xlu1 %4496, %v522_v31  }
  0x37   : > { %4362 = vmatmul.mubr.msk.f32.gmra.mxu0 %vm624_vm1, %v4766_v32  ;;  %4380 = vmatmul.mubr.msk.f32.gmra.mxu1 %vm624_vm1, %v4766_v32 }
  0x38   : > { %802 = vmatprep.mubr.f32.mxu0 %v7531_v1  ;;  %963 = vmatprep.mubr.f32.mxu1 %v7531_v1 }
  0x39   : > { %543 = vperm.xlu0 %4495, %v521_v33   ;;  %538 = vperm.xlu1 %4496, %v520_v34  }
  0x3b   : > { %4363 = vmatmul.mubr.msk.f32.gmra.mxu0 %vm624_vm1, %v4779_v35  ;;  %4381 = vmatmul.mubr.msk.f32.gmra.mxu1 %vm624_vm1, %v4779_v35 }
  0x3c   : > { %808 = vmatprep.mubr.f32.mxu0 %v7531_v1  ;;  %969 = vmatprep.mubr.f32.mxu1 %v7531_v1 }
  0x3d   : > { %1699 = vperm.xlu0 %4495, %v1621_v36   ;;  %1694 = vperm.xlu1 %4496, %v1620_v37  }
  0x3f   : > { %4364 = vmatmul.mubr.msk.f32.gmra.mxu0 %vm624_vm1, %v4796_v38  ;;  %4382 = vmatmul.mubr.msk.f32.gmra.mxu1 %vm624_vm1, %v4796_v38 }
  0x40   : > { %814 = vmatprep.mubr.f32.mxu0 %v7531_v1  ;;  %975 = vmatprep.mubr.f32.mxu1 %v7531_v1 }
  0x41   : > { %1689 = vperm.xlu0 %4495, %v1619_v39   ;;  %1684 = vperm.xlu1 %4496, %v1618_v40  }
  0x43   : > { %4365 = vmatmul.mubr.msk.f32.gmra.mxu0 %vm624_vm1, %v4813_v41  ;;  %4383 = vmatmul.mubr.msk.f32.gmra.mxu1 %vm624_vm1, %v4813_v41 }
  0x44   : > { %820 = vmatprep.mubr.f32.mxu0 %v7531_v1  ;;  %981 = vmatprep.mubr.f32.mxu1 %v7531_v1 }
  0x45   : > { %1679 = vperm.xlu0 %4495, %v1617_v42   ;;  %1674 = vperm.xlu1 %4496, %v1616_v43  }
  0x47   : > { %4366 = vmatmul.mubr.msk.f32.gmra.mxu0 %vm624_vm1, %v4830_v44  ;;  %4384 = vmatmul.mubr.msk.f32.gmra.mxu1 %vm624_vm1, %v4830_v44 }
  0x48   : > { %826 = vmatprep.mubr.f32.mxu0 %v7531_v1  ;;  %987 = vmatprep.mubr.f32.mxu1 %v7531_v1 }
  0x49   : > { %1669 = vperm.xlu0 %4495, %v1615_v45   ;;  %1664 = vperm.xlu1 %4496, %v1614_v46  }
  0x4b   : > { %4367 = vmatmul.mubr.msk.f32.gmra.mxu0 %vm624_vm1, %v4847_v47  ;;  %4385 = vmatmul.mubr.msk.f32.gmra.mxu1 %vm624_vm1, %v4847_v47 }
  0x4c   : > { %832 = vmatprep.mubr.f32.mxu0 %v7531_v1  ;;  %993 = vmatprep.mubr.f32.mxu1 %v7531_v1 }
  0x4d   : > { %1659 = vperm.xlu0 %4495, %v1613_v48   ;;  %1654 = vperm.xlu1 %4496, %v1612_v49  }
  0x4f   : > { %4368 = vmatmul.mubr.msk.f32.gmra.mxu0 %vm624_vm1, %v4864_v50  ;;  %4386 = vmatmul.mubr.msk.f32.gmra.mxu1 %vm624_vm1, %v4864_v50 }
  0x50   : > { %838 = vmatprep.mubr.f32.mxu0 %v7531_v1  ;;  %999 = vmatprep.mubr.f32.mxu1 %v7531_v1 }
  0x51   : > { %1649 = vperm.xlu0 %4495, %v1611_v51   ;;  %1644 = vperm.xlu1 %4496, %v1610_v52  }
  0x53   : > { %4369 = vmatmul.mubr.msk.f32.gmra.mxu0 %vm624_vm1, %v4881_v53  ;;  %4387 = vmatmul.mubr.msk.f32.gmra.mxu1 %vm624_vm1, %v4881_v53 }
  0x54   : > { %844 = vmatprep.mubr.f32.mxu0 %v7531_v1  ;;  %1005 = vmatprep.mubr.f32.mxu1 %v7531_v1 }
  0x55   : > { %1639 = vperm.xlu0 %4495, %v1609_v54   ;;  %1634 = vperm.xlu1 %4496, %v1608_v55  }
  0x57   : > { %4370 = vmatmul.mubr.msk.f32.gmra.mxu0 %vm624_vm1, %v4898_v56  ;;  %4388 = vmatmul.mubr.msk.f32.gmra.mxu1 %vm624_vm1, %v4898_v56 }
  0x58   : > { %1076 = vmatprep.mubr.f32.mxu0 %v7531_v1  ;;  %1237 = vmatprep.mubr.f32.mxu1 %v7531_v1 }
  0x59   : > { %1629 = vperm.xlu0 %4495, %v1607_v57   ;;  %1624 = vperm.xlu1 %4496, %v1606_v58  }
  0x5b   : > { %4391 = vmatmul.mubr.msk.f32.vlgmr.msra.gmra.mxu0 %vm624_vm1, %v4669_v11  ;;  %4409 = vmatmul.mubr.msk.f32.vlgmr.msra.gmra.mxu1 %vm624_vm1, %v4669_v11  ;;  %v4061_v11 = vld [vmem:[%s7528_s11 + $0x8] sm:$0xff] }
  0x5c   : > { %1082 = vmatprep.mubr.f32.mxu0 %v7531_v1  ;;  %1243 = vmatprep.mubr.f32.mxu1 %v7531_v1 }
  0x5d   : > { %2655 = vperm.xlu0 %4495, %v2617_v59   ;;  %2650 = vperm.xlu1 %4496, %v2616_v60  }
  0x5f   : > { %4392 = vmatmul.mubr.msk.f32.gmra.mxu0 %vm624_vm1, %v4684_v14  ;;  %4410 = vmatmul.mubr.msk.f32.gmra.mxu1 %vm624_vm1, %v4684_v14 }
  0x60   : > { %1088 = vmatprep.mubr.f32.mxu0 %v7531_v1  ;;  %1249 = vmatprep.mubr.f32.mxu1 %v7531_v1 }
  0x61   : > { %2645 = vperm.xlu0 %4495, %v2615_v61   ;;  %2640 = vperm.xlu1 %4496, %v2614_v62  }
  0x63   : > { %4393 = vmatmul.mubr.msk.f32.gmra.mxu0 %vm624_vm1, %v4701_v17  ;;  %4411 = vmatmul.mubr.msk.f32.gmra.mxu1 %vm624_vm1, %v4701_v17 }
  0x64   : > { %1094 = vmatprep.mubr.f32.mxu0 %v7531_v1  ;;  %1255 = vmatprep.mubr.f32.mxu1 %v7531_v1 }
  0x65   : > { %2635 = vperm.xlu0 %4495, %v2613_v63   ;;  %2630 = vperm.xlu1 %4496, %v2612_v0  }
  0x67   : > { %4394 = vmatmul.mubr.msk.f32.gmra.mxu0 %vm624_vm1, %v4714_v20  ;;  %4412 = vmatmul.mubr.msk.f32.gmra.mxu1 %vm624_vm1, %v4714_v20 }
  0x68   : > { %1100 = vmatprep.mubr.f32.mxu0 %v7531_v1  ;;  %1261 = vmatprep.mubr.f32.mxu1 %v7531_v1 }
  0x69   : > { %2625 = vperm.xlu0 %4495, %v2611_v2   ;;  %2620 = vperm.xlu1 %4496, %v2610_v3  }
  0x6b   : > { %4395 = vmatmul.mubr.msk.f32.gmra.mxu0 %vm624_vm1, %v4727_v23  ;;  %4413 = vmatmul.mubr.msk.f32.gmra.mxu1 %vm624_vm1, %v4727_v23 }
  0x6c   : > { %1106 = vmatprep.mubr.f32.mxu0 %v7531_v1  ;;  %1267 = vmatprep.mubr.f32.mxu1 %v7531_v1 }
  0x6d   : > { %3263 = vperm.xlu0 %4495, %v3245_v4   ;;  %3258 = vperm.xlu1 %4496, %v3244_v5  }
  0x6f   : > { %4396 = vmatmul.mubr.msk.f32.gmra.mxu0 %vm624_vm1, %v4740_v26  ;;  %4414 = vmatmul.mubr.msk.f32.gmra.mxu1 %vm624_vm1, %v4740_v26 }
  0x70   : > { %1112 = vmatprep.mubr.f32.mxu0 %v7531_v1  ;;  %1273 = vmatprep.mubr.f32.mxu1 %v7531_v1 }
  0x71   : > { %3253 = vperm.xlu0 %4495, %v3243_v6   ;;  %3248 = vperm.xlu1 %4496, %v3242_v7  }
  0x73   : > { %4397 = vmatmul.mubr.msk.f32.gmra.mxu0 %vm624_vm1, %v4753_v29  ;;  %4415 = vmatmul.mubr.msk.f32.gmra.mxu1 %vm624_vm1, %v4753_v29 }
  0x74   : > { %1118 = vmatprep.mubr.f32.mxu0 %v7531_v1  ;;  %1279 = vmatprep.mubr.f32.mxu1 %v7531_v1 }
  0x75   : > { %3705 = vperm.xlu0 %4495, %v3701_v8   ;;  %3710 = vperm.xlu1 %4496, %v3702_v9  }
  0x77   : > { %4398 = vmatmul.mubr.msk.f32.gmra.mxu0 %vm624_vm1, %v4766_v32  ;;  %4416 = vmatmul.mubr.msk.f32.gmra.mxu1 %vm624_vm1, %v4766_v32 }
  0x78   : > { %1124 = vmatprep.mubr.f32.mxu0 %v7531_v1  ;;  %1285 = vmatprep.mubr.f32.mxu1 %v7531_v1 }
  0x79   : > { %4064 = vperm.xlu0 %4495, %v4060_v10   ;;  %4069 = vperm.xlu1 %4496, %v4061_v11  }
  0x7b   : > { %4399 = vmatmul.mubr.msk.f32.gmra.mxu0 %vm624_vm1, %v4779_v35  ;;  %4417 = vmatmul.mubr.msk.f32.gmra.mxu1 %vm624_vm1, %v4779_v35 }
  0x7c   : > { %1130 = vmatprep.mubr.f32.mxu0 %v7531_v1  ;;  %1291 = vmatprep.mubr.f32.mxu1 %v7531_v1 }
  0x7d   : > { %4147 = vperm.xlu0 %4495, %v4144_v12  }
  0x7f   : > { %4400 = vmatmul.mubr.msk.f32.gmra.mxu0 %vm624_vm1, %v4796_v38  ;;  %4418 = vmatmul.mubr.msk.f32.gmra.mxu1 %vm624_vm1, %v4796_v38 }
  0x80   : > { %1136 = vmatprep.mubr.f32.mxu0 %v7531_v1  ;;  %1297 = vmatprep.mubr.f32.mxu1 %v7531_v1 }
  0x83   : > { %4401 = vmatmul.mubr.msk.f32.gmra.mxu0 %vm624_vm1, %v4813_v41  ;;  %4419 = vmatmul.mubr.msk.f32.gmra.mxu1 %vm624_vm1, %v4813_v41 }
  0x84   : > { %1142 = vmatprep.mubr.f32.mxu0 %v7531_v1  ;;  %1303 = vmatprep.mubr.f32.mxu1 %v7531_v1 }
  0x87   : > { %4402 = vmatmul.mubr.msk.f32.gmra.mxu0 %vm624_vm1, %v4830_v44  ;;  %4420 = vmatmul.mubr.msk.f32.gmra.mxu1 %vm624_vm1, %v4830_v44 }
  0x88   : > { %1148 = vmatprep.mubr.f32.mxu0 %v7531_v1  ;;  %1309 = vmatprep.mubr.f32.mxu1 %v7531_v1 }
  0x8b   : > { %4403 = vmatmul.mubr.msk.f32.gmra.mxu0 %vm624_vm1, %v4847_v47  ;;  %4421 = vmatmul.mubr.msk.f32.gmra.mxu1 %vm624_vm1, %v4847_v47 }
  0x8c   : > { %1154 = vmatprep.mubr.f32.mxu0 %v7531_v1  ;;  %1315 = vmatprep.mubr.f32.mxu1 %v7531_v1 }
  0x8f   : > { %4404 = vmatmul.mubr.msk.f32.gmra.mxu0 %vm624_vm1, %v4864_v50  ;;  %4422 = vmatmul.mubr.msk.f32.gmra.mxu1 %vm624_vm1, %v4864_v50 }
  0x90   : > { %1160 = vmatprep.mubr.f32.mxu0 %v7531_v1  ;;  %1321 = vmatprep.mubr.f32.mxu1 %v7531_v1  ;;  %v5068_v19 = vpop.permute.xlu1 %603  ;;  %v5078_v24 = vpop.permute.xlu0 %613 }
  0x91   : > { %7692 = vst [vmem:[#allocation4_spill] sm:$0xff] %v5068_v19  ;;  %7694 = vst [vmem:[#allocation6_spill] sm:$0xff] %v5078_v24 }
  0x93   : > { %4405 = vmatmul.mubr.msk.f32.gmra.mxu0 %vm624_vm1, %v4881_v53  ;;  %4423 = vmatmul.mubr.msk.f32.gmra.mxu1 %vm624_vm1, %v4881_v53 }
  0x94   : > { %1166 = vmatprep.mubr.f32.mxu0 %v7531_v1  ;;  %1327 = vmatprep.mubr.f32.mxu1 %v7531_v1 }
  0x97   : > { %4406 = vmatmul.mubr.msk.f32.gmra.mxu0 %vm624_vm1, %v4898_v56  ;;  %4424 = vmatmul.mubr.msk.f32.gmra.mxu1 %vm624_vm1, %v4898_v56 }
  0x98   : > { %1766 = vmatprep.mubr.f32.mxu0 %v7531_v1  ;;  %1927 = vmatprep.mubr.f32.mxu1 %v7531_v1 }
  0x9c   : > { %v5084_v27 = vpop.permute.xlu1 %598  ;;  %v5094_v32 = vpop.permute.xlu0 %608 }
  0x9d   : > { %7696 = vst [vmem:[#allocation8_spill] sm:$0xff] %v5094_v32 }
  0xa0   : > { %v5100_v35 = vpop.permute.xlu1 %588  ;;  %v5110_v40 = vpop.permute.xlu0 %593 }
  0xa1   : > { %7698 = vst [vmem:[#allocation10_spill] sm:$0xff] %v5110_v40 }
  0xa4   : > { %v5116_v43 = vpop.permute.xlu1 %578  ;;  %v5120_v48 = vpop.permute.xlu0 %583 }
  0xa5   : > { %7699 = vst [vmem:[#allocation11_spill] sm:$0xff] %v5116_v43 }
  0xa8   : > { %v5122_v51 = vpop.permute.xlu1 %568  ;;  %v5126_v56 = vpop.permute.xlu0 %573 }
  0xac   : > { %v5128_v59 = vpop.permute.xlu1 %558  ;;  %v5132_v0 = vpop.permute.xlu0 %563 }
  0xad   : > { %7702 = vst [vmem:[#allocation14_spill] sm:$0xff] %v5128_v59  ;;  %7704 = vst [vmem:[#allocation16_spill] sm:$0xff] %v5132_v0 }
  0xb0   : > { %v5136_v4 = vpop.permute.xlu1 %548  ;;  %v5138_v9 = vpop.permute.xlu0 %553 }
  0xb1   : > { %7706 = vst [vmem:[#allocation18_spill] sm:$0xff] %v5136_v4  ;;  %7707 = vst [vmem:[#allocation19_spill] sm:$0xff] %v5138_v9 }
  0xb4   : > { %v5140_v12 = vpop.permute.xlu1 %538 }
  0xb5   : > { %7708 = vst [vmem:[#allocation20_spill] sm:$0xff] %v5140_v12 }
  0xdb   : > { %v5056_v13 = vpop.f32.mrf.mxu0  ;;  %v5058_v14 = vpop.f32.mrf.mxu1 }
  0xdd   : > { %v5060_v15 = vpop.f32.mrf.mxu0  ;;  %v5062_v16 = vpop.f32.mrf.mxu1 }
  0xdf   : > { %v5064_v17 = vpop.f32.mrf.mxu0  ;;  %v5066_v18 = vpop.f32.mrf.mxu1 }
  0xe1   : > { %v5070_v20 = vpop.f32.mrf.mxu0  ;;  %v5072_v21 = vpop.f32.mrf.mxu1 }
  0xe2   : > { %7693 = vst [vmem:[#allocation5_spill] sm:$0xff] %v5072_v21 }
  0xe3   : > { %v5074_v22 = vpop.f32.mrf.mxu0  ;;  %v5076_v23 = vpop.f32.mrf.mxu1 }
  0xe5   : > { %v5080_v25 = vpop.f32.mrf.mxu0  ;;  %v5082_v26 = vpop.f32.mrf.mxu1 }
  0xe7   : > { %v5086_v28 = vpop.f32.mrf.mxu0  ;;  %v5088_v29 = vpop.f32.mrf.mxu1 }
  0xe9   : > { %v5090_v30 = vpop.f32.mrf.mxu0  ;;  %v5092_v31 = vpop.f32.mrf.mxu1 }
  0xea   : > { %7695 = vst [vmem:[#allocation7_spill] sm:$0xff] %v5092_v31 }
  0xeb   : > { %v5096_v33 = vpop.f32.mrf.mxu0  ;;  %v5098_v34 = vpop.f32.mrf.mxu1 }
  0xed   : > { %v5102_v36 = vpop.f32.mrf.mxu0  ;;  %v5104_v37 = vpop.f32.mrf.mxu1 }
  0xee   : > { %7697 = vst [vmem:[#allocation9_spill] sm:$0xff] %v5104_v37 }
  0xef   : > { %v5106_v38 = vpop.f32.mrf.mxu0  ;;  %v5108_v39 = vpop.f32.mrf.mxu1 }
  0xf1   : > { %v5112_v41 = vpop.f32.mrf.mxu0  ;;  %v5114_v42 = vpop.f32.mrf.mxu1 }
  0xf3   : > { %v792_v44 = vpop.f32.mrf.mxu0  ;;  %v953_v45 = vpop.f32.mrf.mxu1 }
  0xf5   : > { %v794_v46 = vpop.f32.mrf.mxu0  ;;  %v5118_v47 = vpop.f32.mrf.mxu1 }
  0xf6   : > { %7700 = vst [vmem:[#allocation12_spill] sm:$0xff] %v5118_v47  ;;  %v5148_v47 = vpop.permute.xlu0 %543 }
  0xf7   : > { %v798_v49 = vpop.f32.mrf.mxu0  ;;  %v959_v50 = vpop.f32.mrf.mxu1  ;;  %7711 = vst [vmem:[#allocation23_spill] sm:$0xff] %v5148_v47 }
  0xf9   : > { %v800_v52 = vpop.f32.mrf.mxu0  ;;  %v5124_v53 = vpop.f32.mrf.mxu1 }
  0xfa   : > { %7701 = vst [vmem:[#allocation13_spill] sm:$0xff] %v5124_v53  ;;  %v5152_v53 = vadd.f32 %v5056_v13, %v5140_v12  ;;  %v5172_v13 = vadd.f32 %v5066_v18, %v5148_v47  ;;  %v5192_v18 = vadd.f32 %v5082_v26, %v5136_v4  ;;  %v5212_v26 = vadd.f32 %v5098_v34, %v5128_v59 }
  0xfb   : > { %v804_v54 = vpop.f32.mrf.mxu0  ;;  %v965_v55 = vpop.f32.mrf.mxu1  ;;  %v5232_v34 = vadd.f32 %v5114_v42, %v5132_v0  ;;  %v5250_v42 = vadd.f32 %v800_v52, %v5126_v56 }
  0xfc   : > { %7712 = vst [vmem:[#allocation24_spill] sm:$0xff] %v5152_v53  ;;  %7717 = vst [vmem:[#allocation29_spill] sm:$0xff] %v5172_v13  ;;  %v5244_v13 = vadd.f32 %v798_v49, %v5126_v56 }
  0xfd   : > { %v806_v57 = vpop.f32.mrf.mxu0  ;;  %v967_v58 = vpop.f32.mrf.mxu1  ;;  %7722 = vst [vmem:[#allocation34_spill] sm:$0xff] %v5192_v18  ;;  %7727 = vst [vmem:[#allocation39_spill] sm:$0xff] %v5212_v26 }
  0xfe   : > { %7731 = vst [vmem:[#allocation43_spill] sm:$0xff] %v5232_v34 }
  0xff   : > { %v810_v60 = vpop.f32.mrf.mxu0  ;;  %v5130_v61 = vpop.f32.mrf.mxu1 }
 0x100   : > { %7703 = vst [vmem:[#allocation15_spill] sm:$0xff] %v5130_v61  ;;  %v5156_v61 = vadd.f32 %v5058_v14, %v5140_v12  ;;  %v5176_v14 = vadd.f32 %v5070_v20, %v5148_v47  ;;  %v5196_v20 = vadd.f32 %v5086_v28, %v5138_v9  ;;  %v5216_v28 = vadd.f32 %v5102_v36, %v5128_v59 }
 0x101   : > { %v812_v62 = vpop.f32.mrf.mxu0  ;;  %v973_v63 = vpop.f32.mrf.mxu1  ;;  %v5238_v36 = vadd.f32 %v953_v45, %v5122_v51  ;;  %v5256_v45 = vadd.f32 %v965_v55, %v5116_v43  ;;  %v5265_v49 = vadd.f32 %v810_v60, %v5120_v48 }
 0x102   : > { %7713 = vst [vmem:[#allocation25_spill] sm:$0xff] %v5156_v61  ;;  %7718 = vst [vmem:[#allocation30_spill] sm:$0xff] %v5176_v14  ;;  %v5268_v52 = vadd.f32 %v812_v62, %v5120_v48 }
 0x103   : > { %v816_v2 = vpop.f32.mrf.mxu0  ;;  %v5134_v3 = vpop.f32.mrf.mxu1  ;;  %7723 = vst [vmem:[#allocation35_spill] sm:$0xff] %v5196_v20  ;;  %7728 = vst [vmem:[#allocation40_spill] sm:$0xff] %v5216_v28 }
 0x104   : > { %7705 = vst [vmem:[#allocation17_spill] sm:$0xff] %v5134_v3  ;;  %v5160_v3 = vadd.f32 %v5060_v15, %v5140_v12  ;;  %v5180_v15 = vadd.f32 %v5074_v22, %v5136_v4  ;;  %v5200_v22 = vadd.f32 %v5088_v29, %v5138_v9  ;;  %v5220_v29 = vadd.f32 %v5106_v38, %v5132_v0 }
 0x105   : > { %v818_v5 = vpop.f32.mrf.mxu0  ;;  %v979_v6 = vpop.f32.mrf.mxu1  ;;  %v5241_v38 = vadd.f32 %v794_v46, %v5122_v51  ;;  %v5259_v46 = vadd.f32 %v806_v57, %v5116_v43  ;;  %v5274_v55 = vadd.f32 %v816_v2, %v5100_v35 }
 0x106   : > { %7714 = vst [vmem:[#allocation26_spill] sm:$0xff] %v5160_v3  ;;  %7719 = vst [vmem:[#allocation31_spill] sm:$0xff] %v5180_v15  ;;  %v5277_v57 = vadd.f32 %v818_v5, %v5100_v35 }
 0x107   : > { %v822_v7 = vpop.f32.mrf.mxu0  ;;  %v983_v8 = vpop.f32.mrf.mxu1  ;;  %7724 = vst [vmem:[#allocation36_spill] sm:$0xff] %v5200_v22  ;;  %7729 = vst [vmem:[#allocation41_spill] sm:$0xff] %v5220_v29 }
 0x108   : > { %v5283_v60 = vadd.f32 %v822_v7, %v5110_v40 }
 0x109   : > { %v824_v10 = vpop.f32.mrf.mxu0  ;;  %v985_v11 = vpop.f32.mrf.mxu1 }
 0x10a   : > { %v5296_v15 = vadd.f32 %v985_v11, %v5110_v40 }
 0x10b   : > { %v5142_v1 = vpop.f32.mrf.mxu0  ;;  %v5144_v21 = vpop.f32.mrf.mxu1 }
 0x10c   : > { %7709 = vst [vmem:[#allocation21_spill] sm:$0xff] %v5144_v21  ;;  %v5164_v21 = vadd.f32 %v5062_v16, %v5140_v12  ;;  %v5184_v16 = vadd.f32 %v5076_v23, %v5136_v4  ;;  %v5204_v23 = vadd.f32 %v5090_v30, %v5138_v9  ;;  %v5224_v30 = vadd.f32 %v5108_v39, %v5132_v0 }
 0x10d   : > { %v830_v31 = vpop.f32.mrf.mxu0  ;;  %v5146_v37 = vpop.f32.mrf.mxu1 }
 0x10e   : > { %7710 = vst [vmem:[#allocation22_spill] sm:$0xff] %v5146_v37  ;;  %7715 = vst [vmem:[#allocation27_spill] sm:$0xff] %v5164_v21  ;;  %v5168_v37 = vadd.f32 %v5064_v17, %v5148_v47  ;;  %v5188_v17 = vadd.f32 %v5080_v25, %v5136_v4  ;;  %v5208_v25 = vadd.f32 %v5096_v33, %v5128_v59 }
 0x10f   : > { %v834_v61 = vpop.f32.mrf.mxu0  ;;  %v995_v53 = vpop.f32.mrf.mxu1  ;;  %7720 = vst [vmem:[#allocation32_spill] sm:$0xff] %v5184_v16  ;;  %7725 = vst [vmem:[#allocation37_spill] sm:$0xff] %v5204_v23  ;;  %v5228_v33 = vadd.f32 %v5112_v41, %v5132_v0  ;;  %v5235_v21 = vadd.f32 %v792_v44, %v5122_v51  ;;  %v5247_v41 = vadd.f32 %v959_v50, %v5126_v56 }
 0x110   : > { %7716 = vst [vmem:[#allocation28_spill] sm:$0xff] %v5168_v37  ;;  %7721 = vst [vmem:[#allocation33_spill] sm:$0xff] %v5188_v17  ;;  %v5253_v44 = vadd.f32 %v804_v54, %v5116_v43  ;;  %v5262_v0 = vadd.f32 %v967_v58, %v5116_v43  ;;  %v5271_v54 = vadd.f32 %v973_v63, %v5120_v48 }
 0x111   : > { %7726 = vst [vmem:[#allocation38_spill] sm:$0xff] %v5208_v25  ;;  %v836_v4 = vpop.f32.mrf.mxu0  ;;  %v997_v12 = vpop.f32.mrf.mxu1  ;;  %7730 = vst [vmem:[#allocation42_spill] sm:$0xff] %v5224_v30  ;;  %v5280_v58 = vadd.f32 %v979_v6, %v5100_v35  ;;  %v5286_v43 = vadd.f32 %v983_v8, %v5110_v40  ;;  %v5290_v16 = vadd.f32 %v824_v10, %v5110_v40 }
 0x112   : > { %v5299_v7 = vadd.f32 %v830_v31, %v5084_v27  ;;  %v5304_v10 = vadd.f32 %v834_v61, %v5068_v19  ;;  %v5310_v11 = vadd.f32 %v997_v12, %v5068_v19 }
 0x113   : > { %v840_v3 = vpop.f32.mrf.mxu0  ;;  %v1001_v39 = vpop.f32.mrf.mxu1 }
 0x114   : > { %v841_v8 = vadd.f32 %v840_v3, %v5094_v32  ;;  %v1441_v28 = vmul.f32 0.02, %v5310_v11 }
 0x115   : > { %v842_v50 = vpop.f32.mrf.mxu0  ;;  %v1003_v37 = vpop.f32.mrf.mxu1  ;;  %v7734_v12 = vld [vmem:[#allocation22_spill] sm:$0xff] }
 0x116   : > { %v843_v62 = vadd.f32 %v842_v50, %v5094_v32  ;;  %v1004_v2 = vadd.f32 %v1003_v37, %v5094_v32  ;;  %v1002_v50 = vadd.f32 %v1001_v39, %v5094_v32  ;;  %v837_v37 = vadd.f32 %v836_v4, %v5068_v19 }
 0x117   : > { %v846_v14 = vpop.f32.mrf.mxu0  ;;  %v1007_v63 = vpop.f32.mrf.mxu1  ;;  %v5317_v32 = vadd.f32 %v995_v53, %v5068_v19  ;;  %v7737_v53 = vld [vmem:[#allocation21_spill] sm:$0xff] }
 0x118   : > { %v847_v5 = vadd.f32 %v846_v14, %v5078_v24  ;;  %v1008_v6 = vadd.f32 %v1007_v63, %v5078_v24  ;;  %v1447_v31 = vmul.f32 0.02, %v843_v62  ;;  %v1449_v61 = vmul.f32 0.02, %v1004_v2 }
 0x119   : > { %v848_v18 = vpop.f32.mrf.mxu0  ;;  %v1009_v17 = vpop.f32.mrf.mxu1  ;;  %v1448_v23 = vmul.f32 0.02, %v1002_v50  ;;  %v1439_v19 = vmul.f32 0.02, %v837_v37 }
 0x11a   : > { %v849_v14 = vadd.f32 %v848_v18, %v5078_v24  ;;  %v1010_v63 = vadd.f32 %v1009_v17, %v5078_v24  ;;  %v1454_v40 = vmul.f32 0.02, %v847_v5  ;;  %v1456_v22 = vmul.f32 0.02, %v1008_v6 }
 0x11b   : > { %v5312_v3 = vpop.f32.mrf.mxu0  ;;  %v5314_v39 = vpop.f32.mrf.mxu1  ;;  %v5321_v18 = vadd.f32 %v5142_v1, %v5084_v27  ;;  %v5325_v17 = vadd.f32 %v7734_v12, %v5084_v27  ;;  %v1446_v24 = vmul.f32 0.02, %v841_v8  ;;  %v1438_v1 = vmul.f32 0.02, %v5304_v10 }
 0x11c   : > { %7732 = vst [vmem:[#allocation44_spill] sm:$0xff] %v5312_v3  ;;  %7733 = vst [vmem:[#allocation45_spill] sm:$0xff] %v5314_v39  ;;  %v1455_v20 = vmul.f32 0.02, %v849_v14  ;;  %v1457_v4 = vmul.f32 0.02, %v1010_v63  ;;  %v5333_v39 = vadd.f32 %v7737_v53, %v5084_v27  ;;  %v1582_v30 = vmax.f32 %v847_v5, %v1454_v40 }
 0x11d   : > { %v5327_v47 = vpop.f32.mrf.mxu0  ;;  %v5329_v3 = vpop.f32.mrf.mxu1  ;;  %v1584_v12 = vmax.f32 %v1008_v6, %v1456_v22  ;;  %v1575_v9 = vmax.f32 %v843_v62, %v1447_v31  ;;  %v1577_v53 = vmax.f32 %v1004_v2, %v1449_v61  ;;  %v7742_v5 = vld [vmem:[#allocation17_spill] sm:$0xff]  ;;  %v1423_v62 = vmul.f32 0.02, %v5290_v16  ;;  %v7745_v31 = vld [vmem:[#allocation15_spill] sm:$0xff] }
 0x11e   : > { %7735 = vst [vmem:[#allocation22_spill] sm:$0xff] %v5327_v47  ;;  %7736 = vst [vmem:[#allocation46_spill] sm:$0xff] %v5329_v3  ;;  %v1583_v26 = vmax.f32 %v849_v14, %v1455_v20  ;;  %v1585_v25 = vmax.f32 %v1010_v63, %v1457_v4  ;;  %v1431_v47 = vmul.f32 0.02, %v5299_v7  ;;  %v1440_v3 = vmul.f32 0.02, %v5317_v32 }
 0x11f   : > { %v5337_v29 = vpop.f32.mrf.mxu0  ;;  %v5339_v34 = vpop.f32.mrf.mxu1  ;;  %v1430_v20 = vmul.f32 0.02, %v5321_v18  ;;  %v1433_v14 = vmul.f32 0.02, %v5325_v17  ;;  %v1574_v63 = vmax.f32 %v841_v8, %v1446_v24  ;;  %v1576_v4 = vmax.f32 %v1002_v50, %v1448_v23 }
 0x120   : > { %7738 = vst [vmem:[#allocation21_spill] sm:$0xff] %v5337_v29  ;;  %7739 = vst [vmem:[#allocation47_spill] sm:$0xff] %v5339_v34  ;;  %1702 = vmatprep.subr.mxu0 %v1583_v26  ;;  %1863 = vmatprep.subr.mxu1 %v1585_v25  ;;  %v5351_v6 = vadd.f32 %v7742_v5, %v5100_v35  ;;  %v1432_v25 = vmul.f32 0.02, %v5333_v39  ;;  %v1567_v26 = vmax.f32 %v837_v37, %v1439_v19  ;;  %v7774_v34 = vld [vmem:[#allocation34_spill] sm:$0xff] }
 0x121   : > { %v5345_v40 = vpop.f32.mrf.mxu0  ;;  %v5347_v22 = vpop.f32.mrf.mxu1  ;;  %1703 = vmatpush1.msra.mxu0 %v1582_v30  ;;  %1864 = vmatpush1.msra.mxu1 %v1584_v12  ;;  %v1422_v24 = vmul.f32 0.02, %v5283_v60  ;;  %v1425_v23 = vmul.f32 0.02, %v5296_v15  ;;  %v1566_v2 = vmax.f32 %v5304_v10, %v1438_v1  ;;  %v1569_v30 = vmax.f32 %v5310_v11, %v1441_v28  ;;  %v7777_v29 = vld [vmem:[#allocation30_spill] sm:$0xff] }
 0x122   : > { %7740 = vst [vmem:[#allocation48_spill] sm:$0xff] %v5345_v40  ;;  %7741 = vst [vmem:[#allocation49_spill] sm:$0xff] %v5347_v22  ;;  %1704 = vmatprep.subr.mxu0 %v1575_v9  ;;  %1865 = vmatprep.subr.mxu1 %v1577_v53  ;;  %v5365_v61 = vadd.f32 %v7745_v31, %v5120_v48  ;;  %v1424_v19 = vmul.f32 0.02, %v5286_v43  ;;  %v1559_v9 = vmax.f32 %v5299_v7, %v1431_v47 }
 0x123   : > { %v5359_v8 = vpop.f32.mrf.mxu0  ;;  %v5361_v50 = vpop.f32.mrf.mxu1  ;;  %1705 = vmatpush1.msra.mxu0 %v1574_v63  ;;  %1866 = vmatpush1.msra.mxu1 %v1576_v4  ;;  %v1568_v37 = vmax.f32 %v5317_v32, %v1440_v3  ;;  %v1415_v10 = vmul.f32 0.02, %v5277_v57  ;;  %v1417_v28 = vmul.f32 0.02, %v5280_v58  ;;  %v1558_v11 = vmax.f32 %v5321_v18, %v1430_v20 }
 0x124   : > { %7743 = vst [vmem:[#allocation17_spill] sm:$0xff] %v5359_v8  ;;  %7744 = vst [vmem:[#allocation50_spill] sm:$0xff] %v5361_v50  ;;  %1706 = vmatprep.subr.mxu0 %v1567_v26  ;;  %v1561_v1 = vmax.f32 %v5325_v17, %v1433_v14  ;;  %1867 = vmatprep.subr.mxu1 %v1569_v30  ;;  %v1414_v63 = vmul.f32 0.02, %v5274_v55  ;;  %v1416_v47 = vmul.f32 0.02, %v5351_v6 }
 0x125   : > { %v5374_v12 = vpop.f32.mrf.mxu0  ;;  %v5376_v53 = vpop.f32.mrf.mxu1  ;;  %1707 = vmatpush1.msra.mxu0 %v1566_v2  ;;  %v1551_v32 = vmax.f32 %v5290_v16, %v1423_v62  ;;  %v1560_v7 = vmax.f32 %v5333_v39, %v1432_v25  ;;  %1868 = vmatpush1.msra.mxu1 %v1568_v37  ;;  %v1407_v3 = vmul.f32 0.02, %v5268_v52  ;;  %v1409_v18 = vmul.f32 0.02, %v5271_v54  ;;  %v7750_v16 = vld [vmem:[#allocation13_spill] sm:$0xff]  ;;  %v7753_v30 = vld [vmem:[#allocation12_spill] sm:$0xff] }
 0x126   : > { %7746 = vst [vmem:[#allocation15_spill] sm:$0xff] %v5374_v12  ;;  %7747 = vst [vmem:[#allocation51_spill] sm:$0xff] %v5376_v53  ;;  %1708 = vmatprep.subr.mxu0 %v1559_v9  ;;  %v1550_v17 = vmax.f32 %v5283_v60, %v1422_v24  ;;  %v1553_v20 = vmax.f32 %v5296_v15, %v1425_v23  ;;  %1869 = vmatprep.subr.mxu1 %v1561_v1  ;;  %v1406_v39 = vmul.f32 0.02, %v5265_v49  ;;  %v7793_v53 = vld [vmem:[#allocation8_spill] sm:$0xff] }
 0x127   : > { %v5386_v14 = vpop.f32.mrf.mxu0  ;;  %v5388_v4 = vpop.f32.mrf.mxu1  ;;  %1709 = vmatpush1.msra.mxu0 %v1558_v11  ;;  %v5392_v5 = vadd.f32 %v7750_v16, %v5126_v56  ;;  %v1408_v62 = vmul.f32 0.02, %v5365_v61  ;;  %v1552_v25 = vmax.f32 %v5286_v43, %v1424_v19  ;;  %1870 = vmatpush1.msra.mxu1 %v1560_v7  ;;  %v1399_v15 = vmul.f32 0.02, %v5259_v46 }
 0x128   : > { %7748 = vst [vmem:[#allocation52_spill] sm:$0xff] %v5386_v14  ;;  %7749 = vst [vmem:[#allocation53_spill] sm:$0xff] %v5388_v4  ;;  %1710 = vmatprep.subr.mxu0 %v1551_v32  ;;  %v1401_v60 = vmul.f32 0.02, %v5262_v0  ;;  %v1543_v26 = vmax.f32 %v5277_v57, %v1415_v10  ;;  %v1545_v24 = vmax.f32 %v5280_v58, %v1417_v28  ;;  %1871 = vmatprep.subr.mxu1 %v1553_v20 }
 0x129   : > { %v5401_v23 = vpop.f32.mrf.mxu0  ;;  %v5403_v2 = vpop.f32.mrf.mxu1  ;;  %1711 = vmatpush1.msra.mxu0 %v1550_v17  ;;  %v5407_v31 = vadd.f32 %v7753_v30, %v5122_v51  ;;  %v1398_v43 = vmul.f32 0.02, %v5253_v44  ;;  %v1542_v19 = vmax.f32 %v5274_v55, %v1414_v63  ;;  %v1544_v9 = vmax.f32 %v5351_v6, %v1416_v47  ;;  %1872 = vmatpush1.msra.mxu1 %v1552_v25 }
 0x12a   : > { %7751 = vst [vmem:[#allocation13_spill] sm:$0xff] %v5401_v23  ;;  %7752 = vst [vmem:[#allocation54_spill] sm:$0xff] %v5403_v2  ;;  %v1391_v57 = vmul.f32 0.02, %v5250_v42  ;;  %v1400_v58 = vmul.f32 0.02, %v5256_v45  ;;  %v1535_v37 = vmax.f32 %v5268_v52, %v1407_v3  ;;  %v1537_v10 = vmax.f32 %v5271_v54, %v1409_v18  ;;  %1712 = vmatprep.subr.mxu0 %v1543_v26 }
 0x12b   : > { %1873 = vmatprep.subr.mxu1 %v1545_v24  ;;  %v5416_v28 = vpop.f32.mrf.mxu0  ;;  %v5418_v11 = vpop.f32.mrf.mxu1  ;;  %v1390_v1 = vmul.f32 0.02, %v5244_v13  ;;  %v1393_v55 = vmul.f32 0.02, %v5392_v5  ;;  %v1534_v6 = vmax.f32 %v5265_v49, %v1406_v39  ;;  %v1536_v63 = vmax.f32 %v5365_v61, %v1408_v62  ;;  %1713 = vmatpush1.msra.mxu0 %v1542_v19  ;;  %v7758_v49 = vld [vmem:[#allocation9_spill] sm:$0xff] }
 0x12c   : > { %7754 = vst [vmem:[#allocation12_spill] sm:$0xff] %v5416_v28  ;;  %7755 = vst [vmem:[#allocation55_spill] sm:$0xff] %v5418_v11  ;;  %1874 = vmatpush1.msra.mxu1 %v1544_v9  ;;  %v1383_v52 = vmul.f32 0.02, %v5241_v38  ;;  %v1392_v54 = vmul.f32 0.02, %v5247_v41  ;;  %v1527_v47 = vmax.f32 %v5259_v46, %v1399_v15  ;;  %v1529_v32 = vmax.f32 %v5262_v0, %v1401_v60 }
 0x12d   : > { %1714 = vmatprep.subr.mxu0 %v1535_v37  ;;  %1875 = vmatprep.subr.mxu1 %v1537_v10  ;;  %v5428_v7 = vpop.f32.mrf.mxu0  ;;  %v5430_v3 = vpop.f32.mrf.mxu1  ;;  %v5434_v18 = vadd.f32 %v7758_v49, %v5128_v59  ;;  %v1382_v61 = vmul.f32 0.02, %v5235_v21  ;;  %v1385_v17 = vmul.f32 0.02, %v5407_v31  ;;  %v1526_v20 = vmax.f32 %v5253_v44, %v1398_v43  ;;  %v7760_v15 = vld [vmem:[#allocation19_spill] sm:$0xff] }
 0x12e   : > { %7756 = vst [vmem:[#allocation56_spill] sm:$0xff] %v5428_v7  ;;  %7757 = vst [vmem:[#allocation57_spill] sm:$0xff] %v5430_v3  ;;  %1715 = vmatpush1.msra.mxu0 %v1534_v6  ;;  %1876 = vmatpush1.msra.mxu1 %v1536_v63  ;;  %v1375_v0 = vmul.f32 0.02, %v5228_v33  ;;  %v1384_v46 = vmul.f32 0.02, %v5238_v36  ;;  %v1519_v16 = vmax.f32 %v5250_v42, %v1391_v57 }
 0x12f   : > { %v1528_v39 = vmax.f32 %v5256_v45, %v1400_v58  ;;  %1716 = vmatprep.subr.mxu0 %v1527_v47  ;;  %1877 = vmatprep.subr.mxu1 %v1529_v32  ;;  %v5443_v62 = vpop.f32.mrf.mxu0  ;;  %v5445_v25 = vpop.f32.mrf.mxu1  ;;  %v7761_v60 = vld [vmem:[#allocation7_spill] sm:$0xff]  ;;  %v1518_v30 = vmax.f32 %v5244_v13, %v1390_v1  ;;  %v1521_v43 = vmax.f32 %v5392_v5, %v1393_v55  ;;  %v7763_v42 = vld [vmem:[#allocation41_spill] sm:$0xff]  ;;  %v7764_v45 = vld [vmem:[#allocation42_spill] sm:$0xff]  ;;  %v1369_v13 = vmul.f32 0.02, %v5434_v18 }
 0x130   : > { %7759 = vst [vmem:[#allocation9_spill] sm:$0xff] %v5445_v25  ;;  %v5449_v26 = vadd.f32 %v7761_v60, %v7760_v15  ;;  %v7762_v44 = vld [vmem:[#allocation43_spill] sm:$0xff]  ;;  %1717 = vmatpush1.msra.mxu0 %v1526_v20  ;;  %v1374_v19 = vmul.f32 0.02, %v7763_v42  ;;  %v1376_v9 = vmul.f32 0.02, %v7764_v45  ;;  %v1511_v57 = vmax.f32 %v5241_v38, %v1383_v52 }
 0x131   : > { %v1377_v24 = vmul.f32 0.02, %v7762_v44  ;;  %v1520_v58 = vmax.f32 %v5247_v41, %v1392_v54  ;;  %1878 = vmatpush1.msra.mxu1 %v1528_v39  ;;  %1718 = vmatprep.subr.mxu0 %v1519_v16  ;;  %v5458_v37 = vpop.f32.mrf.mxu0  ;;  %v5460_v10 = vpop.f32.mrf.mxu1  ;;  %v7765_v6 = vld [vmem:[#allocation40_spill] sm:$0xff]  ;;  %v1510_v5 = vmax.f32 %v5235_v21, %v1382_v61  ;;  %v1513_v1 = vmax.f32 %v5407_v31, %v1385_v17  ;;  %v7766_v55 = vld [vmem:[#allocation38_spill] sm:$0xff]  ;;  %v7767_v52 = vld [vmem:[#allocation39_spill] sm:$0xff] }
 0x132   : > { %v1367_v63 = vmul.f32 0.02, %v7765_v6  ;;  %1879 = vmatprep.subr.mxu1 %v1521_v43  ;;  %1719 = vmatpush1.msra.mxu0 %v1518_v30  ;;  %v1366_v38 = vmul.f32 0.02, %v7766_v55  ;;  %v1368_v41 = vmul.f32 0.02, %v7767_v52  ;;  %v1503_v54 = vmax.f32 %v5228_v33, %v1375_v0 }
 0x133   : > { %v1512_v47 = vmax.f32 %v5238_v36, %v1384_v46  ;;  %1880 = vmatpush1.msra.mxu1 %v1520_v58  ;;  %1720 = vmatprep.subr.mxu0 %v1511_v57  ;;  %v5470_v32 = vpop.f32.mrf.mxu0  ;;  %v5472_v49 = vpop.f32.mrf.mxu1  ;;  %v7768_v20 = vld [vmem:[#allocation23_spill] sm:$0xff]  ;;  %v7769_v21 = vld [vmem:[#allocation5_spill] sm:$0xff]  ;;  %v1361_v16 = vmul.f32 0.02, %v5449_v26  ;;  %v1505_v39 = vmax.f32 %v7762_v44, %v1377_v24  ;;  %v7772_v0 = vld [vmem:[#allocation36_spill] sm:$0xff]  ;;  %v1502_v60 = vmax.f32 %v7763_v42, %v1374_v19 }
 0x134   : > { %v5476_v61 = vadd.f32 %v7769_v21, %v7768_v20  ;;  %v7770_v31 = vld [vmem:[#allocation37_spill] sm:$0xff]  ;;  %1881 = vmatprep.subr.mxu1 %v1513_v1  ;;  %1721 = vmatpush1.msra.mxu0 %v1510_v5  ;;  %v7771_v33 = vld [vmem:[#allocation35_spill] sm:$0xff]  ;;  %v1360_v46 = vmul.f32 0.02, %v7772_v0  ;;  %v1504_v30 = vmax.f32 %v7764_v45, %v1376_v9  ;;  %v1353_v44 = vmul.f32 0.02, %v7774_v34 }
 0x135   : > { %v1359_v17 = vmul.f32 0.02, %v7770_v31  ;;  %v1358_v36 = vmul.f32 0.02, %v7771_v33  ;;  %1882 = vmatpush1.msra.mxu1 %v1512_v47  ;;  %1722 = vmatprep.subr.mxu0 %v1503_v54  ;;  %v5485_v43 = vpop.f32.mrf.mxu0  ;;  %v5487_v57 = vpop.f32.mrf.mxu1  ;;  %v7773_v58 = vld [vmem:[#allocation33_spill] sm:$0xff]  ;;  %v1495_v24 = vmax.f32 %v7765_v6, %v1367_v63  ;;  %v1497_v5 = vmax.f32 %v5434_v18, %v1369_v13  ;;  %v7775_v1 = vld [vmem:[#allocation31_spill] sm:$0xff] }
 0x136   : > { %v1351_v21 = vmul.f32 0.02, %v7773_v58  ;;  %1883 = vmatprep.subr.mxu1 %v1505_v39  ;;  %v1350_v22 = vmul.f32 0.02, %v7775_v1  ;;  %v7776_v42 = vld [vmem:[#allocation32_spill] sm:$0xff]  ;;  %v1494_v45 = vmax.f32 %v7766_v55, %v1366_v38  ;;  %v1496_v9 = vmax.f32 %v7767_v52, %v1368_v41  ;;  %1723 = vmatpush1.msra.mxu0 %v1502_v60  ;;  %v7779_v38 = vld [vmem:[#allocation29_spill] sm:$0xff] }
 0x137   : > { %v1352_v19 = vmul.f32 0.02, %v7776_v42  ;;  %1884 = vmatpush1.msra.mxu1 %v1504_v30  ;;  %v5497_v54 = vpop.f32.mrf.mxu0  ;;  %v5499_v47 = vpop.f32.mrf.mxu1  ;;  %v1343_v40 = vmul.f32 0.02, %v7777_v29  ;;  %v1345_v6 = vmul.f32 0.02, %v5476_v61  ;;  %v1487_v18 = vmax.f32 %v7770_v31, %v1359_v17  ;;  %1724 = vmatprep.subr.mxu0 %v1495_v24 }
 0x138   : > { %v1489_v63 = vmax.f32 %v5449_v26, %v1361_v16  ;;  %1885 = vmatprep.subr.mxu1 %v1497_v5  ;;  %v7778_v13 = vld [vmem:[#allocation28_spill] sm:$0xff]  ;;  %v1344_v52 = vmul.f32 0.02, %v7779_v38  ;;  %v1486_v41 = vmax.f32 %v7771_v33, %v1358_v36  ;;  %v1488_v39 = vmax.f32 %v7772_v0, %v1360_v46  ;;  %1725 = vmatpush1.msra.mxu0 %v1494_v45  ;;  %v7780_v20 = vld [vmem:[#allocation26_spill] sm:$0xff]  ;;  %v7781_v17 = vld [vmem:[#allocation27_spill] sm:$0xff] }
 0x139   : > { %v1342_v55 = vmul.f32 0.02, %v7778_v13  ;;  %1886 = vmatpush1.msra.mxu1 %v1496_v9  ;;  %v5509_v60 = vpop.f32.mrf.mxu0  ;;  %v5511_v30 = vpop.f32.mrf.mxu1  ;;  %v1335_v31 = vmul.f32 0.02, %v7780_v20  ;;  %v1337_v26 = vmul.f32 0.02, %v7781_v17  ;;  %v1479_v16 = vmax.f32 %v7773_v58, %v1351_v21  ;;  %1726 = vmatprep.subr.mxu0 %v1487_v18 }
 0x13a   : > { %v1481_v24 = vmax.f32 %v7774_v34, %v1353_v44  ;;  %1887 = vmatprep.subr.mxu1 %v1489_v63  ;;  %v7782_v5 = vld [vmem:[#allocation24_spill] sm:$0xff]  ;;  %v7783_v36 = vld [vmem:[#allocation25_spill] sm:$0xff]  ;;  %v1478_v46 = vmax.f32 %v7775_v1, %v1350_v22  ;;  %v1480_v45 = vmax.f32 %v7776_v42, %v1352_v19  ;;  %1727 = vmatpush1.msra.mxu0 %v1486_v41 }
 0x13b   : > { %v1334_v33 = vmul.f32 0.02, %v7782_v5  ;;  %v1336_v0 = vmul.f32 0.02, %v7783_v36  ;;  %1888 = vmatpush1.msra.mxu1 %v1488_v39  ;;  %v5521_v9 = vpop.f32.mrf.mxu0  ;;  %v5523_v50 = vpop.f32.mrf.mxu1  ;;  %v1471_v58 = vmax.f32 %v7777_v29, %v1343_v40  ;;  %v1473_v34 = vmax.f32 %v5476_v61, %v1345_v6  ;;  %1728 = vmatprep.subr.mxu0 %v1479_v16  ;;  %v5544_v18 = vld [vmem:[%s7520_s3] sm:$0xff] }
 0x13c   : > { %1889 = vmatprep.subr.mxu1 %v1481_v24  ;;  %v1470_v21 = vmax.f32 %v7778_v13, %v1342_v55  ;;  %v1472_v44 = vmax.f32 %v7779_v38, %v1344_v52  ;;  %1729 = vmatpush1.msra.mxu0 %v1478_v46  ;;  %v1463_v42 = vmax.f32 %v7780_v20, %v1335_v31  ;;  %v7785_v38 = vmov 0.0   ;;  %v5561_v52 = vld [vmem:[%s7520_s3 + $0x8] sm:$0xff] }
 0x13d   : > { %1890 = vmatpush1.msra.mxu1 %v1480_v45  ;;  %v5529_v22 = vpop.f32.mrf.mxu0  ;;  %v5531_v1 = vpop.f32.mrf.mxu1  ;;  %v1465_v19 = vmax.f32 %v7781_v17, %v1337_v26  ;;  %1730 = vmatprep.subr.mxu0 %v1471_v58  ;;  %v1462_v29 = vmax.f32 %v7782_v5, %v1334_v33  ;;  %v1464_v40 = vmax.f32 %v7783_v36, %v1336_v0  ;;  %v5578_v26 = vld [vmem:[%s7520_s3 + $0x10] sm:$0xff]  ;;  %v5595_v36 = vld [vmem:[%s7520_s3 + $0x18] sm:$0xff] }
 0x13e   : > { %1891 = vmatprep.subr.mxu1 %v1473_v34  ;;  %1731 = vmatpush1.msra.mxu0 %v1470_v21  ;;  %7784 = vst [vmem:[#allocation7_spill] sm:$0xff] %v5544_v18  ;;  %7786 = vst [vmem:[#allocation43_spill] sm:$0xff] %v5561_v52  ;;  %v5604_v34 = vld [vmem:[%s7520_s3 + $0x20] sm:$0xff] }
 0x13f   : > { %1892 = vmatpush1.msra.mxu1 %v1472_v44  ;;  %v5537_v61 = vpop.f32.mrf.mxu0  ;;  %v5539_v6 = vpop.f32.mrf.mxu1  ;;  %1732 = vmatprep.subr.mxu0 %v1463_v42  ;;  %7787 = vst [vmem:[#allocation41_spill] sm:$0xff] %v5578_v26  ;;  %7788 = vst [vmem:[#allocation42_spill] sm:$0xff] %v5595_v36 }
 0x140   : > { %1893 = vmatprep.subr.mxu1 %v1465_v19  ;;  %1733 = vmatpush1.msra.mxu0 %v1462_v29  ;;  %7789 = vst [vmem:[#allocation40_spill] sm:$0xff] %v5604_v34  ;;  %v5613_v29 = vld [vmem:[%s7520_s3 + $0x28] sm:$0xff] }
 0x141   : > { %1894 = vmatpush1.msra.mxu1 %v1464_v40  ;;  %v5546_v20 = vpop.f32.mrf.mxu0  ;;  %v5548_v63 = vpop.f32.mrf.mxu1  ;;  %1767 = vmatmul.mubr.f32.vlgmr.msra.gmra.mxu0 %v5544_v18  ;;  %7790 = vst [vmem:[#allocation38_spill] sm:$0xff] %v5613_v29 }
 0x142   : > { %1928 = vmatmul.mubr.f32.vlgmr.msra.gmra.mxu1 %v5544_v18  ;;  %1772 = vmatprep.mubr.f32.mxu0 %v7785_v38  ;;  %v7792_v18 = vld [vmem:[#allocation6_spill] sm:$0xff] }
 0x143   : > { %v5552_v13 = vpop.f32.mrf.mxu0  ;;  %v5554_v55 = vpop.f32.mrf.mxu1  ;;  %1933 = vmatprep.mubr.f32.mxu1 %v7785_v38 }
 0x145   : > { %v5563_v41 = vpop.f32.mrf.mxu0  ;;  %v5565_v39 = vpop.f32.mrf.mxu1  ;;  %1773 = vmatmul.mubr.f32.gmra.mxu0 %v5561_v52 }
 0x146   : > { %1934 = vmatmul.mubr.f32.gmra.mxu1 %v5561_v52  ;;  %1778 = vmatprep.mubr.f32.mxu0 %v7785_v38 }
 0x147   : > { %v5569_v31 = vpop.f32.mrf.mxu0  ;;  %v5571_v17 = vpop.f32.mrf.mxu1  ;;  %1939 = vmatprep.mubr.f32.mxu1 %v7785_v38 }
 0x149   : > { %v5580_v16 = vpop.f32.mrf.mxu0  ;;  %v5582_v24 = vpop.f32.mrf.mxu1  ;;  %1779 = vmatmul.mubr.f32.gmra.mxu0 %v5578_v26 }
 0x14a   : > { %1940 = vmatmul.mubr.f32.gmra.mxu1 %v5578_v26  ;;  %1784 = vmatprep.mubr.f32.mxu0 %v7785_v38 }
 0x14b   : > { %v5586_v5 = vpop.f32.mrf.mxu0  ;;  %v5588_v33 = vpop.f32.mrf.mxu1  ;;  %1945 = vmatprep.mubr.f32.mxu1 %v7785_v38 }
 0x14d   : > { %v1152_v0 = vpop.f32.mrf.mxu0  ;;  %v1313_v46 = vpop.f32.mrf.mxu1  ;;  %1785 = vmatmul.mubr.f32.gmra.mxu0 %v5595_v36 }
 0x14e   : > { %1946 = vmatmul.mubr.f32.gmra.mxu1 %v5595_v36  ;;  %1790 = vmatprep.mubr.f32.mxu0 %v7785_v38 }
 0x14f   : > { %v1156_v45 = vpop.f32.mrf.mxu0  ;;  %v1317_v58 = vpop.f32.mrf.mxu1  ;;  %1951 = vmatprep.mubr.f32.mxu1 %v7785_v38 }
 0x151   : > { %v1158_v21 = vpop.f32.mrf.mxu0  ;;  %v1319_v44 = vpop.f32.mrf.mxu1  ;;  %1791 = vmatmul.mubr.f32.gmra.mxu0 %v5604_v34 }
 0x152   : > { %1952 = vmatmul.mubr.f32.gmra.mxu1 %v5604_v34  ;;  %1796 = vmatprep.mubr.f32.mxu0 %v7785_v38  ;;  %v5622_v34 = vld [vmem:[%s7520_s3 + $0x30] sm:$0xff] }
 0x153   : > { %v1162_v42 = vpop.f32.mrf.mxu0  ;;  %v1323_v19 = vpop.f32.mrf.mxu1  ;;  %1957 = vmatprep.mubr.f32.mxu1 %v7785_v38  ;;  %7791 = vst [vmem:[#allocation39_spill] sm:$0xff] %v5622_v34 }
 0x154   : > { %v1163_v15 = vadd.f32 %v1162_v42, %v7793_v53 }
 0x155   : > { %v1164_v40 = vpop.f32.mrf.mxu0  ;;  %v1325_v36 = vpop.f32.mrf.mxu1  ;;  %1797 = vmatmul.mubr.f32.gmra.mxu0 %v5613_v29 }
 0x156   : > { %1958 = vmatmul.mubr.f32.gmra.mxu1 %v5613_v29  ;;  %1802 = vmatprep.mubr.f32.mxu0 %v7785_v38  ;;  %v1165_v4 = vadd.f32 %v1164_v40, %v7793_v53  ;;  %v1326_v29 = vadd.f32 %v1325_v36, %v7793_v53  ;;  %v1324_v36 = vadd.f32 %v1323_v19, %v7793_v53  ;;  %v7795_v40 = vld [vmem:[#allocation4_spill] sm:$0xff] }
 0x157   : > { %v1168_v26 = vpop.f32.mrf.mxu0  ;;  %v1329_v52 = vpop.f32.mrf.mxu1  ;;  %1963 = vmatprep.mubr.f32.mxu1 %v7785_v38  ;;  %v5645_v42 = vadd.f32 %v1158_v21, %v7795_v40  ;;  %v5648_v3 = vadd.f32 %v1156_v45, %v7795_v40  ;;  %v5651_v25 = vadd.f32 %v1319_v44, %v7795_v40  ;;  %v5656_v53 = vadd.f32 %v1317_v58, %v7795_v40  ;;  %v5663_v45 = vld [vmem:[%s7520_s3 + $0x40] sm:$0xff] }
 0x158   : > { %v1169_v8 = vadd.f32 %v1168_v26, %v7792_v18  ;;  %v1330_v12 = vadd.f32 %v1329_v52, %v7792_v18  ;;  %v5638_v52 = vld [vmem:[%s7520_s3 + $0x38] sm:$0xff]  ;;  %v5641_v26 = vadd.f32 %v1152_v0, %v5084_v27  ;;  %v1453_v7 = vmul.f32 0.02, %v1326_v29  ;;  %v7797_v44 = vld [vmem:[#allocation44_spill] sm:$0xff] }
 0x159   : > { %v1170_v2 = vpop.f32.mrf.mxu0  ;;  %v1331_v14 = vpop.f32.mrf.mxu1  ;;  %1803 = vmatmul.mubr.f32.gmra.mxu0 %v5622_v34  ;;  %7794 = vst [vmem:[#allocation5_spill] sm:$0xff] %v5638_v52  ;;  %v1450_v0 = vmul.f32 0.02, %v1163_v15  ;;  %v1452_v58 = vmul.f32 0.02, %v1324_v36 }
 0x15a   : > { %1964 = vmatmul.mubr.f32.gmra.mxu1 %v5622_v34  ;;  %v1171_v23 = vadd.f32 %v1170_v2, %v7792_v18  ;;  %v1458_v11 = vmul.f32 0.02, %v1169_v8  ;;  %v1332_v28 = vadd.f32 %v1331_v14, %v7792_v18  ;;  %1808 = vmatprep.mubr.f32.mxu0 %v7785_v38  ;;  %v1451_v34 = vmul.f32 0.02, %v1165_v4 }
 0x15b   : > { %1969 = vmatprep.mubr.f32.mxu1 %v7785_v38  ;;  %v1460_v14 = vmul.f32 0.02, %v1330_v12 }
 0x15c   : > { %v1459_v2 = vmul.f32 0.02, %v1171_v23  ;;  %v1461_v18 = vmul.f32 0.02, %v1332_v28  ;;  %v1586_v21 = vmax.f32 %v1169_v8, %v1458_v11  ;;  %v5674_v8 = vadd.f32 %v5586_v5, %v5084_v27 }
 0x15d   : > { %1809 = vmatmul.mubr.f32.gmra.mxu0 %v5638_v52  ;;  %v1579_v11 = vmax.f32 %v1165_v4, %v1451_v34  ;;  %v1588_v40 = vmax.f32 %v1330_v12, %v1460_v14  ;;  %v1435_v12 = vmul.f32 0.02, %v5641_v26  ;;  %v1444_v4 = vmul.f32 0.02, %v5656_v53 }
 0x15e   : > { %v1587_v59 = vmax.f32 %v1171_v23, %v1459_v2  ;;  %1970 = vmatmul.mubr.f32.gmra.mxu1 %v5638_v52  ;;  %v1589_v19 = vmax.f32 %v1332_v28, %v1461_v18  ;;  %1814 = vmatprep.mubr.f32.mxu0 %v7785_v38  ;;  %v7796_v23 = vld [vmem:[#allocation20_spill] sm:$0xff]  ;;  %v5670_v52 = vadd.f32 %v1313_v46, %v5084_v27  ;;  %v1443_v28 = vmul.f32 0.02, %v5645_v42 }
 0x15f   : > { %1975 = vmatprep.mubr.f32.mxu1 %v7785_v38  ;;  %v5667_v2 = vadd.f32 %v7797_v44, %v7796_v23  ;;  %v5679_v18 = vadd.f32 %v5588_v33, %v5084_v27  ;;  %v1442_v44 = vmul.f32 0.02, %v5648_v3  ;;  %v1445_v46 = vmul.f32 0.02, %v5651_v25  ;;  %v5694_v27 = vld [vmem:[%s7520_s3 + $0x48] sm:$0xff] }
 0x160   : > { %2024 = vmatprep.subr.mxu0 %v1587_v59  ;;  %2185 = vmatprep.subr.mxu1 %v1589_v19  ;;  %v7799_v59 = vld [vmem:[#allocation10_spill] sm:$0xff]  ;;  %v1578_v34 = vmax.f32 %v1163_v15, %v1450_v0  ;;  %v1437_v33 = vmul.f32 0.02, %v5670_v52  ;;  %v5708_v15 = vadd.f32 %v5563_v41, %v5100_v35  ;;  %v1571_v0 = vmax.f32 %v5645_v42, %v1443_v28 }
 0x161   : > { %7798 = vst [vmem:[#allocation37_spill] sm:$0xff] %v5667_v2  ;;  %2025 = vmatpush1.msra.mxu0 %v1586_v21  ;;  %v1581_v2 = vmax.f32 %v1326_v29, %v1453_v7  ;;  %v5687_v5 = vadd.f32 %v5580_v16, %v7799_v59  ;;  %2186 = vmatpush1.msra.mxu1 %v1588_v40 }
 0x162   : > { %1815 = vmatmul.mubr.f32.gmra.mxu0 %v5663_v45  ;;  %1976 = vmatmul.mubr.f32.gmra.mxu1 %v5663_v45  ;;  %v5698_v7 = vadd.f32 %v5569_v31, %v7799_v59  ;;  %v5702_v16 = vadd.f32 %v5582_v24, %v7799_v59  ;;  %v1580_v29 = vmax.f32 %v1324_v36, %v1452_v58  ;;  %v1434_v31 = vmul.f32 0.02, %v5674_v8 }
 0x163   : > { %2026 = vmatprep.subr.mxu0 %v1579_v11  ;;  %2187 = vmatprep.subr.mxu1 %v1581_v2  ;;  %v5712_v14 = vadd.f32 %v5571_v17, %v7799_v59  ;;  %v5719_v24 = vadd.f32 %v5565_v39, %v5100_v35  ;;  %v1436_v36 = vmul.f32 0.02, %v5679_v18  ;;  %v1570_v41 = vmax.f32 %v5648_v3, %v1442_v44 }
 0x164   : > { %1820 = vmatprep.mubr.f32.mxu0 %v7785_v38  ;;  %1981 = vmatprep.mubr.f32.mxu1 %v7785_v38  ;;  %v1573_v21 = vmax.f32 %v5651_v25, %v1445_v46  ;;  %v5727_v17 = vadd.f32 %v5552_v13, %v5100_v35  ;;  %v1427_v42 = vmul.f32 0.02, %v5687_v5  ;;  %v1563_v19 = vmax.f32 %v5641_v26, %v1435_v12 }
 0x165   : > { %2027 = vmatpush1.msra.mxu0 %v1578_v34  ;;  %2188 = vmatpush1.msra.mxu1 %v1580_v29  ;;  %v1572_v39 = vmax.f32 %v5656_v53, %v1444_v4  ;;  %v5735_v3 = vadd.f32 %v5554_v55, %v5100_v35  ;;  %v1426_v25 = vmul.f32 0.02, %v5698_v7  ;;  %v1429_v2 = vmul.f32 0.02, %v5702_v16  ;;  %v5750_v35 = vld [vmem:[%s7520_s3 + $0x50] sm:$0xff] }
 0x166   : > { %1821 = vmatmul.mubr.f32.gmra.mxu0 %v5694_v27  ;;  %1982 = vmatmul.mubr.f32.gmra.mxu1 %v5694_v27  ;;  %v1565_v13 = vmax.f32 %v5670_v52, %v1437_v33  ;;  %v5742_v26 = vadd.f32 %v5546_v20, %v5120_v48  ;;  %v1419_v53 = vmul.f32 0.02, %v5708_v15  ;;  %v1428_v58 = vmul.f32 0.02, %v5712_v14 }
 0x167   : > { %2028 = vmatprep.subr.mxu0 %v1571_v0  ;;  %2189 = vmatprep.subr.mxu1 %v1573_v21  ;;  %v1562_v28 = vmax.f32 %v5674_v8, %v1434_v31  ;;  %v5754_v55 = vadd.f32 %v5537_v61, %v5120_v48  ;;  %v5758_v20 = vadd.f32 %v5548_v63, %v5120_v48  ;;  %v1421_v52 = vmul.f32 0.02, %v5719_v24  ;;  %v7800_v8 = vld [vmem:[#allocation11_spill] sm:$0xff] }
 0x168   : > { %2029 = vmatpush1.msra.mxu0 %v1570_v41  ;;  %2190 = vmatpush1.msra.mxu1 %v1572_v39  ;;  %v1564_v11 = vmax.f32 %v5679_v18, %v1436_v36  ;;  %v5765_v40 = vadd.f32 %v5529_v22, %v7800_v8  ;;  %v5769_v44 = vadd.f32 %v5539_v6, %v5120_v48  ;;  %v1418_v61 = vmul.f32 0.02, %v5727_v17 }
 0x169   : > { %2030 = vmatprep.subr.mxu0 %v1563_v19  ;;  %2191 = vmatprep.subr.mxu1 %v1565_v13  ;;  %v1555_v63 = vmax.f32 %v5687_v5, %v1427_v42  ;;  %v5776_v18 = vadd.f32 %v5531_v1, %v7800_v8  ;;  %v1420_v46 = vmul.f32 0.02, %v5735_v3  ;;  %v1554_v22 = vmax.f32 %v5698_v7, %v1426_v25 }
 0x16a   : > { %1826 = vmatprep.mubr.f32.mxu0 %v7785_v38  ;;  %1987 = vmatprep.mubr.f32.mxu1 %v7785_v38  ;;  %v1557_v59 = vmax.f32 %v5702_v16, %v1429_v2  ;;  %v5784_v48 = vadd.f32 %v5521_v9, %v7800_v8  ;;  %v1411_v6 = vmul.f32 0.02, %v5742_v26  ;;  %v1547_v5 = vmax.f32 %v5708_v15, %v1419_v53 }
 0x16b   : > { %2031 = vmatpush1.msra.mxu0 %v1562_v28  ;;  %2192 = vmatpush1.msra.mxu1 %v1564_v11  ;;  %v1556_v1 = vmax.f32 %v5712_v14, %v1428_v58  ;;  %v5792_v12 = vadd.f32 %v5523_v50, %v7800_v8  ;;  %v1410_v4 = vmul.f32 0.02, %v5754_v55  ;;  %v1413_v34 = vmul.f32 0.02, %v5758_v20  ;;  %v5807_v50 = vld [vmem:[%s7520_s3 + $0x58] sm:$0xff]  ;;  %v7805_v8 = vld [vmem:[#allocation57_spill] sm:$0xff] }
 0x16c   : > { %1827 = vmatmul.mubr.f32.gmra.mxu0 %v5750_v35  ;;  %1988 = vmatmul.mubr.f32.gmra.mxu1 %v5750_v35  ;;  %v1549_v9 = vmax.f32 %v5719_v24, %v1421_v52  ;;  %v5799_v7 = vadd.f32 %v5509_v60, %v5126_v56  ;;  %v1403_v16 = vmul.f32 0.02, %v5765_v40  ;;  %v1412_v33 = vmul.f32 0.02, %v5769_v44  ;;  %v7802_v28 = vld [vmem:[#allocation14_spill] sm:$0xff]  ;;  %v7804_v52 = vld [vmem:[#allocation9_spill] sm:$0xff] }
 0x16d   : > { %2032 = vmatprep.subr.mxu0 %v1555_v63  ;;  %2193 = vmatprep.subr.mxu1 %v1557_v59  ;;  %v1546_v29 = vmax.f32 %v5727_v17, %v1418_v61  ;;  %v5811_v15 = vadd.f32 %v5497_v54, %v5126_v56  ;;  %v5815_v60 = vadd.f32 %v5511_v30, %v5126_v56  ;;  %v1405_v14 = vmul.f32 0.02, %v5776_v18 }
 0x16e   : > { %2033 = vmatpush1.msra.mxu0 %v1554_v22  ;;  %2194 = vmatpush1.msra.mxu1 %v1556_v1  ;;  %v1548_v31 = vmax.f32 %v5735_v3, %v1420_v46  ;;  %v5822_v0 = vadd.f32 %v5485_v43, %v5122_v51  ;;  %v5826_v24 = vadd.f32 %v5499_v47, %v5126_v56  ;;  %v1402_v54 = vmul.f32 0.02, %v5784_v48  ;;  %v7801_v3 = vld [vmem:[#allocation16_spill] sm:$0xff] }
 0x16f   : > { %2034 = vmatprep.subr.mxu0 %v1547_v5  ;;  %2195 = vmatprep.subr.mxu1 %v1549_v9  ;;  %v1539_v30 = vmax.f32 %v5742_v26, %v1411_v6  ;;  %v5833_v36 = vadd.f32 %v5487_v57, %v5122_v51  ;;  %v1404_v41 = vmul.f32 0.02, %v5792_v12  ;;  %v1538_v43 = vmax.f32 %v5754_v55, %v1410_v4  ;;  %v7803_v55 = vld [vmem:[#allocation56_spill] sm:$0xff]  ;;  %v7807_v6 = vld [vmem:[#allocation55_spill] sm:$0xff]  ;;  %v7809_v9 = vld [vmem:[#allocation13_spill] sm:$0xff] }
 0x170   : > { %1832 = vmatprep.mubr.f32.mxu0 %v7785_v38  ;;  %1993 = vmatprep.mubr.f32.mxu1 %v7785_v38  ;;  %v1541_v21 = vmax.f32 %v5758_v20, %v1413_v34  ;;  %v5841_v56 = vadd.f32 %v5470_v32, %v5122_v51  ;;  %v1395_v47 = vmul.f32 0.02, %v5799_v7  ;;  %v1531_v17 = vmax.f32 %v5765_v40, %v1403_v16  ;;  %v7808_v34 = vld [vmem:[#allocation19_spill] sm:$0xff] }
 0x171   : > { %2035 = vmatpush1.msra.mxu0 %v1546_v29  ;;  %2196 = vmatpush1.msra.mxu1 %v1548_v31  ;;  %v1540_v57 = vmax.f32 %v5769_v44, %v1412_v33  ;;  %v5849_v42 = vadd.f32 %v5472_v49, %v5122_v51  ;;  %v1394_v19 = vmul.f32 0.02, %v5811_v15  ;;  %v1397_v39 = vmul.f32 0.02, %v5815_v60  ;;  %v5864_v51 = vld [vmem:[%s7520_s3 + $0x60] sm:$0xff]  ;;  %v7811_v31 = vld [vmem:[#allocation54_spill] sm:$0xff] }
 0x172   : > { %1833 = vmatmul.mubr.f32.gmra.mxu0 %v5807_v50  ;;  %1994 = vmatmul.mubr.f32.gmra.mxu1 %v5807_v50  ;;  %v1533_v32 = vmax.f32 %v5776_v18, %v1405_v14  ;;  %v5856_v25 = vadd.f32 %v5458_v37, %v7801_v3  ;;  %v1387_v2 = vmul.f32 0.02, %v5822_v0  ;;  %v1396_v13 = vmul.f32 0.02, %v5826_v24  ;;  %v7806_v18 = vld [vmem:[#allocation12_spill] sm:$0xff] }
 0x173   : > { %2036 = vmatprep.subr.mxu0 %v1539_v30  ;;  %2197 = vmatprep.subr.mxu1 %v1541_v21  ;;  %v1530_v26 = vmax.f32 %v5784_v48, %v1402_v54  ;;  %v5868_v49 = vadd.f32 %v5443_v62, %v7801_v3  ;;  %v5872_v37 = vadd.f32 %v5460_v10, %v7801_v3  ;;  %v1389_v53 = vmul.f32 0.02, %v5833_v36  ;;  %v7812_v30 = vld [vmem:[#allocation18_spill] sm:$0xff] }
 0x174   : > { %2037 = vmatpush1.msra.mxu0 %v1538_v43  ;;  %2198 = vmatpush1.msra.mxu1 %v1540_v57  ;;  %v1532_v58 = vmax.f32 %v5792_v12, %v1404_v41  ;;  %v5879_v20 = vadd.f32 %v7803_v55, %v7802_v28  ;;  %v5883_v11 = vadd.f32 %v7804_v52, %v7801_v3  ;;  %v1386_v62 = vmul.f32 0.02, %v5841_v56  ;;  %v7814_v43 = vld [vmem:[#allocation53_spill] sm:$0xff]  ;;  %v7819_v55 = vld [vmem:[#allocation48_spill] sm:$0xff] }
 0x175   : > { %2038 = vmatprep.subr.mxu0 %v1531_v17  ;;  %2199 = vmatprep.subr.mxu1 %v1533_v32  ;;  %v1523_v10 = vmax.f32 %v5799_v7, %v1395_v47  ;;  %v5890_v40 = vadd.f32 %v7805_v8, %v7802_v28  ;;  %v1388_v44 = vmul.f32 0.02, %v5849_v42  ;;  %v1522_v61 = vmax.f32 %v5811_v15, %v1394_v19  ;;  %v5921_v15 = vld [vmem:[%s7520_s3 + $0x68] sm:$0xff]  ;;  %v7815_v17 = vld [vmem:[#allocation51_spill] sm:$0xff] }
 0x176   : > { %1838 = vmatprep.mubr.f32.mxu0 %v7785_v38  ;;  %1999 = vmatprep.mubr.f32.mxu1 %v7785_v38  ;;  %v1525_v63 = vmax.f32 %v5815_v60, %v1397_v39  ;;  %v5898_v46 = vadd.f32 %v7806_v18, %v7802_v28  ;;  %v1379_v22 = vmul.f32 0.02, %v5856_v25  ;;  %v1515_v59 = vmax.f32 %v5822_v0, %v1387_v2  ;;  %v7810_v60 = vld [vmem:[#allocation52_spill] sm:$0xff]  ;;  %v7816_v32 = vld [vmem:[#allocation17_spill] sm:$0xff] }
 0x177   : > { %2039 = vmatpush1.msra.mxu0 %v1530_v26  ;;  %2200 = vmatpush1.msra.mxu1 %v1532_v58  ;;  %v1524_v48 = vmax.f32 %v5826_v24, %v1396_v13  ;;  %v5906_v5 = vadd.f32 %v7807_v6, %v7802_v28  ;;  %v1378_v1 = vmul.f32 0.02, %v5868_v49  ;;  %v1381_v12 = vmul.f32 0.02, %v5872_v37  ;;  %v7817_v26 = vld [vmem:[#allocation50_spill] sm:$0xff]  ;;  %v7818_v28 = vld [vmem:[#allocation23_spill] sm:$0xff] }
 0x178   : > { %1839 = vmatmul.mubr.f32.gmra.mxu0 %v5864_v51  ;;  %2000 = vmatmul.mubr.f32.gmra.mxu1 %v5864_v51  ;;  %v1517_v4 = vmax.f32 %v5833_v36, %v1389_v53  ;;  %v5913_v7 = vadd.f32 %v7809_v9, %v7808_v34  ;;  %v1371_v16 = vmul.f32 0.02, %v5879_v20  ;;  %v1380_v33 = vmul.f32 0.02, %v5883_v11  ;;  %v7813_v36 = vld [vmem:[#allocation15_spill] sm:$0xff]  ;;  %v7820_v8 = vld [vmem:[#allocation21_spill] sm:$0xff] }
 0x179   : > { %2040 = vmatprep.subr.mxu0 %v1523_v10  ;;  %2201 = vmatprep.subr.mxu1 %v1525_v63  ;;  %v1514_v29 = vmax.f32 %v5841_v56, %v1386_v62  ;;  %v5925_v14 = vadd.f32 %v7810_v60, %v7808_v34  ;;  %v5929_v0 = vadd.f32 %v7811_v31, %v7808_v34  ;;  %v1373_v24 = vmul.f32 0.02, %v5890_v40  ;;  %v5969_v10 = vld [vmem:[%s7520_s3 + $0x70] sm:$0xff] }
 0x17a   : > { %2041 = vmatpush1.msra.mxu0 %v1522_v61  ;;  %2202 = vmatpush1.msra.mxu1 %v1524_v48  ;;  %v1516_v54 = vmax.f32 %v5849_v42, %v1388_v44  ;;  %v5936_v41 = vadd.f32 %v7813_v36, %v7812_v30  ;;  %v1258_v21 = vadd.f32 %v7814_v43, %v7808_v34  ;;  %v1370_v56 = vmul.f32 0.02, %v5898_v46  ;;  %v7821_v44 = vld [vmem:[#allocation49_spill] sm:$0xff] }
 0x17b   : > { %2042 = vmatprep.subr.mxu0 %v1515_v59  ;;  %2203 = vmatprep.subr.mxu1 %v1517_v4  ;;  %v1507_v47 = vmax.f32 %v5856_v25, %v1379_v22  ;;  %v5945_v57 = vadd.f32 %v7815_v17, %v7812_v30  ;;  %v1372_v42 = vmul.f32 0.02, %v5906_v5  ;;  %v1506_v19 = vmax.f32 %v5868_v49, %v1378_v1  ;;  %v7823_v59 = vld [vmem:[#allocation47_spill] sm:$0xff]  ;;  %v7826_v36 = vld [vmem:[#allocation37_spill] sm:$0xff] }
 0x17c   : > { %1844 = vmatprep.mubr.f32.mxu0 %v7785_v38  ;;  %2005 = vmatprep.mubr.f32.mxu1 %v7785_v38  ;;  %v1509_v39 = vmax.f32 %v5872_v37, %v1381_v12  ;;  %v1091_v3 = vadd.f32 %v7816_v32, %v7812_v30  ;;  %v1363_v25 = vmul.f32 0.02, %v5913_v7  ;;  %v1499_v2 = vmax.f32 %v5879_v20, %v1371_v16  ;;  %v7824_v12 = vld [vmem:[#allocation46_spill] sm:$0xff]  ;;  %v7825_v16 = vld [vmem:[#allocation45_spill] sm:$0xff] }
 0x17d   : > { %2043 = vmatpush1.msra.mxu0 %v1514_v29  ;;  %2204 = vmatpush1.msra.mxu1 %v1516_v54  ;;  %v1508_v13 = vmax.f32 %v5883_v11, %v1380_v33  ;;  %v1252_v49 = vadd.f32 %v7817_v26, %v7812_v30  ;;  %v1362_v37 = vmul.f32 0.02, %v5925_v14  ;;  %v1365_v53 = vmul.f32 0.02, %v5929_v0  ;;  %v7830_v26 = vld [vmem:[#allocation42_spill] sm:$0xff] }
 0x17e   : > { %1845 = vmatmul.mubr.f32.gmra.mxu0 %v5921_v15  ;;  %2006 = vmatmul.mubr.f32.gmra.mxu1 %v5921_v15  ;;  %v1501_v58 = vmax.f32 %v5890_v40, %v1373_v24  ;;  %v1087_v52 = vadd.f32 %v7819_v55, %v7818_v28  ;;  %v1355_v20 = vmul.f32 0.02, %v5936_v41  ;;  %v1364_v11 = vmul.f32 0.02, %v1258_v21 }
 0x17f   : > { %2044 = vmatprep.subr.mxu0 %v1507_v47  ;;  %2205 = vmatprep.subr.mxu1 %v1509_v39  ;;  %v1498_v62 = vmax.f32 %v5898_v46, %v1370_v56  ;;  %v1085_v40 = vadd.f32 %v7820_v8, %v7818_v28  ;;  %v1248_v61 = vadd.f32 %v7821_v44, %v7818_v28  ;;  %v1357_v63 = vmul.f32 0.02, %v5945_v57  ;;  %v7822_v46 = vld [vmem:[#allocation22_spill] sm:$0xff] }
 0x180   : > { %2045 = vmatpush1.msra.mxu0 %v1506_v19  ;;  %2206 = vmatpush1.msra.mxu1 %v1508_v13  ;;  %v1500_v18 = vmax.f32 %v5906_v5, %v1372_v42  ;;  %v1081_v22 = vadd.f32 %v7822_v46, %v7796_v23  ;;  %v1246_v48 = vadd.f32 %v7823_v59, %v7818_v28  ;;  %v1354_v6 = vmul.f32 0.02, %v1091_v3  ;;  %v7829_v13 = vld [vmem:[#allocation41_spill] sm:$0xff]  ;;  %v6113_v59 = vpop.permute.xlu0 %1699 }
 0x181   : > { %2046 = vmatprep.subr.mxu0 %v1499_v2  ;;  %2207 = vmatprep.subr.mxu1 %v1501_v58  ;;  %v1491_v1 = vmax.f32 %v5913_v7, %v1363_v25  ;;  %v1242_v4 = vadd.f32 %v7824_v12, %v7796_v23  ;;  %v1356_v34 = vmul.f32 0.02, %v1252_v49  ;;  %v1490_v5 = vmax.f32 %v5925_v14, %v1362_v37  ;;  %v7827_v25 = vld [vmem:[#allocation7_spill] sm:$0xff]  ;;  %v7832_v37 = vld [vmem:[#allocation38_spill] sm:$0xff]  ;;  %v7834_v58 = vld [vmem:[#allocation5_spill] sm:$0xff] }
 0x182   : > { %1850 = vmatprep.mubr.f32.mxu0 %v7785_v38  ;;  %2011 = vmatprep.mubr.f32.mxu1 %v7785_v38  ;;  %v1493_v9 = vmax.f32 %v5929_v0, %v1365_v53  ;;  %v1240_v33 = vadd.f32 %v7825_v16, %v7796_v23  ;;  %v1347_v29 = vmul.f32 0.02, %v1087_v52  ;;  %v1483_v7 = vmax.f32 %v5936_v41, %v1355_v20  ;;  %v5997_v23 = vld [vmem:[%s7520_s3 + $0x78] sm:$0xff] }
 0x183   : > { %2047 = vmatpush1.msra.mxu0 %v1498_v62  ;;  %2208 = vmatpush1.msra.mxu1 %v1500_v18  ;;  %v1492_v60 = vmax.f32 %v1258_v21, %v1364_v11  ;;  %v1346_v31 = vmul.f32 0.02, %v1085_v40  ;;  %v1349_v24 = vmul.f32 0.02, %v1248_v61  ;;  %v1485_v54 = vmax.f32 %v5945_v57, %v1357_v63  ;;  %v7828_v2 = vld [vmem:[#allocation43_spill] sm:$0xff]  ;;  %v6107_v18 = vpop.permute.xlu1 %1694  ;;  %7836 = vst [vmem:[#allocation36_spill] sm:$0xff] %v6113_v59 }
 0x184   : > { %1851 = vmatmul.mubr.f32.gmra.mxu0 %v5969_v10  ;;  %2012 = vmatmul.mubr.f32.gmra.mxu1 %v5969_v10  ;;  %v1339_v14 = vmul.f32 0.02, %v1081_v22  ;;  %v1348_v0 = vmul.f32 0.02, %v1246_v48  ;;  %v1482_v30 = vmax.f32 %v1091_v3, %v1354_v6  ;;  %v1338_v41 = vmul.f32 0.02, %v7826_v36 }
 0x185   : > { %2048 = vmatprep.subr.mxu0 %v1491_v1  ;;  %2209 = vmatprep.subr.mxu1 %v1493_v9  ;;  %v1341_v43 = vmul.f32 0.02, %v1242_v4  ;;  %v1484_v21 = vmax.f32 %v1252_v49, %v1356_v34  ;;  %v1340_v56 = vmul.f32 0.02, %v1240_v33  ;;  %v1475_v47 = vmax.f32 %v1087_v52, %v1347_v29  ;;  %v7831_v49 = vld [vmem:[#allocation40_spill] sm:$0xff]  ;;  %v7833_v53 = vld [vmem:[#allocation39_spill] sm:$0xff]  ;;  %v6129_v9 = vpop.permute.xlu0 %1689 }
 0x186   : > { %2049 = vmatpush1.msra.mxu0 %v1490_v5  ;;  %2210 = vmatpush1.msra.mxu1 %v1492_v60  ;;  %v1474_v17 = vmax.f32 %v1085_v40, %v1346_v31  ;;  %v1477_v57 = vmax.f32 %v1248_v61, %v1349_v24  ;;  %v1467_v42 = vmax.f32 %v1081_v22, %v1339_v14 }
 0x187   : > { %2050 = vmatprep.subr.mxu0 %v1483_v7  ;;  %2211 = vmatprep.subr.mxu1 %v1485_v54  ;;  %v1476_v19 = vmax.f32 %v1246_v48, %v1348_v0  ;;  %v1466_v39 = vmax.f32 %v7826_v36, %v1338_v41  ;;  %v1469_v32 = vmax.f32 %v1242_v4, %v1341_v43  ;;  %v6123_v4 = vpop.permute.xlu1 %1684 }
 0x188   : > { %1856 = vmatprep.mubr.f32.mxu0 %v7785_v38  ;;  %2017 = vmatprep.mubr.f32.mxu1 %v7785_v38  ;;  %v1468_v3 = vmax.f32 %v1240_v33, %v1340_v56  ;;  %7835 = vst [vmem:[#allocation35_spill] sm:$0xff] %v6107_v18  ;;  %7837 = vst [vmem:[#allocation33_spill] sm:$0xff] %v6123_v4 }
 0x189   : > { %2051 = vmatpush1.msra.mxu0 %v1482_v30  ;;  %2212 = vmatpush1.msra.mxu1 %v1484_v21  ;;  %7838 = vst [vmem:[#allocation34_spill] sm:$0xff] %v6129_v9  ;;  %v6145_v54 = vpop.permute.xlu0 %1679 }
 0x18a   : > { %1857 = vmatmul.mubr.f32.gmra.mxu0 %v5997_v23  ;;  %2018 = vmatmul.mubr.f32.gmra.mxu1 %v5997_v23  ;;  %7840 = vst [vmem:[#allocation32_spill] sm:$0xff] %v6145_v54 }
 0x18b   : > { %2052 = vmatprep.subr.mxu0 %v1475_v47  ;;  %2213 = vmatprep.subr.mxu1 %v1477_v57  ;;  %v6139_v60 = vpop.permute.xlu1 %1674 }
 0x18c   : > { %2053 = vmatpush1.msra.mxu0 %v1474_v17  ;;  %2214 = vmatpush1.msra.mxu1 %v1476_v19  ;;  %7839 = vst [vmem:[#allocation31_spill] sm:$0xff] %v6139_v60 }
 0x18d   : > { %2054 = vmatprep.subr.mxu0 %v1467_v42  ;;  %2215 = vmatprep.subr.mxu1 %v1469_v32  ;;  %v6159_v43 = vpop.permute.xlu0 %1669 }
 0x18e   : > { %2055 = vmatpush1.msra.mxu0 %v1466_v39  ;;  %2088 = vmatprep.mubr.f32.mxu0 %v7785_v38  ;;  %7842 = vst [vmem:[#allocation28_spill] sm:$0xff] %v6159_v43 }
 0x18f   : > { %2216 = vmatpush1.msra.mxu1 %v1468_v3  ;;  %2249 = vmatprep.mubr.f32.mxu1 %v7785_v38  ;;  %v6155_v36 = vpop.permute.xlu1 %1664 }
 0x190   : > { %2089 = vmatmul.mubr.f32.vlgmr.msra.gmra.mxu0 %v7827_v25  ;;  %2250 = vmatmul.mubr.f32.vlgmr.msra.gmra.mxu1 %v7827_v25  ;;  %7841 = vst [vmem:[#allocation30_spill] sm:$0xff] %v6155_v36 }
 0x191   : > { %2094 = vmatprep.mubr.f32.mxu0 %v7785_v38  ;;  %2255 = vmatprep.mubr.f32.mxu1 %v7785_v38  ;;  %v6171_v42 = vpop.permute.xlu0 %1659 }
 0x192   : > { %7844 = vst [vmem:[#allocation26_spill] sm:$0xff] %v6171_v42 }
 0x193   : > { %v6167_v17 = vpop.permute.xlu1 %1654 }
 0x194   : > { %2095 = vmatmul.mubr.f32.gmra.mxu0 %v7828_v2  ;;  %2256 = vmatmul.mubr.f32.gmra.mxu1 %v7828_v2  ;;  %7843 = vst [vmem:[#allocation29_spill] sm:$0xff] %v6167_v17 }
 0x195   : > { %2100 = vmatprep.mubr.f32.mxu0 %v7785_v38  ;;  %2261 = vmatprep.mubr.f32.mxu1 %v7785_v38  ;;  %v6183_v2 = vpop.permute.xlu0 %1649 }
 0x196   : > { %7846 = vst [vmem:[#allocation24_spill] sm:$0xff] %v6183_v2 }
 0x197   : > { %v6179_v3 = vpop.permute.xlu1 %1644 }
 0x198   : > { %2101 = vmatmul.mubr.f32.gmra.mxu0 %v7829_v13  ;;  %2262 = vmatmul.mubr.f32.gmra.mxu1 %v7829_v13  ;;  %7845 = vst [vmem:[#allocation27_spill] sm:$0xff] %v6179_v3 }
 0x199   : > { %2106 = vmatprep.mubr.f32.mxu0 %v7785_v38  ;;  %2267 = vmatprep.mubr.f32.mxu1 %v7785_v38 }
 0x19c   : > { %2107 = vmatmul.mubr.f32.gmra.mxu0 %v7830_v26  ;;  %2268 = vmatmul.mubr.f32.gmra.mxu1 %v7830_v26 }
 0x19d   : > { %2112 = vmatprep.mubr.f32.mxu0 %v7785_v38  ;;  %2273 = vmatprep.mubr.f32.mxu1 %v7785_v38 }
 0x1a0   : > { %2113 = vmatmul.mubr.f32.gmra.mxu0 %v7831_v49  ;;  %2274 = vmatmul.mubr.f32.gmra.mxu1 %v7831_v49 }
 0x1a1   : > { %2118 = vmatprep.mubr.f32.mxu0 %v7785_v38  ;;  %2279 = vmatprep.mubr.f32.mxu1 %v7785_v38 }
 0x1a4   : > { %2119 = vmatmul.mubr.f32.gmra.mxu0 %v7832_v37  ;;  %2280 = vmatmul.mubr.f32.gmra.mxu1 %v7832_v37  ;;  %v6191_v37 = vpop.permute.xlu1 %1634 }
 0x1a5   : > { %2124 = vmatprep.mubr.f32.mxu0 %v7785_v38  ;;  %2285 = vmatprep.mubr.f32.mxu1 %v7785_v38  ;;  %7850 = vst [vmem:[#allocation4_spill] sm:$0xff] %v6191_v37 }
 0x1a8   : > { %2125 = vmatmul.mubr.f32.gmra.mxu0 %v7833_v53  ;;  %2286 = vmatmul.mubr.f32.gmra.mxu1 %v7833_v53  ;;  %v6203_v59 = vpop.permute.xlu1 %1624 }
 0x1a9   : > { %2130 = vmatprep.mubr.f32.mxu0 %v7785_v38  ;;  %2291 = vmatprep.mubr.f32.mxu1 %v7785_v38  ;;  %7855 = vst [vmem:[#allocation16_spill] sm:$0xff] %v6203_v59 }
 0x1ac   : > { %2131 = vmatmul.mubr.f32.gmra.mxu0 %v7834_v58  ;;  %2292 = vmatmul.mubr.f32.gmra.mxu1 %v7834_v58  ;;  %v6195_v58 = vpop.permute.xlu0 %1639 }
 0x1ad   : > { %2136 = vmatprep.mubr.f32.mxu0 %v7785_v38  ;;  %2297 = vmatprep.mubr.f32.mxu1 %v7785_v38  ;;  %7852 = vst [vmem:[#allocation44_spill] sm:$0xff] %v6195_v58 }
 0x1b0   : > { %2137 = vmatmul.mubr.f32.gmra.mxu0 %v5663_v45  ;;  %2298 = vmatmul.mubr.f32.gmra.mxu1 %v5663_v45 }
 0x1b1   : > { %2142 = vmatprep.mubr.f32.mxu0 %v7785_v38  ;;  %2303 = vmatprep.mubr.f32.mxu1 %v7785_v38 }
 0x1b4   : > { %2143 = vmatmul.mubr.f32.gmra.mxu0 %v5694_v27  ;;  %2304 = vmatmul.mubr.f32.gmra.mxu1 %v5694_v27 }
 0x1b5   : > { %2148 = vmatprep.mubr.f32.mxu0 %v7785_v38  ;;  %2309 = vmatprep.mubr.f32.mxu1 %v7785_v38 }
 0x1b8   : > { %2149 = vmatmul.mubr.f32.gmra.mxu0 %v5750_v35  ;;  %2310 = vmatmul.mubr.f32.gmra.mxu1 %v5750_v35 }
 0x1b9   : > { %2154 = vmatprep.mubr.f32.mxu0 %v7785_v38  ;;  %2315 = vmatprep.mubr.f32.mxu1 %v7785_v38 }
 0x1bc   : > { %2155 = vmatmul.mubr.f32.gmra.mxu0 %v5807_v50  ;;  %2316 = vmatmul.mubr.f32.gmra.mxu1 %v5807_v50 }
 0x1bd   : > { %2160 = vmatprep.mubr.f32.mxu0 %v7785_v38  ;;  %2321 = vmatprep.mubr.f32.mxu1 %v7785_v38 }
 0x1c0   : > { %2161 = vmatmul.mubr.f32.gmra.mxu0 %v5864_v51  ;;  %2322 = vmatmul.mubr.f32.gmra.mxu1 %v5864_v51 }
 0x1c1   : > { %2166 = vmatprep.mubr.f32.mxu0 %v7785_v38  ;;  %2327 = vmatprep.mubr.f32.mxu1 %v7785_v38 }
 0x1c4   : > { %2167 = vmatmul.mubr.f32.gmra.mxu0 %v5921_v15  ;;  %2328 = vmatmul.mubr.f32.gmra.mxu1 %v5921_v15 }
 0x1c5   : > { %2172 = vmatprep.mubr.f32.mxu0 %v7785_v38  ;;  %2333 = vmatprep.mubr.f32.mxu1 %v7785_v38 }
 0x1c8   : > { %2173 = vmatmul.mubr.f32.gmra.mxu0 %v5969_v10  ;;  %2334 = vmatmul.mubr.f32.gmra.mxu1 %v5969_v10 }
 0x1c9   : > { %2178 = vmatprep.mubr.f32.mxu0 %v7785_v38  ;;  %2339 = vmatprep.mubr.f32.mxu1 %v7785_v38 }
 0x1cc   : > { %2179 = vmatmul.mubr.f32.gmra.mxu0 %v5997_v23  ;;  %2340 = vmatmul.mubr.f32.gmra.mxu1 %v5997_v23 }
 0x1cd   : > { %2722 = vmatprep.mubr.f32.mxu0 %v7785_v38  ;;  %2835 = vmatprep.mubr.f32.mxu1 %v7785_v38 }
 0x201   : > { %v6071_v45 = vpop.f32.mrf.mxu0 }
 0x202   : > { %v6073_v27 = vpop.f32.mrf.mxu1 }
 0x203   : > { %v6075_v35 = vpop.f32.mrf.mxu0 }
 0x204   : > { %v6077_v50 = vpop.f32.mrf.mxu1 }
 0x205   : > { %v6079_v51 = vpop.f32.mrf.mxu0 }
 0x206   : > { %v6081_v15 = vpop.f32.mrf.mxu1 }
 0x207   : > { %v6083_v28 = vpop.f32.mrf.mxu0 }
 0x208   : > { %v6085_v55 = vpop.f32.mrf.mxu1 }
 0x209   : > { %v6087_v52 = vpop.f32.mrf.mxu0 }
 0x20a   : > { %v6089_v20 = vpop.f32.mrf.mxu1 }
 0x20b   : > { %v6091_v11 = vpop.f32.mrf.mxu0 }
 0x20c   : > { %v6093_v62 = vpop.f32.mrf.mxu1 }
 0x20d   : > { %v6095_v10 = vpop.f32.mrf.mxu0 }
 0x20e   : > { %v6097_v8 = vpop.f32.mrf.mxu1 }
 0x20f   : > { %v6099_v40 = vpop.f32.mrf.mxu0 }
 0x210   : > { %v6101_v44 = vpop.f32.mrf.mxu1 }
 0x211   : > { %v6103_v61 = vpop.f32.mrf.mxu0 }
 0x212   : > { %v6105_v63 = vpop.f32.mrf.mxu1 }
 0x213   : > { %v6109_v46 = vpop.f32.mrf.mxu0 }
 0x214   : > { %v6111_v22 = vpop.f32.mrf.mxu1 }
 0x215   : > { %v6115_v48 = vpop.f32.mrf.mxu0 }
 0x216   : > { %v6117_v6 = vpop.f32.mrf.mxu1 }
 0x217   : > { %v6119_v1 = vpop.f32.mrf.mxu0 }
 0x218   : > { %v6121_v12 = vpop.f32.mrf.mxu1 }
 0x219   : > { %v6125_v34 = vpop.f32.mrf.mxu0 }
 0x21a   : > { %v6127_v5 = vpop.f32.mrf.mxu1 }
 0x21b   : > { %v6131_v16 = vpop.f32.mrf.mxu0 }
 0x21c   : > { %v6133_v33 = vpop.f32.mrf.mxu1 }
 0x21d   : > { %v6135_v29 = vpop.f32.mrf.mxu0 }
 0x21e   : > { %v6137_v7 = vpop.f32.mrf.mxu1 }
 0x21f   : > { %v6141_v31 = vpop.f32.mrf.mxu0 }
 0x220   : > { %v6143_v24 = vpop.f32.mrf.mxu1 }
 0x222   : > { %v6147_v14 = vpop.f32.mrf.mxu0  ;;  %v6149_v0 = vpop.f32.mrf.mxu1 }
 0x224   : > { %v6151_v30 = vpop.f32.mrf.mxu0  ;;  %v6153_v23 = vpop.f32.mrf.mxu1 }
 0x226   : > { %v6157_v41 = vpop.f32.mrf.mxu0  ;;  %v6161_v21 = vpop.f32.mrf.mxu1 }
 0x228   : > { %v6163_v56 = vpop.f32.mrf.mxu0  ;;  %v6165_v47 = vpop.f32.mrf.mxu1 }
 0x22c   : > { %v6169_v57 = vpop.f32.mrf.mxu0  ;;  %v6173_v19 = vpop.f32.mrf.mxu1 }
 0x22e   : > { %v6175_v39 = vpop.f32.mrf.mxu0  ;;  %v6177_v32 = vpop.f32.mrf.mxu1 }
 0x232   : > { %v6181_v25 = vpop.f32.mrf.mxu0  ;;  %v6185_v13 = vpop.f32.mrf.mxu1 }
 0x233   : > { %7847 = vst [vmem:[#allocation25_spill] sm:$0xff] %v6185_v13  ;;  %v6207_v13 = vpop.permute.xlu0 %1629 }
 0x234   : > { %v6187_v26 = vpop.f32.mrf.mxu0  ;;  %v6189_v49 = vpop.f32.mrf.mxu1  ;;  %7857 = vst [vmem:[#allocation56_spill] sm:$0xff] %v6207_v13 }
 0x235   : > { %7848 = vst [vmem:[#allocation6_spill] sm:$0xff] %v6187_v26  ;;  %7849 = vst [vmem:[#allocation8_spill] sm:$0xff] %v6189_v49  ;;  %v6211_v49 = vadd.f32 %v6071_v45, %v6203_v59  ;;  %v6233_v45 = vadd.f32 %v6081_v15, %v6207_v13  ;;  %v6253_v15 = vadd.f32 %v6091_v11, %v6191_v37 }
 0x236   : > { %v6273_v11 = vadd.f32 %v6101_v44, %v6195_v58  ;;  %v6293_v44 = vadd.f32 %v6115_v48, %v6183_v2  ;;  %v6313_v48 = vadd.f32 %v6127_v5, %v6167_v17  ;;  %v6333_v5 = vadd.f32 %v6141_v31, %v6171_v42 }
 0x237   : > { %7858 = vst [vmem:[#allocation9_spill] sm:$0xff] %v6211_v49  ;;  %7863 = vst [vmem:[#allocation13_spill] sm:$0xff] %v6233_v45  ;;  %v6353_v31 = vadd.f32 %v6153_v23, %v6155_v36  ;;  %v6373_v23 = vadd.f32 %v6169_v57, %v6139_v60 }
 0x238   : > { %v6193_v53 = vpop.f32.mrf.mxu0  ;;  %v6197_v38 = vpop.f32.mrf.mxu1  ;;  %7868 = vst [vmem:[#allocation53_spill] sm:$0xff] %v6253_v15  ;;  %7873 = vst [vmem:[#allocation48_spill] sm:$0xff] %v6273_v11 }
 0x239   : > { %7851 = vst [vmem:[#allocation20_spill] sm:$0xff] %v6193_v53  ;;  %7853 = vst [vmem:[#allocation10_spill] sm:$0xff] %v6197_v38  ;;  %v6215_v53 = vadd.f32 %v6073_v27, %v6203_v59  ;;  %v6221_v38 = vadd.f32 %v6075_v35, %v6203_v59  ;;  %v6241_v35 = vadd.f32 %v6085_v55, %v6207_v13 }
 0x23a   : > { %v6199_v9 = vpop.f32.mrf.mxu0  ;;  %v6201_v4 = vpop.f32.mrf.mxu1  ;;  %v6261_v55 = vadd.f32 %v6095_v10, %v6195_v58  ;;  %v6281_v10 = vadd.f32 %v6105_v63, %v6179_v3  ;;  %7878 = vst [vmem:[#allocation46_spill] sm:$0xff] %v6293_v44  ;;  %v6301_v63 = vadd.f32 %v6119_v1, %v6183_v2  ;;  %v6321_v1 = vadd.f32 %v6133_v33, %v6167_v17 }
 0x23b   : > { %7854 = vst [vmem:[#allocation11_spill] sm:$0xff] %v6201_v4  ;;  %7859 = vst [vmem:[#allocation57_spill] sm:$0xff] %v6215_v53  ;;  %v6225_v4 = vadd.f32 %v6077_v50, %v6203_v59  ;;  %v6237_v53 = vadd.f32 %v6083_v28, %v6207_v13  ;;  %v6245_v50 = vadd.f32 %v6087_v52, %v6191_v37 }
 0x23c   : > { %7860 = vst [vmem:[#allocation12_spill] sm:$0xff] %v6221_v38  ;;  %7865 = vst [vmem:[#allocation54_spill] sm:$0xff] %v6241_v35  ;;  %v6257_v28 = vadd.f32 %v6093_v62, %v6191_v37  ;;  %v6265_v52 = vadd.f32 %v6097_v8, %v6195_v58  ;;  %v6277_v62 = vadd.f32 %v6103_v61, %v6179_v3 }
 0x23d   : > { %7861 = vst [vmem:[#allocation55_spill] sm:$0xff] %v6225_v4  ;;  %7864 = vst [vmem:[#allocation52_spill] sm:$0xff] %v6237_v53  ;;  %v6285_v8 = vadd.f32 %v6109_v46, %v6179_v3  ;;  %v6297_v61 = vadd.f32 %v6117_v6, %v6183_v2  ;;  %v6305_v46 = vadd.f32 %v6121_v12, %v6183_v2 }
 0x23e   : > { %v6205_v18 = vpop.f32.mrf.mxu0  ;;  %v6217_v26 = vpop.f32.mrf.mxu1  ;;  %7866 = vst [vmem:[#allocation18_spill] sm:$0xff] %v6245_v50  ;;  %7869 = vst [vmem:[#allocation51_spill] sm:$0xff] %v6257_v28  ;;  %v6317_v6 = vadd.f32 %v6131_v16, %v6167_v17  ;;  %v6325_v12 = vadd.f32 %v6135_v29, %v6171_v42  ;;  %v6337_v16 = vadd.f32 %v6143_v24, %v6171_v42 }
 0x23f   : > { %7856 = vst [vmem:[#allocation14_spill] sm:$0xff] %v6205_v18  ;;  %v6229_v18 = vadd.f32 %v6079_v51, %v6207_v13  ;;  %v6249_v51 = vadd.f32 %v6089_v20, %v6191_v37  ;;  %7870 = vst [vmem:[#allocation17_spill] sm:$0xff] %v6261_v55  ;;  %v6269_v20 = vadd.f32 %v6099_v40, %v6195_v58  ;;  %v7884_v13 = vld [vmem:[#allocation35_spill] sm:$0xff] }
 0x240   : > { %v1848_v27 = vpop.f32.mrf.mxu0  ;;  %v2009_v59 = vpop.f32.mrf.mxu1  ;;  %7871 = vst [vmem:[#allocation50_spill] sm:$0xff] %v6265_v52  ;;  %7874 = vst [vmem:[#allocation21_spill] sm:$0xff] %v6277_v62  ;;  %v6289_v40 = vadd.f32 %v6111_v22, %v6179_v3  ;;  %v6309_v22 = vadd.f32 %v6125_v34, %v6167_v17  ;;  %v6329_v34 = vadd.f32 %v6137_v7, %v6171_v42  ;;  %v7887_v45 = vld [vmem:[#allocation20_spill] sm:$0xff] }
 0x241   : > { %7862 = vst [vmem:[#allocation19_spill] sm:$0xff] %v6229_v18  ;;  %7867 = vst [vmem:[#allocation15_spill] sm:$0xff] %v6249_v51  ;;  %v6341_v33 = vadd.f32 %v6147_v14, %v6155_v36  ;;  %v6345_v29 = vadd.f32 %v6149_v0, %v6155_v36  ;;  %v6349_v7 = vadd.f32 %v6151_v30, %v6155_v36 }
 0x242   : > { %7872 = vst [vmem:[#allocation23_spill] sm:$0xff] %v6269_v20  ;;  %7875 = vst [vmem:[#allocation49_spill] sm:$0xff] %v6281_v10  ;;  %v6357_v24 = vadd.f32 %v6157_v41, %v6159_v43  ;;  %v6361_v14 = vadd.f32 %v6161_v21, %v6159_v43  ;;  %v6365_v0 = vadd.f32 %v6163_v56, %v6159_v43 }
 0x243   : > { %7876 = vst [vmem:[#allocation22_spill] sm:$0xff] %v6285_v8  ;;  %7877 = vst [vmem:[#allocation47_spill] sm:$0xff] %v6289_v40  ;;  %v6369_v30 = vadd.f32 %v6165_v47, %v6159_v43  ;;  %v6377_v41 = vadd.f32 %v6173_v19, %v6139_v60  ;;  %v6381_v21 = vadd.f32 %v6175_v39, %v6139_v60  ;;  %v7881_v43 = vld [vmem:[#allocation25_spill] sm:$0xff]  ;;  %v7882_v19 = vld [vmem:[#allocation6_spill] sm:$0xff] }
 0x244   : > { %7879 = vst [vmem:[#allocation45_spill] sm:$0xff] %v6297_v61  ;;  %v1852_v58 = vpop.f32.mrf.mxu0  ;;  %7880 = vst [vmem:[#allocation37_spill] sm:$0xff] %v6305_v46  ;;  %v2013_v3 = vpop.f32.mrf.mxu1  ;;  %v6385_v56 = vadd.f32 %v6177_v32, %v6139_v60  ;;  %v6389_v47 = vadd.f32 %v6181_v25, %v6145_v54  ;;  %v6393_v57 = vadd.f32 %v7881_v43, %v6145_v54  ;;  %v7883_v39 = vld [vmem:[#allocation8_spill] sm:$0xff]  ;;  %v7886_v25 = vld [vmem:[#allocation33_spill] sm:$0xff] }
 0x245   : > { %v6397_v42 = vadd.f32 %v7882_v19, %v6145_v54  ;;  %v6401_v37 = vadd.f32 %v7883_v39, %v6145_v54  ;;  %v7885_v60 = vld [vmem:[#allocation36_spill] sm:$0xff]  ;;  %v6407_v38 = vadd.f32 %v7887_v45, %v7886_v25  ;;  %v1853_v43 = vadd.f32 %v1852_v58, %v7884_v13  ;;  %v7888_v54 = vld [vmem:[#allocation34_spill] sm:$0xff] }
 0x246   : > { %v1854_v2 = vpop.f32.mrf.mxu0  ;;  %v2015_v17 = vpop.f32.mrf.mxu1  ;;  %v6414_v39 = vadd.f32 %v6199_v9, %v7886_v25  ;;  %v7889_v45 = vld [vmem:[#allocation14_spill] sm:$0xff]  ;;  %v6427_v9 = vadd.f32 %v6217_v26, %v7888_v54 }
 0x247   : > { %v1855_v32 = vadd.f32 %v1854_v2, %v7884_v13  ;;  %v2016_v35 = vadd.f32 %v2015_v17, %v7884_v13  ;;  %v1849_v2 = vadd.f32 %v1848_v27, %v7888_v54  ;;  %v6421_v28 = vadd.f32 %v7889_v45, %v7888_v54 }
 0x248   : > { %v2010_v17 = vadd.f32 %v2009_v59, %v7888_v54  ;;  %v7892_v59 = vld [vmem:[#allocation10_spill] sm:$0xff]  ;;  %v2443_v61 = vmul.f32 0.02, %v6414_v39 }
 0x249   : > { %v2459_v50 = vmul.f32 0.02, %v1855_v32  ;;  %v2461_v15 = vmul.f32 0.02, %v2016_v35  ;;  %v6437_v55 = vadd.f32 %v7892_v59, %v7886_v25  ;;  %v2450_v10 = vmul.f32 0.02, %v6421_v28 }
 0x24a   : > { %v1858_v36 = vpop.f32.mrf.mxu0  ;;  %v2019_v49 = vpop.f32.mrf.mxu1  ;;  %v2453_v20 = vmul.f32 0.02, %v2010_v17 }
 0x24b   : > { %v1859_v4 = vadd.f32 %v1858_v36, %v7885_v60  ;;  %v2020_v19 = vadd.f32 %v2019_v49, %v7885_v60  ;;  %v2014_v36 = vadd.f32 %v2013_v3, %v7884_v13  ;;  %v7890_v3 = vld [vmem:[#allocation11_spill] sm:$0xff]  ;;  %v2458_v13 = vmul.f32 0.02, %v1853_v43 }
 0x24c   : > { %v1860_v18 = vpop.f32.mrf.mxu0  ;;  %v2021_v53 = vpop.f32.mrf.mxu1  ;;  %v2587_v8 = vmax.f32 %v1855_v32, %v2459_v50 }
 0x24d   : > { %v1861_v51 = vadd.f32 %v1860_v18, %v7885_v60  ;;  %v2466_v58 = vmul.f32 0.02, %v1859_v4  ;;  %v2022_v49 = vadd.f32 %v2021_v53, %v7885_v60  ;;  %v2468_v27 = vmul.f32 0.02, %v2020_v19 }
 0x24e   : > { %v6431_v18 = vadd.f32 %v7890_v3, %v7886_v25  ;;  %v2451_v53 = vmul.f32 0.02, %v1849_v2  ;;  %v2460_v60 = vmul.f32 0.02, %v2014_v36  ;;  %v2586_v25 = vmax.f32 %v1853_v43, %v2458_v13 }
 0x24f   : > { %v2467_v52 = vmul.f32 0.02, %v1861_v51  ;;  %v2469_v45 = vmul.f32 0.02, %v2022_v49  ;;  %v2594_v40 = vmax.f32 %v1859_v4, %v2466_v58  ;;  %v2596_v46 = vmax.f32 %v2020_v19, %v2468_v27 }
 0x250   : > { %v6433_v11 = vpop.f32.mrf.mxu0  ;;  %v6439_v54 = vpop.f32.mrf.mxu1  ;;  %v2435_v4 = vmul.f32 0.02, %v6397_v42  ;;  %v2444_v58 = vmul.f32 0.02, %v6437_v55  ;;  %v2588_v50 = vmax.f32 %v2014_v36, %v2460_v60  ;;  %v2434_v19 = vmul.f32 0.02, %v6389_v47 }
 0x251   : > { %7891 = vst [vmem:[#allocation7_spill] sm:$0xff] %v6433_v11  ;;  %v2595_v26 = vmax.f32 %v1861_v51, %v2467_v52  ;;  %7893 = vst [vmem:[#allocation43_spill] sm:$0xff] %v6439_v54  ;;  %v2597_v3 = vmax.f32 %v2022_v49, %v2469_v45  ;;  %v2452_v11 = vmul.f32 0.02, %v6427_v9  ;;  %v2442_v51 = vmul.f32 0.02, %v6407_v38 }
 0x252   : > { %v6442_v62 = vpop.f32.mrf.mxu0  ;;  %v6446_v59 = vpop.f32.mrf.mxu1  ;;  %v2445_v52 = vmul.f32 0.02, %v6431_v18  ;;  %v2589_v54 = vmax.f32 %v2016_v35, %v2461_v15  ;;  %v2579_v49 = vmax.f32 %v1849_v2, %v2451_v53  ;;  %v2437_v27 = vmul.f32 0.02, %v6401_v37 }
 0x253   : > { %2658 = vmatprep.subr.mxu0 %v2595_v26  ;;  %2771 = vmatprep.subr.mxu1 %v2597_v3  ;;  %v2578_v13 = vmax.f32 %v6421_v28, %v2450_v10  ;;  %v2581_v35 = vmax.f32 %v2010_v17, %v2453_v20  ;;  %v2436_v43 = vmul.f32 0.02, %v6393_v57  ;;  %v2571_v60 = vmax.f32 %v6414_v39, %v2443_v61 }
 0x254   : > { %v6450_v44 = vpop.f32.mrf.mxu0  ;;  %2659 = vmatpush1.msra.mxu0 %v2594_v40  ;;  %v6454_v32 = vpop.f32.mrf.mxu1  ;;  %2772 = vmatpush1.msra.mxu1 %v2596_v46  ;;  %v2427_v40 = vmul.f32 0.02, %v6381_v21  ;;  %v2580_v46 = vmax.f32 %v6427_v9, %v2452_v11  ;;  %v2426_v2 = vmul.f32 0.02, %v6373_v23  ;;  %v2429_v28 = vmul.f32 0.02, %v6385_v56 }
 0x255   : > { %2660 = vmatprep.subr.mxu0 %v2587_v8  ;;  %2773 = vmatprep.subr.mxu1 %v2589_v54  ;;  %v2570_v20 = vmax.f32 %v6407_v38, %v2442_v51  ;;  %v2573_v54 = vmax.f32 %v6431_v18, %v2445_v52  ;;  %v2419_v61 = vmul.f32 0.02, %v6365_v0  ;;  %v2428_v11 = vmul.f32 0.02, %v6377_v41 }
 0x256   : > { %v6459_v15 = vpop.f32.mrf.mxu0  ;;  %2661 = vmatpush1.msra.mxu0 %v2586_v25  ;;  %v6465_v8 = vpop.f32.mrf.mxu1  ;;  %2774 = vmatpush1.msra.mxu1 %v2588_v50  ;;  %v2563_v25 = vmax.f32 %v6397_v42, %v2435_v4  ;;  %v2572_v39 = vmax.f32 %v6437_v55, %v2444_v58  ;;  %v2418_v38 = vmul.f32 0.02, %v6357_v24  ;;  %v2421_v17 = vmul.f32 0.02, %v6369_v30 }
 0x257   : > { %2662 = vmatprep.subr.mxu0 %v2579_v49  ;;  %2775 = vmatprep.subr.mxu1 %v2581_v35  ;;  %v2562_v9 = vmax.f32 %v6389_v47, %v2434_v19  ;;  %v2565_v18 = vmax.f32 %v6401_v37, %v2437_v27  ;;  %v2411_v42 = vmul.f32 0.02, %v6349_v7  ;;  %v2420_v55 = vmul.f32 0.02, %v6361_v14 }
 0x258   : > { %v6471_v10 = vpop.f32.mrf.mxu0  ;;  %2663 = vmatpush1.msra.mxu0 %v2578_v13  ;;  %v6477_v36 = vpop.f32.mrf.mxu1  ;;  %2776 = vmatpush1.msra.mxu1 %v2580_v46  ;;  %v2555_v53 = vmax.f32 %v6381_v21, %v2427_v40  ;;  %v2564_v26 = vmax.f32 %v6393_v57, %v2436_v43  ;;  %v2410_v47 = vmul.f32 0.02, %v6341_v33  ;;  %v2413_v37 = vmul.f32 0.02, %v6353_v31 }
 0x259   : > { %2664 = vmatprep.subr.mxu0 %v2571_v60  ;;  %2777 = vmatprep.subr.mxu1 %v2573_v54  ;;  %v2554_v51 = vmax.f32 %v6373_v23, %v2426_v2  ;;  %v2557_v52 = vmax.f32 %v6385_v56, %v2429_v28  ;;  %v2403_v21 = vmul.f32 0.02, %v6333_v5  ;;  %v2412_v57 = vmul.f32 0.02, %v6345_v29 }
 0x25a   : > { %v6483_v45 = vpop.f32.mrf.mxu0  ;;  %2665 = vmatpush1.msra.mxu0 %v2570_v20  ;;  %v6489_v3 = vpop.f32.mrf.mxu1  ;;  %2778 = vmatpush1.msra.mxu1 %v2572_v39  ;;  %v2547_v58 = vmax.f32 %v6365_v0, %v2419_v61  ;;  %v2556_v49 = vmax.f32 %v6377_v41, %v2428_v11  ;;  %v2402_v23 = vmul.f32 0.02, %v6325_v12  ;;  %v2405_v56 = vmul.f32 0.02, %v6337_v16  ;;  %v7894_v61 = vld [vmem:[#allocation46_spill] sm:$0xff]  ;;  %v7895_v11 = vld [vmem:[#allocation37_spill] sm:$0xff] }
 0x25b   : > { %2666 = vmatprep.subr.mxu0 %v2563_v25  ;;  %2779 = vmatprep.subr.mxu1 %v2565_v18  ;;  %v2546_v19 = vmax.f32 %v6357_v24, %v2418_v38  ;;  %v2549_v27 = vmax.f32 %v6369_v30, %v2421_v17  ;;  %v2395_v0 = vmul.f32 0.02, %v6317_v6  ;;  %v2404_v41 = vmul.f32 0.02, %v6329_v34  ;;  %v7896_v17 = vld [vmem:[#allocation22_spill] sm:$0xff] }
 0x25c   : > { %v6495_v4 = vpop.f32.mrf.mxu0  ;;  %2667 = vmatpush1.msra.mxu0 %v2562_v9  ;;  %v6501_v50 = vpop.f32.mrf.mxu1  ;;  %2780 = vmatpush1.msra.mxu1 %v2564_v26  ;;  %v2539_v35 = vmax.f32 %v6349_v7, %v2411_v42  ;;  %v2548_v40 = vmax.f32 %v6361_v14, %v2420_v55  ;;  %v2394_v24 = vmul.f32 0.02, %v6309_v22  ;;  %v2397_v30 = vmul.f32 0.02, %v6321_v1  ;;  %v7897_v9 = vld [vmem:[#allocation45_spill] sm:$0xff]  ;;  %v7899_v26 = vld [vmem:[#allocation47_spill] sm:$0xff] }
 0x25d   : > { %2668 = vmatprep.subr.mxu0 %v2555_v53  ;;  %2781 = vmatprep.subr.mxu1 %v2557_v52  ;;  %v2538_v60 = vmax.f32 %v6341_v33, %v2410_v47  ;;  %v2541_v46 = vmax.f32 %v6353_v31, %v2413_v37  ;;  %v2387_v7 = vmul.f32 0.02, %v6301_v63  ;;  %v2396_v14 = vmul.f32 0.02, %v6313_v48  ;;  %v7898_v53 = vld [vmem:[#allocation21_spill] sm:$0xff]  ;;  %v7900_v52 = vld [vmem:[#allocation23_spill] sm:$0xff] }
 0x25e   : > { %v6507_v13 = vpop.f32.mrf.mxu0  ;;  %2669 = vmatpush1.msra.mxu0 %v2554_v51  ;;  %v6513_v43 = vpop.f32.mrf.mxu1  ;;  %2782 = vmatpush1.msra.mxu1 %v2556_v49  ;;  %v2531_v28 = vmax.f32 %v6333_v5, %v2403_v21  ;;  %v2540_v20 = vmax.f32 %v6345_v29, %v2412_v57  ;;  %v2386_v33 = vmul.f32 0.02, %v7894_v61  ;;  %v2389_v31 = vmul.f32 0.02, %v7895_v11  ;;  %v7901_v21 = vld [vmem:[#allocation49_spill] sm:$0xff] }
 0x25f   : > { %2670 = vmatprep.subr.mxu0 %v2547_v58  ;;  %2783 = vmatprep.subr.mxu1 %v2549_v27  ;;  %v2530_v25 = vmax.f32 %v6325_v12, %v2402_v23  ;;  %v2533_v39 = vmax.f32 %v6337_v16, %v2405_v56  ;;  %v2379_v5 = vmul.f32 0.02, %v7896_v17  ;;  %v2388_v29 = vmul.f32 0.02, %v7897_v9  ;;  %v7902_v23 = vld [vmem:[#allocation17_spill] sm:$0xff]  ;;  %v7903_v56 = vld [vmem:[#allocation48_spill] sm:$0xff] }
 0x260   : > { %v6519_v2 = vpop.f32.mrf.mxu0  ;;  %2671 = vmatpush1.msra.mxu0 %v2546_v19  ;;  %v6525_v54 = vpop.f32.mrf.mxu1  ;;  %2784 = vmatpush1.msra.mxu1 %v2548_v40  ;;  %v2523_v18 = vmax.f32 %v6317_v6, %v2395_v0  ;;  %v2532_v42 = vmax.f32 %v6329_v34, %v2404_v41  ;;  %v2378_v12 = vmul.f32 0.02, %v7898_v53  ;;  %v2381_v16 = vmul.f32 0.02, %v7899_v26  ;;  %v7904_v41 = vld [vmem:[#allocation53_spill] sm:$0xff] }
 0x261   : > { %2672 = vmatprep.subr.mxu0 %v2539_v35  ;;  %2785 = vmatprep.subr.mxu1 %v2541_v46  ;;  %v2522_v47 = vmax.f32 %v6309_v22, %v2394_v24  ;;  %v2525_v37 = vmax.f32 %v6321_v1, %v2397_v30  ;;  %v2371_v6 = vmul.f32 0.02, %v7900_v52  ;;  %v2380_v34 = vmul.f32 0.02, %v7901_v21  ;;  %v7905_v35 = vld [vmem:[#allocation50_spill] sm:$0xff] }
 0x262   : > { %v6531_v38 = vpop.f32.mrf.mxu0  ;;  %2673 = vmatpush1.msra.mxu0 %v2538_v60  ;;  %v6537_v55 = vpop.f32.mrf.mxu1  ;;  %2786 = vmatpush1.msra.mxu1 %v2540_v20  ;;  %v2515_v57 = vmax.f32 %v6301_v63, %v2387_v7  ;;  %v2524_v58 = vmax.f32 %v6313_v48, %v2396_v14  ;;  %v2370_v22 = vmul.f32 0.02, %v7902_v23  ;;  %v2373_v1 = vmul.f32 0.02, %v7903_v56  ;;  %v7906_v60 = vld [vmem:[#allocation18_spill] sm:$0xff]  ;;  %v7907_v7 = vld [vmem:[#allocation51_spill] sm:$0xff] }
 0x263   : > { %2674 = vmatprep.subr.mxu0 %v2531_v28  ;;  %2787 = vmatprep.subr.mxu1 %v2533_v39  ;;  %v2514_v19 = vmax.f32 %v7894_v61, %v2386_v33  ;;  %v2517_v27 = vmax.f32 %v7895_v11, %v2389_v31  ;;  %v2363_v63 = vmul.f32 0.02, %v7904_v41  ;;  %v2372_v48 = vmul.f32 0.02, %v7905_v35  ;;  %v7908_v33 = vld [vmem:[#allocation52_spill] sm:$0xff]  ;;  %v7909_v31 = vld [vmem:[#allocation15_spill] sm:$0xff] }
 0x264   : > { %v6543_v51 = vpop.f32.mrf.mxu0  ;;  %2675 = vmatpush1.msra.mxu0 %v2530_v25  ;;  %v6549_v49 = vpop.f32.mrf.mxu1  ;;  %2788 = vmatpush1.msra.mxu1 %v2532_v42  ;;  %v2507_v40 = vmax.f32 %v7896_v17, %v2379_v5  ;;  %v2516_v24 = vmax.f32 %v7897_v9, %v2388_v29  ;;  %v2362_v46 = vmul.f32 0.02, %v7906_v60  ;;  %v2365_v14 = vmul.f32 0.02, %v7907_v7  ;;  %v7910_v9 = vld [vmem:[#allocation19_spill] sm:$0xff] }
 0x265   : > { %2676 = vmatprep.subr.mxu0 %v2523_v18  ;;  %2789 = vmatprep.subr.mxu1 %v2525_v37  ;;  %v2506_v28 = vmax.f32 %v7898_v53, %v2378_v12  ;;  %v2509_v20 = vmax.f32 %v7899_v26, %v2381_v16  ;;  %v2355_v11 = vmul.f32 0.02, %v7908_v33  ;;  %v2364_v25 = vmul.f32 0.02, %v7909_v31  ;;  %v7911_v18 = vld [vmem:[#allocation54_spill] sm:$0xff]  ;;  %v7912_v16 = vld [vmem:[#allocation12_spill] sm:$0xff] }
 0x266   : > { %v6555_v0 = vpop.f32.mrf.mxu0  ;;  %2677 = vmatpush1.msra.mxu0 %v2522_v47  ;;  %v6561_v30 = vpop.f32.mrf.mxu1  ;;  %2790 = vmatpush1.msra.mxu1 %v2524_v58  ;;  %v2499_v39 = vmax.f32 %v7900_v52, %v2371_v6  ;;  %v2508_v17 = vmax.f32 %v7901_v21, %v2380_v34  ;;  %v2354_v29 = vmul.f32 0.02, %v7910_v9  ;;  %v2357_v42 = vmul.f32 0.02, %v7911_v18  ;;  %v7913_v37 = vld [vmem:[#allocation13_spill] sm:$0xff] }
 0x267   : > { %2678 = vmatprep.subr.mxu0 %v2515_v57  ;;  %2791 = vmatprep.subr.mxu1 %v2517_v27  ;;  %v2498_v53 = vmax.f32 %v7902_v23, %v2370_v22  ;;  %v2501_v12 = vmax.f32 %v7903_v56, %v2373_v1  ;;  %v2347_v47 = vmul.f32 0.02, %v7912_v16  ;;  %v2356_v52 = vmul.f32 0.02, %v7913_v37  ;;  %v7914_v57 = vld [vmem:[#allocation9_spill] sm:$0xff]  ;;  %v7915_v23 = vld [vmem:[#allocation55_spill] sm:$0xff] }
 0x268   : > { %v6567_v61 = vpop.f32.mrf.mxu0  ;;  %2679 = vmatpush1.msra.mxu0 %v2514_v19  ;;  %v6573_v5 = vpop.f32.mrf.mxu1  ;;  %2792 = vmatpush1.msra.mxu1 %v2516_v24  ;;  %v2491_v6 = vmax.f32 %v7904_v41, %v2363_v63  ;;  %v2500_v21 = vmax.f32 %v7905_v35, %v2372_v48  ;;  %v2346_v58 = vmul.f32 0.02, %v7914_v57  ;;  %v2349_v22 = vmul.f32 0.02, %v7915_v23  ;;  %v7916_v27 = vld [vmem:[#allocation57_spill] sm:$0xff] }
 0x269   : > { %2680 = vmatprep.subr.mxu0 %v2507_v40  ;;  %2793 = vmatprep.subr.mxu1 %v2509_v20  ;;  %v2490_v56 = vmax.f32 %v7906_v60, %v2362_v46  ;;  %v2493_v1 = vmax.f32 %v7907_v7, %v2365_v14  ;;  %v2348_v41 = vmul.f32 0.02, %v7916_v27  ;;  %v2483_v63 = vmax.f32 %v7908_v33, %v2355_v11  ;;  %v6613_v11 = vld [vmem:[%s7522_s5] sm:$0xff] }
 0x26a   : > { %v6579_v26 = vpop.f32.mrf.mxu0  ;;  %2681 = vmatpush1.msra.mxu0 %v2506_v28  ;;  %v6585_v34 = vpop.f32.mrf.mxu1  ;;  %2794 = vmatpush1.msra.mxu1 %v2508_v17  ;;  %v2492_v35 = vmax.f32 %v7909_v31, %v2364_v25  ;;  %v2482_v40 = vmax.f32 %v7910_v9, %v2354_v29  ;;  %v2485_v24 = vmax.f32 %v7911_v18, %v2357_v42  ;;  %v7918_v29 = vmov 0.0   ;;  %v6630_v18 = vld [vmem:[%s7522_s5 + $0x8] sm:$0xff] }
 0x26b   : > { %2682 = vmatprep.subr.mxu0 %v2499_v39  ;;  %2795 = vmatprep.subr.mxu1 %v2501_v12  ;;  %v2475_v46 = vmax.f32 %v7912_v16, %v2347_v47  ;;  %v2484_v7 = vmax.f32 %v7913_v37, %v2356_v52  ;;  %v2474_v28 = vmax.f32 %v7914_v57, %v2346_v58  ;;  %v6647_v47 = vld [vmem:[%s7522_s5 + $0x10] sm:$0xff]  ;;  %v6664_v57 = vld [vmem:[%s7522_s5 + $0x18] sm:$0xff] }
 0x26c   : > { %v6591_v19 = vpop.f32.mrf.mxu0  ;;  %2683 = vmatpush1.msra.mxu0 %v2498_v53  ;;  %v6596_v48 = vpop.f32.mrf.mxu1  ;;  %2796 = vmatpush1.msra.mxu1 %v2500_v21  ;;  %v2477_v20 = vmax.f32 %v7915_v23, %v2349_v22  ;;  %7917 = vst [vmem:[#allocation41_spill] sm:$0xff] %v6613_v11  ;;  %v2476_v31 = vmax.f32 %v7916_v27, %v2348_v41  ;;  %7919 = vst [vmem:[#allocation42_spill] sm:$0xff] %v6630_v18 }
 0x26d   : > { %2684 = vmatprep.subr.mxu0 %v2491_v6  ;;  %2797 = vmatprep.subr.mxu1 %v2493_v1  ;;  %7920 = vst [vmem:[#allocation40_spill] sm:$0xff] %v6647_v47  ;;  %7921 = vst [vmem:[#allocation38_spill] sm:$0xff] %v6664_v57  ;;  %v7923_v1 = vld [vmem:[#allocation7_spill] sm:$0xff] }
 0x26e   : > { %v6600_v60 = vpop.f32.mrf.mxu0  ;;  %2685 = vmatpush1.msra.mxu0 %v2490_v56  ;;  %v6604_v14 = vpop.f32.mrf.mxu1  ;;  %2798 = vmatpush1.msra.mxu1 %v2492_v35  ;;  %v7922_v56 = vld [vmem:[#allocation16_spill] sm:$0xff]  ;;  %v7926_v35 = vld [vmem:[#allocation43_spill] sm:$0xff] }
 0x26f   : > { %2686 = vmatprep.subr.mxu0 %v2483_v63  ;;  %2799 = vmatprep.subr.mxu1 %v2485_v24  ;;  %v6676_v27 = vadd.f32 %v7923_v1, %v7922_v56  ;;  %v6685_v63 = vld [vmem:[%s7522_s5 + $0x20] sm:$0xff]  ;;  %v6693_v24 = vadd.f32 %v6442_v62, %v7922_v56 }
 0x270   : > { %v6608_v33 = vpop.f32.mrf.mxu0  ;;  %2687 = vmatpush1.msra.mxu0 %v2482_v40  ;;  %v6616_v25 = vpop.f32.mrf.mxu1  ;;  %2800 = vmatpush1.msra.mxu1 %v2484_v7  ;;  %7925 = vst [vmem:[#allocation5_spill] sm:$0xff] %v6685_v63  ;;  %v6689_v40 = vadd.f32 %v7926_v35, %v7922_v56  ;;  %v7930_v7 = vld [vmem:[#allocation56_spill] sm:$0xff] }
 0x271   : > { %2688 = vmatprep.subr.mxu0 %v2475_v46  ;;  %2801 = vmatprep.subr.mxu1 %v2477_v20  ;;  %7924 = vst [vmem:[#allocation39_spill] sm:$0xff] %v6676_v27  ;;  %7928 = vst [vmem:[#allocation6_spill] sm:$0xff] %v6693_v24  ;;  %v6697_v46 = vadd.f32 %v6446_v59, %v7922_v56  ;;  %v6712_v62 = vadd.f32 %v6459_v15, %v7930_v7  ;;  %v7935_v56 = vld [vmem:[#allocation4_spill] sm:$0xff]  ;;  %v7961_v24 = vld [vmem:[#allocation31_spill] sm:$0xff] }
 0x272   : > { %v6618_v39 = vpop.f32.mrf.mxu0  ;;  %2689 = vmatpush1.msra.mxu0 %v2474_v28  ;;  %v6620_v17 = vpop.f32.mrf.mxu1  ;;  %2802 = vmatpush1.msra.mxu1 %v2476_v31  ;;  %7927 = vst [vmem:[#allocation25_spill] sm:$0xff] %v6689_v40  ;;  %v6701_v28 = vadd.f32 %v6450_v44, %v7930_v7  ;;  %v6708_v31 = vadd.f32 %v6454_v32, %v7930_v7 }
 0x273   : > { %2723 = vmatmul.mubr.f32.vlgmr.msra.gmra.mxu0 %v6613_v11  ;;  %2836 = vmatmul.mubr.f32.vlgmr.msra.gmra.mxu1 %v6613_v11  ;;  %7929 = vst [vmem:[#allocation8_spill] sm:$0xff] %v6697_v46  ;;  %7933 = vst [vmem:[#allocation11_spill] sm:$0xff] %v6712_v62  ;;  %v6716_v59 = vadd.f32 %v6465_v8, %v7930_v7  ;;  %v6720_v44 = vadd.f32 %v6471_v10, %v7935_v56  ;;  %v7940_v8 = vld [vmem:[#allocation44_spill] sm:$0xff] }
 0x274   : > { %v6623_v9 = vpop.f32.mrf.mxu0  ;;  %2728 = vmatprep.mubr.f32.mxu0 %v7918_v29  ;;  %v6632_v42 = vpop.f32.mrf.mxu1  ;;  %2841 = vmatprep.mubr.f32.mxu1 %v7918_v29  ;;  %7931 = vst [vmem:[#allocation20_spill] sm:$0xff] %v6701_v28  ;;  %7932 = vst [vmem:[#allocation14_spill] sm:$0xff] %v6708_v31  ;;  %v6726_v35 = vadd.f32 %v6477_v36, %v7935_v56  ;;  %v6730_v32 = vadd.f32 %v6483_v45, %v7935_v56 }
 0x275   : > { %7934 = vst [vmem:[#allocation10_spill] sm:$0xff] %v6716_v59  ;;  %7936 = vst [vmem:[#allocation46_spill] sm:$0xff] %v6720_v44  ;;  %v6734_v15 = vadd.f32 %v6489_v3, %v7935_v56  ;;  %v6738_v7 = vadd.f32 %v6495_v4, %v7940_v8  ;;  %v6745_v36 = vadd.f32 %v6501_v50, %v7940_v8  ;;  %v6762_v4 = vld [vmem:[%s7522_s5 + $0x28] sm:$0xff]  ;;  %v7946_v50 = vld [vmem:[#allocation27_spill] sm:$0xff] }
 0x276   : > { %v6635_v53 = vpop.f32.mrf.mxu0  ;;  %v6637_v12 = vpop.f32.mrf.mxu1  ;;  %7937 = vst [vmem:[#allocation37_spill] sm:$0xff] %v6726_v35  ;;  %7938 = vst [vmem:[#allocation22_spill] sm:$0xff] %v6730_v32  ;;  %v6749_v45 = vadd.f32 %v6507_v13, %v7940_v8  ;;  %v6753_v3 = vadd.f32 %v6513_v43, %v7940_v8  ;;  %v6770_v13 = vadd.f32 %v6525_v54, %v7946_v50  ;;  %v7965_v59 = vld [vmem:[#allocation36_spill] sm:$0xff]  ;;  %v7966_v35 = vld [vmem:[#allocation33_spill] sm:$0xff] }
 0x277   : > { %2729 = vmatmul.mubr.f32.gmra.mxu0 %v6630_v18  ;;  %2842 = vmatmul.mubr.f32.gmra.mxu1 %v6630_v18  ;;  %7939 = vst [vmem:[#allocation45_spill] sm:$0xff] %v6734_v15  ;;  %7941 = vst [vmem:[#allocation21_spill] sm:$0xff] %v6738_v7  ;;  %v6774_v43 = vadd.f32 %v6531_v38, %v7946_v50  ;;  %v6778_v8 = vadd.f32 %v6537_v55, %v7946_v50  ;;  %v7955_v18 = vld [vmem:[#allocation29_spill] sm:$0xff] }
 0x278   : > { %v6640_v16 = vpop.f32.mrf.mxu0  ;;  %2734 = vmatprep.mubr.f32.mxu0 %v7918_v29  ;;  %v6649_v37 = vpop.f32.mrf.mxu1  ;;  %2847 = vmatprep.mubr.f32.mxu1 %v7918_v29  ;;  %7942 = vst [vmem:[#allocation47_spill] sm:$0xff] %v6745_v36  ;;  %7943 = vst [vmem:[#allocation23_spill] sm:$0xff] %v6749_v45  ;;  %v6801_v11 = vadd.f32 %v6567_v61, %v7955_v18 }
 0x279   : > { %7944 = vst [vmem:[#allocation49_spill] sm:$0xff] %v6753_v3  ;;  %7945 = vst [vmem:[#allocation17_spill] sm:$0xff] %v6762_v4 }
 0x27a   : > { %v6652_v52 = vpop.f32.mrf.mxu0  ;;  %v6654_v6 = vpop.f32.mrf.mxu1  ;;  %7948 = vst [vmem:[#allocation53_spill] sm:$0xff] %v6770_v13  ;;  %7949 = vst [vmem:[#allocation50_spill] sm:$0xff] %v6774_v43 }
 0x27b   : > { %2735 = vmatmul.mubr.f32.gmra.mxu0 %v6647_v47  ;;  %2848 = vmatmul.mubr.f32.gmra.mxu1 %v6647_v47  ;;  %7950 = vst [vmem:[#allocation18_spill] sm:$0xff] %v6778_v8  ;;  %v7951_v47 = vld [vmem:[#allocation24_spill] sm:$0xff] }
 0x27c   : > { %v6657_v21 = vpop.f32.mrf.mxu0  ;;  %2740 = vmatprep.mubr.f32.mxu0 %v7918_v29  ;;  %v6666_v58 = vpop.f32.mrf.mxu1  ;;  %2853 = vmatprep.mubr.f32.mxu1 %v7918_v29  ;;  %v6789_v54 = vadd.f32 %v6549_v49, %v7951_v47  ;;  %v6793_v38 = vadd.f32 %v6555_v0, %v7951_v47  ;;  %v6797_v55 = vadd.f32 %v6561_v30, %v7951_v47  ;;  %v7957_v30 = vld [vmem:[#allocation26_spill] sm:$0xff] }
 0x27d   : > { %v6809_v49 = vadd.f32 %v6579_v26, %v7955_v18  ;;  %v6813_v0 = vadd.f32 %v6585_v34, %v7955_v18  ;;  %v6822_v61 = vadd.f32 %v6596_v48, %v7957_v30  ;;  %v6833_v34 = vld [vmem:[%s7522_s5 + $0x30] sm:$0xff] }
 0x27e   : > { %v6669_v23 = vpop.f32.mrf.mxu0  ;;  %v6671_v22 = vpop.f32.mrf.mxu1  ;;  %7953 = vst [vmem:[#allocation52_spill] sm:$0xff] %v6789_v54  ;;  %7954 = vst [vmem:[#allocation15_spill] sm:$0xff] %v6797_v55  ;;  %v7959_v48 = vld [vmem:[#allocation30_spill] sm:$0xff] }
 0x27f   : > { %2741 = vmatmul.mubr.f32.gmra.mxu0 %v6664_v57  ;;  %2854 = vmatmul.mubr.f32.gmra.mxu1 %v6664_v57  ;;  %v6766_v57 = vadd.f32 %v6519_v2, %v7946_v50  ;;  %v6785_v2 = vadd.f32 %v6543_v51, %v7951_v47  ;;  %v6805_v51 = vadd.f32 %v6573_v5, %v7955_v18 }
 0x280   : > { %v6678_v41 = vpop.f32.mrf.mxu0  ;;  %2746 = vmatprep.mubr.f32.mxu0 %v7918_v29  ;;  %v6703_v20 = vpop.f32.mrf.mxu1  ;;  %2859 = vmatprep.mubr.f32.mxu1 %v7918_v29  ;;  %v6818_v47 = vadd.f32 %v6591_v19, %v7957_v30  ;;  %v6826_v5 = vadd.f32 %v6600_v60, %v7957_v30  ;;  %7958 = vst [vmem:[#allocation54_spill] sm:$0xff] %v6833_v34 }
 0x281   : > { %7947 = vst [vmem:[#allocation48_spill] sm:$0xff] %v6766_v57  ;;  %7952 = vst [vmem:[#allocation51_spill] sm:$0xff] %v6785_v2  ;;  %v6837_v19 = vadd.f32 %v6604_v14, %v7957_v30  ;;  %v6841_v18 = vadd.f32 %v6608_v33, %v7959_v48  ;;  %v6845_v60 = vadd.f32 %v6616_v25, %v7959_v48  ;;  %v7960_v14 = vld [vmem:[#allocation28_spill] sm:$0xff] }
 0x282   : > { %v6722_v1 = vpop.f32.mrf.mxu0  ;;  %v6740_v10 = vpop.f32.mrf.mxu1  ;;  %7956 = vst [vmem:[#allocation19_spill] sm:$0xff] %v6805_v51  ;;  %v6854_v27 = vadd.f32 %v6620_v17, %v7959_v48  ;;  %v6858_v30 = vadd.f32 %v6623_v9, %v7960_v14  ;;  %v6862_v33 = vadd.f32 %v6632_v42, %v7960_v14  ;;  %v6866_v25 = vadd.f32 %v6635_v53, %v7960_v14 }
 0x283   : > { %2747 = vmatmul.mubr.f32.gmra.mxu0 %v6685_v63  ;;  %2860 = vmatmul.mubr.f32.gmra.mxu1 %v6685_v63  ;;  %v6870_v31 = vadd.f32 %v6637_v12, %v7960_v14  ;;  %v6874_v17 = vadd.f32 %v6640_v16, %v7961_v24  ;;  %v6878_v9 = vadd.f32 %v6649_v37, %v7961_v24  ;;  %v7962_v12 = vld [vmem:[#allocation32_spill] sm:$0xff] }
 0x284   : > { %v6755_v56 = vpop.f32.mrf.mxu0  ;;  %2752 = vmatprep.mubr.f32.mxu0 %v7918_v29  ;;  %v6780_v63 = vpop.f32.mrf.mxu1  ;;  %2865 = vmatprep.mubr.f32.mxu1 %v7918_v29  ;;  %v6882_v42 = vadd.f32 %v6652_v52, %v7961_v24  ;;  %v6887_v53 = vadd.f32 %v6654_v6, %v7961_v24  ;;  %v6891_v14 = vadd.f32 %v6657_v21, %v7962_v12  ;;  %v6902_v52 = vld [vmem:[%s7522_s5 + $0x38] sm:$0xff] }
 0x285   : > { %v6895_v16 = vadd.f32 %v6666_v58, %v7962_v12  ;;  %7963 = vst [vmem:[#allocation12_spill] sm:$0xff] %v6902_v52  ;;  %v6906_v6 = vadd.f32 %v6669_v23, %v7962_v12  ;;  %v6910_v21 = vadd.f32 %v6671_v22, %v7962_v12  ;;  %v7964_v58 = vld [vmem:[#allocation35_spill] sm:$0xff]  ;;  %v6917_v62 = vadd.f32 %v6678_v41, %v7966_v35 }
 0x286   : > { %v2170_v50 = vpop.f32.mrf.mxu0  ;;  %v2331_v40 = vpop.f32.mrf.mxu1  ;;  %v6924_v22 = vadd.f32 %v6722_v1, %v7966_v35 }
 0x287   : > { %2753 = vmatmul.mubr.f32.gmra.mxu0 %v6762_v4  ;;  %2866 = vmatmul.mubr.f32.gmra.mxu1 %v6762_v4  ;;  %v6849_v4 = vadd.f32 %v6618_v39, %v7959_v48 }
 0x288   : > { %v2174_v26 = vpop.f32.mrf.mxu0  ;;  %2758 = vmatprep.mubr.f32.mxu0 %v7918_v29  ;;  %v2335_v46 = vpop.f32.mrf.mxu1  ;;  %2871 = vmatprep.mubr.f32.mxu1 %v7918_v29  ;;  %v2447_v57 = vmul.f32 0.02, %v6924_v22 }
 0x289   : > { %v2175_v15 = vadd.f32 %v2174_v26, %v7964_v58 }
 0x28a   : > { %v2176_v39 = vpop.f32.mrf.mxu0  ;;  %v2337_v48 = vpop.f32.mrf.mxu1 }
 0x28b   : > { %2759 = vmatmul.mubr.f32.gmra.mxu0 %v6833_v34  ;;  %2872 = vmatmul.mubr.f32.gmra.mxu1 %v6833_v34  ;;  %v2177_v24 = vadd.f32 %v2176_v39, %v7964_v58  ;;  %v2338_v23 = vadd.f32 %v2337_v48, %v7964_v58  ;;  %v7967_v39 = vld [vmem:[#allocation34_spill] sm:$0xff] }
 0x28c   : > { %v2180_v37 = vpop.f32.mrf.mxu0  ;;  %2764 = vmatprep.mubr.f32.mxu0 %v7918_v29  ;;  %v2341_v34 = vpop.f32.mrf.mxu1  ;;  %2877 = vmatprep.mubr.f32.mxu1 %v7918_v29  ;;  %v2171_v12 = vadd.f32 %v2170_v50, %v7967_v39  ;;  %v2169_v41 = vadd.f32 %v6755_v56, %v7967_v39  ;;  %v2332_v26 = vadd.f32 %v2331_v40, %v7967_v39 }
 0x28d   : > { %v2181_v28 = vadd.f32 %v2180_v37, %v7965_v59  ;;  %v2342_v44 = vadd.f32 %v2341_v34, %v7965_v59  ;;  %v2336_v37 = vadd.f32 %v2335_v46, %v7964_v58  ;;  %v2330_v46 = vadd.f32 %v6780_v63, %v7967_v39 }
 0x28e   : > { %v2182_v36 = vpop.f32.mrf.mxu0  ;;  %v2343_v3 = vpop.f32.mrf.mxu1  ;;  %v2463_v1 = vmul.f32 0.02, %v2177_v24  ;;  %v2326_v56 = vadd.f32 %v6740_v10, %v7966_v35  ;;  %v2462_v58 = vmul.f32 0.02, %v2175_v15  ;;  %v2465_v40 = vmul.f32 0.02, %v2338_v23 }
 0x28f   : > { %v2183_v32 = vadd.f32 %v2182_v36, %v7965_v59  ;;  %2765 = vmatmul.mubr.f32.gmra.mxu0 %v6902_v52  ;;  %v2470_v34 = vmul.f32 0.02, %v2181_v28  ;;  %v2344_v48 = vadd.f32 %v2343_v3, %v7965_v59  ;;  %2878 = vmatmul.mubr.f32.gmra.mxu1 %v6902_v52  ;;  %v2472_v36 = vmul.f32 0.02, %v2342_v44 }
 0x290   : > { %2948 = vmatprep.mubr.f32.mxu0 %v7918_v29  ;;  %3061 = vmatprep.mubr.f32.mxu1 %v7918_v29  ;;  %v2324_v59 = vadd.f32 %v6703_v20, %v7966_v35  ;;  %v2455_v3 = vmul.f32 0.02, %v2171_v12  ;;  %v2464_v52 = vmul.f32 0.02, %v2336_v37  ;;  %v2454_v45 = vmul.f32 0.02, %v2169_v41 }
 0x291   : > { %v2471_v50 = vmul.f32 0.02, %v2183_v32  ;;  %v2473_v7 = vmul.f32 0.02, %v2344_v48  ;;  %v2457_v8 = vmul.f32 0.02, %v2332_v26  ;;  %v2598_v63 = vmax.f32 %v2181_v28, %v2470_v34 }
 0x292   : > { %v2456_v54 = vmul.f32 0.02, %v2330_v46  ;;  %v2591_v29 = vmax.f32 %v2177_v24, %v2463_v1  ;;  %v2600_v43 = vmax.f32 %v2342_v44, %v2472_v36  ;;  %v2446_v10 = vmul.f32 0.02, %v6917_v62 }
 0x293   : > { %v2599_v13 = vmax.f32 %v2183_v32, %v2471_v50  ;;  %v2601_v39 = vmax.f32 %v2344_v48, %v2473_v7  ;;  %v2449_v55 = vmul.f32 0.02, %v2326_v56  ;;  %v2590_v2 = vmax.f32 %v2175_v15, %v2462_v58 }
 0x294   : > { %v2593_v51 = vmax.f32 %v2338_v23, %v2465_v40  ;;  %v2439_v20 = vmul.f32 0.02, %v6906_v6  ;;  %v2448_v35 = vmul.f32 0.02, %v2324_v59  ;;  %v2583_v32 = vmax.f32 %v2171_v12, %v2455_v3 }
 0x295   : > { %2884 = vmatprep.subr.mxu0 %v2599_v13  ;;  %2997 = vmatprep.subr.mxu1 %v2601_v39  ;;  %v2592_v50 = vmax.f32 %v2336_v37, %v2464_v52  ;;  %v2438_v28 = vmul.f32 0.02, %v6891_v14  ;;  %v2441_v7 = vmul.f32 0.02, %v6910_v21  ;;  %v2582_v44 = vmax.f32 %v2169_v41, %v2454_v45  ;;  %v7968_v39 = vld [vmem:[#allocation19_spill] sm:$0xff] }
 0x296   : > { %2885 = vmatpush1.msra.mxu0 %v2598_v63  ;;  %2998 = vmatpush1.msra.mxu1 %v2600_v43  ;;  %v2585_v13 = vmax.f32 %v2332_v26, %v2457_v8  ;;  %v2431_v15 = vmul.f32 0.02, %v6882_v42  ;;  %v2440_v24 = vmul.f32 0.02, %v6895_v16  ;;  %v2575_v23 = vmax.f32 %v6924_v22, %v2447_v57 }
 0x297   : > { %2886 = vmatprep.subr.mxu0 %v2591_v29  ;;  %2999 = vmatprep.subr.mxu1 %v2593_v51  ;;  %v2584_v34 = vmax.f32 %v2330_v46, %v2456_v54  ;;  %v2430_v43 = vmul.f32 0.02, %v6874_v17  ;;  %v2433_v29 = vmul.f32 0.02, %v6887_v53  ;;  %v2574_v52 = vmax.f32 %v6917_v62, %v2446_v10 }
 0x298   : > { %2887 = vmatpush1.msra.mxu0 %v2590_v2  ;;  %3000 = vmatpush1.msra.mxu1 %v2592_v50  ;;  %v2577_v12 = vmax.f32 %v2326_v56, %v2449_v55  ;;  %v2423_v45 = vmul.f32 0.02, %v6866_v25  ;;  %v2432_v8 = vmul.f32 0.02, %v6878_v9  ;;  %v2567_v2 = vmax.f32 %v6906_v6, %v2439_v20  ;;  %v7969_v20 = vld [vmem:[#allocation51_spill] sm:$0xff] }
 0x299   : > { %2888 = vmatprep.subr.mxu0 %v2583_v32  ;;  %3001 = vmatprep.subr.mxu1 %v2585_v13  ;;  %v2576_v51 = vmax.f32 %v2324_v59, %v2448_v35  ;;  %v2422_v57 = vmul.f32 0.02, %v6858_v30  ;;  %v2425_v54 = vmul.f32 0.02, %v6870_v31  ;;  %v2566_v22 = vmax.f32 %v6891_v14, %v2438_v28  ;;  %v7970_v32 = vld [vmem:[#allocation15_spill] sm:$0xff]  ;;  %v7971_v28 = vld [vmem:[#allocation50_spill] sm:$0xff] }
 0x29a   : > { %2889 = vmatpush1.msra.mxu0 %v2582_v44  ;;  %3002 = vmatpush1.msra.mxu1 %v2584_v34  ;;  %v2569_v62 = vmax.f32 %v6910_v21, %v2441_v7  ;;  %v2415_v55 = vmul.f32 0.02, %v6849_v4  ;;  %v2424_v37 = vmul.f32 0.02, %v6862_v33  ;;  %v2559_v41 = vmax.f32 %v6882_v42, %v2431_v15  ;;  %v7972_v44 = vld [vmem:[#allocation52_spill] sm:$0xff] }
 0x29b   : > { %2890 = vmatprep.subr.mxu0 %v2575_v23  ;;  %3003 = vmatprep.subr.mxu1 %v2577_v12  ;;  %v2568_v6 = vmax.f32 %v6895_v16, %v2440_v24  ;;  %v2414_v26 = vmul.f32 0.02, %v6841_v18  ;;  %v2417_v48 = vmul.f32 0.02, %v6854_v27  ;;  %v2558_v14 = vmax.f32 %v6874_v17, %v2430_v43  ;;  %v7973_v15 = vld [vmem:[#allocation48_spill] sm:$0xff]  ;;  %v7974_v23 = vld [vmem:[#allocation18_spill] sm:$0xff] }
 0x29c   : > { %2891 = vmatpush1.msra.mxu0 %v2574_v52  ;;  %3004 = vmatpush1.msra.mxu1 %v2576_v51  ;;  %v2561_v21 = vmax.f32 %v6887_v53, %v2433_v29  ;;  %v2407_v46 = vmul.f32 0.02, %v6826_v5  ;;  %v2416_v1 = vmul.f32 0.02, %v6845_v60  ;;  %v2551_v42 = vmax.f32 %v6866_v25, %v2423_v45  ;;  %v7975_v43 = vld [vmem:[#allocation23_spill] sm:$0xff]  ;;  %v7976_v52 = vld [vmem:[#allocation53_spill] sm:$0xff] }
 0x29d   : > { %2892 = vmatprep.subr.mxu0 %v2567_v2  ;;  %3005 = vmatprep.subr.mxu1 %v2569_v62  ;;  %v2560_v16 = vmax.f32 %v6878_v9, %v2432_v8  ;;  %v2406_v36 = vmul.f32 0.02, %v6818_v47  ;;  %v2409_v56 = vmul.f32 0.02, %v6837_v19  ;;  %v2550_v17 = vmax.f32 %v6858_v30, %v2422_v57  ;;  %v7977_v45 = vld [vmem:[#allocation21_spill] sm:$0xff]  ;;  %v7979_v57 = vld [vmem:[#allocation22_spill] sm:$0xff] }
 0x29e   : > { %2893 = vmatpush1.msra.mxu0 %v2566_v22  ;;  %3006 = vmatpush1.msra.mxu1 %v2568_v6  ;;  %v2553_v53 = vmax.f32 %v6870_v31, %v2425_v54  ;;  %v2399_v58 = vmul.f32 0.02, %v6809_v49  ;;  %v2408_v40 = vmul.f32 0.02, %v6822_v61  ;;  %v2543_v25 = vmax.f32 %v6849_v4, %v2415_v55  ;;  %v7978_v2 = vld [vmem:[#allocation49_spill] sm:$0xff]  ;;  %v7980_v22 = vld [vmem:[#allocation47_spill] sm:$0xff] }
 0x29f   : > { %2894 = vmatprep.subr.mxu0 %v2559_v41  ;;  %3007 = vmatprep.subr.mxu1 %v2561_v21  ;;  %v2552_v9 = vmax.f32 %v6862_v33, %v2424_v37  ;;  %v2398_v59 = vmul.f32 0.02, %v6801_v11  ;;  %v2401_v3 = vmul.f32 0.02, %v6813_v0  ;;  %v2542_v30 = vmax.f32 %v6841_v18, %v2414_v26  ;;  %v7981_v37 = vld [vmem:[#allocation46_spill] sm:$0xff]  ;;  %v7982_v6 = vld [vmem:[#allocation45_spill] sm:$0xff] }
 0x2a0   : > { %2895 = vmatpush1.msra.mxu0 %v2558_v14  ;;  %3008 = vmatpush1.msra.mxu1 %v2560_v16  ;;  %v2545_v31 = vmax.f32 %v6854_v27, %v2417_v48  ;;  %v2391_v63 = vmul.f32 0.02, %v6793_v38  ;;  %v2400_v10 = vmul.f32 0.02, %v7968_v39  ;;  %v2535_v4 = vmax.f32 %v6826_v5, %v2407_v46  ;;  %v7983_v21 = vld [vmem:[#allocation11_spill] sm:$0xff] }
 0x2a1   : > { %2896 = vmatprep.subr.mxu0 %v2551_v42  ;;  %3009 = vmatprep.subr.mxu1 %v2553_v53  ;;  %v2544_v33 = vmax.f32 %v6845_v60, %v2416_v1  ;;  %v2390_v35 = vmul.f32 0.02, %v7969_v20  ;;  %v2393_v50 = vmul.f32 0.02, %v7970_v32  ;;  %v2534_v18 = vmax.f32 %v6818_v47, %v2406_v36  ;;  %v7984_v1 = vld [vmem:[#allocation37_spill] sm:$0xff]  ;;  %v7986_v53 = vld [vmem:[#allocation10_spill] sm:$0xff] }
 0x2a2   : > { %2897 = vmatpush1.msra.mxu0 %v2550_v17  ;;  %3010 = vmatpush1.msra.mxu1 %v2552_v9  ;;  %v2537_v27 = vmax.f32 %v6837_v19, %v2409_v56  ;;  %v2383_v7 = vmul.f32 0.02, %v7971_v28  ;;  %v2392_v13 = vmul.f32 0.02, %v7972_v44  ;;  %v2527_v5 = vmax.f32 %v6809_v49, %v2399_v58  ;;  %v7985_v56 = vld [vmem:[#allocation20_spill] sm:$0xff]  ;;  %v7987_v9 = vld [vmem:[#allocation6_spill] sm:$0xff] }
 0x2a3   : > { %2898 = vmatprep.subr.mxu0 %v2543_v25  ;;  %3011 = vmatprep.subr.mxu1 %v2545_v31  ;;  %v2536_v60 = vmax.f32 %v6822_v61, %v2408_v40  ;;  %v2382_v24 = vmul.f32 0.02, %v7973_v15  ;;  %v2385_v34 = vmul.f32 0.02, %v7974_v23  ;;  %v2526_v47 = vmax.f32 %v6801_v11, %v2398_v59 }
 0x2a4   : > { %2899 = vmatpush1.msra.mxu0 %v2542_v30  ;;  %3012 = vmatpush1.msra.mxu1 %v2544_v33  ;;  %v2529_v19 = vmax.f32 %v6813_v0, %v2401_v3  ;;  %v2375_v29 = vmul.f32 0.02, %v7975_v43  ;;  %v2384_v12 = vmul.f32 0.02, %v7976_v52  ;;  %v2519_v49 = vmax.f32 %v6793_v38, %v2391_v63  ;;  %v7988_v3 = vld [vmem:[#allocation14_spill] sm:$0xff] }
 0x2a5   : > { %2900 = vmatprep.subr.mxu0 %v2535_v4  ;;  %3013 = vmatprep.subr.mxu1 %v2537_v27  ;;  %v2528_v61 = vmax.f32 %v7968_v39, %v2400_v10  ;;  %v2374_v8 = vmul.f32 0.02, %v7977_v45  ;;  %v2377_v51 = vmul.f32 0.02, %v7978_v2  ;;  %v2518_v11 = vmax.f32 %v7969_v20, %v2390_v35  ;;  %v7989_v39 = vld [vmem:[#allocation39_spill] sm:$0xff]  ;;  %v7990_v4 = vld [vmem:[#allocation8_spill] sm:$0xff] }
 0x2a6   : > { %2901 = vmatpush1.msra.mxu0 %v2534_v18  ;;  %3014 = vmatpush1.msra.mxu1 %v2536_v60  ;;  %v2521_v0 = vmax.f32 %v7970_v32, %v2393_v50  ;;  %v2367_v54 = vmul.f32 0.02, %v7979_v57  ;;  %v2376_v62 = vmul.f32 0.02, %v7980_v22  ;;  %v2511_v38 = vmax.f32 %v7971_v28, %v2383_v7  ;;  %v7991_v32 = vld [vmem:[#allocation25_spill] sm:$0xff] }
 0x2a7   : > { %2902 = vmatprep.subr.mxu0 %v2527_v5  ;;  %3015 = vmatprep.subr.mxu1 %v2529_v19  ;;  %v2520_v55 = vmax.f32 %v7972_v44, %v2392_v13  ;;  %v2366_v41 = vmul.f32 0.02, %v7981_v37  ;;  %v2369_v26 = vmul.f32 0.02, %v7982_v6  ;;  %v2510_v48 = vmax.f32 %v7973_v15, %v2382_v24  ;;  %v7992_v24 = vld [vmem:[#allocation41_spill] sm:$0xff]  ;;  %v7996_v19 = vld [vmem:[#allocation38_spill] sm:$0xff] }
 0x2a8   : > { %2903 = vmatpush1.msra.mxu0 %v2526_v47  ;;  %3016 = vmatpush1.msra.mxu1 %v2528_v61  ;;  %v2513_v14 = vmax.f32 %v7974_v23, %v2385_v34  ;;  %v2359_v46 = vmul.f32 0.02, %v7983_v21  ;;  %v2368_v42 = vmul.f32 0.02, %v7984_v1  ;;  %v2503_v16 = vmax.f32 %v7975_v43, %v2375_v29  ;;  %v7994_v34 = vld [vmem:[#allocation42_spill] sm:$0xff]  ;;  %v7995_v47 = vld [vmem:[#allocation40_spill] sm:$0xff] }
 0x2a9   : > { %2904 = vmatprep.subr.mxu0 %v2519_v49  ;;  %3017 = vmatprep.subr.mxu1 %v2521_v0  ;;  %v2512_v36 = vmax.f32 %v7976_v52, %v2384_v12  ;;  %v2358_v17 = vmul.f32 0.02, %v7985_v56  ;;  %v2361_v58 = vmul.f32 0.02, %v7986_v53  ;;  %v2502_v40 = vmax.f32 %v7977_v45, %v2374_v8  ;;  %v7997_v43 = vld [vmem:[#allocation5_spill] sm:$0xff]  ;;  %v7999_v52 = vld [vmem:[#allocation54_spill] sm:$0xff] }
 0x2aa   : > { %2905 = vmatpush1.msra.mxu0 %v2518_v11  ;;  %3018 = vmatpush1.msra.mxu1 %v2520_v55  ;;  %v2505_v25 = vmax.f32 %v7978_v2, %v2377_v51  ;;  %v2351_v59 = vmul.f32 0.02, %v7987_v9  ;;  %v2360_v30 = vmul.f32 0.02, %v7988_v3  ;;  %v2495_v31 = vmax.f32 %v7979_v57, %v2367_v54  ;;  %v7998_v29 = vld [vmem:[#allocation17_spill] sm:$0xff]  ;;  %v8000_v12 = vld [vmem:[#allocation12_spill] sm:$0xff]  ;;  %v7075_v11 = vpop.permute.xlu1 %2650  ;;  %v7077_v57 = vpop.permute.xlu0 %2655 }
 0x2ab   : > { %2906 = vmatprep.subr.mxu0 %v2511_v38  ;;  %3019 = vmatprep.subr.mxu1 %v2513_v14  ;;  %v2504_v63 = vmax.f32 %v7980_v22, %v2376_v62  ;;  %v2350_v10 = vmul.f32 0.02, %v7989_v39  ;;  %v2353_v33 = vmul.f32 0.02, %v7990_v4  ;;  %v2494_v20 = vmax.f32 %v7981_v37, %v2366_v41 }
 0x2ac   : > { %2907 = vmatpush1.msra.mxu0 %v2510_v48  ;;  %3020 = vmatpush1.msra.mxu1 %v2512_v36  ;;  %v2497_v35 = vmax.f32 %v7982_v6, %v2369_v26  ;;  %v2352_v50 = vmul.f32 0.02, %v7991_v32  ;;  %v2487_v18 = vmax.f32 %v7983_v21, %v2359_v46  ;;  %v2496_v27 = vmax.f32 %v7984_v1, %v2368_v42 }
 0x2ad   : > { %2908 = vmatprep.subr.mxu0 %v2503_v16  ;;  %3021 = vmatprep.subr.mxu1 %v2505_v25  ;;  %v2486_v28 = vmax.f32 %v7985_v56, %v2358_v17  ;;  %v2489_v7 = vmax.f32 %v7986_v53, %v2361_v58  ;;  %v2479_v44 = vmax.f32 %v7987_v9, %v2351_v59  ;;  %v7993_v23 = vmov 0.0  }
 0x2ae   : > { %2909 = vmatpush1.msra.mxu0 %v2502_v40  ;;  %3022 = vmatpush1.msra.mxu1 %v2504_v63  ;;  %v2488_v13 = vmax.f32 %v7988_v3, %v2360_v30  ;;  %v2478_v5 = vmax.f32 %v7989_v39, %v2350_v10  ;;  %v2481_v60 = vmax.f32 %v7990_v4, %v2353_v33  ;;  %v7079_v37 = vpop.permute.xlu1 %2640  ;;  %v7081_v6 = vpop.permute.xlu0 %2645 }
 0x2af   : > { %2910 = vmatprep.subr.mxu0 %v2495_v31  ;;  %3023 = vmatprep.subr.mxu1 %v2497_v35  ;;  %v2480_v15 = vmax.f32 %v7991_v32, %v2352_v50  ;;  %8001 = vst [vmem:[#allocation13_spill] sm:$0xff] %v7081_v6 }
 0x2b0   : > { %2911 = vmatpush1.msra.mxu0 %v2494_v20  ;;  %3024 = vmatpush1.msra.mxu1 %v2496_v27 }
 0x2b1   : > { %2912 = vmatprep.subr.mxu0 %v2487_v18  ;;  %3025 = vmatprep.subr.mxu1 %v2489_v7 }
 0x2b2   : > { %2913 = vmatpush1.msra.mxu0 %v2486_v28  ;;  %3026 = vmatpush1.msra.mxu1 %v2488_v13  ;;  %v7083_v1 = vpop.permute.xlu1 %2630  ;;  %v7085_v16 = vpop.permute.xlu0 %2635 }
 0x2b3   : > { %2914 = vmatprep.subr.mxu0 %v2479_v44  ;;  %3027 = vmatprep.subr.mxu1 %v2481_v60 }
 0x2b4   : > { %2915 = vmatpush1.msra.mxu0 %v2478_v5  ;;  %3028 = vmatpush1.msra.mxu1 %v2480_v15 }
 0x2b5   : > { %2949 = vmatmul.mubr.f32.vlgmr.msra.gmra.mxu0 %v7992_v24  ;;  %3062 = vmatmul.mubr.f32.vlgmr.msra.gmra.mxu1 %v7992_v24 }
 0x2b6   : > { %2954 = vmatprep.mubr.f32.mxu0 %v7993_v23  ;;  %3067 = vmatprep.mubr.f32.mxu1 %v7993_v23  ;;  %v7087_v40 = vpop.permute.xlu1 %2620  ;;  %v7089_v9 = vpop.permute.xlu0 %2625 }
 0x2b9   : > { %2955 = vmatmul.mubr.f32.gmra.mxu0 %v7994_v34  ;;  %3068 = vmatmul.mubr.f32.gmra.mxu1 %v7994_v34 }
 0x2ba   : > { %2960 = vmatprep.mubr.f32.mxu0 %v7993_v23  ;;  %3073 = vmatprep.mubr.f32.mxu1 %v7993_v23 }
 0x2bd   : > { %2961 = vmatmul.mubr.f32.gmra.mxu0 %v7995_v47  ;;  %3074 = vmatmul.mubr.f32.gmra.mxu1 %v7995_v47 }
 0x2be   : > { %2966 = vmatprep.mubr.f32.mxu0 %v7993_v23  ;;  %3079 = vmatprep.mubr.f32.mxu1 %v7993_v23 }
 0x2c1   : > { %2967 = vmatmul.mubr.f32.gmra.mxu0 %v7996_v19  ;;  %3080 = vmatmul.mubr.f32.gmra.mxu1 %v7996_v19 }
 0x2c2   : > { %2972 = vmatprep.mubr.f32.mxu0 %v7993_v23  ;;  %3085 = vmatprep.mubr.f32.mxu1 %v7993_v23 }
 0x2c5   : > { %2973 = vmatmul.mubr.f32.gmra.mxu0 %v7997_v43  ;;  %3086 = vmatmul.mubr.f32.gmra.mxu1 %v7997_v43 }
 0x2c6   : > { %2978 = vmatprep.mubr.f32.mxu0 %v7993_v23  ;;  %3091 = vmatprep.mubr.f32.mxu1 %v7993_v23 }
 0x2c9   : > { %2979 = vmatmul.mubr.f32.gmra.mxu0 %v7998_v29  ;;  %3092 = vmatmul.mubr.f32.gmra.mxu1 %v7998_v29 }
 0x2ca   : > { %2984 = vmatprep.mubr.f32.mxu0 %v7993_v23  ;;  %3097 = vmatprep.mubr.f32.mxu1 %v7993_v23 }
 0x2cd   : > { %2985 = vmatmul.mubr.f32.gmra.mxu0 %v7999_v52  ;;  %3098 = vmatmul.mubr.f32.gmra.mxu1 %v7999_v52 }
 0x2ce   : > { %2990 = vmatprep.mubr.f32.mxu0 %v7993_v23  ;;  %3103 = vmatprep.mubr.f32.mxu1 %v7993_v23 }
 0x2d1   : > { %2991 = vmatmul.mubr.f32.gmra.mxu0 %v8000_v12  ;;  %3104 = vmatmul.mubr.f32.gmra.mxu1 %v8000_v12 }
 0x2d2   : > { %3343 = vmatprep.mubr.f32.mxu0 %v7993_v23  ;;  %3432 = vmatprep.mubr.f32.mxu1 %v7993_v23 }
 0x333   : > { %v2724_v49 = vpop.f32.mrf.mxu0  ;;  %v2837_v61 = vpop.f32.mrf.mxu1 }
 0x334   : > { %v7092_v59 = vadd.f32 %v2724_v49, %v7087_v40  ;;  %v7095_v3 = vadd.f32 %v2837_v61, %v7087_v40 }
 0x335   : > { %v2726_v45 = vpop.f32.mrf.mxu0  ;;  %v2839_v8 = vpop.f32.mrf.mxu1 }
 0x336   : > { %v7098_v31 = vadd.f32 %v2726_v45, %v7087_v40  ;;  %v7101_v63 = vadd.f32 %v2839_v8, %v7087_v40 }
 0x337   : > { %v2730_v2 = vpop.f32.mrf.mxu0  ;;  %v2843_v51 = vpop.f32.mrf.mxu1 }
 0x338   : > { %v7104_v39 = vadd.f32 %v2730_v2, %v7089_v9  ;;  %v7107_v10 = vadd.f32 %v2843_v51, %v7089_v9 }
 0x339   : > { %v2732_v0 = vpop.f32.mrf.mxu0  ;;  %v2845_v54 = vpop.f32.mrf.mxu1 }
 0x33a   : > { %v7110_v33 = vadd.f32 %v2732_v0, %v7089_v9  ;;  %v7113_v20 = vadd.f32 %v2845_v54, %v7089_v9 }
 0x33b   : > { %v2736_v22 = vpop.f32.mrf.mxu0  ;;  %v2849_v62 = vpop.f32.mrf.mxu1 }
 0x33c   : > { %v7116_v35 = vadd.f32 %v2736_v22, %v7083_v1  ;;  %v7119_v32 = vadd.f32 %v2849_v62, %v7083_v1 }
 0x33d   : > { %v2738_v38 = vpop.f32.mrf.mxu0  ;;  %v2851_v55 = vpop.f32.mrf.mxu1 }
 0x33e   : > { %v7122_v18 = vadd.f32 %v2738_v38, %v7083_v1  ;;  %v7125_v27 = vadd.f32 %v2851_v55, %v7083_v1 }
 0x33f   : > { %v2742_v41 = vpop.f32.mrf.mxu0  ;;  %v2855_v26 = vpop.f32.mrf.mxu1 }
 0x340   : > { %v7128_v28 = vadd.f32 %v2742_v41, %v7085_v16  ;;  %v7131_v7 = vadd.f32 %v2855_v26, %v7085_v16 }
 0x341   : > { %v2744_v48 = vpop.f32.mrf.mxu0  ;;  %v2857_v14 = vpop.f32.mrf.mxu1 }
 0x342   : > { %v7134_v13 = vadd.f32 %v2744_v48, %v7085_v16  ;;  %v7137_v5 = vadd.f32 %v2857_v14, %v7085_v16 }
 0x343   : > { %v2748_v21 = vpop.f32.mrf.mxu0  ;;  %v2861_v46 = vpop.f32.mrf.mxu1 }
 0x344   : > { %v7142_v34 = vadd.f32 %v2748_v21, %v7079_v37  ;;  %v2862_v14 = vadd.f32 %v2861_v46, %v7079_v37  ;;  %v3135_v46 = vmul.f32 0.02, %v7134_v13 }
 0x345   : > { %v2750_v42 = vpop.f32.mrf.mxu0  ;;  %v2863_v36 = vpop.f32.mrf.mxu1 }
 0x346   : > { %v7148_v52 = vadd.f32 %v2750_v42, %v7079_v37  ;;  %v2864_v55 = vadd.f32 %v2863_v36, %v7079_v37  ;;  %v3142_v36 = vmul.f32 0.02, %v7142_v34 }
 0x347   : > { %v2754_v56 = vpop.f32.mrf.mxu0  ;;  %v2867_v17 = vpop.f32.mrf.mxu1 }
 0x348   : > { %v2755_v8 = vadd.f32 %v2754_v56, %v7081_v6  ;;  %v2868_v54 = vadd.f32 %v2867_v17, %v7081_v6 }
 0x349   : > { %v2756_v53 = vpop.f32.mrf.mxu0  ;;  %v2869_v58 = vpop.f32.mrf.mxu1 }
 0x34a   : > { %v2757_v12 = vadd.f32 %v2756_v53, %v7081_v6  ;;  %v2870_v2 = vadd.f32 %v2869_v58, %v7081_v6  ;;  %v3150_v53 = vmul.f32 0.02, %v2755_v8  ;;  %v3152_v17 = vmul.f32 0.02, %v2868_v54 }
 0x34b   : > { %v2760_v25 = vpop.f32.mrf.mxu0  ;;  %v2873_v30 = vpop.f32.mrf.mxu1 }
 0x34c   : > { %v2761_v47 = vadd.f32 %v2760_v25, %v7075_v11  ;;  %v2874_v49 = vadd.f32 %v2873_v30, %v7075_v11  ;;  %v3151_v21 = vmul.f32 0.02, %v2757_v12  ;;  %v3153_v58 = vmul.f32 0.02, %v2870_v2 }
 0x34d   : > { %v2762_v4 = vpop.f32.mrf.mxu0  ;;  %v2875_v50 = vpop.f32.mrf.mxu1 }
 0x34e   : > { %v2763_v60 = vadd.f32 %v2762_v4, %v7075_v11  ;;  %v2876_v19 = vadd.f32 %v2875_v50, %v7075_v11  ;;  %v3158_v41 = vmul.f32 0.02, %v2761_v47  ;;  %v3160_v42 = vmul.f32 0.02, %v2874_v49 }
 0x34f   : > { %v2766_v44 = vpop.f32.mrf.mxu0  ;;  %v2879_v24 = vpop.f32.mrf.mxu1  ;;  %v3143_v4 = vmul.f32 0.02, %v7148_v52 }
 0x350   : > { %v2767_v15 = vadd.f32 %v2766_v44, %v7077_v57  ;;  %v2880_v43 = vadd.f32 %v2879_v24, %v7077_v57  ;;  %v3159_v22 = vmul.f32 0.02, %v2763_v60  ;;  %v3161_v26 = vmul.f32 0.02, %v2876_v19 }
 0x351   : > { %v2768_v29 = vpop.f32.mrf.mxu0  ;;  %v2881_v45 = vpop.f32.mrf.mxu1  ;;  %v3145_v24 = vmul.f32 0.02, %v2864_v55  ;;  %v3224_v6 = vmax.f32 %v2874_v49, %v3160_v42  ;;  %v3129_v49 = vmul.f32 0.02, %v7125_v27 }
 0x352   : > { %v2769_v61 = vadd.f32 %v2768_v29, %v7077_v57  ;;  %v3166_v51 = vmul.f32 0.02, %v2767_v15  ;;  %v2882_v0 = vadd.f32 %v2881_v45, %v7077_v57  ;;  %v3168_v62 = vmul.f32 0.02, %v2880_v43 }
 0x353   : > { %v3223_v50 = vmax.f32 %v2763_v60, %v3159_v22  ;;  %v3222_v29 = vmax.f32 %v2761_v47, %v3158_v41  ;;  %v3225_v45 = vmax.f32 %v2876_v19, %v3161_v26  ;;  %v3137_v60 = vmul.f32 0.02, %v7137_v5 }
 0x354   : > { %v3167_v38 = vmul.f32 0.02, %v2769_v61  ;;  %v3169_v48 = vmul.f32 0.02, %v2882_v0  ;;  %v3230_v25 = vmax.f32 %v2767_v15, %v3166_v51  ;;  %v3232_v44 = vmax.f32 %v2880_v43, %v3168_v62 }
 0x355   : > { %v3134_v15 = vmul.f32 0.02, %v7128_v28  ;;  %v3214_v43 = vmax.f32 %v2755_v8, %v3150_v53  ;;  %v3217_v51 = vmax.f32 %v2870_v2, %v3153_v58  ;;  %v3127_v47 = vmul.f32 0.02, %v7122_v18 }
 0x356   : > { %v3231_v56 = vmax.f32 %v2769_v61, %v3167_v38  ;;  %v3233_v30 = vmax.f32 %v2882_v0, %v3169_v48  ;;  %v3144_v61 = vmul.f32 0.02, %v2862_v14  ;;  %v3215_v38 = vmax.f32 %v2757_v12, %v3151_v21 }
 0x357   : > { %v3136_v19 = vmul.f32 0.02, %v7131_v7  ;;  %v3207_v0 = vmax.f32 %v7148_v52, %v3143_v4  ;;  %v3216_v22 = vmax.f32 %v2868_v54, %v3152_v17  ;;  %v3126_v12 = vmul.f32 0.02, %v7116_v35 }
 0x358   : > { %3295 = vmatprep.subr.mxu0 %v3231_v56  ;;  %3384 = vmatprep.subr.mxu1 %v3233_v30  ;;  %v3206_v62 = vmax.f32 %v7142_v34, %v3142_v36  ;;  %v3209_v41 = vmax.f32 %v2864_v55, %v3145_v24  ;;  %v3119_v8 = vmul.f32 0.02, %v7110_v33  ;;  %v3128_v2 = vmul.f32 0.02, %v7119_v32 }
 0x359   : > { %3296 = vmatpush1.msra.mxu0 %v3230_v25  ;;  %3385 = vmatpush1.msra.mxu1 %v3232_v44  ;;  %v3199_v26 = vmax.f32 %v7134_v13, %v3135_v46  ;;  %v3208_v48 = vmax.f32 %v2862_v14, %v3144_v61  ;;  %v3121_v52 = vmul.f32 0.02, %v7113_v20  ;;  %v3198_v54 = vmax.f32 %v7128_v28, %v3134_v15 }
 0x35a   : > { %3297 = vmatprep.subr.mxu0 %v3223_v50  ;;  %3386 = vmatprep.subr.mxu1 %v3225_v45  ;;  %v3201_v34 = vmax.f32 %v7137_v5, %v3137_v60  ;;  %v3111_v55 = vmul.f32 0.02, %v7098_v31  ;;  %v3120_v21 = vmul.f32 0.02, %v7107_v10  ;;  %v3191_v42 = vmax.f32 %v7122_v18, %v3127_v47 }
 0x35b   : > { %3298 = vmatpush1.msra.mxu0 %v3222_v29  ;;  %3387 = vmatpush1.msra.mxu1 %v3224_v6  ;;  %v3118_v6 = vmul.f32 0.02, %v7104_v39  ;;  %v3200_v13 = vmax.f32 %v7131_v7, %v3136_v19  ;;  %v3110_v14 = vmul.f32 0.02, %v7092_v59  ;;  %v3113_v56 = vmul.f32 0.02, %v7101_v63 }
 0x35c   : > { %3299 = vmatprep.subr.mxu0 %v3215_v38  ;;  %3388 = vmatprep.subr.mxu1 %v3217_v51  ;;  %v3190_v28 = vmax.f32 %v7116_v35, %v3126_v12  ;;  %v3193_v5 = vmax.f32 %v7125_v27, %v3129_v49  ;;  %v3112_v53 = vmul.f32 0.02, %v7095_v3  ;;  %v3183_v58 = vmax.f32 %v7110_v33, %v3119_v8 }
 0x35d   : > { %3300 = vmatpush1.msra.mxu0 %v3214_v43  ;;  %3389 = vmatpush1.msra.mxu1 %v3216_v22  ;;  %v3192_v18 = vmax.f32 %v7119_v32, %v3128_v2  ;;  %v3182_v7 = vmax.f32 %v7104_v39, %v3118_v6  ;;  %v3185_v25 = vmax.f32 %v7113_v20, %v3121_v52  ;;  %v7197_v39 = vld [vmem:[%s7524_s7] sm:$0xff] }
 0x35e   : > { %3301 = vmatprep.subr.mxu0 %v3207_v0  ;;  %3390 = vmatprep.subr.mxu1 %v3209_v41  ;;  %v3175_v35 = vmax.f32 %v7098_v31, %v3111_v55  ;;  %v3184_v27 = vmax.f32 %v7107_v10, %v3120_v21  ;;  %v3174_v30 = vmax.f32 %v7092_v59, %v3110_v14  ;;  %v7208_v59 = vld [vmem:[%s7524_s7 + $0x8] sm:$0xff]  ;;  %v7230_v31 = vld [vmem:[%s7524_s7 + $0x18] sm:$0xff] }
 0x35f   : > { %3302 = vmatpush1.msra.mxu0 %v3206_v62  ;;  %3391 = vmatpush1.msra.mxu1 %v3208_v48  ;;  %v3177_v33 = vmax.f32 %v7101_v63, %v3113_v56  ;;  %v3176_v20 = vmax.f32 %v7095_v3, %v3112_v53  ;;  %v7219_v3 = vld [vmem:[%s7524_s7 + $0x10] sm:$0xff] }
 0x360   : > { %3303 = vmatprep.subr.mxu0 %v3199_v26  ;;  %3392 = vmatprep.subr.mxu1 %v3201_v34 }
 0x361   : > { %3304 = vmatpush1.msra.mxu0 %v3198_v54  ;;  %3393 = vmatpush1.msra.mxu1 %v3200_v13 }
 0x362   : > { %3305 = vmatprep.subr.mxu0 %v3191_v42  ;;  %3394 = vmatprep.subr.mxu1 %v3193_v5 }
 0x363   : > { %3306 = vmatpush1.msra.mxu0 %v3190_v28  ;;  %3395 = vmatpush1.msra.mxu1 %v3192_v18 }
 0x364   : > { %3307 = vmatprep.subr.mxu0 %v3183_v58  ;;  %3396 = vmatprep.subr.mxu1 %v3185_v25 }
 0x365   : > { %3308 = vmatpush1.msra.mxu0 %v3182_v7  ;;  %3397 = vmatpush1.msra.mxu1 %v3184_v27 }
 0x366   : > { %3309 = vmatprep.subr.mxu0 %v3175_v35  ;;  %3398 = vmatprep.subr.mxu1 %v3177_v33 }
 0x367   : > { %3310 = vmatpush1.msra.mxu0 %v3174_v30  ;;  %3399 = vmatpush1.msra.mxu1 %v3176_v20 }
 0x368   : > { %4425 = vmatmul.mubr.msk.f32.vlgmr.msra.gmra.mxu0 %vm3266_vm2, %v7197_v39  ;;  %4429 = vmatmul.mubr.msk.f32.vlgmr.msra.gmra.mxu1 %vm3266_vm2, %v7197_v39 }
 0x369   : > { %3349 = vmatprep.mubr.f32.mxu0 %v7993_v23  ;;  %3438 = vmatprep.mubr.f32.mxu1 %v7993_v23 }
 0x36c   : > { %4426 = vmatmul.mubr.msk.f32.gmra.mxu0 %vm3266_vm2, %v7208_v59  ;;  %4430 = vmatmul.mubr.msk.f32.gmra.mxu1 %vm3266_vm2, %v7208_v59 }
 0x36d   : > { %3355 = vmatprep.mubr.f32.mxu0 %v7993_v23  ;;  %3444 = vmatprep.mubr.f32.mxu1 %v7993_v23 }
 0x370   : > { %4427 = vmatmul.mubr.msk.f32.gmra.mxu0 %vm3266_vm2, %v7219_v3  ;;  %4431 = vmatmul.mubr.msk.f32.gmra.mxu1 %vm3266_vm2, %v7219_v3 }
 0x371   : > { %3361 = vmatprep.mubr.f32.mxu0 %v7993_v23  ;;  %3450 = vmatprep.mubr.f32.mxu1 %v7993_v23 }
 0x374   : > { %4428 = vmatmul.mubr.msk.f32.gmra.mxu0 %vm3266_vm2, %v7230_v31  ;;  %4432 = vmatmul.mubr.msk.f32.gmra.mxu1 %vm3266_vm2, %v7230_v31 }
 0x375   : > { %v2950_v63 = vpop.f32.mrf.mxu0  ;;  %3521 = vmatprep.mubr.f32.mxu0 %v7993_v23  ;;  %v3063_v10 = vpop.f32.mrf.mxu1  ;;  %3610 = vmatprep.mubr.f32.mxu1 %v7993_v23 }
 0x376   : > { %v7240_v41 = vadd.f32 %v2950_v63, %v7087_v40  ;;  %v7243_v8 = vadd.f32 %v3063_v10, %v7087_v40 }
 0x377   : > { %v2952_v32 = vpop.f32.mrf.mxu0  ;;  %v3065_v4 = vpop.f32.mrf.mxu1 }
 0x378   : > { %v7246_v26 = vadd.f32 %v2952_v32, %v7087_v40  ;;  %v7249_v48 = vadd.f32 %v3065_v4, %v7087_v40 }
 0x379   : > { %v2956_v17 = vpop.f32.mrf.mxu0  ;;  %v3069_v50 = vpop.f32.mrf.mxu1 }
 0x37a   : > { %v7252_v6 = vadd.f32 %v2956_v17, %v7089_v9  ;;  %v7255_v52 = vadd.f32 %v3069_v50, %v7089_v9 }
 0x37b   : > { %v2958_v44 = vpop.f32.mrf.mxu0  ;;  %v3071_v36 = vpop.f32.mrf.mxu1 }
 0x37c   : > { %v7258_v34 = vadd.f32 %v2958_v44, %v7089_v9  ;;  %v7261_v55 = vadd.f32 %v3071_v36, %v7089_v9 }
 0x37d   : > { %v2962_v24 = vpop.f32.mrf.mxu0  ;;  %v3075_v29 = vpop.f32.mrf.mxu1 }
 0x37e   : > { %v7264_v21 = vadd.f32 %v2962_v24, %v7083_v1  ;;  %v7267_v42 = vadd.f32 %v3075_v29, %v7083_v1 }
 0x37f   : > { %v2964_v45 = vpop.f32.mrf.mxu0  ;;  %v3077_v46 = vpop.f32.mrf.mxu1 }
 0x380   : > { %v7270_v13 = vadd.f32 %v2964_v45, %v7083_v1  ;;  %v7273_v14 = vadd.f32 %v3077_v46, %v7083_v1 }
 0x381   : > { %v2968_v61 = vpop.f32.mrf.mxu0  ;;  %v3081_v38 = vpop.f32.mrf.mxu1 }
 0x382   : > { %v7276_v56 = vadd.f32 %v2968_v61, %v7085_v16  ;;  %v7279_v28 = vadd.f32 %v3081_v38, %v7085_v16 }
 0x383   : > { %v2970_v15 = vpop.f32.mrf.mxu0  ;;  %v3083_v60 = vpop.f32.mrf.mxu1 }
 0x384   : > { %v7282_v5 = vadd.f32 %v2970_v15, %v7085_v16  ;;  %v7285_v53 = vadd.f32 %v3083_v60, %v7085_v16  ;;  %v8002_v16 = vld [vmem:[#allocation13_spill] sm:$0xff] }
 0x385   : > { %v2974_v43 = vpop.f32.mrf.mxu0  ;;  %v3087_v51 = vpop.f32.mrf.mxu1 }
 0x386   : > { %v7290_v1 = vadd.f32 %v2974_v43, %v7079_v37  ;;  %v3088_v15 = vadd.f32 %v3087_v51, %v7079_v37 }
 0x387   : > { %v2976_v47 = vpop.f32.mrf.mxu0  ;;  %v3089_v19 = vpop.f32.mrf.mxu1 }
 0x388   : > { %v7296_v33 = vadd.f32 %v2976_v47, %v7079_v37  ;;  %v3090_v46 = vadd.f32 %v3089_v19, %v7079_v37  ;;  %v3146_v19 = vmul.f32 0.02, %v7290_v1  ;;  %v3139_v37 = vmul.f32 0.02, %v7282_v5 }
 0x389   : > { %v2980_v0 = vpop.f32.mrf.mxu0  ;;  %v3093_v22 = vpop.f32.mrf.mxu1  ;;  %v3148_v51 = vmul.f32 0.02, %v3088_v15 }
 0x38a   : > { %v2981_v4 = vadd.f32 %v2980_v0, %v8002_v16  ;;  %v3094_v36 = vadd.f32 %v3093_v22, %v8002_v16 }
 0x38b   : > { %v2982_v12 = vpop.f32.mrf.mxu0  ;;  %v3095_v49 = vpop.f32.mrf.mxu1 }
 0x38c   : > { %v2983_v20 = vadd.f32 %v2982_v12, %v8002_v16  ;;  %v3096_v17 = vadd.f32 %v3095_v49, %v8002_v16  ;;  %v3154_v0 = vmul.f32 0.02, %v2981_v4  ;;  %v3156_v22 = vmul.f32 0.02, %v3094_v36 }
 0x38d   : > { %v2986_v62 = vpop.f32.mrf.mxu0  ;;  %v3099_v2 = vpop.f32.mrf.mxu1 }
 0x38e   : > { %v2987_v25 = vadd.f32 %v2986_v62, %v7075_v11  ;;  %v3100_v63 = vadd.f32 %v3099_v2, %v7075_v11  ;;  %v3155_v60 = vmul.f32 0.02, %v2983_v20  ;;  %v3157_v12 = vmul.f32 0.02, %v3096_v17 }
 0x38f   : > { %v2988_v54 = vpop.f32.mrf.mxu0  ;;  %v3101_v40 = vpop.f32.mrf.mxu1 }
 0x390   : > { %v2989_v58 = vadd.f32 %v2988_v54, %v7075_v11  ;;  %v3102_v35 = vadd.f32 %v3101_v40, %v7075_v11  ;;  %v3162_v61 = vmul.f32 0.02, %v2987_v25  ;;  %v3164_v43 = vmul.f32 0.02, %v3100_v63 }
 0x391   : > { %v2992_v9 = vpop.f32.mrf.mxu0  ;;  %v3105_v7 = vpop.f32.mrf.mxu1  ;;  %v3149_v40 = vmul.f32 0.02, %v3090_v46 }
 0x392   : > { %v2993_v18 = vadd.f32 %v2992_v9, %v7077_v57  ;;  %v3106_v27 = vadd.f32 %v3105_v7, %v7077_v57  ;;  %v3163_v24 = vmul.f32 0.02, %v2989_v58  ;;  %v3165_v38 = vmul.f32 0.02, %v3102_v35 }
 0x393   : > { %v2994_v30 = vpop.f32.mrf.mxu0  ;;  %v3107_v32 = vpop.f32.mrf.mxu1  ;;  %v3226_v9 = vmax.f32 %v2987_v25, %v3162_v61  ;;  %v3228_v16 = vmax.f32 %v3100_v63, %v3164_v43  ;;  %v3131_v25 = vmul.f32 0.02, %v7270_v13  ;;  %v3133_v63 = vmul.f32 0.02, %v7273_v14 }
 0x394   : > { %v2995_v10 = vadd.f32 %v2994_v30, %v7077_v57  ;;  %v3170_v50 = vmul.f32 0.02, %v2993_v18  ;;  %v3108_v44 = vadd.f32 %v3107_v32, %v7077_v57  ;;  %v3172_v29 = vmul.f32 0.02, %v3106_v27 }
 0x395   : > { %v3147_v57 = vmul.f32 0.02, %v7296_v33  ;;  %v3227_v2 = vmax.f32 %v2989_v58, %v3163_v24  ;;  %v3229_v7 = vmax.f32 %v3102_v35, %v3165_v38  ;;  %v3219_v30 = vmax.f32 %v2983_v20, %v3155_v60 }
 0x396   : > { %v3171_v45 = vmul.f32 0.02, %v2995_v10  ;;  %v3173_v11 = vmul.f32 0.02, %v3108_v44  ;;  %v3234_v49 = vmax.f32 %v2993_v18, %v3170_v50  ;;  %v3236_v54 = vmax.f32 %v3106_v27, %v3172_v29 }
 0x397   : > { %v3138_v18 = vmul.f32 0.02, %v7276_v56  ;;  %v3141_v58 = vmul.f32 0.02, %v7285_v53  ;;  %v3218_v27 = vmax.f32 %v2981_v4, %v3154_v0  ;;  %v3140_v35 = vmul.f32 0.02, %v7279_v28 }
 0x398   : > { %v3235_v47 = vmax.f32 %v2995_v10, %v3171_v45  ;;  %v3237_v62 = vmax.f32 %v3108_v44, %v3173_v11  ;;  %v3221_v10 = vmax.f32 %v3096_v17, %v3157_v12  ;;  %v3211_v32 = vmax.f32 %v7296_v33, %v3147_v57 }
 0x399   : > { %v3220_v50 = vmax.f32 %v3094_v36, %v3156_v22  ;;  %v3130_v20 = vmul.f32 0.02, %v7264_v21  ;;  %v3210_v44 = vmax.f32 %v7290_v1, %v3146_v19  ;;  %v3213_v24 = vmax.f32 %v3090_v46, %v3149_v40 }
 0x39a   : > { %3473 = vmatprep.subr.mxu0 %v3235_v47  ;;  %3562 = vmatprep.subr.mxu1 %v3237_v62  ;;  %v3123_v4 = vmul.f32 0.02, %v7258_v34  ;;  %v3132_v17 = vmul.f32 0.02, %v7267_v42  ;;  %v3203_v29 = vmax.f32 %v7282_v5, %v3139_v37  ;;  %v3212_v45 = vmax.f32 %v3088_v15, %v3148_v51 }
 0x39b   : > { %3474 = vmatpush1.msra.mxu0 %v3234_v49  ;;  %3563 = vmatpush1.msra.mxu1 %v3236_v54  ;;  %v3122_v33 = vmul.f32 0.02, %v7252_v6  ;;  %v3125_v36 = vmul.f32 0.02, %v7261_v55  ;;  %v3202_v61 = vmax.f32 %v7276_v56, %v3138_v18  ;;  %v3205_v1 = vmax.f32 %v7285_v53, %v3141_v58 }
 0x39c   : > { %3475 = vmatprep.subr.mxu0 %v3227_v2  ;;  %3564 = vmatprep.subr.mxu1 %v3229_v7  ;;  %v3115_v46 = vmul.f32 0.02, %v7246_v26  ;;  %v3124_v38 = vmul.f32 0.02, %v7255_v52  ;;  %v3195_v11 = vmax.f32 %v7270_v13, %v3131_v25  ;;  %v3204_v5 = vmax.f32 %v7279_v28, %v3140_v35 }
 0x39d   : > { %3476 = vmatpush1.msra.mxu0 %v3226_v9  ;;  %3565 = vmatpush1.msra.mxu1 %v3228_v16  ;;  %v3114_v15 = vmul.f32 0.02, %v7240_v41  ;;  %v3117_v60 = vmul.f32 0.02, %v7249_v48  ;;  %v3194_v56 = vmax.f32 %v7264_v21, %v3130_v20  ;;  %v3197_v53 = vmax.f32 %v7273_v14, %v3133_v63 }
 0x39e   : > { %3477 = vmatprep.subr.mxu0 %v3219_v30  ;;  %3566 = vmatprep.subr.mxu1 %v3221_v10  ;;  %v3116_v43 = vmul.f32 0.02, %v7243_v8  ;;  %v3187_v47 = vmax.f32 %v7258_v34, %v3123_v4  ;;  %v3196_v13 = vmax.f32 %v7267_v42, %v3132_v17  ;;  %v3186_v28 = vmax.f32 %v7252_v6, %v3122_v33  ;;  %v7367_v6 = vpop.permute.xlu1 %3258 }
 0x39f   : > { %3478 = vmatpush1.msra.mxu0 %v3218_v27  ;;  %3567 = vmatpush1.msra.mxu1 %v3220_v50  ;;  %v3189_v0 = vmax.f32 %v7261_v55, %v3125_v36  ;;  %v3179_v21 = vmax.f32 %v7246_v26, %v3115_v46  ;;  %v3188_v14 = vmax.f32 %v7255_v52, %v3124_v38  ;;  %v7369_v55 = vpop.permute.xlu0 %3263 }
 0x3a0   : > { %3479 = vmatprep.subr.mxu0 %v3211_v32  ;;  %3568 = vmatprep.subr.mxu1 %v3213_v24  ;;  %v3178_v12 = vmax.f32 %v7240_v41, %v3114_v15  ;;  %v3181_v34 = vmax.f32 %v7249_v48, %v3117_v60  ;;  %v3180_v42 = vmax.f32 %v7243_v8, %v3116_v43 }
 0x3a1   : > { %3480 = vmatpush1.msra.mxu0 %v3210_v44  ;;  %3569 = vmatpush1.msra.mxu1 %v3212_v45 }
 0x3a2   : > { %3481 = vmatprep.subr.mxu0 %v3203_v29  ;;  %3570 = vmatprep.subr.mxu1 %v3205_v1  ;;  %v7371_v2 = vpop.permute.xlu1 %3248 }
 0x3a3   : > { %3482 = vmatpush1.msra.mxu0 %v3202_v61  ;;  %3571 = vmatpush1.msra.mxu1 %v3204_v5  ;;  %v7375_v9 = vpop.permute.xlu0 %3253 }
 0x3a4   : > { %3483 = vmatprep.subr.mxu0 %v3195_v11  ;;  %3572 = vmatprep.subr.mxu1 %v3197_v53 }
 0x3a5   : > { %3484 = vmatpush1.msra.mxu0 %v3194_v56  ;;  %3573 = vmatpush1.msra.mxu1 %v3196_v13 }
 0x3a6   : > { %3485 = vmatprep.subr.mxu0 %v3187_v47  ;;  %3574 = vmatprep.subr.mxu1 %v3189_v0 }
 0x3a7   : > { %3486 = vmatpush1.msra.mxu0 %v3186_v28  ;;  %3575 = vmatpush1.msra.mxu1 %v3188_v14 }
 0x3a8   : > { %3487 = vmatprep.subr.mxu0 %v3179_v21  ;;  %3576 = vmatprep.subr.mxu1 %v3181_v34 }
 0x3a9   : > { %3488 = vmatpush1.msra.mxu0 %v3178_v12  ;;  %3577 = vmatpush1.msra.mxu1 %v3180_v42 }
 0x3aa   : > { %4433 = vmatmul.mubr.msk.f32.vlgmr.msra.gmra.mxu0 %vm3266_vm2, %v7197_v39  ;;  %4437 = vmatmul.mubr.msk.f32.vlgmr.msra.gmra.mxu1 %vm3266_vm2, %v7197_v39 }
 0x3ab   : > { %3527 = vmatprep.mubr.f32.mxu0 %v7993_v23  ;;  %3616 = vmatprep.mubr.f32.mxu1 %v7993_v23 }
 0x3ae   : > { %4434 = vmatmul.mubr.msk.f32.gmra.mxu0 %vm3266_vm2, %v7208_v59  ;;  %4438 = vmatmul.mubr.msk.f32.gmra.mxu1 %vm3266_vm2, %v7208_v59 }
 0x3af   : > { %3533 = vmatprep.mubr.f32.mxu0 %v7993_v23  ;;  %3622 = vmatprep.mubr.f32.mxu1 %v7993_v23 }
 0x3b2   : > { %4435 = vmatmul.mubr.msk.f32.gmra.mxu0 %vm3266_vm2, %v7219_v3  ;;  %4439 = vmatmul.mubr.msk.f32.gmra.mxu1 %vm3266_vm2, %v7219_v3 }
 0x3b3   : > { %3539 = vmatprep.mubr.f32.mxu0 %v7993_v23  ;;  %3628 = vmatprep.mubr.f32.mxu1 %v7993_v23 }
 0x3b6   : > { %4436 = vmatmul.mubr.msk.f32.gmra.mxu0 %vm3266_vm2, %v7230_v31  ;;  %4440 = vmatmul.mubr.msk.f32.gmra.mxu1 %vm3266_vm2, %v7230_v31 }
 0x3b7   : > { %3784 = vmatprep.mubr.f32.mxu0 %v7993_v23  ;;  %3861 = vmatprep.mubr.f32.mxu1 %v7993_v23 }
 0x428   : > { %v3345_v39 = vpop.f32.mrf.mxu0  ;;  %v3434_v59 = vpop.f32.mrf.mxu1 }
 0x429   : > { %v7378_v7 = vadd.f32 %v3345_v39, %v7371_v2  ;;  %v3435_v36 = vadd.f32 %v3434_v59, %v7371_v2 }
 0x42a   : > { %v3347_v41 = vpop.f32.mrf.mxu0  ;;  %v3436_v8 = vpop.f32.mrf.mxu1 }
 0x42b   : > { %v3348_v18 = vadd.f32 %v3347_v41, %v7371_v2  ;;  %v3437_v17 = vadd.f32 %v3436_v8, %v7371_v2  ;;  %v3635_v47 = vmul.f32 0.02, %v7378_v7  ;;  %v3637_v21 = vmul.f32 0.02, %v3435_v36 }
 0x42c   : > { %v3351_v26 = vpop.f32.mrf.mxu0  ;;  %v3440_v3 = vpop.f32.mrf.mxu1 }
 0x42d   : > { %v3352_v35 = vadd.f32 %v3351_v26, %v7375_v9  ;;  %v3441_v63 = vadd.f32 %v3440_v3, %v7375_v9  ;;  %v3636_v60 = vmul.f32 0.02, %v3348_v18  ;;  %v3638_v13 = vmul.f32 0.02, %v3437_v17  ;;  %v7398_v26 = vld [vmem:[%s7526_s9] sm:$0xff] }
 0x42e   : > { %v3353_v48 = vpop.f32.mrf.mxu0  ;;  %v3442_v52 = vpop.f32.mrf.mxu1  ;;  %v3667_v41 = vmax.f32 %v7378_v7, %v3635_v47  ;;  %v3669_v3 = vmax.f32 %v3435_v36, %v3637_v21 }
 0x42f   : > { %v3354_v58 = vadd.f32 %v3353_v48, %v7375_v9  ;;  %v3443_v32 = vadd.f32 %v3442_v52, %v7375_v9  ;;  %v3643_v38 = vmul.f32 0.02, %v3352_v35  ;;  %v3645_v56 = vmul.f32 0.02, %v3441_v63  ;;  %v7408_v48 = vld [vmem:[%s7526_s9 + $0x8] sm:$0xff] }
 0x430   : > { %v3357_v49 = vpop.f32.mrf.mxu0  ;;  %v3446_v62 = vpop.f32.mrf.mxu1  ;;  %v3668_v39 = vmax.f32 %v3348_v18, %v3636_v60  ;;  %v3670_v8 = vmax.f32 %v3437_v17, %v3638_v13 }
 0x431   : > { %v3358_v37 = vadd.f32 %v3357_v49, %v7367_v6  ;;  %v3447_v27 = vadd.f32 %v3446_v62, %v7367_v6  ;;  %v3644_v61 = vmul.f32 0.02, %v3354_v58  ;;  %v3646_v11 = vmul.f32 0.02, %v3443_v32 }
 0x432   : > { %v3359_v57 = vpop.f32.mrf.mxu0  ;;  %v3448_v31 = vpop.f32.mrf.mxu1  ;;  %v3675_v34 = vmax.f32 %v3352_v35, %v3643_v38  ;;  %v3677_v59 = vmax.f32 %v3441_v63, %v3645_v56 }
 0x433   : > { %v3360_v54 = vadd.f32 %v3359_v57, %v7367_v6  ;;  %v3449_v51 = vadd.f32 %v3448_v31, %v7367_v6  ;;  %v3651_v29 = vmul.f32 0.02, %v3358_v37  ;;  %v3653_v1 = vmul.f32 0.02, %v3447_v27 }
 0x434   : > { %v3363_v22 = vpop.f32.mrf.mxu0  ;;  %v3452_v40 = vpop.f32.mrf.mxu1  ;;  %v3676_v14 = vmax.f32 %v3354_v58, %v3644_v61  ;;  %v3678_v42 = vmax.f32 %v3443_v32, %v3646_v11 }
 0x435   : > { %v3364_v19 = vadd.f32 %v3363_v22, %v7369_v55  ;;  %v3453_v30 = vadd.f32 %v3452_v40, %v7369_v55  ;;  %v3652_v44 = vmul.f32 0.02, %v3360_v54  ;;  %v3654_v45 = vmul.f32 0.02, %v3449_v51 }
 0x436   : > { %v3365_v16 = vpop.f32.mrf.mxu0  ;;  %v3454_v25 = vpop.f32.mrf.mxu1  ;;  %v3683_v28 = vmax.f32 %v3358_v37, %v3651_v29  ;;  %v3685_v12 = vmax.f32 %v3447_v27, %v3653_v1 }
 0x437   : > { %v3366_v10 = vadd.f32 %v3365_v16, %v7369_v55  ;;  %v3659_v50 = vmul.f32 0.02, %v3364_v19  ;;  %v3455_v20 = vadd.f32 %v3454_v25, %v7369_v55  ;;  %v3661_v24 = vmul.f32 0.02, %v3453_v30 }
 0x438   : > { %v3684_v53 = vmax.f32 %v3360_v54, %v3652_v44  ;;  %v3686_v0 = vmax.f32 %v3449_v51, %v3654_v45 }
 0x439   : > { %v3660_v4 = vmul.f32 0.02, %v3366_v10  ;;  %v3662_v33 = vmul.f32 0.02, %v3455_v20  ;;  %v3691_v5 = vmax.f32 %v3364_v19, %v3659_v50  ;;  %v3693_v43 = vmax.f32 %v3453_v30, %v3661_v24 }
 0x43b   : > { %v3692_v46 = vmax.f32 %v3366_v10, %v3660_v4  ;;  %v3694_v15 = vmax.f32 %v3455_v20, %v3662_v33 }
 0x43d   : > { %3744 = vmatprep.subr.mxu0 %v3692_v46  ;;  %3821 = vmatprep.subr.mxu1 %v3694_v15 }
 0x43e   : > { %3745 = vmatpush1.msra.mxu0 %v3691_v5  ;;  %3822 = vmatpush1.msra.mxu1 %v3693_v43 }
 0x43f   : > { %3746 = vmatprep.subr.mxu0 %v3684_v53  ;;  %3823 = vmatprep.subr.mxu1 %v3686_v0 }
 0x440   : > { %3747 = vmatpush1.msra.mxu0 %v3683_v28  ;;  %3824 = vmatpush1.msra.mxu1 %v3685_v12 }
 0x441   : > { %3748 = vmatprep.subr.mxu0 %v3676_v14  ;;  %3825 = vmatprep.subr.mxu1 %v3678_v42 }
 0x442   : > { %3749 = vmatpush1.msra.mxu0 %v3675_v34  ;;  %3826 = vmatpush1.msra.mxu1 %v3677_v59 }
 0x443   : > { %3750 = vmatprep.subr.mxu0 %v3668_v39  ;;  %3827 = vmatprep.subr.mxu1 %v3670_v8 }
 0x444   : > { %3751 = vmatpush1.msra.mxu0 %v3667_v41  ;;  %3828 = vmatpush1.msra.mxu1 %v3669_v3 }
 0x445   : > { %4441 = vmatmul.mubr.msk.f32.vlgmr.msra.gmra.mxu0 %vm3713_vm3, %v7398_v26  ;;  %4443 = vmatmul.mubr.msk.f32.vlgmr.msra.gmra.mxu1 %vm3713_vm3, %v7398_v26 }
 0x446   : > { %3790 = vmatprep.mubr.f32.mxu0 %v7993_v23  ;;  %3867 = vmatprep.mubr.f32.mxu1 %v7993_v23 }
 0x449   : > { %4442 = vmatmul.mubr.msk.f32.gmra.mxu0 %vm3713_vm3, %v7408_v48  ;;  %4444 = vmatmul.mubr.msk.f32.gmra.mxu1 %vm3713_vm3, %v7408_v48 }
 0x44a   : > { %3938 = vmatprep.mubr.f32.mxu0 %v7993_v23  ;;  %4015 = vmatprep.mubr.f32.mxu1 %v7993_v23 }
 0x46a   : > { %v3523_v52 = vpop.f32.mrf.mxu0  ;;  %v3612_v49 = vpop.f32.mrf.mxu1 }
 0x46b   : > { %v3524_v27 = vadd.f32 %v3523_v52, %v7371_v2  ;;  %v3613_v5 = vadd.f32 %v3612_v49, %v7371_v2 }
 0x46c   : > { %v3525_v62 = vpop.f32.mrf.mxu0  ;;  %v3614_v57 = vpop.f32.mrf.mxu1 }
 0x46d   : > { %v3526_v50 = vadd.f32 %v3525_v62, %v7371_v2  ;;  %v3615_v46 = vadd.f32 %v3614_v57, %v7371_v2  ;;  %v3639_v21 = vmul.f32 0.02, %v3524_v27  ;;  %v3641_v42 = vmul.f32 0.02, %v3613_v5 }
 0x46e   : > { %v3529_v31 = vpop.f32.mrf.mxu0  ;;  %v3618_v22 = vpop.f32.mrf.mxu1 }
 0x46f   : > { %v3530_v4 = vadd.f32 %v3529_v31, %v7375_v9  ;;  %v3619_v33 = vadd.f32 %v3618_v22, %v7375_v9  ;;  %v3642_v14 = vmul.f32 0.02, %v3615_v46  ;;  %v3671_v52 = vmax.f32 %v3524_v27, %v3639_v21 }
 0x470   : > { %v3531_v54 = vpop.f32.mrf.mxu0  ;;  %v3620_v19 = vpop.f32.mrf.mxu1  ;;  %v3673_v62 = vmax.f32 %v3613_v5, %v3641_v42 }
 0x471   : > { %v3532_v20 = vadd.f32 %v3531_v54, %v7375_v9  ;;  %v3621_v17 = vadd.f32 %v3620_v19, %v7375_v9  ;;  %v3647_v53 = vmul.f32 0.02, %v3530_v4  ;;  %v3649_v28 = vmul.f32 0.02, %v3619_v33 }
 0x472   : > { %v3535_v40 = vpop.f32.mrf.mxu0  ;;  %v3624_v7 = vpop.f32.mrf.mxu1  ;;  %v3674_v49 = vmax.f32 %v3615_v46, %v3642_v14 }
 0x473   : > { %v3536_v10 = vadd.f32 %v3535_v40, %v7367_v6  ;;  %v3625_v63 = vadd.f32 %v3624_v7, %v7367_v6  ;;  %v3648_v15 = vmul.f32 0.02, %v3532_v20  ;;  %v3650_v43 = vmul.f32 0.02, %v3621_v17 }
 0x474   : > { %v3537_v37 = vpop.f32.mrf.mxu0  ;;  %v3626_v51 = vpop.f32.mrf.mxu1  ;;  %v3679_v59 = vmax.f32 %v3530_v4, %v3647_v53  ;;  %v3681_v3 = vmax.f32 %v3619_v33, %v3649_v28 }
 0x475   : > { %v3538_v16 = vadd.f32 %v3537_v37, %v7367_v6  ;;  %v3627_v25 = vadd.f32 %v3626_v51, %v7367_v6  ;;  %v3655_v38 = vmul.f32 0.02, %v3536_v10  ;;  %v3657_v60 = vmul.f32 0.02, %v3625_v63  ;;  %v7443_v51 = vpop.permute.xlu1 %3710 }
 0x476   : > { %v3541_v30 = vpop.f32.mrf.mxu0  ;;  %v3630_v58 = vpop.f32.mrf.mxu1  ;;  %v3680_v2 = vmax.f32 %v3532_v20, %v3648_v15  ;;  %v3682_v41 = vmax.f32 %v3621_v17, %v3650_v43 }
 0x477   : > { %v3542_v18 = vadd.f32 %v3541_v30, %v7369_v55  ;;  %v3631_v35 = vadd.f32 %v3630_v58, %v7369_v55  ;;  %v3656_v36 = vmul.f32 0.02, %v3538_v16  ;;  %v3658_v11 = vmul.f32 0.02, %v3627_v25  ;;  %v7446_v30 = vpop.permute.xlu0 %3705 }
 0x478   : > { %v3543_v32 = vpop.f32.mrf.mxu0  ;;  %v3632_v24 = vpop.f32.mrf.mxu1  ;;  %v3687_v12 = vmax.f32 %v3536_v10, %v3655_v38  ;;  %v3689_v39 = vmax.f32 %v3625_v63, %v3657_v60 }
 0x479   : > { %v3544_v44 = vadd.f32 %v3543_v32, %v7369_v55  ;;  %v3663_v29 = vmul.f32 0.02, %v3542_v18  ;;  %v3633_v45 = vadd.f32 %v3632_v24, %v7369_v55  ;;  %v3665_v61 = vmul.f32 0.02, %v3631_v35  ;;  %v7455_v33 = vpop.permute.xlu1 %4069 }
 0x47a   : > { %v3640_v55 = vmul.f32 0.02, %v3526_v50  ;;  %v3688_v9 = vmax.f32 %v3538_v16, %v3656_v36  ;;  %v3690_v34 = vmax.f32 %v3627_v25, %v3658_v11 }
 0x47b   : > { %v3664_v1 = vmul.f32 0.02, %v3544_v44  ;;  %v3666_v6 = vmul.f32 0.02, %v3633_v45  ;;  %v3695_v47 = vmax.f32 %v3542_v18, %v3663_v29  ;;  %v3697_v0 = vmax.f32 %v3631_v35, %v3665_v61  ;;  %v7458_v38 = vpop.permute.xlu0 %4064 }
 0x47c   : > { %v3672_v8 = vmax.f32 %v3526_v50, %v3640_v55 }
 0x47d   : > { %v3696_v56 = vmax.f32 %v3544_v44, %v3664_v1  ;;  %v3698_v13 = vmax.f32 %v3633_v45, %v3666_v6 }
 0x47f   : > { %3898 = vmatprep.subr.mxu0 %v3696_v56  ;;  %3975 = vmatprep.subr.mxu1 %v3698_v13 }
 0x480   : > { %3899 = vmatpush1.msra.mxu0 %v3695_v47  ;;  %3976 = vmatpush1.msra.mxu1 %v3697_v0 }
 0x481   : > { %3900 = vmatprep.subr.mxu0 %v3688_v9  ;;  %3977 = vmatprep.subr.mxu1 %v3690_v34  ;;  %v4150_v34 = vlaneseq }
 0x482   : > { %3901 = vmatpush1.msra.mxu0 %v3687_v12  ;;  %3978 = vmatpush1.msra.mxu1 %v3689_v39 }
 0x483   : > { %3902 = vmatprep.subr.mxu0 %v3680_v2  ;;  %3979 = vmatprep.subr.mxu1 %v3682_v41  ;;  %v7467_v41 = vshrl.u32 %v4150_v34, 7 }
 0x484   : > { %3903 = vmatpush1.msra.mxu0 %v3679_v59  ;;  %3980 = vmatpush1.msra.mxu1 %v3681_v3 }
 0x485   : > { %3904 = vmatprep.subr.mxu0 %v3672_v8  ;;  %3981 = vmatprep.subr.mxu1 %v3674_v49 }
 0x486   : > { %3905 = vmatpush1.msra.mxu0 %v3671_v52  ;;  %3982 = vmatpush1.msra.mxu1 %v3673_v62 }
 0x487   : > { %4445 = vmatmul.mubr.msk.f32.vlgmr.msra.gmra.mxu0 %vm3713_vm3, %v7398_v26  ;;  %4447 = vmatmul.mubr.msk.f32.vlgmr.msra.gmra.mxu1 %vm3713_vm3, %v7398_v26 }
 0x488   : > { %3944 = vmatprep.mubr.f32.mxu0 %v7993_v23  ;;  %4021 = vmatprep.mubr.f32.mxu1 %v7993_v23 }
 0x48b   : > { %4446 = vmatmul.mubr.msk.f32.gmra.mxu0 %vm3713_vm3, %v7408_v48  ;;  %4448 = vmatmul.mubr.msk.f32.gmra.mxu1 %vm3713_vm3, %v7408_v48 }
 0x505   : > { %v3786_v57 = vpop.f32.mrf.mxu0  ;;  %v3863_v31 = vpop.f32.mrf.mxu1 }
 0x506   : > { %v3787_v27 = vadd.f32 %v3786_v57, %v7446_v30  ;;  %v3864_v25 = vadd.f32 %v3863_v31, %v7446_v30 }
 0x507   : > { %v3788_v22 = vpop.f32.mrf.mxu0  ;;  %v3865_v54 = vpop.f32.mrf.mxu1 }
 0x508   : > { %v3789_v16 = vadd.f32 %v3788_v22, %v7446_v30  ;;  %v3866_v18 = vadd.f32 %v3865_v54, %v7446_v30  ;;  %v4028_v44 = vmul.f32 0.02, %v3787_v27  ;;  %v4030_v4 = vmul.f32 0.02, %v3864_v25 }
 0x509   : > { %v3792_v19 = vpop.f32.mrf.mxu0  ;;  %v3869_v40 = vpop.f32.mrf.mxu1  ;;  %v4152_v22 = vsub.s32 0, %v7467_v41 }
 0x50a   : > { %v3793_v48 = vadd.f32 %v3792_v19, %v7443_v51  ;;  %v3870_v58 = vadd.f32 %v3869_v40, %v7443_v51  ;;  %v4029_v32 = vmul.f32 0.02, %v3789_v16  ;;  %v4031_v20 = vmul.f32 0.02, %v3866_v18 }
 0x50b   : > { %v3794_v7 = vpop.f32.mrf.mxu0  ;;  %v3871_v37 = vpop.f32.mrf.mxu1  ;;  %v4044_v1 = vmax.f32 %v3787_v27, %v4028_v44  ;;  %v4046_v11 = vmax.f32 %v3864_v25, %v4030_v4 }
 0x50c   : > { %v3795_v26 = vadd.f32 %v3794_v7, %v7443_v51  ;;  %v3872_v23 = vadd.f32 %v3871_v37, %v7443_v51  ;;  %v4036_v50 = vmul.f32 0.02, %v3793_v48  ;;  %v4038_v63 = vmul.f32 0.02, %v3870_v58  ;;  %v4148_v7 = vpop.permute.xlu0 %4147 }
 0x50d   : > { %v4045_v29 = vmax.f32 %v3789_v16, %v4029_v32  ;;  %v4047_v36 = vmax.f32 %v3866_v18, %v4031_v20  ;;  %v4072_v53 = vmul.f32 %v7458_v38, %v4044_v1  ;;  %v4074_v47 = vmul.f32 %v7458_v38, %v4046_v11 }
 0x50e   : > { %v4037_v10 = vmul.f32 0.02, %v3795_v26  ;;  %v4039_v35 = vmul.f32 0.02, %v3872_v23  ;;  %v4052_v45 = vmax.f32 %v3793_v48, %v4036_v50  ;;  %v4054_v61 = vmax.f32 %v3870_v58, %v4038_v63 }
 0x50f   : > { %v4073_v5 = vmul.f32 %v7458_v38, %v4045_v29  ;;  %v4075_v60 = vmul.f32 %v7458_v38, %v4047_v36  ;;  %v7475_v50 = vrot.slane %v4148_v7, %v4152_v22 }
 0x510   : > { %v4053_v24 = vmax.f32 %v3795_v26, %v4037_v10  ;;  %v4055_v17 = vmax.f32 %v3872_v23, %v4039_v35  ;;  %v4080_v15 = vmul.f32 %v7455_v33, %v4052_v45  ;;  %v4082_v56 = vmul.f32 %v7455_v33, %v4054_v61 }
 0x512   : > { %v4081_v46 = vmul.f32 %v7455_v33, %v4053_v24  ;;  %v4083_v6 = vmul.f32 %v7455_v33, %v4055_v17  ;;  %v4088_v55 = vadd.f32 %v4080_v15, %v4072_v53  ;;  %v4102_v28 = vadd.f32 %v4082_v56, %v4074_v47 }
 0x514   : > { %v4095_v43 = vadd.f32 %v4081_v46, %v4073_v5  ;;  %v4109_v13 = vadd.f32 %v4083_v6, %v4075_v60  ;;  %v4089_v21 = vrot.slane %v4088_v55, 4  ;;  %v4103_v14 = vrot.slane %v4102_v28, 4 }
 0x516   : > { %v4096_v9 = vrot.slane %v4095_v43, 4  ;;  %v4110_v0 = vrot.slane %v4109_v13, 4  ;;  %v4090_v2 = vadd.f32 %v4089_v21, %v4088_v55  ;;  %v4104_v39 = vadd.f32 %v4103_v14, %v4102_v28 }
 0x518   : > { %v4097_v12 = vadd.f32 %v4096_v9, %v4095_v43  ;;  %v4111_v42 = vadd.f32 %v4110_v0, %v4109_v13  ;;  %v4091_v3 = vrot.slane %v4090_v2, 2  ;;  %v4105_v52 = vrot.slane %v4104_v39, 2 }
 0x51a   : > { %v4098_v59 = vrot.slane %v4097_v12, 2  ;;  %v4112_v8 = vrot.slane %v4111_v42, 2  ;;  %v4092_v37 = vadd.f32 %v4091_v3, %v4090_v2  ;;  %v4106_v48 = vadd.f32 %v4105_v52, %v4104_v39 }
 0x51c   : > { %v4099_v62 = vadd.f32 %v4098_v59, %v4097_v12  ;;  %v4113_v54 = vadd.f32 %v4112_v8, %v4111_v42  ;;  %v4093_v4 = vrot.slane %v4092_v37, 1 }
 0x51e   : > { %v4100_v10 = vrot.slane %v4099_v62, 1  ;;  %v4114_v20 = vrot.slane %v4113_v54, 1  ;;  %v4094_v47 = vadd.f32 %v4093_v4, %v4092_v37 }
 0x520   : > { %v4101_v11 = vadd.f32 %v4100_v10, %v4099_v62  ;;  %v4115_v60 = vadd.f32 %v4114_v20, %v4113_v54 }
 0x522   : > { %v4155_v14 = vadd.f32 %v7475_v50, %v4101_v11  ;;  %v4157_v2 = vadd.f32 %v7475_v50, %v4115_v60 }
 0x547   : > { %v3940_v49 = vpop.f32.mrf.mxu0  ;;  %v4017_v31 = vpop.f32.mrf.mxu1 }
 0x548   : > { %v3941_v57 = vadd.f32 %v3940_v49, %v7446_v30  ;;  %v4018_v19 = vadd.f32 %v4017_v31, %v7446_v30  ;;  %v4154_v49 = vadd.f32 %v7475_v50, %v4094_v47 }
 0x549   : > { %v3942_v40 = vpop.f32.mrf.mxu0  ;;  %v4019_v16 = vpop.f32.mrf.mxu1 }
 0x54a   : > { %v4032_v26 = vmul.f32 0.02, %v3941_v57  ;;  %v3943_v23 = vadd.f32 %v3942_v40, %v7446_v30  ;;  %v4034_v18 = vmul.f32 0.02, %v4018_v19  ;;  %v4020_v58 = vadd.f32 %v4019_v16, %v7446_v30 }
 0x54b   : > { %v3946_v27 = vpop.f32.mrf.mxu0  ;;  %v4023_v32 = vpop.f32.mrf.mxu1  ;;  %v4107_v30 = vrot.slane %v4106_v48, 1  ;;  %v4165_v40 = vmul.f32 0.01, %v4157_v2 }
 0x54c   : > { %v4033_v25 = vmul.f32 0.02, %v3943_v23  ;;  %v3947_v35 = vadd.f32 %v3946_v27, %v7443_v51  ;;  %v4035_v63 = vmul.f32 0.02, %v4020_v58  ;;  %v4024_v44 = vadd.f32 %v4023_v32, %v7443_v51 }
 0x54d   : > { %v3948_v24 = vpop.f32.mrf.mxu0  ;;  %v4048_v17 = vmax.f32 %v3941_v57, %v4032_v26  ;;  %v4025_v36 = vpop.f32.mrf.mxu1  ;;  %v4050_v61 = vmax.f32 %v4018_v19, %v4034_v18  ;;  %v4108_v9 = vadd.f32 %v4107_v30, %v4106_v48  ;;  %v4163_v19 = vmul.f32 0.01, %v4155_v14 }
 0x54e   : > { %v4040_v29 = vmul.f32 0.02, %v3947_v35  ;;  %v3949_v45 = vadd.f32 %v3948_v24, %v7443_v51  ;;  %v4042_v1 = vmul.f32 0.02, %v4024_v44  ;;  %v4026_v46 = vadd.f32 %v4025_v36, %v7443_v51 }
 0x54f   : > { %v4049_v6 = vmax.f32 %v3943_v23, %v4033_v25  ;;  %v4051_v56 = vmax.f32 %v4020_v58, %v4035_v63  ;;  %v4076_v13 = vmul.f32 %v7458_v38, %v4048_v17  ;;  %v4078_v0 = vmul.f32 %v7458_v38, %v4050_v61 }
 0x550   : > { %v4056_v5 = vmax.f32 %v3947_v35, %v4040_v29  ;;  %v4041_v15 = vmul.f32 0.02, %v3949_v45  ;;  %v4058_v53 = vmax.f32 %v4024_v44, %v4042_v1  ;;  %v4043_v43 = vmul.f32 0.02, %v4026_v46 }
 0x551   : > { %v4077_v12 = vmul.f32 %v7458_v38, %v4049_v6  ;;  %v4079_v39 = vmul.f32 %v7458_v38, %v4051_v56  ;;  %v4156_v62 = vadd.f32 %v7475_v50, %v4108_v9  ;;  %v4162_v38 = vmul.f32 0.01, %v4154_v49 }
 0x552   : > { %v4084_v55 = vmul.f32 %v7455_v33, %v4056_v5  ;;  %v4057_v28 = vmax.f32 %v3949_v45, %v4041_v15  ;;  %v4086_v21 = vmul.f32 %v7455_v33, %v4058_v53  ;;  %v4059_v51 = vmax.f32 %v4026_v46, %v4043_v43 }
 0x553   : > { %v4164_v16 = vmul.f32 0.01, %v4156_v62  ;;  %v4171_v27 = vadd.f32 0.99, %v4163_v19  ;;  %v4173_v10 = vadd.f32 0.99, %v4165_v40 }
 0x554   : > { %v4116_v34 = vadd.f32 %v4084_v55, %v4076_v13  ;;  %v4085_v42 = vmul.f32 %v7455_v33, %v4057_v28  ;;  %v4130_v59 = vadd.f32 %v4086_v21, %v4078_v0  ;;  %v4087_v8 = vmul.f32 %v7455_v33, %v4059_v51 }
 0x555   : > { %v4170_v63 = vadd.f32 0.99, %v4162_v38  ;;  %v4172_v44 = vadd.f32 0.99, %v4164_v16  ;;  %v4543_v17 = vmov 1966171168   ;;  %v4179_v30 = vmin.f32 %v4155_v14, %v4171_v27 }
 0x556   : > { %v4117_v3 = vrot.slane %v4116_v34, 4  ;;  %v4123_v52 = vadd.f32 %v4085_v42, %v4077_v12  ;;  %v4131_v57 = vrot.slane %v4130_v59, 4  ;;  %v4137_v31 = vadd.f32 %v4087_v8, %v4079_v39 }
 0x557   : > { %v4207_v29 = vunpack.c.l.s4 %v4543_v17  ;;  %v4181_v61 = vmin.f32 %v4157_v2, %v4173_v10  ;;  %v4178_v5 = vmin.f32 %v4154_v49, %v4170_v63  ;;  %v4180_v15 = vmin.f32 %v4156_v62, %v4172_v44 }
 0x558   : > { %v4118_v22 = vadd.f32 %v4117_v3, %v4116_v34  ;;  %v4124_v54 = vrot.slane %v4123_v52, 4  ;;  %v4132_v7 = vadd.f32 %v4131_v57, %v4130_v59  ;;  %v4138_v37 = vrot.slane %v4137_v31, 4 }
 0x559   : > { %v4208_v53 = vunpack.c.0.s8 %v4207_v29  ;;  %v4187_v13 = vmax.f32 %v4179_v30, %v4163_v19  ;;  %v4189_v55 = vmax.f32 %v4181_v61, %v4165_v40  ;;  %v4186_v51 = vmax.f32 %v4178_v5, %v4162_v38 }
 0x55a   : > { %v4119_v26 = vrot.slane %v4118_v22, 2  ;;  %v4125_v23 = vadd.f32 %v4124_v54, %v4123_v52  ;;  %v4133_v48 = vrot.slane %v4132_v7, 2  ;;  %v4139_v33 = vadd.f32 %v4138_v37, %v4137_v31 }
 0x55b   : > { %v4188_v14 = vmax.f32 %v4180_v15, %v4164_v16  ;;  %v4211_v42 = vsub.s32 %v4208_v53, %v7467_v41  ;;  %v4202_v59 = vcombine.low %v4186_v51, %v4187_v13 }
 0x55c   : > { %v4120_v18 = vadd.f32 %v4119_v26, %v4118_v22  ;;  %v4126_v58 = vrot.slane %v4125_v23, 2  ;;  %v4134_v25 = vadd.f32 %v4133_v48, %v4132_v7  ;;  %v4140_v35 = vrot.slane %v4139_v33, 2 }
 0x55d   : > { %v4203_v8 = vcombine.low %v4188_v14, %v4189_v55  ;;  %v4212_v31 = vrot.slane %v4202_v59, %v4211_v42 }
 0x55e   : > { %v4121_v32 = vrot.slane %v4120_v18, 1  ;;  %v4127_v20 = vadd.f32 %v4126_v58, %v4125_v23  ;;  %v4135_v24 = vrot.slane %v4134_v25, 1  ;;  %v4141_v4 = vadd.f32 %v4140_v35, %v4139_v33 }
 0x55f   : > { %v4219_v22 = vrot.slane %v4203_v8, %v4211_v42 }
 0x560   : > { %v4122_v45 = vadd.f32 %v4121_v32, %v4120_v18  ;;  %v4128_v36 = vrot.slane %v4127_v20, 1  ;;  %v4136_v1 = vadd.f32 %v4135_v24, %v4134_v25  ;;  %v4142_v46 = vrot.slane %v4141_v4, 1 }
 0x561   : > { %v4234_v37 = vcombine.low %v4212_v31, %v4219_v22 }
 0x562   : > { %v4158_v11 = vadd.f32 %v7475_v50, %v4122_v45  ;;  %v4129_v6 = vadd.f32 %v4128_v36, %v4127_v20  ;;  %v4160_v60 = vadd.f32 %v7475_v50, %v4136_v1  ;;  %v4143_v56 = vadd.f32 %v4142_v46, %v4141_v4 }
 0x563   : > { %v4242_v38 = vrot.slane %v4234_v37, %v4211_v42 }
 0x564   : > { %v4166_v43 = vmul.f32 0.01, %v4158_v11  ;;  %v4159_v47 = vadd.f32 %v7475_v50, %v4129_v6  ;;  %v4168_v28 = vmul.f32 0.01, %v4160_v60  ;;  %v4161_v9 = vadd.f32 %v7475_v50, %v4143_v56 }
 0x566   : > { %v4174_v0 = vadd.f32 0.99, %v4166_v43  ;;  %v4167_v21 = vmul.f32 0.01, %v4159_v47  ;;  %v4176_v12 = vadd.f32 0.99, %v4168_v28 }
 0x567   : > { %v4169_v34 = vmul.f32 0.01, %v4161_v9 }
 0x568   : > { %v4182_v2 = vmin.f32 %v4158_v11, %v4174_v0  ;;  %v4175_v39 = vadd.f32 0.99, %v4167_v21  ;;  %v4184_v3 = vmin.f32 %v4160_v60, %v4176_v12 }
 0x569   : > { %v4177_v52 = vadd.f32 0.99, %v4169_v34 }
 0x56a   : > { %v4183_v49 = vmin.f32 %v4159_v47, %v4175_v39  ;;  %v4190_v57 = vmax.f32 %v4182_v2, %v4166_v43  ;;  %v4192_v54 = vmax.f32 %v4184_v3, %v4168_v28 }
 0x56b   : > { %v4185_v62 = vmin.f32 %v4161_v9, %v4177_v52 }
 0x56c   : > { %v4191_v50 = vmax.f32 %v4183_v49, %v4167_v21 }
 0x56d   : > { %v4193_v19 = vmax.f32 %v4185_v62, %v4169_v34 }
 0x56e   : > { %v4204_v40 = vcombine.low %v4190_v57, %v4191_v50 }
 0x56f   : > { %v4205_v7 = vcombine.low %v4192_v54, %v4193_v19 }
 0x570   : > { %v4226_v41 = vrot.slane %v4204_v40, %v4211_v42 }
 0x571   : > { %v4233_v26 = vrot.slane %v4205_v7, %v4211_v42 }
 0x573   : > { %v4235_v23 = vcombine.low %v4226_v41, %v4233_v26 }
 0x575   : > { %v4249_v16 = vrot.slane %v4235_v23, %v4211_v42 }
 0x577   : > { %v4250_v48 = vcombine.low %v4242_v38, %v4249_v16 }
 0x579   : > { %4252 = vst [vmem:[%s496_s19] sm:$0xff] %v4250_v48 }
 0x57a PF: > { %s25_s14 = sadd.s32 1, %s4539_s14   ;;  %s8003_s20 = sld [smem:[#allocation3_spill]] }
 0x57b   : > { %p22_p8 = scmp.ge.s32.totalorder %s25_s14, 10   ;;  %s8004_s27 = smov %s4531_s29 }
 0x57c   : > { %s8005_s28 = smov %s4535_s30  ;;  %s8006_s29 = smov %s8009_s12 }
 0x57d   :  { %24 = sbr.rel (!%p22_p8) target bundleno = 3 (0x3), region = 105 }
 0x580   : > { %s8007_s30 = smov %s8003_s20 }

</bundles_post_ra>
